<compile_context>
chip_gen: v7x
topology: tpu7x:2x2x1
jax: 0.10.0
libtpu: 0.0.40
codegen_flags: <defaults>
</compile_context>

<pallas_src>
import functools
import math

import numpy as np
import jax
import jax.numpy as jnp
from jax import lax
from jax.experimental import pallas as pl
from jax.experimental.pallas import tpu as pltpu

INF = 100000.0
LN_EPS = 1e-5


def ga_fused_kernel(
    # per-batch-element data (layer-invariant index maps -> VMEM resident across layers)
    x_ref,        # (L, F)      f32   node features (layer-0 input)
    z_ref,        # (C, L, L)   bf16  pair features, channel-major (lane-dense)
    geom_ref,     # (L, 12)     f32   [R00..R22 (row-major), tx, ty, tz] (t in nm)
    mask_ref,     # (L, 1)      f32   node mask
    fmask_ref,    # (L, L)      f32   mask_pair & mask_i & mask_j (precomputed)
    # per-layer parameters (indexed by the layer grid axis)
    win_ref,      # (F, Dtot)   bf16  fused [wq|wk|wv|wqp_x|wqp_y|wqp_z|wkp_xyz|wvp_xyz]
    wpb_ref,      # (C, H)      f32   pair-bias weights
    coef_ref,     # (1, H)      f32   -softplus(gamma)*sqrt(2/(9*Pq))/2
    wout_ref,     # (d_in, F)   bf16  out_transform weight (rows permuted to kernel order)
    bout_ref,     # (1, F)      f32
    ln1w_ref, ln1b_ref,                       # (1, F) f32
    w1_ref, b1_ref, w2_ref, b2_ref, w3_ref, b3_ref,   # (F, F) bf16 / (1, F) f32
    ln2w_ref, ln2b_ref,                       # (1, F) f32
    # output
    out_ref,      # (L, F) f32
    # scratch
    xs_ref,       # (L, F) f32  carried node features across the layer axis
    *, L, F, C, H, Dk, Dv, Pq, Pv,
):
    layer = pl.program_id(1)

    @pl.when(layer == 0)
    def _():
        xs_ref[...] = x_ref[...]

    x = xs_ref[...]                                   # (L, F) f32
    xb = x.astype(jnp.bfloat16)

    # ---------------- fused input projection (one wide MXU matmul) ----------------
    proj = jnp.dot(xb, win_ref[...], preferred_element_type=jnp.float32)   # (L, Dtot)

    HDk, HDv, HPq, HPv = H * Dk, H * Dv, H * Pq, H * Pv
    o = 0
    q_all = proj[:, o:o + HDk]; o += HDk
    k_all = proj[:, o:o + HDk]; o += HDk
    v_all = proj[:, o:o + HDv]; o += HDv
    qpx = proj[:, o:o + HPq]; o += HPq
    qpy = proj[:, o:o + HPq]; o += HPq
    qpz = proj[:, o:o + HPq]; o += HPq
    kpx = proj[:, o:o + HPq]; o += HPq
    kpy = proj[:, o:o + HPq]; o += HPq
    kpz = proj[:, o:o + HPq]; o += HPq
    vpx = proj[:, o:o + HPv]; o += HPv
    vpy = proj[:, o:o + HPv]; o += HPv
    vpz = proj[:, o:o + HPv]; o += HPv

    # ---------------- frames, coordinate-split (no trailing dim-3 tensors) --------
    g = geom_ref[...]
    r = [g[:, i:i + 1] for i in range(9)]             # r[a*3+b] = R[a, b], each (L, 1)
    tx, ty, tz = g[:, 9:10], g[:, 10:11], g[:, 11:12]

    def local_to_global(px, py, pz):                  # g_a = sum_b R[a,b] p_b + t_a
        gx = r[0] * px + r[1] * py + r[2] * pz + tx
        gy = r[3] * px + r[4] * py + r[5] * pz + ty
        gz = r[6] * px + r[7] * py + r[8] * pz + tz
        return gx, gy, gz

    qgx, qgy, qgz = local_to_global(qpx, qpy, qpz)    # (L, H*Pq)
    kgx, kgy, kgz = local_to_global(kpx, kpy, kpz)    # (L, H*Pq)
    vgx, vgy, vgz = local_to_global(vpx, vpy, vpz)    # (L, H*Pv)

    mask = mask_ref[...]                              # (L, 1)
    fmask = fmask_ref[...]                            # (L, L)
    z_f32 = z_ref[...].astype(jnp.float32)            # (C, L, L)
    wpb = wpb_ref[...]                                # (C, H)
    coef = coef_ref[...]                              # (1, H)
    ones_col = jnp.ones((L, 1), jnp.float32)
    inv_sqrt_dk = 1.0 / math.sqrt(Dk)
    sqrt13 = math.sqrt(1.0 / 3.0)

    node_parts, ax_parts, ay_parts, az_parts, p2n_parts = [], [], [], [], []

    for h in range(H):                                # static, unrolled (H is small)
        q_h = q_all[:, h * Dk:(h + 1) * Dk]
        k_h = k_all[:, h * Dk:(h + 1) * Dk]
        v_h = v_all[:, h * Dv:(h + 1) * Dv]
        sq = slice(h * Pq, (h + 1) * Pq)
        sv = slice(h * Pv, (h + 1) * Pv)
        qgx_h, qgy_h, qgz_h = qgx[:, sq], qgy[:, sq], qgz[:, sq]
        kgx_h, kgy_h, kgz_h = kgx[:, sq], kgy[:, sq], kgz[:, sq]
        coef_h = coef[0:1, h:h + 1]                   # (1, 1)

        sqn_q = jnp.sum(qgx_h * qgx_h + qgy_h * qgy_h + qgz_h * qgz_h,
                        axis=1, keepdims=True)        # (L, 1)
        sqn_k = jnp.sum(kgx_h * kgx_h + kgy_h * kgy_h + kgz_h * kgz_h,
                        axis=1, keepdims=True)        # (L, 1)

        # node + spatial logits fused into ONE MXU matmul (B-transposed contraction):
        #   out[i,j] = q.k/sqrt(Dk) + coef*(||qg_i||^2 + ||kg_j||^2 - 2 qg_i.kg_j)
        lhs = jnp.concatenate(
            [q_h * inv_sqrt_dk,
             qgx_h * (-2.0 * coef_h), qgy_h * (-2.0 * coef_h), qgz_h * (-2.0 * coef_h),
             sqn_q * coef_h, ones_col], axis=1).astype(jnp.bfloat16)
        rhs = jnp.concatenate(
            [k_h, kgx_h, kgy_h, kgz_h, ones_col, sqn_k * coef_h],
            axis=1).astype(jnp.bfloat16)
        logits_h = lax.dot_general(lhs, rhs, (((1,), (1,)), ((), ())),
                                   preferred_element_type=jnp.float32)   # (L, L)

        # pair bias: small per-channel VPU accumulation on the lane-dense z slabs
        lp = jnp.zeros((L, L), jnp.float32)
        for c in range(C):
            lp = lp + wpb[c:c + 1, h:h + 1] * z_f32[c]
        logits_h = (logits_h + lp) * sqrt13

        # masked softmax over j (lane axis)
        lm = jnp.where(fmask > 0.5, logits_h, logits_h - INF)
        lmax = jnp.max(lm, axis=1, keepdims=True)
        e = jnp.exp(lm - lmax)
        denom = jnp.sum(e, axis=1, keepdims=True)
        alpha_h = e * pl.reciprocal(denom, approx=True)
        alpha_h = alpha_h * mask                      # zero rows where mask_i == 0

        # node + spatial-point aggregation: ONE (L,L) @ (L, Dv+3Pv) MXU matmul
        val = jnp.concatenate([v_h, vgx[:, sv], vgy[:, sv], vgz[:, sv]],
                              axis=1).astype(jnp.bfloat16)
        agg = jnp.dot(alpha_h.astype(jnp.bfloat16), val,
                      preferred_element_type=jnp.float32)                # (L, Dv+3Pv)
        node_parts.append(agg[:, 0:Dv])
        ax_parts.append(agg[:, Dv:Dv + Pv])
        ay_parts.append(agg[:, Dv + Pv:Dv + 2 * Pv])
        az_parts.append(agg[:, Dv + 2 * Pv:Dv + 3 * Pv])

        # pair aggregation: feat_p2n[c, i] = sum_j alpha[i,j] * z[c,i,j]   -> (C, L)
        p2n_parts.append(jnp.sum(alpha_h[None, :, :] * z_f32, axis=-1))

    feat_node = jnp.concatenate(node_parts, axis=1)                      # (L, H*Dv)
    feat_p2n = jnp.transpose(jnp.concatenate(p2n_parts, axis=0))          # (L, H*C)
    ax = jnp.concatenate(ax_parts, axis=1)                                # (L, H*Pv)
    ay = jnp.concatenate(ay_parts, axis=1)
    az = jnp.concatenate(az_parts, axis=1)

    # global_to_local of the aggregated points: p_a = sum_b R[b,a] (g_b - t_b)
    dx, dy, dz = ax - tx, ay - ty, az - tz
    fpx = r[0] * dx + r[3] * dy + r[6] * dz
    fpy = r[1] * dx + r[4] * dy + r[7] * dz
    fpz = r[2] * dx + r[5] * dy + r[8] * dz
    feat_dist = jnp.sqrt(fpx * fpx + fpy * fpy + fpz * fpz)               # (L, H*Pv)
    inv = pl.reciprocal(feat_dist + 1e-4, approx=True)
    fdx, fdy, fdz = fpx * inv, fpy * inv, fpz * inv

    # output transform (single wide bf16 matmul; wout rows were permuted to this order)
    feat_all = jnp.concatenate(
        [feat_p2n, feat_node, fpx, fpy, fpz, feat_dist, fdx, fdy, fdz], axis=1)
    feat_all = jnp.dot(feat_all.astype(jnp.bfloat16), wout_ref[...],
                       preferred_element_type=jnp.float32) + bout_ref[...]
    feat_all = feat_all * mask                                            # mask_zero

    # residual + LayerNorm 1
    h1 = x + feat_all
    mu1 = jnp.mean(h1, axis=-1, keepdims=True)
    var1 = jnp.mean((h1 - mu1) ** 2, axis=-1, keepdims=True)
    h1n = (h1 - mu1) * lax.rsqrt(var1 + LN_EPS) * ln1w_ref[...] + ln1b_ref[...]

    # MLP transition (bf16 matmul inputs, f32 accumulate)
    m = jnp.dot(h1n.astype(jnp.bfloat16), w1_ref[...],
                preferred_element_type=jnp.float32) + b1_ref[...]
    m = jnp.maximum(m, 0.0)
    m = jnp.dot(m.astype(jnp.bfloat16), w2_ref[...],
                preferred_element_type=jnp.float32) + b2_ref[...]
    m = jnp.maximum(m, 0.0)
    m = jnp.dot(m.astype(jnp.bfloat16), w3_ref[...],
                preferred_element_type=jnp.float32) + b3_ref[...]

    h2 = h1n + m
    mu2 = jnp.mean(h2, axis=-1, keepdims=True)
    var2 = jnp.mean((h2 - mu2) ** 2, axis=-1, keepdims=True)
    x_new = (h2 - mu2) * lax.rsqrt(var2 + LN_EPS) * ln2w_ref[...] + ln2b_ref[...]

    xs_ref[...] = x_new

    @pl.when(layer == pl.num_programs(1) - 1)
    def _():
        out_ref[...] = x_new


def _param_spec(p):
    nd = p.ndim
    return pl.BlockSpec((None,) + tuple(p.shape[1:]),
                        lambda n, l, _nd=nd: (l,) + (0,) * (_nd - 1))


def ga_encoder_forward(x, z_t, geom, mask_col, fullmask, stacked_params, *,
                       L, F, C, H, Dk, Dv, Pq, Pv, num_layers):
    N = x.shape[0]
    kernel = functools.partial(ga_fused_kernel, L=L, F=F, C=C, H=H,
                               Dk=Dk, Dv=Dv, Pq=Pq, Pv=Pv)
    data_specs = [
        pl.BlockSpec((None, L, F),    lambda n, l: (n, 0, 0)),      # x
        pl.BlockSpec((None, C, L, L), lambda n, l: (n, 0, 0, 0)),   # z (channel-major)
        pl.BlockSpec((None, L, 12),   lambda n, l: (n, 0, 0)),      # geom (R|t)
        pl.BlockSpec((None, L, 1),    lambda n, l: (n, 0, 0)),      # mask
        pl.BlockSpec((None, L, L),    lambda n, l: (n, 0, 0)),      # full pair mask
    ]
    param_specs = [_param_spec(p) for p in stacked_params]
    return pl.pallas_call(
        kernel,
        out_shape=jax.ShapeDtypeStruct((N, L, F), jnp.float32),
        grid=(N, num_layers),                     # batch outer (parallel), layer inner
        in_specs=data_specs + param_specs,
        out_specs=pl.BlockSpec((None, L, F), lambda n, l: (n, 0, 0)),
        scratch_shapes=[pltpu.VMEM((L, F), jnp.float32)],
        compiler_params=pltpu.CompilerParams(
            dimension_semantics=("parallel", "arbitrary"),
            # explicit budget (re-derive / tile the key axis for large L on v7x 64 MiB)
            vmem_limit_bytes=64 * 1024 * 1024,
        ),
    )(x, z_t, geom, mask_col, fullmask, *stacked_params)


# ----------------------------- parameters (plain JAX glue) -----------------------------

def init_block_params(key, F, C, H, Dk, Dv, Pq, Pv):
    """Canonical (PyTorch-layout) parameters for one GABlock."""
    ks = jax.random.split(key, 11)
    s = 0.05
    d_in = H * C + H * Dv + H * Pv * 7
    return dict(
        wq=jax.random.normal(ks[0], (F, H * Dk), jnp.float32) * s,
        wk=jax.random.normal(ks[1], (F, H * Dk), jnp.float32) * s,
        wv=jax.random.normal(ks[2], (F, H * Dv), jnp.float32) * s,
        wpb=jax.random.normal(ks[3], (C, H), jnp.float32) * s,
        spatial_coef=jnp.full((1, H), math.log(math.exp(1.0) - 1.0), jnp.float32),
        wqp=jax.random.normal(ks[4], (F, H * Pq * 3), jnp.float32) * s,
        wkp=jax.random.normal(ks[5], (F, H * Pq * 3), jnp.float32) * s,
        wvp=jax.random.normal(ks[6], (F, H * Pv * 3), jnp.float32) * s,
        wout=jax.random.normal(ks[7], (d_in, F), jnp.float32) * s,
        bout=jnp.zeros((1, F), jnp.float32),
        ln1w=jnp.ones((1, F), jnp.float32), ln1b=jnp.zeros((1, F), jnp.float32),
        w1=jax.random.normal(ks[8], (F, F), jnp.float32) * s, b1=jnp.zeros((1, F), jnp.float32),
        w2=jax.random.normal(ks[9], (F, F), jnp.float32) * s, b2=jnp.zeros((1, F), jnp.float32),
        w3=jax.random.normal(ks[10], (F, F), jnp.float32) * s, b3=jnp.zeros((1, F), jnp.float32),
        ln2w=jnp.ones((1, F), jnp.float32), ln2b=jnp.zeros((1, F), jnp.float32),
    )


def _wout_permutation(H, C, Dv, Pv):
    """Row gather mapping kernel feature order -> canonical out_transform row order."""
    d_p2n, d_node, m = H * C, H * Dv, H * Pv
    base_pts = d_p2n + d_node
    base_dist = base_pts + 3 * m
    base_dir = base_dist + m
    idx = list(range(base_pts))                                  # p2n + node unchanged
    for coord in range(3):                                       # points x | y | z
        idx += [base_pts + mm * 3 + coord for mm in range(m)]
    idx += list(range(base_dist, base_dist + m))                 # distances
    for coord in range(3):                                       # directions x | y | z
        idx += [base_dir + mm * 3 + coord for mm in range(m)]
    return np.asarray(idx, dtype=np.int32)


def prepare_stacked_params(layer_params, H, C, Dk, Dv, Pq, Pv):
    """Canonical params -> fused / coordinate-split / bf16 kernel params, stacked over layers."""
    perm = _wout_permutation(H, C, Dv, Pv)
    scale = math.sqrt(2.0 / (9.0 * Pq)) / 2.0

    def one(p):
        def xyz(w):  # columns are (point, coord)-interleaved -> split per coordinate
            return w[:, 0::3], w[:, 1::3], w[:, 2::3]
        qx, qy, qz = xyz(p["wqp"]); kx, ky, kz = xyz(p["wkp"]); vx, vy, vz = xyz(p["wvp"])
        win = jnp.concatenate([p["wq"], p["wk"], p["wv"],
                               qx, qy, qz, kx, ky, kz, vx, vy, vz],
                              axis=1).astype(jnp.bfloat16)
        coef = (-jax.nn.softplus(p["spatial_coef"]) * scale).astype(jnp.float32)   # (1, H)
        wout_k = p["wout"][perm, :].astype(jnp.bfloat16)
        return [win, p["wpb"], coef, wout_k, p["bout"], p["ln1w"], p["ln1b"],
                p["w1"].astype(jnp.bfloat16), p["b1"],
                p["w2"].astype(jnp.bfloat16), p["b2"],
                p["w3"].astype(jnp.bfloat16), p["b3"],
                p["ln2w"], p["ln2b"]]

    per_layer = [one(p) for p in layer_params]
    n_params = len(per_layer[0])
    return [jnp.stack([lp_params[i] for lp_params in per_layer], axis=0)
            for i in range(n_params)]


def get_mask_pair(rec, pep, qry, strategy="all"):
    if strategy != "all":
        raise NotImplementedError  # TODO(synk): prefix/suffix strategies not wired in demo
    top = jnp.concatenate([jnp.ones((rec, rec)), jnp.zeros((rec, pep)),
                           jnp.zeros((rec, qry))], axis=1)
    mid = jnp.concatenate([jnp.ones((pep, rec)), jnp.tril(jnp.ones((pep, pep))),
                           jnp.zeros((pep, qry))], axis=1)
    bot = jnp.concatenate([jnp.ones((qry, rec)), jnp.ones((qry, pep)),
                           jnp.eye(qry)], axis=1)
    return jnp.concatenate([top, mid, bot], axis=0).astype(jnp.float32)


class GAEncoderPallas:
    def __init__(self, node_feat_dim, pair_feat_dim, num_layers, key,
                 value_dim=16, query_key_dim=16, num_query_points=4,
                 num_value_points=4, num_heads=4):
        # The reference module reshapes value heads with query_key_dim, so they must match.
        assert value_dim == query_key_dim
        self.F, self.C, self.H = node_feat_dim, pair_feat_dim, num_heads
        self.Dk, self.Dv = query_key_dim, value_dim
        self.Pq, self.Pv = num_query_points, num_value_points
        self.num_layers = num_layers
        keys = jax.random.split(key, num_layers)
        canon = [init_block_params(k, self.F, self.C, self.H,
                                   self.Dk, self.Dv, self.Pq, self.Pv) for k in keys]
        self.stacked = prepare_stacked_params(canon, self.H, self.C,
                                              self.Dk, self.Dv, self.Pq, self.Pv)

    def __call__(self, R, t, res_feat, pair_feat, mask,
                 rec_length, pep_length, qry_length, qry_strategy="all"):
        N, L = res_feat.shape[:2]
        assert L == rec_length + pep_length + qry_length
        mask_pair = get_mask_pair(rec_length, pep_length, qry_length, qry_strategy)
        mask_f = mask.astype(jnp.float32)
        fullmask = mask_pair[None, :, :] * mask_f[:, :, None] * mask_f[:, None, :]   # (N,L,L)
        mask_col = mask_f[:, :, None]                                                # (N,L,1)
        geom = jnp.concatenate([R.reshape(N, L, 9), t / 10.0], axis=-1)              # (N,L,12)
        geom = geom.astype(jnp.float32)
        z_t = jnp.transpose(pair_feat, (0, 3, 1, 2)).astype(jnp.bfloat16)            # (N,C,L,L)
        return ga_encoder_forward(res_feat.astype(jnp.float32), z_t, geom,
                                  mask_col, fullmask, self.stacked,
                                  L=L, F=self.F, C=self.C, H=self.H,
                                  Dk=self.Dk, Dv=self.Dv, Pq=self.Pq, Pv=self.Pv,
                                  num_layers=self.num_layers)


if __name__ == "__main__":
    key = jax.random.PRNGKey(0)
    k_R, k_t, k_x, k_z, k_p = jax.random.split(key, 5)

    N = 2
    rec_length, pep_length, qry_length = 8, 4, 4
    L = rec_length + pep_length + qry_length          # 16
    node_feat_dim = 32
    pair_feat_dim = 8
    num_layers = 2

    R = jax.random.normal(k_R, (N, L, 3, 3), jnp.float32)
    t = jax.random.normal(k_t, (N, L, 3), jnp.float32) * 10.0
    res_feat = jax.random.normal(k_x, (N, L, node_feat_dim), jnp.float32)
    pair_feat = jax.random.normal(k_z, (N, L, L, pair_feat_dim), jnp.float32)
    mask = jnp.ones((N, L), jnp.bool_).at[0, L - 2:].set(False)

    encoder = GAEncoderPallas(node_feat_dim, pair_feat_dim, num_layers, k_p,
                              value_dim=16, query_key_dim=16,
                              num_query_points=4, num_value_points=4, num_heads=4)

    out = encoder(R, t, res_feat, pair_feat, mask,
                  rec_length, pep_length, qry_length, qry_strategy="all")
    out = jax.block_until_ready(out)
    assert out.shape == (N, L, node_feat_dim)
    assert bool(jnp.all(jnp.isfinite(out)))
    print("KERNEL_OK")
</pallas_src>

<mosaic_0001>
module attributes {stable_mosaic.version = 11 : i64} {
  func.func @ga_fused_kernel(%arg0: i32, %arg1: i32, %arg2: memref<1x16x32xf32, #tpu.memory_space<vmem>>, %arg3: memref<1x8x16x16xbf16, #tpu.memory_space<vmem>>, %arg4: memref<1x16x12xf32, #tpu.memory_space<vmem>>, %arg5: memref<1x16x1xf32, #tpu.memory_space<vmem>>, %arg6: memref<1x16x16xf32, #tpu.memory_space<vmem>>, %arg7: memref<1x32x336xbf16, #tpu.memory_space<vmem>>, %arg8: memref<1x8x4xf32, #tpu.memory_space<vmem>>, %arg9: memref<1x1x4xf32, #tpu.memory_space<vmem>>, %arg10: memref<1x208x32xbf16, #tpu.memory_space<vmem>>, %arg11: memref<1x1x32xf32, #tpu.memory_space<vmem>>, %arg12: memref<1x1x32xf32, #tpu.memory_space<vmem>>, %arg13: memref<1x1x32xf32, #tpu.memory_space<vmem>>, %arg14: memref<1x32x32xbf16, #tpu.memory_space<vmem>>, %arg15: memref<1x1x32xf32, #tpu.memory_space<vmem>>, %arg16: memref<1x32x32xbf16, #tpu.memory_space<vmem>>, %arg17: memref<1x1x32xf32, #tpu.memory_space<vmem>>, %arg18: memref<1x32x32xbf16, #tpu.memory_space<vmem>>, %arg19: memref<1x1x32xf32, #tpu.memory_space<vmem>>, %arg20: memref<1x1x32xf32, #tpu.memory_space<vmem>>, %arg21: memref<1x1x32xf32, #tpu.memory_space<vmem>>, %arg22: memref<1x16x32xf32, #tpu.memory_space<vmem>>, %arg23: memref<16x32xf32, #tpu.memory_space<vmem>>) attributes {dimension_semantics = [#tpu.dimension_semantics<parallel>, #tpu.dimension_semantics<arbitrary>], iteration_bounds = array<i64: 2, 2>, scalar_prefetch = 0 : i64, scratch_operands = 1 : i64, tpu.core_type = #tpu.core_type<tc>, window_params = [{transform_indices = @transform_0, window_bounds = array<i64: 1, 16, 32>}, {transform_indices = @transform_1, window_bounds = array<i64: 1, 8, 16, 16>}, {transform_indices = @transform_2, window_bounds = array<i64: 1, 16, 12>}, {transform_indices = @transform_3, window_bounds = array<i64: 1, 16, 1>}, {transform_indices = @transform_4, window_bounds = array<i64: 1, 16, 16>}, {transform_indices = @transform_5, window_bounds = array<i64: 1, 32, 336>}, {transform_indices = @transform_6, window_bounds = array<i64: 1, 8, 4>}, {transform_indices = @transform_7, window_bounds = array<i64: 1, 1, 4>}, {transform_indices = @transform_8, window_bounds = array<i64: 1, 208, 32>}, {transform_indices = @transform_9, window_bounds = array<i64: 1, 1, 32>}, {transform_indices = @transform_10, window_bounds = array<i64: 1, 1, 32>}, {transform_indices = @transform_11, window_bounds = array<i64: 1, 1, 32>}, {transform_indices = @transform_12, window_bounds = array<i64: 1, 32, 32>}, {transform_indices = @transform_13, window_bounds = array<i64: 1, 1, 32>}, {transform_indices = @transform_14, window_bounds = array<i64: 1, 32, 32>}, {transform_indices = @transform_15, window_bounds = array<i64: 1, 1, 32>}, {transform_indices = @transform_16, window_bounds = array<i64: 1, 32, 32>}, {transform_indices = @transform_17, window_bounds = array<i64: 1, 1, 32>}, {transform_indices = @transform_18, window_bounds = array<i64: 1, 1, 32>}, {transform_indices = @transform_19, window_bounds = array<i64: 1, 1, 32>}, {transform_indices = @transform_20, window_bounds = array<i64: 1, 16, 32>}]} {
    %c0_i32 = arith.constant 0 : i32
    %0 = arith.cmpi eq, %arg1, %c0_i32 : i32
    %1 = arith.extui %0 : i1 to i32
    %c0_i32_0 = arith.constant 0 : i32
    %2 = arith.cmpi ne, %1, %c0_i32_0 : i32
    scf.if %2 {
      %c0_141 = arith.constant 0 : index
      %c0_142 = arith.constant 0 : index
      %c0_143 = arith.constant 0 : index
      %805 = vector.load %arg2[%c0_141, %c0_142, %c0_143] : memref<1x16x32xf32, #tpu.memory_space<vmem>>, vector<1x16x32xf32>
      %806 = vector.shape_cast %805 : vector<1x16x32xf32> to vector<16x32xf32>
      %c0_144 = arith.constant 0 : index
      %c0_145 = arith.constant 0 : index
      %807 = vector.load %arg23[%c0_144, %c0_145] : memref<16x32xf32, #tpu.memory_space<vmem>>, vector<16x32xf32>
      tpu.vector_store %arg23[%c0_144, %c0_145], %806 {strides = array<i32>} : memref<16x32xf32, #tpu.memory_space<vmem>>, vector<16x32xf32>,
    } else {
    }
    %c0 = arith.constant 0 : index
    %c0_1 = arith.constant 0 : index
    %3 = vector.load %arg23[%c0, %c0_1] : memref<16x32xf32, #tpu.memory_space<vmem>>, vector<16x32xf32>
    %4 = arith.truncf %3 : vector<16x32xf32> to vector<16x32xbf16>
    %c0_2 = arith.constant 0 : index
    %c0_3 = arith.constant 0 : index
    %c0_4 = arith.constant 0 : index
    %5 = vector.load %arg7[%c0_2, %c0_3, %c0_4] : memref<1x32x336xbf16, #tpu.memory_space<vmem>>, vector<1x32x336xbf16>
    %6 = vector.shape_cast %5 : vector<1x32x336xbf16> to vector<32x336xbf16>
    %cst = arith.constant dense<0.000000e+00> : vector<16x336xf32>
    %7 = tpu.matmul %4, %6, %cst {dimension_numbers = #tpu.dot_dimension_numbers<[1], [0], [0], [1], [0, 0, 1, 1], [], []>} : vector<16x32xbf16>, vector<32x336xbf16>, vector<16x336xf32> -> vector<16x336xf32>
    %8 = vector.extract_strided_slice %7 {offsets = [0, 0], sizes = [16, 64], strides = [1, 1]} : vector<16x336xf32> to vector<16x64xf32>
    %9 = vector.extract_strided_slice %7 {offsets = [0, 64], sizes = [16, 64], strides = [1, 1]} : vector<16x336xf32> to vector<16x64xf32>
    %10 = vector.extract_strided_slice %7 {offsets = [0, 128], sizes = [16, 64], strides = [1, 1]} : vector<16x336xf32> to vector<16x64xf32>
    %11 = vector.extract_strided_slice %7 {offsets = [0, 192], sizes = [16, 16], strides = [1, 1]} : vector<16x336xf32> to vector<16x16xf32>
    %12 = vector.extract_strided_slice %7 {offsets = [0, 208], sizes = [16, 16], strides = [1, 1]} : vector<16x336xf32> to vector<16x16xf32>
    %13 = vector.extract_strided_slice %7 {offsets = [0, 224], sizes = [16, 16], strides = [1, 1]} : vector<16x336xf32> to vector<16x16xf32>
    %14 = vector.extract_strided_slice %7 {offsets = [0, 240], sizes = [16, 16], strides = [1, 1]} : vector<16x336xf32> to vector<16x16xf32>
    %15 = vector.extract_strided_slice %7 {offsets = [0, 256], sizes = [16, 16], strides = [1, 1]} : vector<16x336xf32> to vector<16x16xf32>
    %16 = vector.extract_strided_slice %7 {offsets = [0, 272], sizes = [16, 16], strides = [1, 1]} : vector<16x336xf32> to vector<16x16xf32>
    %17 = vector.extract_strided_slice %7 {offsets = [0, 288], sizes = [16, 16], strides = [1, 1]} : vector<16x336xf32> to vector<16x16xf32>
    %18 = vector.extract_strided_slice %7 {offsets = [0, 304], sizes = [16, 16], strides = [1, 1]} : vector<16x336xf32> to vector<16x16xf32>
    %19 = vector.extract_strided_slice %7 {offsets = [0, 320], sizes = [16, 16], strides = [1, 1]} : vector<16x336xf32> to vector<16x16xf32>
    %c0_5 = arith.constant 0 : index
    %c0_6 = arith.constant 0 : index
    %c0_7 = arith.constant 0 : index
    %20 = vector.load %arg4[%c0_5, %c0_6, %c0_7] : memref<1x16x12xf32, #tpu.memory_space<vmem>>, vector<1x16x12xf32>
    %21 = vector.shape_cast %20 : vector<1x16x12xf32> to vector<16x12xf32>
    %22 = vector.extract_strided_slice %21 {offsets = [0, 0], sizes = [16, 1], strides = [1, 1]} : vector<16x12xf32> to vector<16x1xf32>
    %23 = vector.extract_strided_slice %21 {offsets = [0, 1], sizes = [16, 1], strides = [1, 1]} : vector<16x12xf32> to vector<16x1xf32>
    %24 = vector.extract_strided_slice %21 {offsets = [0, 2], sizes = [16, 1], strides = [1, 1]} : vector<16x12xf32> to vector<16x1xf32>
    %25 = vector.extract_strided_slice %21 {offsets = [0, 3], sizes = [16, 1], strides = [1, 1]} : vector<16x12xf32> to vector<16x1xf32>
    %26 = vector.extract_strided_slice %21 {offsets = [0, 4], sizes = [16, 1], strides = [1, 1]} : vector<16x12xf32> to vector<16x1xf32>
    %27 = vector.extract_strided_slice %21 {offsets = [0, 5], sizes = [16, 1], strides = [1, 1]} : vector<16x12xf32> to vector<16x1xf32>
    %28 = vector.extract_strided_slice %21 {offsets = [0, 6], sizes = [16, 1], strides = [1, 1]} : vector<16x12xf32> to vector<16x1xf32>
    %29 = vector.extract_strided_slice %21 {offsets = [0, 7], sizes = [16, 1], strides = [1, 1]} : vector<16x12xf32> to vector<16x1xf32>
    %30 = vector.extract_strided_slice %21 {offsets = [0, 8], sizes = [16, 1], strides = [1, 1]} : vector<16x12xf32> to vector<16x1xf32>
    %31 = vector.extract_strided_slice %21 {offsets = [0, 9], sizes = [16, 1], strides = [1, 1]} : vector<16x12xf32> to vector<16x1xf32>
    %32 = vector.extract_strided_slice %21 {offsets = [0, 10], sizes = [16, 1], strides = [1, 1]} : vector<16x12xf32> to vector<16x1xf32>
    %33 = vector.extract_strided_slice %21 {offsets = [0, 11], sizes = [16, 1], strides = [1, 1]} : vector<16x12xf32> to vector<16x1xf32>
    %34 = vector.broadcast %22 : vector<16x1xf32> to vector<16x16xf32>
    %35 = arith.mulf %34, %11 : vector<16x16xf32>
    %36 = vector.broadcast %23 : vector<16x1xf32> to vector<16x16xf32>
    %37 = arith.mulf %36, %12 : vector<16x16xf32>
    %38 = arith.addf %35, %37 : vector<16x16xf32>
    %39 = vector.broadcast %24 : vector<16x1xf32> to vector<16x16xf32>
    %40 = arith.mulf %39, %13 : vector<16x16xf32>
    %41 = arith.addf %38, %40 : vector<16x16xf32>
    %42 = vector.broadcast %31 : vector<16x1xf32> to vector<16x16xf32>
    %43 = arith.addf %41, %42 : vector<16x16xf32>
    %44 = vector.broadcast %25 : vector<16x1xf32> to vector<16x16xf32>
    %45 = arith.mulf %44, %11 : vector<16x16xf32>
    %46 = vector.broadcast %26 : vector<16x1xf32> to vector<16x16xf32>
    %47 = arith.mulf %46, %12 : vector<16x16xf32>
    %48 = arith.addf %45, %47 : vector<16x16xf32>
    %49 = vector.broadcast %27 : vector<16x1xf32> to vector<16x16xf32>
    %50 = arith.mulf %49, %13 : vector<16x16xf32>
    %51 = arith.addf %48, %50 : vector<16x16xf32>
    %52 = vector.broadcast %32 : vector<16x1xf32> to vector<16x16xf32>
    %53 = arith.addf %51, %52 : vector<16x16xf32>
    %54 = vector.broadcast %28 : vector<16x1xf32> to vector<16x16xf32>
    %55 = arith.mulf %54, %11 : vector<16x16xf32>
    %56 = vector.broadcast %29 : vector<16x1xf32> to vector<16x16xf32>
    %57 = arith.mulf %56, %12 : vector<16x16xf32>
    %58 = arith.addf %55, %57 : vector<16x16xf32>
    %59 = vector.broadcast %30 : vector<16x1xf32> to vector<16x16xf32>
    %60 = arith.mulf %59, %13 : vector<16x16xf32>
    %61 = arith.addf %58, %60 : vector<16x16xf32>
    %62 = vector.broadcast %33 : vector<16x1xf32> to vector<16x16xf32>
    %63 = arith.addf %61, %62 : vector<16x16xf32>
    %64 = vector.broadcast %22 : vector<16x1xf32> to vector<16x16xf32>
    %65 = arith.mulf %64, %14 : vector<16x16xf32>
    %66 = vector.broadcast %23 : vector<16x1xf32> to vector<16x16xf32>
    %67 = arith.mulf %66, %15 : vector<16x16xf32>
    %68 = arith.addf %65, %67 : vector<16x16xf32>
    %69 = vector.broadcast %24 : vector<16x1xf32> to vector<16x16xf32>
    %70 = arith.mulf %69, %16 : vector<16x16xf32>
    %71 = arith.addf %68, %70 : vector<16x16xf32>
    %72 = vector.broadcast %31 : vector<16x1xf32> to vector<16x16xf32>
    %73 = arith.addf %71, %72 : vector<16x16xf32>
    %74 = vector.broadcast %25 : vector<16x1xf32> to vector<16x16xf32>
    %75 = arith.mulf %74, %14 : vector<16x16xf32>
    %76 = vector.broadcast %26 : vector<16x1xf32> to vector<16x16xf32>
    %77 = arith.mulf %76, %15 : vector<16x16xf32>
    %78 = arith.addf %75, %77 : vector<16x16xf32>
    %79 = vector.broadcast %27 : vector<16x1xf32> to vector<16x16xf32>
    %80 = arith.mulf %79, %16 : vector<16x16xf32>
    %81 = arith.addf %78, %80 : vector<16x16xf32>
    %82 = vector.broadcast %32 : vector<16x1xf32> to vector<16x16xf32>
    %83 = arith.addf %81, %82 : vector<16x16xf32>
    %84 = vector.broadcast %28 : vector<16x1xf32> to vector<16x16xf32>
    %85 = arith.mulf %84, %14 : vector<16x16xf32>
    %86 = vector.broadcast %29 : vector<16x1xf32> to vector<16x16xf32>
    %87 = arith.mulf %86, %15 : vector<16x16xf32>
    %88 = arith.addf %85, %87 : vector<16x16xf32>
    %89 = vector.broadcast %30 : vector<16x1xf32> to vector<16x16xf32>
    %90 = arith.mulf %89, %16 : vector<16x16xf32>
    %91 = arith.addf %88, %90 : vector<16x16xf32>
    %92 = vector.broadcast %33 : vector<16x1xf32> to vector<16x16xf32>
    %93 = arith.addf %91, %92 : vector<16x16xf32>
    %94 = vector.broadcast %22 : vector<16x1xf32> to vector<16x16xf32>
    %95 = arith.mulf %94, %17 : vector<16x16xf32>
    %96 = vector.broadcast %23 : vector<16x1xf32> to vector<16x16xf32>
    %97 = arith.mulf %96, %18 : vector<16x16xf32>
    %98 = arith.addf %95, %97 : vector<16x16xf32>
    %99 = vector.broadcast %24 : vector<16x1xf32> to vector<16x16xf32>
    %100 = arith.mulf %99, %19 : vector<16x16xf32>
    %101 = arith.addf %98, %100 : vector<16x16xf32>
    %102 = vector.broadcast %31 : vector<16x1xf32> to vector<16x16xf32>
    %103 = arith.addf %101, %102 : vector<16x16xf32>
    %104 = vector.broadcast %25 : vector<16x1xf32> to vector<16x16xf32>
    %105 = arith.mulf %104, %17 : vector<16x16xf32>
    %106 = vector.broadcast %26 : vector<16x1xf32> to vector<16x16xf32>
    %107 = arith.mulf %106, %18 : vector<16x16xf32>
    %108 = arith.addf %105, %107 : vector<16x16xf32>
    %109 = vector.broadcast %27 : vector<16x1xf32> to vector<16x16xf32>
    %110 = arith.mulf %109, %19 : vector<16x16xf32>
    %111 = arith.addf %108, %110 : vector<16x16xf32>
    %112 = vector.broadcast %32 : vector<16x1xf32> to vector<16x16xf32>
    %113 = arith.addf %111, %112 : vector<16x16xf32>
    %114 = vector.broadcast %28 : vector<16x1xf32> to vector<16x16xf32>
    %115 = arith.mulf %114, %17 : vector<16x16xf32>
    %116 = vector.broadcast %29 : vector<16x1xf32> to vector<16x16xf32>
    %117 = arith.mulf %116, %18 : vector<16x16xf32>
    %118 = arith.addf %115, %117 : vector<16x16xf32>
    %119 = vector.broadcast %30 : vector<16x1xf32> to vector<16x16xf32>
    %120 = arith.mulf %119, %19 : vector<16x16xf32>
    %121 = arith.addf %118, %120 : vector<16x16xf32>
    %122 = vector.broadcast %33 : vector<16x1xf32> to vector<16x16xf32>
    %123 = arith.addf %121, %122 : vector<16x16xf32>
    %c0_8 = arith.constant 0 : index
    %c0_9 = arith.constant 0 : index
    %c0_10 = arith.constant 0 : index
    %124 = vector.load %arg5[%c0_8, %c0_9, %c0_10] : memref<1x16x1xf32, #tpu.memory_space<vmem>>, vector<1x16x1xf32>
    %125 = vector.shape_cast %124 : vector<1x16x1xf32> to vector<16x1xf32>
    %c0_11 = arith.constant 0 : index
    %c0_12 = arith.constant 0 : index
    %c0_13 = arith.constant 0 : index
    %126 = vector.load %arg6[%c0_11, %c0_12, %c0_13] : memref<1x16x16xf32, #tpu.memory_space<vmem>>, vector<1x16x16xf32>
    %127 = vector.shape_cast %126 : vector<1x16x16xf32> to vector<16x16xf32>
    %c0_14 = arith.constant 0 : index
    %c0_15 = arith.constant 0 : index
    %c0_16 = arith.constant 0 : index
    %c0_17 = arith.constant 0 : index
    %128 = vector.load %arg3[%c0_14, %c0_15, %c0_16, %c0_17] : memref<1x8x16x16xbf16, #tpu.memory_space<vmem>>, vector<1x8x16x16xbf16>
    %129 = vector.shape_cast %128 : vector<1x8x16x16xbf16> to vector<8x16x16xbf16>
    %130 = arith.extf %129 : vector<8x16x16xbf16> to vector<8x16x16xf32>
    %c0_18 = arith.constant 0 : index
    %c0_19 = arith.constant 0 : index
    %c0_20 = arith.constant 0 : index
    %131 = vector.load %arg8[%c0_18, %c0_19, %c0_20] : memref<1x8x4xf32, #tpu.memory_space<vmem>>, vector<1x8x4xf32>
    %132 = vector.shape_cast %131 : vector<1x8x4xf32> to vector<8x4xf32>
    %c0_21 = arith.constant 0 : index
    %c0_22 = arith.constant 0 : index
    %c0_23 = arith.constant 0 : index
    %133 = vector.load %arg9[%c0_21, %c0_22, %c0_23] : memref<1x1x4xf32, #tpu.memory_space<vmem>>, vector<1x1x4xf32>
    %134 = vector.shape_cast %133 : vector<1x1x4xf32> to vector<1x4xf32>
    %cst_24 = arith.constant 1.000000e+00 : f32
    %135 = vector.broadcast %cst_24 : f32 to vector<16x1xf32>
    %136 = vector.extract_strided_slice %8 {offsets = [0, 0], sizes = [16, 16], strides = [1, 1]} : vector<16x64xf32> to vector<16x16xf32>
    %137 = vector.extract_strided_slice %9 {offsets = [0, 0], sizes = [16, 16], strides = [1, 1]} : vector<16x64xf32> to vector<16x16xf32>
    %138 = vector.extract_strided_slice %10 {offsets = [0, 0], sizes = [16, 16], strides = [1, 1]} : vector<16x64xf32> to vector<16x16xf32>
    %139 = vector.extract_strided_slice %43 {offsets = [0, 0], sizes = [16, 4], strides = [1, 1]} : vector<16x16xf32> to vector<16x4xf32>
    %140 = vector.extract_strided_slice %53 {offsets = [0, 0], sizes = [16, 4], strides = [1, 1]} : vector<16x16xf32> to vector<16x4xf32>
    %141 = vector.extract_strided_slice %63 {offsets = [0, 0], sizes = [16, 4], strides = [1, 1]} : vector<16x16xf32> to vector<16x4xf32>
    %142 = vector.extract_strided_slice %73 {offsets = [0, 0], sizes = [16, 4], strides = [1, 1]} : vector<16x16xf32> to vector<16x4xf32>
    %143 = vector.extract_strided_slice %83 {offsets = [0, 0], sizes = [16, 4], strides = [1, 1]} : vector<16x16xf32> to vector<16x4xf32>
    %144 = vector.extract_strided_slice %93 {offsets = [0, 0], sizes = [16, 4], strides = [1, 1]} : vector<16x16xf32> to vector<16x4xf32>
    %145 = vector.extract_strided_slice %134 {offsets = [0, 0], sizes = [1, 1], strides = [1, 1]} : vector<1x4xf32> to vector<1x1xf32>
    %146 = arith.mulf %139, %139 : vector<16x4xf32>
    %147 = arith.mulf %140, %140 : vector<16x4xf32>
    %148 = arith.addf %146, %147 : vector<16x4xf32>
    %149 = arith.mulf %141, %141 : vector<16x4xf32>
    %150 = arith.addf %148, %149 : vector<16x4xf32>
    %cst_25 = arith.constant dense<0.000000e+00> : vector<16xf32>
    %151 = vector.multi_reduction <add>, %150, %cst_25 [1] : vector<16x4xf32> to vector<16xf32>
    %152 = vector.shape_cast %151 : vector<16xf32> to vector<16x1xf32>
    %153 = arith.mulf %142, %142 : vector<16x4xf32>
    %154 = arith.mulf %143, %143 : vector<16x4xf32>
    %155 = arith.addf %153, %154 : vector<16x4xf32>
    %156 = arith.mulf %144, %144 : vector<16x4xf32>
    %157 = arith.addf %155, %156 : vector<16x4xf32>
    %cst_26 = arith.constant dense<0.000000e+00> : vector<16xf32>
    %158 = vector.multi_reduction <add>, %157, %cst_26 [1] : vector<16x4xf32> to vector<16xf32>
    %159 = vector.shape_cast %158 : vector<16xf32> to vector<16x1xf32>
    %cst_27 = arith.constant 2.500000e-01 : f32
    %160 = vector.broadcast %cst_27 : f32 to vector<16x16xf32>
    %161 = arith.mulf %136, %160 : vector<16x16xf32>
    %cst_28 = arith.constant -2.000000e+00 : f32
    %162 = vector.broadcast %cst_28 : f32 to vector<1x1xf32>
    %163 = arith.mulf %162, %145 : vector<1x1xf32>
    %164 = vector.broadcast %163 : vector<1x1xf32> to vector<16x4xf32>
    %165 = arith.mulf %139, %164 : vector<16x4xf32>
    %cst_29 = arith.constant -2.000000e+00 : f32
    %166 = vector.broadcast %cst_29 : f32 to vector<1x1xf32>
    %167 = arith.mulf %166, %145 : vector<1x1xf32>
    %168 = vector.broadcast %167 : vector<1x1xf32> to vector<16x4xf32>
    %169 = arith.mulf %140, %168 : vector<16x4xf32>
    %cst_30 = arith.constant -2.000000e+00 : f32
    %170 = vector.broadcast %cst_30 : f32 to vector<1x1xf32>
    %171 = arith.mulf %170, %145 : vector<1x1xf32>
    %172 = vector.broadcast %171 : vector<1x1xf32> to vector<16x4xf32>
    %173 = arith.mulf %141, %172 : vector<16x4xf32>
    %174 = vector.broadcast %145 : vector<1x1xf32> to vector<16x1xf32>
    %175 = arith.mulf %152, %174 : vector<16x1xf32>
    %176 = tpu.concatenate %161, %165, %169, %173, %175, %135 in 1 : vector<16x16xf32>, vector<16x4xf32>, vector<16x4xf32>, vector<16x4xf32>, vector<16x1xf32>, vector<16x1xf32> -> vector<16x30xf32>
    %177 = arith.truncf %176 : vector<16x30xf32> to vector<16x30xbf16>
    %178 = vector.broadcast %145 : vector<1x1xf32> to vector<16x1xf32>
    %179 = arith.mulf %159, %178 : vector<16x1xf32>
    %180 = tpu.concatenate %137, %142, %143, %144, %135, %179 in 1 : vector<16x16xf32>, vector<16x4xf32>, vector<16x4xf32>, vector<16x4xf32>, vector<16x1xf32>, vector<16x1xf32> -> vector<16x30xf32>
    %181 = arith.truncf %180 : vector<16x30xf32> to vector<16x30xbf16>
    %cst_31 = arith.constant dense<0.000000e+00> : vector<16x16xf32>
    %182 = tpu.matmul %177, %181, %cst_31 {dimension_numbers = #tpu.dot_dimension_numbers<[1], [1], [0], [0], [0, 0, 1, 0], [], []>} : vector<16x30xbf16>, vector<16x30xbf16>, vector<16x16xf32> -> vector<16x16xf32>
    %cst_32 = arith.constant 0.000000e+00 : f32
    %183 = vector.broadcast %cst_32 : f32 to vector<16x16xf32>
    %184 = vector.extract_strided_slice %132 {offsets = [0, 0], sizes = [1, 1], strides = [1, 1]} : vector<8x4xf32> to vector<1x1xf32>
    %185 = vector.extract_strided_slice %130 {offsets = [0, 0, 0], sizes = [1, 16, 16], strides = [1, 1, 1]} : vector<8x16x16xf32> to vector<1x16x16xf32>
    %186 = vector.shape_cast %185 : vector<1x16x16xf32> to vector<16x16xf32>
    %187 = vector.broadcast %184 : vector<1x1xf32> to vector<16x16xf32>
    %188 = arith.mulf %187, %186 : vector<16x16xf32>
    %189 = arith.addf %183, %188 : vector<16x16xf32>
    %190 = vector.extract_strided_slice %132 {offsets = [1, 0], sizes = [1, 1], strides = [1, 1]} : vector<8x4xf32> to vector<1x1xf32>
    %191 = vector.extract_strided_slice %130 {offsets = [1, 0, 0], sizes = [1, 16, 16], strides = [1, 1, 1]} : vector<8x16x16xf32> to vector<1x16x16xf32>
    %192 = vector.shape_cast %191 : vector<1x16x16xf32> to vector<16x16xf32>
    %193 = vector.broadcast %190 : vector<1x1xf32> to vector<16x16xf32>
    %194 = arith.mulf %193, %192 : vector<16x16xf32>
    %195 = arith.addf %189, %194 : vector<16x16xf32>
    %196 = vector.extract_strided_slice %132 {offsets = [2, 0], sizes = [1, 1], strides = [1, 1]} : vector<8x4xf32> to vector<1x1xf32>
    %197 = vector.extract_strided_slice %130 {offsets = [2, 0, 0], sizes = [1, 16, 16], strides = [1, 1, 1]} : vector<8x16x16xf32> to vector<1x16x16xf32>
    %198 = vector.shape_cast %197 : vector<1x16x16xf32> to vector<16x16xf32>
    %199 = vector.broadcast %196 : vector<1x1xf32> to vector<16x16xf32>
    %200 = arith.mulf %199, %198 : vector<16x16xf32>
    %201 = arith.addf %195, %200 : vector<16x16xf32>
    %202 = vector.extract_strided_slice %132 {offsets = [3, 0], sizes = [1, 1], strides = [1, 1]} : vector<8x4xf32> to vector<1x1xf32>
    %203 = vector.extract_strided_slice %130 {offsets = [3, 0, 0], sizes = [1, 16, 16], strides = [1, 1, 1]} : vector<8x16x16xf32> to vector<1x16x16xf32>
    %204 = vector.shape_cast %203 : vector<1x16x16xf32> to vector<16x16xf32>
    %205 = vector.broadcast %202 : vector<1x1xf32> to vector<16x16xf32>
    %206 = arith.mulf %205, %204 : vector<16x16xf32>
    %207 = arith.addf %201, %206 : vector<16x16xf32>
    %208 = vector.extract_strided_slice %132 {offsets = [4, 0], sizes = [1, 1], strides = [1, 1]} : vector<8x4xf32> to vector<1x1xf32>
    %209 = vector.extract_strided_slice %130 {offsets = [4, 0, 0], sizes = [1, 16, 16], strides = [1, 1, 1]} : vector<8x16x16xf32> to vector<1x16x16xf32>
    %210 = vector.shape_cast %209 : vector<1x16x16xf32> to vector<16x16xf32>
    %211 = vector.broadcast %208 : vector<1x1xf32> to vector<16x16xf32>
    %212 = arith.mulf %211, %210 : vector<16x16xf32>
    %213 = arith.addf %207, %212 : vector<16x16xf32>
    %214 = vector.extract_strided_slice %132 {offsets = [5, 0], sizes = [1, 1], strides = [1, 1]} : vector<8x4xf32> to vector<1x1xf32>
    %215 = vector.extract_strided_slice %130 {offsets = [5, 0, 0], sizes = [1, 16, 16], strides = [1, 1, 1]} : vector<8x16x16xf32> to vector<1x16x16xf32>
    %216 = vector.shape_cast %215 : vector<1x16x16xf32> to vector<16x16xf32>
    %217 = vector.broadcast %214 : vector<1x1xf32> to vector<16x16xf32>
    %218 = arith.mulf %217, %216 : vector<16x16xf32>
    %219 = arith.addf %213, %218 : vector<16x16xf32>
    %220 = vector.extract_strided_slice %132 {offsets = [6, 0], sizes = [1, 1], strides = [1, 1]} : vector<8x4xf32> to vector<1x1xf32>
    %221 = vector.extract_strided_slice %130 {offsets = [6, 0, 0], sizes = [1, 16, 16], strides = [1, 1, 1]} : vector<8x16x16xf32> to vector<1x16x16xf32>
    %222 = vector.shape_cast %221 : vector<1x16x16xf32> to vector<16x16xf32>
    %223 = vector.broadcast %220 : vector<1x1xf32> to vector<16x16xf32>
    %224 = arith.mulf %223, %222 : vector<16x16xf32>
    %225 = arith.addf %219, %224 : vector<16x16xf32>
    %226 = vector.extract_strided_slice %132 {offsets = [7, 0], sizes = [1, 1], strides = [1, 1]} : vector<8x4xf32> to vector<1x1xf32>
    %227 = vector.extract_strided_slice %130 {offsets = [7, 0, 0], sizes = [1, 16, 16], strides = [1, 1, 1]} : vector<8x16x16xf32> to vector<1x16x16xf32>
    %228 = vector.shape_cast %227 : vector<1x16x16xf32> to vector<16x16xf32>
    %229 = vector.broadcast %226 : vector<1x1xf32> to vector<16x16xf32>
    %230 = arith.mulf %229, %228 : vector<16x16xf32>
    %231 = arith.addf %225, %230 : vector<16x16xf32>
    %232 = arith.addf %182, %231 : vector<16x16xf32>
    %cst_33 = arith.constant 0.577350259 : f32
    %233 = vector.broadcast %cst_33 : f32 to vector<16x16xf32>
    %234 = arith.mulf %232, %233 : vector<16x16xf32>
    %cst_34 = arith.constant 5.000000e-01 : f32
    %235 = vector.broadcast %cst_34 : f32 to vector<16x16xf32>
    %236 = arith.cmpf ogt, %127, %235 : vector<16x16xf32>
    %cst_35 = arith.constant 1.000000e+05 : f32
    %237 = vector.broadcast %cst_35 : f32 to vector<16x16xf32>
    %238 = arith.subf %234, %237 : vector<16x16xf32>
    %239 = arith.select %236, %234, %238 : vector<16x16xi1>, vector<16x16xf32>
    %cst_36 = arith.constant dense<0xFF800000> : vector<16xf32>
    %240 = vector.multi_reduction <maximumf>, %239, %cst_36 [1] : vector<16x16xf32> to vector<16xf32>
    %241 = vector.shape_cast %240 : vector<16xf32> to vector<16x1xf32>
    %242 = vector.broadcast %241 : vector<16x1xf32> to vector<16x16xf32>
    %243 = arith.subf %239, %242 : vector<16x16xf32>
    %244 = math.exp %243 : vector<16x16xf32>
    %cst_37 = arith.constant dense<0.000000e+00> : vector<16xf32>
    %245 = vector.multi_reduction <add>, %244, %cst_37 [1] : vector<16x16xf32> to vector<16xf32>
    %246 = vector.shape_cast %245 : vector<16xf32> to vector<16x1xf32>
    %247 = tpu.reciprocal %246 {approx = true} : vector<16x1xf32> -> vector<16x1xf32>
    %248 = vector.broadcast %247 : vector<16x1xf32> to vector<16x16xf32>
    %249 = arith.mulf %244, %248 : vector<16x16xf32>
    %250 = vector.broadcast %125 : vector<16x1xf32> to vector<16x16xf32>
    %251 = arith.mulf %249, %250 : vector<16x16xf32>
    %252 = vector.extract_strided_slice %103 {offsets = [0, 0], sizes = [16, 4], strides = [1, 1]} : vector<16x16xf32> to vector<16x4xf32>
    %253 = vector.extract_strided_slice %113 {offsets = [0, 0], sizes = [16, 4], strides = [1, 1]} : vector<16x16xf32> to vector<16x4xf32>
    %254 = vector.extract_strided_slice %123 {offsets = [0, 0], sizes = [16, 4], strides = [1, 1]} : vector<16x16xf32> to vector<16x4xf32>
    %255 = tpu.concatenate %138, %252, %253, %254 in 1 : vector<16x16xf32>, vector<16x4xf32>, vector<16x4xf32>, vector<16x4xf32> -> vector<16x28xf32>
    %256 = arith.truncf %255 : vector<16x28xf32> to vector<16x28xbf16>
    %257 = arith.truncf %251 : vector<16x16xf32> to vector<16x16xbf16>
    %cst_38 = arith.constant dense<0.000000e+00> : vector<16x28xf32>
    %258 = tpu.matmul %257, %256, %cst_38 {dimension_numbers = #tpu.dot_dimension_numbers<[1], [0], [0], [1], [0, 0, 1, 1], [], []>} : vector<16x16xbf16>, vector<16x28xbf16>, vector<16x28xf32> -> vector<16x28xf32>
    %259 = vector.extract_strided_slice %258 {offsets = [0, 0], sizes = [16, 16], strides = [1, 1]} : vector<16x28xf32> to vector<16x16xf32>
    %260 = vector.extract_strided_slice %258 {offsets = [0, 16], sizes = [16, 4], strides = [1, 1]} : vector<16x28xf32> to vector<16x4xf32>
    %261 = vector.extract_strided_slice %258 {offsets = [0, 20], sizes = [16, 4], strides = [1, 1]} : vector<16x28xf32> to vector<16x4xf32>
    %262 = vector.extract_strided_slice %258 {offsets = [0, 24], sizes = [16, 4], strides = [1, 1]} : vector<16x28xf32> to vector<16x4xf32>
    %263 = vector.shape_cast %251 : vector<16x16xf32> to vector<1x16x16xf32>
    %264 = vector.broadcast %263 : vector<1x16x16xf32> to vector<8x16x16xf32>
    %265 = arith.mulf %264, %130 : vector<8x16x16xf32>
    %cst_39 = arith.constant dense<0.000000e+00> : vector<8x16xf32>
    %266 = vector.multi_reduction <add>, %265, %cst_39 [2] : vector<8x16x16xf32> to vector<8x16xf32>
    %267 = vector.extract_strided_slice %8 {offsets = [0, 16], sizes = [16, 16], strides = [1, 1]} : vector<16x64xf32> to vector<16x16xf32>
    %268 = vector.extract_strided_slice %9 {offsets = [0, 16], sizes = [16, 16], strides = [1, 1]} : vector<16x64xf32> to vector<16x16xf32>
    %269 = vector.extract_strided_slice %10 {offsets = [0, 16], sizes = [16, 16], strides = [1, 1]} : vector<16x64xf32> to vector<16x16xf32>
    %270 = vector.extract_strided_slice %43 {offsets = [0, 4], sizes = [16, 4], strides = [1, 1]} : vector<16x16xf32> to vector<16x4xf32>
    %271 = vector.extract_strided_slice %53 {offsets = [0, 4], sizes = [16, 4], strides = [1, 1]} : vector<16x16xf32> to vector<16x4xf32>
    %272 = vector.extract_strided_slice %63 {offsets = [0, 4], sizes = [16, 4], strides = [1, 1]} : vector<16x16xf32> to vector<16x4xf32>
    %273 = vector.extract_strided_slice %73 {offsets = [0, 4], sizes = [16, 4], strides = [1, 1]} : vector<16x16xf32> to vector<16x4xf32>
    %274 = vector.extract_strided_slice %83 {offsets = [0, 4], sizes = [16, 4], strides = [1, 1]} : vector<16x16xf32> to vector<16x4xf32>
    %275 = vector.extract_strided_slice %93 {offsets = [0, 4], sizes = [16, 4], strides = [1, 1]} : vector<16x16xf32> to vector<16x4xf32>
    %276 = vector.extract_strided_slice %134 {offsets = [0, 1], sizes = [1, 1], strides = [1, 1]} : vector<1x4xf32> to vector<1x1xf32>
    %277 = arith.mulf %270, %270 : vector<16x4xf32>
    %278 = arith.mulf %271, %271 : vector<16x4xf32>
    %279 = arith.addf %277, %278 : vector<16x4xf32>
    %280 = arith.mulf %272, %272 : vector<16x4xf32>
    %281 = arith.addf %279, %280 : vector<16x4xf32>
    %cst_40 = arith.constant dense<0.000000e+00> : vector<16xf32>
    %282 = vector.multi_reduction <add>, %281, %cst_40 [1] : vector<16x4xf32> to vector<16xf32>
    %283 = vector.shape_cast %282 : vector<16xf32> to vector<16x1xf32>
    %284 = arith.mulf %273, %273 : vector<16x4xf32>
    %285 = arith.mulf %274, %274 : vector<16x4xf32>
    %286 = arith.addf %284, %285 : vector<16x4xf32>
    %287 = arith.mulf %275, %275 : vector<16x4xf32>
    %288 = arith.addf %286, %287 : vector<16x4xf32>
    %cst_41 = arith.constant dense<0.000000e+00> : vector<16xf32>
    %289 = vector.multi_reduction <add>, %288, %cst_41 [1] : vector<16x4xf32> to vector<16xf32>
    %290 = vector.shape_cast %289 : vector<16xf32> to vector<16x1xf32>
    %cst_42 = arith.constant 2.500000e-01 : f32
    %291 = vector.broadcast %cst_42 : f32 to vector<16x16xf32>
    %292 = arith.mulf %267, %291 : vector<16x16xf32>
    %cst_43 = arith.constant -2.000000e+00 : f32
    %293 = vector.broadcast %cst_43 : f32 to vector<1x1xf32>
    %294 = arith.mulf %293, %276 : vector<1x1xf32>
    %295 = vector.broadcast %294 : vector<1x1xf32> to vector<16x4xf32>
    %296 = arith.mulf %270, %295 : vector<16x4xf32>
    %cst_44 = arith.constant -2.000000e+00 : f32
    %297 = vector.broadcast %cst_44 : f32 to vector<1x1xf32>
    %298 = arith.mulf %297, %276 : vector<1x1xf32>
    %299 = vector.broadcast %298 : vector<1x1xf32> to vector<16x4xf32>
    %300 = arith.mulf %271, %299 : vector<16x4xf32>
    %cst_45 = arith.constant -2.000000e+00 : f32
    %301 = vector.broadcast %cst_45 : f32 to vector<1x1xf32>
    %302 = arith.mulf %301, %276 : vector<1x1xf32>
    %303 = vector.broadcast %302 : vector<1x1xf32> to vector<16x4xf32>
    %304 = arith.mulf %272, %303 : vector<16x4xf32>
    %305 = vector.broadcast %276 : vector<1x1xf32> to vector<16x1xf32>
    %306 = arith.mulf %283, %305 : vector<16x1xf32>
    %307 = tpu.concatenate %292, %296, %300, %304, %306, %135 in 1 : vector<16x16xf32>, vector<16x4xf32>, vector<16x4xf32>, vector<16x4xf32>, vector<16x1xf32>, vector<16x1xf32> -> vector<16x30xf32>
    %308 = arith.truncf %307 : vector<16x30xf32> to vector<16x30xbf16>
    %309 = vector.broadcast %276 : vector<1x1xf32> to vector<16x1xf32>
    %310 = arith.mulf %290, %309 : vector<16x1xf32>
    %311 = tpu.concatenate %268, %273, %274, %275, %135, %310 in 1 : vector<16x16xf32>, vector<16x4xf32>, vector<16x4xf32>, vector<16x4xf32>, vector<16x1xf32>, vector<16x1xf32> -> vector<16x30xf32>
    %312 = arith.truncf %311 : vector<16x30xf32> to vector<16x30xbf16>
    %cst_46 = arith.constant dense<0.000000e+00> : vector<16x16xf32>
    %313 = tpu.matmul %308, %312, %cst_46 {dimension_numbers = #tpu.dot_dimension_numbers<[1], [1], [0], [0], [0, 0, 1, 0], [], []>} : vector<16x30xbf16>, vector<16x30xbf16>, vector<16x16xf32> -> vector<16x16xf32>
    %cst_47 = arith.constant 0.000000e+00 : f32
    %314 = vector.broadcast %cst_47 : f32 to vector<16x16xf32>
    %315 = vector.extract_strided_slice %132 {offsets = [0, 1], sizes = [1, 1], strides = [1, 1]} : vector<8x4xf32> to vector<1x1xf32>
    %316 = vector.extract_strided_slice %130 {offsets = [0, 0, 0], sizes = [1, 16, 16], strides = [1, 1, 1]} : vector<8x16x16xf32> to vector<1x16x16xf32>
    %317 = vector.shape_cast %316 : vector<1x16x16xf32> to vector<16x16xf32>
    %318 = vector.broadcast %315 : vector<1x1xf32> to vector<16x16xf32>
    %319 = arith.mulf %318, %317 : vector<16x16xf32>
    %320 = arith.addf %314, %319 : vector<16x16xf32>
    %321 = vector.extract_strided_slice %132 {offsets = [1, 1], sizes = [1, 1], strides = [1, 1]} : vector<8x4xf32> to vector<1x1xf32>
    %322 = vector.extract_strided_slice %130 {offsets = [1, 0, 0], sizes = [1, 16, 16], strides = [1, 1, 1]} : vector<8x16x16xf32> to vector<1x16x16xf32>
    %323 = vector.shape_cast %322 : vector<1x16x16xf32> to vector<16x16xf32>
    %324 = vector.broadcast %321 : vector<1x1xf32> to vector<16x16xf32>
    %325 = arith.mulf %324, %323 : vector<16x16xf32>
    %326 = arith.addf %320, %325 : vector<16x16xf32>
    %327 = vector.extract_strided_slice %132 {offsets = [2, 1], sizes = [1, 1], strides = [1, 1]} : vector<8x4xf32> to vector<1x1xf32>
    %328 = vector.extract_strided_slice %130 {offsets = [2, 0, 0], sizes = [1, 16, 16], strides = [1, 1, 1]} : vector<8x16x16xf32> to vector<1x16x16xf32>
    %329 = vector.shape_cast %328 : vector<1x16x16xf32> to vector<16x16xf32>
    %330 = vector.broadcast %327 : vector<1x1xf32> to vector<16x16xf32>
    %331 = arith.mulf %330, %329 : vector<16x16xf32>
    %332 = arith.addf %326, %331 : vector<16x16xf32>
    %333 = vector.extract_strided_slice %132 {offsets = [3, 1], sizes = [1, 1], strides = [1, 1]} : vector<8x4xf32> to vector<1x1xf32>
    %334 = vector.extract_strided_slice %130 {offsets = [3, 0, 0], sizes = [1, 16, 16], strides = [1, 1, 1]} : vector<8x16x16xf32> to vector<1x16x16xf32>
    %335 = vector.shape_cast %334 : vector<1x16x16xf32> to vector<16x16xf32>
    %336 = vector.broadcast %333 : vector<1x1xf32> to vector<16x16xf32>
    %337 = arith.mulf %336, %335 : vector<16x16xf32>
    %338 = arith.addf %332, %337 : vector<16x16xf32>
    %339 = vector.extract_strided_slice %132 {offsets = [4, 1], sizes = [1, 1], strides = [1, 1]} : vector<8x4xf32> to vector<1x1xf32>
    %340 = vector.extract_strided_slice %130 {offsets = [4, 0, 0], sizes = [1, 16, 16], strides = [1, 1, 1]} : vector<8x16x16xf32> to vector<1x16x16xf32>
    %341 = vector.shape_cast %340 : vector<1x16x16xf32> to vector<16x16xf32>
    %342 = vector.broadcast %339 : vector<1x1xf32> to vector<16x16xf32>
    %343 = arith.mulf %342, %341 : vector<16x16xf32>
    %344 = arith.addf %338, %343 : vector<16x16xf32>
    %345 = vector.extract_strided_slice %132 {offsets = [5, 1], sizes = [1, 1], strides = [1, 1]} : vector<8x4xf32> to vector<1x1xf32>
    %346 = vector.extract_strided_slice %130 {offsets = [5, 0, 0], sizes = [1, 16, 16], strides = [1, 1, 1]} : vector<8x16x16xf32> to vector<1x16x16xf32>
    %347 = vector.shape_cast %346 : vector<1x16x16xf32> to vector<16x16xf32>
    %348 = vector.broadcast %345 : vector<1x1xf32> to vector<16x16xf32>
    %349 = arith.mulf %348, %347 : vector<16x16xf32>
    %350 = arith.addf %344, %349 : vector<16x16xf32>
    %351 = vector.extract_strided_slice %132 {offsets = [6, 1], sizes = [1, 1], strides = [1, 1]} : vector<8x4xf32> to vector<1x1xf32>
    %352 = vector.extract_strided_slice %130 {offsets = [6, 0, 0], sizes = [1, 16, 16], strides = [1, 1, 1]} : vector<8x16x16xf32> to vector<1x16x16xf32>
    %353 = vector.shape_cast %352 : vector<1x16x16xf32> to vector<16x16xf32>
    %354 = vector.broadcast %351 : vector<1x1xf32> to vector<16x16xf32>
    %355 = arith.mulf %354, %353 : vector<16x16xf32>
    %356 = arith.addf %350, %355 : vector<16x16xf32>
    %357 = vector.extract_strided_slice %132 {offsets = [7, 1], sizes = [1, 1], strides = [1, 1]} : vector<8x4xf32> to vector<1x1xf32>
    %358 = vector.extract_strided_slice %130 {offsets = [7, 0, 0], sizes = [1, 16, 16], strides = [1, 1, 1]} : vector<8x16x16xf32> to vector<1x16x16xf32>
    %359 = vector.shape_cast %358 : vector<1x16x16xf32> to vector<16x16xf32>
    %360 = vector.broadcast %357 : vector<1x1xf32> to vector<16x16xf32>
    %361 = arith.mulf %360, %359 : vector<16x16xf32>
    %362 = arith.addf %356, %361 : vector<16x16xf32>
    %363 = arith.addf %313, %362 : vector<16x16xf32>
    %cst_48 = arith.constant 0.577350259 : f32
    %364 = vector.broadcast %cst_48 : f32 to vector<16x16xf32>
    %365 = arith.mulf %363, %364 : vector<16x16xf32>
    %cst_49 = arith.constant 5.000000e-01 : f32
    %366 = vector.broadcast %cst_49 : f32 to vector<16x16xf32>
    %367 = arith.cmpf ogt, %127, %366 : vector<16x16xf32>
    %cst_50 = arith.constant 1.000000e+05 : f32
    %368 = vector.broadcast %cst_50 : f32 to vector<16x16xf32>
    %369 = arith.subf %365, %368 : vector<16x16xf32>
    %370 = arith.select %367, %365, %369 : vector<16x16xi1>, vector<16x16xf32>
    %cst_51 = arith.constant dense<0xFF800000> : vector<16xf32>
    %371 = vector.multi_reduction <maximumf>, %370, %cst_51 [1] : vector<16x16xf32> to vector<16xf32>
    %372 = vector.shape_cast %371 : vector<16xf32> to vector<16x1xf32>
    %373 = vector.broadcast %372 : vector<16x1xf32> to vector<16x16xf32>
    %374 = arith.subf %370, %373 : vector<16x16xf32>
    %375 = math.exp %374 : vector<16x16xf32>
    %cst_52 = arith.constant dense<0.000000e+00> : vector<16xf32>
    %376 = vector.multi_reduction <add>, %375, %cst_52 [1] : vector<16x16xf32> to vector<16xf32>
    %377 = vector.shape_cast %376 : vector<16xf32> to vector<16x1xf32>
    %378 = tpu.reciprocal %377 {approx = true} : vector<16x1xf32> -> vector<16x1xf32>
    %379 = vector.broadcast %378 : vector<16x1xf32> to vector<16x16xf32>
    %380 = arith.mulf %375, %379 : vector<16x16xf32>
    %381 = vector.broadcast %125 : vector<16x1xf32> to vector<16x16xf32>
    %382 = arith.mulf %380, %381 : vector<16x16xf32>
    %383 = vector.extract_strided_slice %103 {offsets = [0, 4], sizes = [16, 4], strides = [1, 1]} : vector<16x16xf32> to vector<16x4xf32>
    %384 = vector.extract_strided_slice %113 {offsets = [0, 4], sizes = [16, 4], strides = [1, 1]} : vector<16x16xf32> to vector<16x4xf32>
    %385 = vector.extract_strided_slice %123 {offsets = [0, 4], sizes = [16, 4], strides = [1, 1]} : vector<16x16xf32> to vector<16x4xf32>
    %386 = tpu.concatenate %269, %383, %384, %385 in 1 : vector<16x16xf32>, vector<16x4xf32>, vector<16x4xf32>, vector<16x4xf32> -> vector<16x28xf32>
    %387 = arith.truncf %386 : vector<16x28xf32> to vector<16x28xbf16>
    %388 = arith.truncf %382 : vector<16x16xf32> to vector<16x16xbf16>
    %cst_53 = arith.constant dense<0.000000e+00> : vector<16x28xf32>
    %389 = tpu.matmul %388, %387, %cst_53 {dimension_numbers = #tpu.dot_dimension_numbers<[1], [0], [0], [1], [0, 0, 1, 1], [], []>} : vector<16x16xbf16>, vector<16x28xbf16>, vector<16x28xf32> -> vector<16x28xf32>
    %390 = vector.extract_strided_slice %389 {offsets = [0, 0], sizes = [16, 16], strides = [1, 1]} : vector<16x28xf32> to vector<16x16xf32>
    %391 = vector.extract_strided_slice %389 {offsets = [0, 16], sizes = [16, 4], strides = [1, 1]} : vector<16x28xf32> to vector<16x4xf32>
    %392 = vector.extract_strided_slice %389 {offsets = [0, 20], sizes = [16, 4], strides = [1, 1]} : vector<16x28xf32> to vector<16x4xf32>
    %393 = vector.extract_strided_slice %389 {offsets = [0, 24], sizes = [16, 4], strides = [1, 1]} : vector<16x28xf32> to vector<16x4xf32>
    %394 = vector.shape_cast %382 : vector<16x16xf32> to vector<1x16x16xf32>
    %395 = vector.broadcast %394 : vector<1x16x16xf32> to vector<8x16x16xf32>
    %396 = arith.mulf %395, %130 : vector<8x16x16xf32>
    %cst_54 = arith.constant dense<0.000000e+00> : vector<8x16xf32>
    %397 = vector.multi_reduction <add>, %396, %cst_54 [2] : vector<8x16x16xf32> to vector<8x16xf32>
    %398 = vector.extract_strided_slice %8 {offsets = [0, 32], sizes = [16, 16], strides = [1, 1]} : vector<16x64xf32> to vector<16x16xf32>
    %399 = vector.extract_strided_slice %9 {offsets = [0, 32], sizes = [16, 16], strides = [1, 1]} : vector<16x64xf32> to vector<16x16xf32>
    %400 = vector.extract_strided_slice %10 {offsets = [0, 32], sizes = [16, 16], strides = [1, 1]} : vector<16x64xf32> to vector<16x16xf32>
    %401 = vector.extract_strided_slice %43 {offsets = [0, 8], sizes = [16, 4], strides = [1, 1]} : vector<16x16xf32> to vector<16x4xf32>
    %402 = vector.extract_strided_slice %53 {offsets = [0, 8], sizes = [16, 4], strides = [1, 1]} : vector<16x16xf32> to vector<16x4xf32>
    %403 = vector.extract_strided_slice %63 {offsets = [0, 8], sizes = [16, 4], strides = [1, 1]} : vector<16x16xf32> to vector<16x4xf32>
    %404 = vector.extract_strided_slice %73 {offsets = [0, 8], sizes = [16, 4], strides = [1, 1]} : vector<16x16xf32> to vector<16x4xf32>
    %405 = vector.extract_strided_slice %83 {offsets = [0, 8], sizes = [16, 4], strides = [1, 1]} : vector<16x16xf32> to vector<16x4xf32>
    %406 = vector.extract_strided_slice %93 {offsets = [0, 8], sizes = [16, 4], strides = [1, 1]} : vector<16x16xf32> to vector<16x4xf32>
    %407 = vector.extract_strided_slice %134 {offsets = [0, 2], sizes = [1, 1], strides = [1, 1]} : vector<1x4xf32> to vector<1x1xf32>
    %408 = arith.mulf %401, %401 : vector<16x4xf32>
    %409 = arith.mulf %402, %402 : vector<16x4xf32>
    %410 = arith.addf %408, %409 : vector<16x4xf32>
    %411 = arith.mulf %403, %403 : vector<16x4xf32>
    %412 = arith.addf %410, %411 : vector<16x4xf32>
    %cst_55 = arith.constant dense<0.000000e+00> : vector<16xf32>
    %413 = vector.multi_reduction <add>, %412, %cst_55 [1] : vector<16x4xf32> to vector<16xf32>
    %414 = vector.shape_cast %413 : vector<16xf32> to vector<16x1xf32>
    %415 = arith.mulf %404, %404 : vector<16x4xf32>
    %416 = arith.mulf %405, %405 : vector<16x4xf32>
    %417 = arith.addf %415, %416 : vector<16x4xf32>
    %418 = arith.mulf %406, %406 : vector<16x4xf32>
    %419 = arith.addf %417, %418 : vector<16x4xf32>
    %cst_56 = arith.constant dense<0.000000e+00> : vector<16xf32>
    %420 = vector.multi_reduction <add>, %419, %cst_56 [1] : vector<16x4xf32> to vector<16xf32>
    %421 = vector.shape_cast %420 : vector<16xf32> to vector<16x1xf32>
    %cst_57 = arith.constant 2.500000e-01 : f32
    %422 = vector.broadcast %cst_57 : f32 to vector<16x16xf32>
    %423 = arith.mulf %398, %422 : vector<16x16xf32>
    %cst_58 = arith.constant -2.000000e+00 : f32
    %424 = vector.broadcast %cst_58 : f32 to vector<1x1xf32>
    %425 = arith.mulf %424, %407 : vector<1x1xf32>
    %426 = vector.broadcast %425 : vector<1x1xf32> to vector<16x4xf32>
    %427 = arith.mulf %401, %426 : vector<16x4xf32>
    %cst_59 = arith.constant -2.000000e+00 : f32
    %428 = vector.broadcast %cst_59 : f32 to vector<1x1xf32>
    %429 = arith.mulf %428, %407 : vector<1x1xf32>
    %430 = vector.broadcast %429 : vector<1x1xf32> to vector<16x4xf32>
    %431 = arith.mulf %402, %430 : vector<16x4xf32>
    %cst_60 = arith.constant -2.000000e+00 : f32
    %432 = vector.broadcast %cst_60 : f32 to vector<1x1xf32>
    %433 = arith.mulf %432, %407 : vector<1x1xf32>
    %434 = vector.broadcast %433 : vector<1x1xf32> to vector<16x4xf32>
    %435 = arith.mulf %403, %434 : vector<16x4xf32>
    %436 = vector.broadcast %407 : vector<1x1xf32> to vector<16x1xf32>
    %437 = arith.mulf %414, %436 : vector<16x1xf32>
    %438 = tpu.concatenate %423, %427, %431, %435, %437, %135 in 1 : vector<16x16xf32>, vector<16x4xf32>, vector<16x4xf32>, vector<16x4xf32>, vector<16x1xf32>, vector<16x1xf32> -> vector<16x30xf32>
    %439 = arith.truncf %438 : vector<16x30xf32> to vector<16x30xbf16>
    %440 = vector.broadcast %407 : vector<1x1xf32> to vector<16x1xf32>
    %441 = arith.mulf %421, %440 : vector<16x1xf32>
    %442 = tpu.concatenate %399, %404, %405, %406, %135, %441 in 1 : vector<16x16xf32>, vector<16x4xf32>, vector<16x4xf32>, vector<16x4xf32>, vector<16x1xf32>, vector<16x1xf32> -> vector<16x30xf32>
    %443 = arith.truncf %442 : vector<16x30xf32> to vector<16x30xbf16>
    %cst_61 = arith.constant dense<0.000000e+00> : vector<16x16xf32>
    %444 = tpu.matmul %439, %443, %cst_61 {dimension_numbers = #tpu.dot_dimension_numbers<[1], [1], [0], [0], [0, 0, 1, 0], [], []>} : vector<16x30xbf16>, vector<16x30xbf16>, vector<16x16xf32> -> vector<16x16xf32>
    %cst_62 = arith.constant 0.000000e+00 : f32
    %445 = vector.broadcast %cst_62 : f32 to vector<16x16xf32>
    %446 = vector.extract_strided_slice %132 {offsets = [0, 2], sizes = [1, 1], strides = [1, 1]} : vector<8x4xf32> to vector<1x1xf32>
    %447 = vector.extract_strided_slice %130 {offsets = [0, 0, 0], sizes = [1, 16, 16], strides = [1, 1, 1]} : vector<8x16x16xf32> to vector<1x16x16xf32>
    %448 = vector.shape_cast %447 : vector<1x16x16xf32> to vector<16x16xf32>
    %449 = vector.broadcast %446 : vector<1x1xf32> to vector<16x16xf32>
    %450 = arith.mulf %449, %448 : vector<16x16xf32>
    %451 = arith.addf %445, %450 : vector<16x16xf32>
    %452 = vector.extract_strided_slice %132 {offsets = [1, 2], sizes = [1, 1], strides = [1, 1]} : vector<8x4xf32> to vector<1x1xf32>
    %453 = vector.extract_strided_slice %130 {offsets = [1, 0, 0], sizes = [1, 16, 16], strides = [1, 1, 1]} : vector<8x16x16xf32> to vector<1x16x16xf32>
    %454 = vector.shape_cast %453 : vector<1x16x16xf32> to vector<16x16xf32>
    %455 = vector.broadcast %452 : vector<1x1xf32> to vector<16x16xf32>
    %456 = arith.mulf %455, %454 : vector<16x16xf32>
    %457 = arith.addf %451, %456 : vector<16x16xf32>
    %458 = vector.extract_strided_slice %132 {offsets = [2, 2], sizes = [1, 1], strides = [1, 1]} : vector<8x4xf32> to vector<1x1xf32>
    %459 = vector.extract_strided_slice %130 {offsets = [2, 0, 0], sizes = [1, 16, 16], strides = [1, 1, 1]} : vector<8x16x16xf32> to vector<1x16x16xf32>
    %460 = vector.shape_cast %459 : vector<1x16x16xf32> to vector<16x16xf32>
    %461 = vector.broadcast %458 : vector<1x1xf32> to vector<16x16xf32>
    %462 = arith.mulf %461, %460 : vector<16x16xf32>
    %463 = arith.addf %457, %462 : vector<16x16xf32>
    %464 = vector.extract_strided_slice %132 {offsets = [3, 2], sizes = [1, 1], strides = [1, 1]} : vector<8x4xf32> to vector<1x1xf32>
    %465 = vector.extract_strided_slice %130 {offsets = [3, 0, 0], sizes = [1, 16, 16], strides = [1, 1, 1]} : vector<8x16x16xf32> to vector<1x16x16xf32>
    %466 = vector.shape_cast %465 : vector<1x16x16xf32> to vector<16x16xf32>
    %467 = vector.broadcast %464 : vector<1x1xf32> to vector<16x16xf32>
    %468 = arith.mulf %467, %466 : vector<16x16xf32>
    %469 = arith.addf %463, %468 : vector<16x16xf32>
    %470 = vector.extract_strided_slice %132 {offsets = [4, 2], sizes = [1, 1], strides = [1, 1]} : vector<8x4xf32> to vector<1x1xf32>
    %471 = vector.extract_strided_slice %130 {offsets = [4, 0, 0], sizes = [1, 16, 16], strides = [1, 1, 1]} : vector<8x16x16xf32> to vector<1x16x16xf32>
    %472 = vector.shape_cast %471 : vector<1x16x16xf32> to vector<16x16xf32>
    %473 = vector.broadcast %470 : vector<1x1xf32> to vector<16x16xf32>
    %474 = arith.mulf %473, %472 : vector<16x16xf32>
    %475 = arith.addf %469, %474 : vector<16x16xf32>
    %476 = vector.extract_strided_slice %132 {offsets = [5, 2], sizes = [1, 1], strides = [1, 1]} : vector<8x4xf32> to vector<1x1xf32>
    %477 = vector.extract_strided_slice %130 {offsets = [5, 0, 0], sizes = [1, 16, 16], strides = [1, 1, 1]} : vector<8x16x16xf32> to vector<1x16x16xf32>
    %478 = vector.shape_cast %477 : vector<1x16x16xf32> to vector<16x16xf32>
    %479 = vector.broadcast %476 : vector<1x1xf32> to vector<16x16xf32>
    %480 = arith.mulf %479, %478 : vector<16x16xf32>
    %481 = arith.addf %475, %480 : vector<16x16xf32>
    %482 = vector.extract_strided_slice %132 {offsets = [6, 2], sizes = [1, 1], strides = [1, 1]} : vector<8x4xf32> to vector<1x1xf32>
    %483 = vector.extract_strided_slice %130 {offsets = [6, 0, 0], sizes = [1, 16, 16], strides = [1, 1, 1]} : vector<8x16x16xf32> to vector<1x16x16xf32>
    %484 = vector.shape_cast %483 : vector<1x16x16xf32> to vector<16x16xf32>
    %485 = vector.broadcast %482 : vector<1x1xf32> to vector<16x16xf32>
    %486 = arith.mulf %485, %484 : vector<16x16xf32>
    %487 = arith.addf %481, %486 : vector<16x16xf32>
    %488 = vector.extract_strided_slice %132 {offsets = [7, 2], sizes = [1, 1], strides = [1, 1]} : vector<8x4xf32> to vector<1x1xf32>
    %489 = vector.extract_strided_slice %130 {offsets = [7, 0, 0], sizes = [1, 16, 16], strides = [1, 1, 1]} : vector<8x16x16xf32> to vector<1x16x16xf32>
    %490 = vector.shape_cast %489 : vector<1x16x16xf32> to vector<16x16xf32>
    %491 = vector.broadcast %488 : vector<1x1xf32> to vector<16x16xf32>
    %492 = arith.mulf %491, %490 : vector<16x16xf32>
    %493 = arith.addf %487, %492 : vector<16x16xf32>
    %494 = arith.addf %444, %493 : vector<16x16xf32>
    %cst_63 = arith.constant 0.577350259 : f32
    %495 = vector.broadcast %cst_63 : f32 to vector<16x16xf32>
    %496 = arith.mulf %494, %495 : vector<16x16xf32>
    %cst_64 = arith.constant 5.000000e-01 : f32
    %497 = vector.broadcast %cst_64 : f32 to vector<16x16xf32>
    %498 = arith.cmpf ogt, %127, %497 : vector<16x16xf32>
    %cst_65 = arith.constant 1.000000e+05 : f32
    %499 = vector.broadcast %cst_65 : f32 to vector<16x16xf32>
    %500 = arith.subf %496, %499 : vector<16x16xf32>
    %501 = arith.select %498, %496, %500 : vector<16x16xi1>, vector<16x16xf32>
    %cst_66 = arith.constant dense<0xFF800000> : vector<16xf32>
    %502 = vector.multi_reduction <maximumf>, %501, %cst_66 [1] : vector<16x16xf32> to vector<16xf32>
    %503 = vector.shape_cast %502 : vector<16xf32> to vector<16x1xf32>
    %504 = vector.broadcast %503 : vector<16x1xf32> to vector<16x16xf32>
    %505 = arith.subf %501, %504 : vector<16x16xf32>
    %506 = math.exp %505 : vector<16x16xf32>
    %cst_67 = arith.constant dense<0.000000e+00> : vector<16xf32>
    %507 = vector.multi_reduction <add>, %506, %cst_67 [1] : vector<16x16xf32> to vector<16xf32>
    %508 = vector.shape_cast %507 : vector<16xf32> to vector<16x1xf32>
    %509 = tpu.reciprocal %508 {approx = true} : vector<16x1xf32> -> vector<16x1xf32>
    %510 = vector.broadcast %509 : vector<16x1xf32> to vector<16x16xf32>
    %511 = arith.mulf %506, %510 : vector<16x16xf32>
    %512 = vector.broadcast %125 : vector<16x1xf32> to vector<16x16xf32>
    %513 = arith.mulf %511, %512 : vector<16x16xf32>
    %514 = vector.extract_strided_slice %103 {offsets = [0, 8], sizes = [16, 4], strides = [1, 1]} : vector<16x16xf32> to vector<16x4xf32>
    %515 = vector.extract_strided_slice %113 {offsets = [0, 8], sizes = [16, 4], strides = [1, 1]} : vector<16x16xf32> to vector<16x4xf32>
    %516 = vector.extract_strided_slice %123 {offsets = [0, 8], sizes = [16, 4], strides = [1, 1]} : vector<16x16xf32> to vector<16x4xf32>
    %517 = tpu.concatenate %400, %514, %515, %516 in 1 : vector<16x16xf32>, vector<16x4xf32>, vector<16x4xf32>, vector<16x4xf32> -> vector<16x28xf32>
    %518 = arith.truncf %517 : vector<16x28xf32> to vector<16x28xbf16>
    %519 = arith.truncf %513 : vector<16x16xf32> to vector<16x16xbf16>
    %cst_68 = arith.constant dense<0.000000e+00> : vector<16x28xf32>
    %520 = tpu.matmul %519, %518, %cst_68 {dimension_numbers = #tpu.dot_dimension_numbers<[1], [0], [0], [1], [0, 0, 1, 1], [], []>} : vector<16x16xbf16>, vector<16x28xbf16>, vector<16x28xf32> -> vector<16x28xf32>
    %521 = vector.extract_strided_slice %520 {offsets = [0, 0], sizes = [16, 16], strides = [1, 1]} : vector<16x28xf32> to vector<16x16xf32>
    %522 = vector.extract_strided_slice %520 {offsets = [0, 16], sizes = [16, 4], strides = [1, 1]} : vector<16x28xf32> to vector<16x4xf32>
    %523 = vector.extract_strided_slice %520 {offsets = [0, 20], sizes = [16, 4], strides = [1, 1]} : vector<16x28xf32> to vector<16x4xf32>
    %524 = vector.extract_strided_slice %520 {offsets = [0, 24], sizes = [16, 4], strides = [1, 1]} : vector<16x28xf32> to vector<16x4xf32>
    %525 = vector.shape_cast %513 : vector<16x16xf32> to vector<1x16x16xf32>
    %526 = vector.broadcast %525 : vector<1x16x16xf32> to vector<8x16x16xf32>
    %527 = arith.mulf %526, %130 : vector<8x16x16xf32>
    %cst_69 = arith.constant dense<0.000000e+00> : vector<8x16xf32>
    %528 = vector.multi_reduction <add>, %527, %cst_69 [2] : vector<8x16x16xf32> to vector<8x16xf32>
    %529 = vector.extract_strided_slice %8 {offsets = [0, 48], sizes = [16, 16], strides = [1, 1]} : vector<16x64xf32> to vector<16x16xf32>
    %530 = vector.extract_strided_slice %9 {offsets = [0, 48], sizes = [16, 16], strides = [1, 1]} : vector<16x64xf32> to vector<16x16xf32>
    %531 = vector.extract_strided_slice %10 {offsets = [0, 48], sizes = [16, 16], strides = [1, 1]} : vector<16x64xf32> to vector<16x16xf32>
    %532 = vector.extract_strided_slice %43 {offsets = [0, 12], sizes = [16, 4], strides = [1, 1]} : vector<16x16xf32> to vector<16x4xf32>
    %533 = vector.extract_strided_slice %53 {offsets = [0, 12], sizes = [16, 4], strides = [1, 1]} : vector<16x16xf32> to vector<16x4xf32>
    %534 = vector.extract_strided_slice %63 {offsets = [0, 12], sizes = [16, 4], strides = [1, 1]} : vector<16x16xf32> to vector<16x4xf32>
    %535 = vector.extract_strided_slice %73 {offsets = [0, 12], sizes = [16, 4], strides = [1, 1]} : vector<16x16xf32> to vector<16x4xf32>
    %536 = vector.extract_strided_slice %83 {offsets = [0, 12], sizes = [16, 4], strides = [1, 1]} : vector<16x16xf32> to vector<16x4xf32>
    %537 = vector.extract_strided_slice %93 {offsets = [0, 12], sizes = [16, 4], strides = [1, 1]} : vector<16x16xf32> to vector<16x4xf32>
    %538 = vector.extract_strided_slice %134 {offsets = [0, 3], sizes = [1, 1], strides = [1, 1]} : vector<1x4xf32> to vector<1x1xf32>
    %539 = arith.mulf %532, %532 : vector<16x4xf32>
    %540 = arith.mulf %533, %533 : vector<16x4xf32>
    %541 = arith.addf %539, %540 : vector<16x4xf32>
    %542 = arith.mulf %534, %534 : vector<16x4xf32>
    %543 = arith.addf %541, %542 : vector<16x4xf32>
    %cst_70 = arith.constant dense<0.000000e+00> : vector<16xf32>
    %544 = vector.multi_reduction <add>, %543, %cst_70 [1] : vector<16x4xf32> to vector<16xf32>
    %545 = vector.shape_cast %544 : vector<16xf32> to vector<16x1xf32>
    %546 = arith.mulf %535, %535 : vector<16x4xf32>
    %547 = arith.mulf %536, %536 : vector<16x4xf32>
    %548 = arith.addf %546, %547 : vector<16x4xf32>
    %549 = arith.mulf %537, %537 : vector<16x4xf32>
    %550 = arith.addf %548, %549 : vector<16x4xf32>
    %cst_71 = arith.constant dense<0.000000e+00> : vector<16xf32>
    %551 = vector.multi_reduction <add>, %550, %cst_71 [1] : vector<16x4xf32> to vector<16xf32>
    %552 = vector.shape_cast %551 : vector<16xf32> to vector<16x1xf32>
    %cst_72 = arith.constant 2.500000e-01 : f32
    %553 = vector.broadcast %cst_72 : f32 to vector<16x16xf32>
    %554 = arith.mulf %529, %553 : vector<16x16xf32>
    %cst_73 = arith.constant -2.000000e+00 : f32
    %555 = vector.broadcast %cst_73 : f32 to vector<1x1xf32>
    %556 = arith.mulf %555, %538 : vector<1x1xf32>
    %557 = vector.broadcast %556 : vector<1x1xf32> to vector<16x4xf32>
    %558 = arith.mulf %532, %557 : vector<16x4xf32>
    %cst_74 = arith.constant -2.000000e+00 : f32
    %559 = vector.broadcast %cst_74 : f32 to vector<1x1xf32>
    %560 = arith.mulf %559, %538 : vector<1x1xf32>
    %561 = vector.broadcast %560 : vector<1x1xf32> to vector<16x4xf32>
    %562 = arith.mulf %533, %561 : vector<16x4xf32>
    %cst_75 = arith.constant -2.000000e+00 : f32
    %563 = vector.broadcast %cst_75 : f32 to vector<1x1xf32>
    %564 = arith.mulf %563, %538 : vector<1x1xf32>
    %565 = vector.broadcast %564 : vector<1x1xf32> to vector<16x4xf32>
    %566 = arith.mulf %534, %565 : vector<16x4xf32>
    %567 = vector.broadcast %538 : vector<1x1xf32> to vector<16x1xf32>
    %568 = arith.mulf %545, %567 : vector<16x1xf32>
    %569 = tpu.concatenate %554, %558, %562, %566, %568, %135 in 1 : vector<16x16xf32>, vector<16x4xf32>, vector<16x4xf32>, vector<16x4xf32>, vector<16x1xf32>, vector<16x1xf32> -> vector<16x30xf32>
    %570 = arith.truncf %569 : vector<16x30xf32> to vector<16x30xbf16>
    %571 = vector.broadcast %538 : vector<1x1xf32> to vector<16x1xf32>
    %572 = arith.mulf %552, %571 : vector<16x1xf32>
    %573 = tpu.concatenate %530, %535, %536, %537, %135, %572 in 1 : vector<16x16xf32>, vector<16x4xf32>, vector<16x4xf32>, vector<16x4xf32>, vector<16x1xf32>, vector<16x1xf32> -> vector<16x30xf32>
    %574 = arith.truncf %573 : vector<16x30xf32> to vector<16x30xbf16>
    %cst_76 = arith.constant dense<0.000000e+00> : vector<16x16xf32>
    %575 = tpu.matmul %570, %574, %cst_76 {dimension_numbers = #tpu.dot_dimension_numbers<[1], [1], [0], [0], [0, 0, 1, 0], [], []>} : vector<16x30xbf16>, vector<16x30xbf16>, vector<16x16xf32> -> vector<16x16xf32>
    %cst_77 = arith.constant 0.000000e+00 : f32
    %576 = vector.broadcast %cst_77 : f32 to vector<16x16xf32>
    %577 = vector.extract_strided_slice %132 {offsets = [0, 3], sizes = [1, 1], strides = [1, 1]} : vector<8x4xf32> to vector<1x1xf32>
    %578 = vector.extract_strided_slice %130 {offsets = [0, 0, 0], sizes = [1, 16, 16], strides = [1, 1, 1]} : vector<8x16x16xf32> to vector<1x16x16xf32>
    %579 = vector.shape_cast %578 : vector<1x16x16xf32> to vector<16x16xf32>
    %580 = vector.broadcast %577 : vector<1x1xf32> to vector<16x16xf32>
    %581 = arith.mulf %580, %579 : vector<16x16xf32>
    %582 = arith.addf %576, %581 : vector<16x16xf32>
    %583 = vector.extract_strided_slice %132 {offsets = [1, 3], sizes = [1, 1], strides = [1, 1]} : vector<8x4xf32> to vector<1x1xf32>
    %584 = vector.extract_strided_slice %130 {offsets = [1, 0, 0], sizes = [1, 16, 16], strides = [1, 1, 1]} : vector<8x16x16xf32> to vector<1x16x16xf32>
    %585 = vector.shape_cast %584 : vector<1x16x16xf32> to vector<16x16xf32>
    %586 = vector.broadcast %583 : vector<1x1xf32> to vector<16x16xf32>
    %587 = arith.mulf %586, %585 : vector<16x16xf32>
    %588 = arith.addf %582, %587 : vector<16x16xf32>
    %589 = vector.extract_strided_slice %132 {offsets = [2, 3], sizes = [1, 1], strides = [1, 1]} : vector<8x4xf32> to vector<1x1xf32>
    %590 = vector.extract_strided_slice %130 {offsets = [2, 0, 0], sizes = [1, 16, 16], strides = [1, 1, 1]} : vector<8x16x16xf32> to vector<1x16x16xf32>
    %591 = vector.shape_cast %590 : vector<1x16x16xf32> to vector<16x16xf32>
    %592 = vector.broadcast %589 : vector<1x1xf32> to vector<16x16xf32>
    %593 = arith.mulf %592, %591 : vector<16x16xf32>
    %594 = arith.addf %588, %593 : vector<16x16xf32>
    %595 = vector.extract_strided_slice %132 {offsets = [3, 3], sizes = [1, 1], strides = [1, 1]} : vector<8x4xf32> to vector<1x1xf32>
    %596 = vector.extract_strided_slice %130 {offsets = [3, 0, 0], sizes = [1, 16, 16], strides = [1, 1, 1]} : vector<8x16x16xf32> to vector<1x16x16xf32>
    %597 = vector.shape_cast %596 : vector<1x16x16xf32> to vector<16x16xf32>
    %598 = vector.broadcast %595 : vector<1x1xf32> to vector<16x16xf32>
    %599 = arith.mulf %598, %597 : vector<16x16xf32>
    %600 = arith.addf %594, %599 : vector<16x16xf32>
    %601 = vector.extract_strided_slice %132 {offsets = [4, 3], sizes = [1, 1], strides = [1, 1]} : vector<8x4xf32> to vector<1x1xf32>
    %602 = vector.extract_strided_slice %130 {offsets = [4, 0, 0], sizes = [1, 16, 16], strides = [1, 1, 1]} : vector<8x16x16xf32> to vector<1x16x16xf32>
    %603 = vector.shape_cast %602 : vector<1x16x16xf32> to vector<16x16xf32>
    %604 = vector.broadcast %601 : vector<1x1xf32> to vector<16x16xf32>
    %605 = arith.mulf %604, %603 : vector<16x16xf32>
    %606 = arith.addf %600, %605 : vector<16x16xf32>
    %607 = vector.extract_strided_slice %132 {offsets = [5, 3], sizes = [1, 1], strides = [1, 1]} : vector<8x4xf32> to vector<1x1xf32>
    %608 = vector.extract_strided_slice %130 {offsets = [5, 0, 0], sizes = [1, 16, 16], strides = [1, 1, 1]} : vector<8x16x16xf32> to vector<1x16x16xf32>
    %609 = vector.shape_cast %608 : vector<1x16x16xf32> to vector<16x16xf32>
    %610 = vector.broadcast %607 : vector<1x1xf32> to vector<16x16xf32>
    %611 = arith.mulf %610, %609 : vector<16x16xf32>
    %612 = arith.addf %606, %611 : vector<16x16xf32>
    %613 = vector.extract_strided_slice %132 {offsets = [6, 3], sizes = [1, 1], strides = [1, 1]} : vector<8x4xf32> to vector<1x1xf32>
    %614 = vector.extract_strided_slice %130 {offsets = [6, 0, 0], sizes = [1, 16, 16], strides = [1, 1, 1]} : vector<8x16x16xf32> to vector<1x16x16xf32>
    %615 = vector.shape_cast %614 : vector<1x16x16xf32> to vector<16x16xf32>
    %616 = vector.broadcast %613 : vector<1x1xf32> to vector<16x16xf32>
    %617 = arith.mulf %616, %615 : vector<16x16xf32>
    %618 = arith.addf %612, %617 : vector<16x16xf32>
    %619 = vector.extract_strided_slice %132 {offsets = [7, 3], sizes = [1, 1], strides = [1, 1]} : vector<8x4xf32> to vector<1x1xf32>
    %620 = vector.extract_strided_slice %130 {offsets = [7, 0, 0], sizes = [1, 16, 16], strides = [1, 1, 1]} : vector<8x16x16xf32> to vector<1x16x16xf32>
    %621 = vector.shape_cast %620 : vector<1x16x16xf32> to vector<16x16xf32>
    %622 = vector.broadcast %619 : vector<1x1xf32> to vector<16x16xf32>
    %623 = arith.mulf %622, %621 : vector<16x16xf32>
    %624 = arith.addf %618, %623 : vector<16x16xf32>
    %625 = arith.addf %575, %624 : vector<16x16xf32>
    %cst_78 = arith.constant 0.577350259 : f32
    %626 = vector.broadcast %cst_78 : f32 to vector<16x16xf32>
    %627 = arith.mulf %625, %626 : vector<16x16xf32>
    %cst_79 = arith.constant 5.000000e-01 : f32
    %628 = vector.broadcast %cst_79 : f32 to vector<16x16xf32>
    %629 = arith.cmpf ogt, %127, %628 : vector<16x16xf32>
    %cst_80 = arith.constant 1.000000e+05 : f32
    %630 = vector.broadcast %cst_80 : f32 to vector<16x16xf32>
    %631 = arith.subf %627, %630 : vector<16x16xf32>
    %632 = arith.select %629, %627, %631 : vector<16x16xi1>, vector<16x16xf32>
    %cst_81 = arith.constant dense<0xFF800000> : vector<16xf32>
    %633 = vector.multi_reduction <maximumf>, %632, %cst_81 [1] : vector<16x16xf32> to vector<16xf32>
    %634 = vector.shape_cast %633 : vector<16xf32> to vector<16x1xf32>
    %635 = vector.broadcast %634 : vector<16x1xf32> to vector<16x16xf32>
    %636 = arith.subf %632, %635 : vector<16x16xf32>
    %637 = math.exp %636 : vector<16x16xf32>
    %cst_82 = arith.constant dense<0.000000e+00> : vector<16xf32>
    %638 = vector.multi_reduction <add>, %637, %cst_82 [1] : vector<16x16xf32> to vector<16xf32>
    %639 = vector.shape_cast %638 : vector<16xf32> to vector<16x1xf32>
    %640 = tpu.reciprocal %639 {approx = true} : vector<16x1xf32> -> vector<16x1xf32>
    %641 = vector.broadcast %640 : vector<16x1xf32> to vector<16x16xf32>
    %642 = arith.mulf %637, %641 : vector<16x16xf32>
    %643 = vector.broadcast %125 : vector<16x1xf32> to vector<16x16xf32>
    %644 = arith.mulf %642, %643 : vector<16x16xf32>
    %645 = vector.extract_strided_slice %103 {offsets = [0, 12], sizes = [16, 4], strides = [1, 1]} : vector<16x16xf32> to vector<16x4xf32>
    %646 = vector.extract_strided_slice %113 {offsets = [0, 12], sizes = [16, 4], strides = [1, 1]} : vector<16x16xf32> to vector<16x4xf32>
    %647 = vector.extract_strided_slice %123 {offsets = [0, 12], sizes = [16, 4], strides = [1, 1]} : vector<16x16xf32> to vector<16x4xf32>
    %648 = tpu.concatenate %531, %645, %646, %647 in 1 : vector<16x16xf32>, vector<16x4xf32>, vector<16x4xf32>, vector<16x4xf32> -> vector<16x28xf32>
    %649 = arith.truncf %648 : vector<16x28xf32> to vector<16x28xbf16>
    %650 = arith.truncf %644 : vector<16x16xf32> to vector<16x16xbf16>
    %cst_83 = arith.constant dense<0.000000e+00> : vector<16x28xf32>
    %651 = tpu.matmul %650, %649, %cst_83 {dimension_numbers = #tpu.dot_dimension_numbers<[1], [0], [0], [1], [0, 0, 1, 1], [], []>} : vector<16x16xbf16>, vector<16x28xbf16>, vector<16x28xf32> -> vector<16x28xf32>
    %652 = vector.extract_strided_slice %651 {offsets = [0, 0], sizes = [16, 16], strides = [1, 1]} : vector<16x28xf32> to vector<16x16xf32>
    %653 = vector.extract_strided_slice %651 {offsets = [0, 16], sizes = [16, 4], strides = [1, 1]} : vector<16x28xf32> to vector<16x4xf32>
    %654 = vector.extract_strided_slice %651 {offsets = [0, 20], sizes = [16, 4], strides = [1, 1]} : vector<16x28xf32> to vector<16x4xf32>
    %655 = vector.extract_strided_slice %651 {offsets = [0, 24], sizes = [16, 4], strides = [1, 1]} : vector<16x28xf32> to vector<16x4xf32>
    %656 = vector.shape_cast %644 : vector<16x16xf32> to vector<1x16x16xf32>
    %657 = vector.broadcast %656 : vector<1x16x16xf32> to vector<8x16x16xf32>
    %658 = arith.mulf %657, %130 : vector<8x16x16xf32>
    %cst_84 = arith.constant dense<0.000000e+00> : vector<8x16xf32>
    %659 = vector.multi_reduction <add>, %658, %cst_84 [2] : vector<8x16x16xf32> to vector<8x16xf32>
    %660 = tpu.concatenate %259, %390, %521, %652 in 1 : vector<16x16xf32>, vector<16x16xf32>, vector<16x16xf32>, vector<16x16xf32> -> vector<16x64xf32>
    %661 = tpu.concatenate %266, %397, %528, %659 in 0 : vector<8x16xf32>, vector<8x16xf32>, vector<8x16xf32>, vector<8x16xf32> -> vector<32x16xf32>
    %662 = tpu.transpose %661, [1, 0] : vector<32x16xf32> -> vector<16x32xf32>
    %663 = tpu.concatenate %260, %391, %522, %653 in 1 : vector<16x4xf32>, vector<16x4xf32>, vector<16x4xf32>, vector<16x4xf32> -> vector<16x16xf32>
    %664 = tpu.concatenate %261, %392, %523, %654 in 1 : vector<16x4xf32>, vector<16x4xf32>, vector<16x4xf32>, vector<16x4xf32> -> vector<16x16xf32>
    %665 = tpu.concatenate %262, %393, %524, %655 in 1 : vector<16x4xf32>, vector<16x4xf32>, vector<16x4xf32>, vector<16x4xf32> -> vector<16x16xf32>
    %666 = vector.broadcast %31 : vector<16x1xf32> to vector<16x16xf32>
    %667 = arith.subf %663, %666 : vector<16x16xf32>
    %668 = vector.broadcast %32 : vector<16x1xf32> to vector<16x16xf32>
    %669 = arith.subf %664, %668 : vector<16x16xf32>
    %670 = vector.broadcast %33 : vector<16x1xf32> to vector<16x16xf32>
    %671 = arith.subf %665, %670 : vector<16x16xf32>
    %672 = vector.broadcast %22 : vector<16x1xf32> to vector<16x16xf32>
    %673 = arith.mulf %672, %667 : vector<16x16xf32>
    %674 = vector.broadcast %25 : vector<16x1xf32> to vector<16x16xf32>
    %675 = arith.mulf %674, %669 : vector<16x16xf32>
    %676 = arith.addf %673, %675 : vector<16x16xf32>
    %677 = vector.broadcast %28 : vector<16x1xf32> to vector<16x16xf32>
    %678 = arith.mulf %677, %671 : vector<16x16xf32>
    %679 = arith.addf %676, %678 : vector<16x16xf32>
    %680 = vector.broadcast %23 : vector<16x1xf32> to vector<16x16xf32>
    %681 = arith.mulf %680, %667 : vector<16x16xf32>
    %682 = vector.broadcast %26 : vector<16x1xf32> to vector<16x16xf32>
    %683 = arith.mulf %682, %669 : vector<16x16xf32>
    %684 = arith.addf %681, %683 : vector<16x16xf32>
    %685 = vector.broadcast %29 : vector<16x1xf32> to vector<16x16xf32>
    %686 = arith.mulf %685, %671 : vector<16x16xf32>
    %687 = arith.addf %684, %686 : vector<16x16xf32>
    %688 = vector.broadcast %24 : vector<16x1xf32> to vector<16x16xf32>
    %689 = arith.mulf %688, %667 : vector<16x16xf32>
    %690 = vector.broadcast %27 : vector<16x1xf32> to vector<16x16xf32>
    %691 = arith.mulf %690, %669 : vector<16x16xf32>
    %692 = arith.addf %689, %691 : vector<16x16xf32>
    %693 = vector.broadcast %30 : vector<16x1xf32> to vector<16x16xf32>
    %694 = arith.mulf %693, %671 : vector<16x16xf32>
    %695 = arith.addf %692, %694 : vector<16x16xf32>
    %696 = arith.mulf %679, %679 : vector<16x16xf32>
    %697 = arith.mulf %687, %687 : vector<16x16xf32>
    %698 = arith.addf %696, %697 : vector<16x16xf32>
    %699 = arith.mulf %695, %695 : vector<16x16xf32>
    %700 = arith.addf %698, %699 : vector<16x16xf32>
    %701 = math.sqrt %700 : vector<16x16xf32>
    %cst_85 = arith.constant 9.99999974E-5 : f32
    %702 = vector.broadcast %cst_85 : f32 to vector<16x16xf32>
    %703 = arith.addf %701, %702 : vector<16x16xf32>
    %704 = tpu.reciprocal %703 {approx = true} : vector<16x16xf32> -> vector<16x16xf32>
    %705 = arith.mulf %679, %704 : vector<16x16xf32>
    %706 = arith.mulf %687, %704 : vector<16x16xf32>
    %707 = arith.mulf %695, %704 : vector<16x16xf32>
    %708 = tpu.concatenate %662, %660, %679, %687, %695, %701, %705, %706, %707 in 1 : vector<16x32xf32>, vector<16x64xf32>, vector<16x16xf32>, vector<16x16xf32>, vector<16x16xf32>, vector<16x16xf32>, vector<16x16xf32>, vector<16x16xf32>, vector<16x16xf32> -> vector<16x208xf32>
    %709 = arith.truncf %708 : vector<16x208xf32> to vector<16x208xbf16>
    %c0_86 = arith.constant 0 : index
    %c0_87 = arith.constant 0 : index
    %c0_88 = arith.constant 0 : index
    %710 = vector.load %arg10[%c0_86, %c0_87, %c0_88] : memref<1x208x32xbf16, #tpu.memory_space<vmem>>, vector<1x208x32xbf16>
    %711 = vector.shape_cast %710 : vector<1x208x32xbf16> to vector<208x32xbf16>
    %cst_89 = arith.constant dense<0.000000e+00> : vector<16x32xf32>
    %712 = tpu.matmul %709, %711, %cst_89 {dimension_numbers = #tpu.dot_dimension_numbers<[1], [0], [0], [1], [0, 0, 1, 1], [], []>} : vector<16x208xbf16>, vector<208x32xbf16>, vector<16x32xf32> -> vector<16x32xf32>
    %c0_90 = arith.constant 0 : index
    %c0_91 = arith.constant 0 : index
    %c0_92 = arith.constant 0 : index
    %713 = vector.load %arg11[%c0_90, %c0_91, %c0_92] : memref<1x1x32xf32, #tpu.memory_space<vmem>>, vector<1x1x32xf32>
    %714 = vector.shape_cast %713 : vector<1x1x32xf32> to vector<1x32xf32>
    %715 = vector.broadcast %714 : vector<1x32xf32> to vector<16x32xf32>
    %716 = arith.addf %712, %715 : vector<16x32xf32>
    %717 = vector.broadcast %125 : vector<16x1xf32> to vector<16x32xf32>
    %718 = arith.mulf %716, %717 : vector<16x32xf32>
    %719 = arith.addf %3, %718 : vector<16x32xf32>
    %cst_93 = arith.constant dense<0.000000e+00> : vector<16xf32>
    %720 = vector.multi_reduction <add>, %719, %cst_93 [1] : vector<16x32xf32> to vector<16xf32>
    %721 = vector.shape_cast %720 : vector<16xf32> to vector<16x1xf32>
    %cst_94 = arith.constant 3.200000e+01 : f32
    %722 = vector.broadcast %cst_94 : f32 to vector<16x1xf32>
    %723 = arith.divf %721, %722 : vector<16x1xf32>
    %724 = vector.broadcast %723 : vector<16x1xf32> to vector<16x32xf32>
    %725 = arith.subf %719, %724 : vector<16x32xf32>
    %726 = arith.mulf %725, %725 : vector<16x32xf32>
    %cst_95 = arith.constant dense<0.000000e+00> : vector<16xf32>
    %727 = vector.multi_reduction <add>, %726, %cst_95 [1] : vector<16x32xf32> to vector<16xf32>
    %728 = vector.shape_cast %727 : vector<16xf32> to vector<16x1xf32>
    %cst_96 = arith.constant 3.200000e+01 : f32
    %729 = vector.broadcast %cst_96 : f32 to vector<16x1xf32>
    %730 = arith.divf %728, %729 : vector<16x1xf32>
    %731 = vector.broadcast %723 : vector<16x1xf32> to vector<16x32xf32>
    %732 = arith.subf %719, %731 : vector<16x32xf32>
    %cst_97 = arith.constant 9.99999974E-6 : f32
    %733 = vector.broadcast %cst_97 : f32 to vector<16x1xf32>
    %734 = arith.addf %730, %733 : vector<16x1xf32>
    %735 = math.rsqrt %734 : vector<16x1xf32>
    %736 = vector.broadcast %735 : vector<16x1xf32> to vector<16x32xf32>
    %737 = arith.mulf %732, %736 : vector<16x32xf32>
    %c0_98 = arith.constant 0 : index
    %c0_99 = arith.constant 0 : index
    %c0_100 = arith.constant 0 : index
    %738 = vector.load %arg12[%c0_98, %c0_99, %c0_100] : memref<1x1x32xf32, #tpu.memory_space<vmem>>, vector<1x1x32xf32>
    %739 = vector.shape_cast %738 : vector<1x1x32xf32> to vector<1x32xf32>
    %740 = vector.broadcast %739 : vector<1x32xf32> to vector<16x32xf32>
    %741 = arith.mulf %737, %740 : vector<16x32xf32>
    %c0_101 = arith.constant 0 : index
    %c0_102 = arith.constant 0 : index
    %c0_103 = arith.constant 0 : index
    %742 = vector.load %arg13[%c0_101, %c0_102, %c0_103] : memref<1x1x32xf32, #tpu.memory_space<vmem>>, vector<1x1x32xf32>
    %743 = vector.shape_cast %742 : vector<1x1x32xf32> to vector<1x32xf32>
    %744 = vector.broadcast %743 : vector<1x32xf32> to vector<16x32xf32>
    %745 = arith.addf %741, %744 : vector<16x32xf32>
    %746 = arith.truncf %745 : vector<16x32xf32> to vector<16x32xbf16>
    %c0_104 = arith.constant 0 : index
    %c0_105 = arith.constant 0 : index
    %c0_106 = arith.constant 0 : index
    %747 = vector.load %arg14[%c0_104, %c0_105, %c0_106] : memref<1x32x32xbf16, #tpu.memory_space<vmem>>, vector<1x32x32xbf16>
    %748 = vector.shape_cast %747 : vector<1x32x32xbf16> to vector<32x32xbf16>
    %cst_107 = arith.constant dense<0.000000e+00> : vector<16x32xf32>
    %749 = tpu.matmul %746, %748, %cst_107 {dimension_numbers = #tpu.dot_dimension_numbers<[1], [0], [0], [1], [0, 0, 1, 1], [], []>} : vector<16x32xbf16>, vector<32x32xbf16>, vector<16x32xf32> -> vector<16x32xf32>
    %c0_108 = arith.constant 0 : index
    %c0_109 = arith.constant 0 : index
    %c0_110 = arith.constant 0 : index
    %750 = vector.load %arg15[%c0_108, %c0_109, %c0_110] : memref<1x1x32xf32, #tpu.memory_space<vmem>>, vector<1x1x32xf32>
    %751 = vector.shape_cast %750 : vector<1x1x32xf32> to vector<1x32xf32>
    %752 = vector.broadcast %751 : vector<1x32xf32> to vector<16x32xf32>
    %753 = arith.addf %749, %752 : vector<16x32xf32>
    %cst_111 = arith.constant 0.000000e+00 : f32
    %754 = vector.broadcast %cst_111 : f32 to vector<16x32xf32>
    %755 = arith.maximumf %753, %754 : vector<16x32xf32>
    %756 = arith.truncf %755 : vector<16x32xf32> to vector<16x32xbf16>
    %c0_112 = arith.constant 0 : index
    %c0_113 = arith.constant 0 : index
    %c0_114 = arith.constant 0 : index
    %757 = vector.load %arg16[%c0_112, %c0_113, %c0_114] : memref<1x32x32xbf16, #tpu.memory_space<vmem>>, vector<1x32x32xbf16>
    %758 = vector.shape_cast %757 : vector<1x32x32xbf16> to vector<32x32xbf16>
    %cst_115 = arith.constant dense<0.000000e+00> : vector<16x32xf32>
    %759 = tpu.matmul %756, %758, %cst_115 {dimension_numbers = #tpu.dot_dimension_numbers<[1], [0], [0], [1], [0, 0, 1, 1], [], []>} : vector<16x32xbf16>, vector<32x32xbf16>, vector<16x32xf32> -> vector<16x32xf32>
    %c0_116 = arith.constant 0 : index
    %c0_117 = arith.constant 0 : index
    %c0_118 = arith.constant 0 : index
    %760 = vector.load %arg17[%c0_116, %c0_117, %c0_118] : memref<1x1x32xf32, #tpu.memory_space<vmem>>, vector<1x1x32xf32>
    %761 = vector.shape_cast %760 : vector<1x1x32xf32> to vector<1x32xf32>
    %762 = vector.broadcast %761 : vector<1x32xf32> to vector<16x32xf32>
    %763 = arith.addf %759, %762 : vector<16x32xf32>
    %cst_119 = arith.constant 0.000000e+00 : f32
    %764 = vector.broadcast %cst_119 : f32 to vector<16x32xf32>
    %765 = arith.maximumf %763, %764 : vector<16x32xf32>
    %766 = arith.truncf %765 : vector<16x32xf32> to vector<16x32xbf16>
    %c0_120 = arith.constant 0 : index
    %c0_121 = arith.constant 0 : index
    %c0_122 = arith.constant 0 : index
    %767 = vector.load %arg18[%c0_120, %c0_121, %c0_122] : memref<1x32x32xbf16, #tpu.memory_space<vmem>>, vector<1x32x32xbf16>
    %768 = vector.shape_cast %767 : vector<1x32x32xbf16> to vector<32x32xbf16>
    %cst_123 = arith.constant dense<0.000000e+00> : vector<16x32xf32>
    %769 = tpu.matmul %766, %768, %cst_123 {dimension_numbers = #tpu.dot_dimension_numbers<[1], [0], [0], [1], [0, 0, 1, 1], [], []>} : vector<16x32xbf16>, vector<32x32xbf16>, vector<16x32xf32> -> vector<16x32xf32>
    %c0_124 = arith.constant 0 : index
    %c0_125 = arith.constant 0 : index
    %c0_126 = arith.constant 0 : index
    %770 = vector.load %arg19[%c0_124, %c0_125, %c0_126] : memref<1x1x32xf32, #tpu.memory_space<vmem>>, vector<1x1x32xf32>
    %771 = vector.shape_cast %770 : vector<1x1x32xf32> to vector<1x32xf32>
    %772 = vector.broadcast %771 : vector<1x32xf32> to vector<16x32xf32>
    %773 = arith.addf %769, %772 : vector<16x32xf32>
    %774 = arith.addf %745, %773 : vector<16x32xf32>
    %cst_127 = arith.constant dense<0.000000e+00> : vector<16xf32>
    %775 = vector.multi_reduction <add>, %774, %cst_127 [1] : vector<16x32xf32> to vector<16xf32>
    %776 = vector.shape_cast %775 : vector<16xf32> to vector<16x1xf32>
    %cst_128 = arith.constant 3.200000e+01 : f32
    %777 = vector.broadcast %cst_128 : f32 to vector<16x1xf32>
    %778 = arith.divf %776, %777 : vector<16x1xf32>
    %779 = vector.broadcast %778 : vector<16x1xf32> to vector<16x32xf32>
    %780 = arith.subf %774, %779 : vector<16x32xf32>
    %781 = arith.mulf %780, %780 : vector<16x32xf32>
    %cst_129 = arith.constant dense<0.000000e+00> : vector<16xf32>
    %782 = vector.multi_reduction <add>, %781, %cst_129 [1] : vector<16x32xf32> to vector<16xf32>
    %783 = vector.shape_cast %782 : vector<16xf32> to vector<16x1xf32>
    %cst_130 = arith.constant 3.200000e+01 : f32
    %784 = vector.broadcast %cst_130 : f32 to vector<16x1xf32>
    %785 = arith.divf %783, %784 : vector<16x1xf32>
    %786 = vector.broadcast %778 : vector<16x1xf32> to vector<16x32xf32>
    %787 = arith.subf %774, %786 : vector<16x32xf32>
    %cst_131 = arith.constant 9.99999974E-6 : f32
    %788 = vector.broadcast %cst_131 : f32 to vector<16x1xf32>
    %789 = arith.addf %785, %788 : vector<16x1xf32>
    %790 = math.rsqrt %789 : vector<16x1xf32>
    %791 = vector.broadcast %790 : vector<16x1xf32> to vector<16x32xf32>
    %792 = arith.mulf %787, %791 : vector<16x32xf32>
    %c0_132 = arith.constant 0 : index
    %c0_133 = arith.constant 0 : index
    %c0_134 = arith.constant 0 : index
    %793 = vector.load %arg20[%c0_132, %c0_133, %c0_134] : memref<1x1x32xf32, #tpu.memory_space<vmem>>, vector<1x1x32xf32>
    %794 = vector.shape_cast %793 : vector<1x1x32xf32> to vector<1x32xf32>
    %795 = vector.broadcast %794 : vector<1x32xf32> to vector<16x32xf32>
    %796 = arith.mulf %792, %795 : vector<16x32xf32>
    %c0_135 = arith.constant 0 : index
    %c0_136 = arith.constant 0 : index
    %c0_137 = arith.constant 0 : index
    %797 = vector.load %arg21[%c0_135, %c0_136, %c0_137] : memref<1x1x32xf32, #tpu.memory_space<vmem>>, vector<1x1x32xf32>
    %798 = vector.shape_cast %797 : vector<1x1x32xf32> to vector<1x32xf32>
    %799 = vector.broadcast %798 : vector<1x32xf32> to vector<16x32xf32>
    %800 = arith.addf %796, %799 : vector<16x32xf32>
    %c0_138 = arith.constant 0 : index
    %c0_139 = arith.constant 0 : index
    %801 = vector.load %arg23[%c0_138, %c0_139] : memref<16x32xf32, #tpu.memory_space<vmem>>, vector<16x32xf32>
    tpu.vector_store %arg23[%c0_138, %c0_139], %800 {strides = array<i32>} : memref<16x32xf32, #tpu.memory_space<vmem>>, vector<16x32xf32>,
    %c1_i32 = arith.constant 1 : i32
    %802 = arith.cmpi eq, %arg1, %c1_i32 : i32
    %803 = arith.extui %802 : i1 to i32
    %c0_i32_140 = arith.constant 0 : i32
    %804 = arith.cmpi ne, %803, %c0_i32_140 : i32
    scf.if %804 {
      %c0_141 = arith.constant 0 : index
      %c0_142 = arith.constant 0 : index
      %c0_143 = arith.constant 0 : index
      %805 = vector.load %arg22[%c0_141, %c0_142, %c0_143] : memref<1x16x32xf32, #tpu.memory_space<vmem>>, vector<1x16x32xf32>
      %806 = vector.shape_cast %805 : vector<1x16x32xf32> to vector<16x32xf32>
      %807 = vector.shape_cast %800 : vector<16x32xf32> to vector<1x16x32xf32>
      tpu.vector_store %arg22[%c0_141, %c0_142, %c0_143], %807 {strides = array<i32>} : memref<1x16x32xf32, #tpu.memory_space<vmem>>, vector<1x16x32xf32>,
    } else {
    }
    return
  }
  func.func @transform_0(%arg0: i32, %arg1: i32) -> (i32, i32, i32) {
    %c0_i32 = arith.constant 0 : i32
    %c0_i32_0 = arith.constant 0 : i32
    %c0_i32_1 = arith.constant 0 : i32
    return %arg0, %c0_i32, %c0_i32_0 : i32, i32, i32
  }
  func.func @transform_1(%arg0: i32, %arg1: i32) -> (i32, i32, i32, i32) {
    %c0_i32 = arith.constant 0 : i32
    %c0_i32_0 = arith.constant 0 : i32
    %c0_i32_1 = arith.constant 0 : i32
    %c0_i32_2 = arith.constant 0 : i32
    return %arg0, %c0_i32, %c0_i32_0, %c0_i32_1 : i32, i32, i32, i32
  }
  func.func @transform_2(%arg0: i32, %arg1: i32) -> (i32, i32, i32) {
    %c0_i32 = arith.constant 0 : i32
    %c0_i32_0 = arith.constant 0 : i32
    %c0_i32_1 = arith.constant 0 : i32
    return %arg0, %c0_i32, %c0_i32_0 : i32, i32, i32
  }
  func.func @transform_3(%arg0: i32, %arg1: i32) -> (i32, i32, i32) {
    %c0_i32 = arith.constant 0 : i32
    %c0_i32_0 = arith.constant 0 : i32
    %c0_i32_1 = arith.constant 0 : i32
    return %arg0, %c0_i32, %c0_i32_0 : i32, i32, i32
  }
  func.func @transform_4(%arg0: i32, %arg1: i32) -> (i32, i32, i32) {
    %c0_i32 = arith.constant 0 : i32
    %c0_i32_0 = arith.constant 0 : i32
    %c0_i32_1 = arith.constant 0 : i32
    return %arg0, %c0_i32, %c0_i32_0 : i32, i32, i32
  }
  func.func @transform_5(%arg0: i32, %arg1: i32) -> (i32, i32, i32) {
    %c0_i32 = arith.constant 0 : i32
    %c0_i32_0 = arith.constant 0 : i32
    %c0_i32_1 = arith.constant 0 : i32
    return %arg1, %c0_i32, %c0_i32_0 : i32, i32, i32
  }
  func.func @transform_6(%arg0: i32, %arg1: i32) -> (i32, i32, i32) {
    %c0_i32 = arith.constant 0 : i32
    %c0_i32_0 = arith.constant 0 : i32
    %c0_i32_1 = arith.constant 0 : i32
    return %arg1, %c0_i32, %c0_i32_0 : i32, i32, i32
  }
  func.func @transform_7(%arg0: i32, %arg1: i32) -> (i32, i32, i32) {
    %c0_i32 = arith.constant 0 : i32
    %c0_i32_0 = arith.constant 0 : i32
    %c0_i32_1 = arith.constant 0 : i32
    return %arg1, %c0_i32, %c0_i32_0 : i32, i32, i32
  }
  func.func @transform_8(%arg0: i32, %arg1: i32) -> (i32, i32, i32) {
    %c0_i32 = arith.constant 0 : i32
    %c0_i32_0 = arith.constant 0 : i32
    %c0_i32_1 = arith.constant 0 : i32
    return %arg1, %c0_i32, %c0_i32_0 : i32, i32, i32
  }
  func.func @transform_9(%arg0: i32, %arg1: i32) -> (i32, i32, i32) {
    %c0_i32 = arith.constant 0 : i32
    %c0_i32_0 = arith.constant 0 : i32
    %c0_i32_1 = arith.constant 0 : i32
    return %arg1, %c0_i32, %c0_i32_0 : i32, i32, i32
  }
  func.func @transform_10(%arg0: i32, %arg1: i32) -> (i32, i32, i32) {
    %c0_i32 = arith.constant 0 : i32
    %c0_i32_0 = arith.constant 0 : i32
    %c0_i32_1 = arith.constant 0 : i32
    return %arg1, %c0_i32, %c0_i32_0 : i32, i32, i32
  }
  func.func @transform_11(%arg0: i32, %arg1: i32) -> (i32, i32, i32) {
    %c0_i32 = arith.constant 0 : i32
    %c0_i32_0 = arith.constant 0 : i32
    %c0_i32_1 = arith.constant 0 : i32
    return %arg1, %c0_i32, %c0_i32_0 : i32, i32, i32
  }
  func.func @transform_12(%arg0: i32, %arg1: i32) -> (i32, i32, i32) {
    %c0_i32 = arith.constant 0 : i32
    %c0_i32_0 = arith.constant 0 : i32
    %c0_i32_1 = arith.constant 0 : i32
    return %arg1, %c0_i32, %c0_i32_0 : i32, i32, i32
  }
  func.func @transform_13(%arg0: i32, %arg1: i32) -> (i32, i32, i32) {
    %c0_i32 = arith.constant 0 : i32
    %c0_i32_0 = arith.constant 0 : i32
    %c0_i32_1 = arith.constant 0 : i32
    return %arg1, %c0_i32, %c0_i32_0 : i32, i32, i32
  }
  func.func @transform_14(%arg0: i32, %arg1: i32) -> (i32, i32, i32) {
    %c0_i32 = arith.constant 0 : i32
    %c0_i32_0 = arith.constant 0 : i32
    %c0_i32_1 = arith.constant 0 : i32
    return %arg1, %c0_i32, %c0_i32_0 : i32, i32, i32
  }
  func.func @transform_15(%arg0: i32, %arg1: i32) -> (i32, i32, i32) {
    %c0_i32 = arith.constant 0 : i32
    %c0_i32_0 = arith.constant 0 : i32
    %c0_i32_1 = arith.constant 0 : i32
    return %arg1, %c0_i32, %c0_i32_0 : i32, i32, i32
  }
  func.func @transform_16(%arg0: i32, %arg1: i32) -> (i32, i32, i32) {
    %c0_i32 = arith.constant 0 : i32
    %c0_i32_0 = arith.constant 0 : i32
    %c0_i32_1 = arith.constant 0 : i32
    return %arg1, %c0_i32, %c0_i32_0 : i32, i32, i32
  }
  func.func @transform_17(%arg0: i32, %arg1: i32) -> (i32, i32, i32) {
    %c0_i32 = arith.constant 0 : i32
    %c0_i32_0 = arith.constant 0 : i32
    %c0_i32_1 = arith.constant 0 : i32
    return %arg1, %c0_i32, %c0_i32_0 : i32, i32, i32
  }
  func.func @transform_18(%arg0: i32, %arg1: i32) -> (i32, i32, i32) {
    %c0_i32 = arith.constant 0 : i32
    %c0_i32_0 = arith.constant 0 : i32
    %c0_i32_1 = arith.constant 0 : i32
    return %arg1, %c0_i32, %c0_i32_0 : i32, i32, i32
  }
  func.func @transform_19(%arg0: i32, %arg1: i32) -> (i32, i32, i32) {
    %c0_i32 = arith.constant 0 : i32
    %c0_i32_0 = arith.constant 0 : i32
    %c0_i32_1 = arith.constant 0 : i32
    return %arg1, %c0_i32, %c0_i32_0 : i32, i32, i32
  }
  func.func @transform_20(%arg0: i32, %arg1: i32) -> (i32, i32, i32) {
    %c0_i32 = arith.constant 0 : i32
    %c0_i32_0 = arith.constant 0 : i32
    %c0_i32_1 = arith.constant 0 : i32
    return %arg0, %c0_i32, %c0_i32_0 : i32, i32, i32
  }
}

</mosaic_0001>

<bundles_post_ra>
// kernel: tpu_custom_call.1
= control target key start
LH: loop header
LB: loop body
LE: loop exit
PB: predicated region body
PF: predicated region fallthrough
CT: control target
= control target key end

     0   :  { %s9777_s0 = inlined_call_operand.hbm [shape: f32[2,16,32], index: 0, kind: input, shape index: {}]   ;;  %s9778_s1 = inlined_call_operand.hbm [shape: bf16[2,8,16,16], index: 1, kind: input, shape index: {}]   ;;  %s9779_s2 = inlined_call_operand.hbm [shape: f32[2,16,12], index: 2, kind: input, shape index: {}]   ;;  %s9780_s3 = inlined_call_operand.hbm [shape: f32[2,16,1], index: 3, kind: input, shape index: {}]   ;;  %s9781_s4 = inlined_call_operand.hbm [shape: f32[2,16,16], index: 4, kind: input, shape index: {}]   ;;  %s9782_s5 = inlined_call_operand.hbm [shape: bf16[2,32,336], index: 5, kind: input, shape index: {}]   ;;  %s9783_s6 = inlined_call_operand.hbm [shape: f32[2,8,4], index: 6, kind: input, shape index: {}]   ;;  %s9784_s7 = inlined_call_operand.hbm [shape: f32[2,1,4], index: 7, kind: input, shape index: {}]   ;;  %s9785_s8 = inlined_call_operand.hbm [shape: bf16[2,208,32], index: 8, kind: input, shape index: {}]   ;;  %s9786_s9 = inlined_call_operand.hbm [shape: f32[2,1,32], index: 9, kind: input, shape index: {}]   ;;  %s9787_s10 = inlined_call_operand.hbm [shape: f32[2,1,32], index: 10, kind: input, shape index: {}]   ;;  %s9788_s11 = inlined_call_operand.hbm [shape: f32[2,1,32], index: 11, kind: input, shape index: {}]   ;;  %s9789_s12 = inlined_call_operand.hbm [shape: bf16[2,32,32], index: 12, kind: input, shape index: {}]   ;;  %s9790_s13 = inlined_call_operand.hbm [shape: f32[2,1,32], index: 13, kind: input, shape index: {}]   ;;  %s9791_s14 = inlined_call_operand.hbm [shape: bf16[2,32,32], index: 14, kind: input, shape index: {}]   ;;  %s9792_s15 = inlined_call_operand.hbm [shape: f32[2,1,32], index: 15, kind: input, shape index: {}]   ;;  %s9793_s16 = inlined_call_operand.hbm [shape: bf16[2,32,32], index: 16, kind: input, shape index: {}]   ;;  %s9794_s17 = inlined_call_operand.hbm [shape: f32[2,1,32], index: 17, kind: input, shape index: {}]   ;;  %s9795_s18 = inlined_call_operand.hbm [shape: f32[2,1,32], index: 18, kind: input, shape index: {}]   ;;  %s9796_s19 = inlined_call_operand.hbm [shape: f32[2,1,32], index: 19, kind: input, shape index: {}]   ;;  %s9797_s20 = inlined_call_operand.hbm [shape: f32[2,16,32], index: 20, kind: output, shape index: {}]  }
   0x1   :  { %9908 = sst [smem:[#allocation89_spill]] %s9777_s0 }
   0x2   :  { %9909 = sst [smem:[#allocation90_spill]] %s9778_s1 }
   0x3   :  { %9910 = sst [smem:[#allocation91_spill]] %s9779_s2 }
   0x4   :  { %9911 = sst [smem:[#allocation92_spill]] %s9780_s3 }
   0x5   :  { %9912 = sst [smem:[#allocation93_spill]] %s9781_s4 }
   0x6   :  { %9913 = sst [smem:[#allocation94_spill]] %s9782_s5 }
   0x7   :  { %9914 = sst [smem:[#allocation95_spill]] %s9783_s6 }
   0x8   :  { %9915 = sst [smem:[#allocation96_spill]] %s9784_s7 }
   0x9   :  { %9916 = sst [smem:[#allocation97_spill]] %s9785_s8 }
   0xa   :  { %9917 = sst [smem:[#allocation98_spill]] %s9786_s9 }
   0xb   :  { %9918 = sst [smem:[#allocation99_spill]] %s9788_s11 }
   0xc   :  { %9919 = sst [smem:[#allocation100_spill]] %s9789_s12 }
   0xd   :  { %9920 = sst [smem:[#allocation101_spill]] %s9790_s13 }
   0xe   :  { %9921 = sst [smem:[#allocation102_spill]] %s9791_s14 }
   0xf   :  { %9922 = sst [smem:[#allocation103_spill]] %s9792_s15 }
  0x10   :  { %9923 = sst [smem:[#allocation104_spill]] %s9793_s16 }
  0x11   :  { %9924 = sst [smem:[#allocation105_spill]] %s9795_s18 }
  0x12   :  { %9925 = sst [smem:[#allocation106_spill]] %s9796_s19 }
  0x13   :  { %9926 = sst [smem:[#allocation107_spill]] %s9797_s20 }
  0x14   :  { %25 = vsyncpa [#allocation4], 0 }
  0x15   :  { %27 = vsyncpa [#allocation4 + $0x1], 0 }
  0x16   :  { %28 = vsyncpa [#allocation7], 0 }
  0x17   :  { %30 = vsyncpa [#allocation7 + $0x1], 0 }
  0x18   :  { %31 = vsyncpa [#allocation10], 0 }
  0x19   :  { %33 = vsyncpa [#allocation10 + $0x1], 0 }
  0x1a   :  { %34 = vsyncpa [#allocation13], 0 }
  0x1b   :  { %36 = vsyncpa [#allocation13 + $0x1], 0 }
  0x1c   :  { %37 = vsyncpa [#allocation16], 0 }
  0x1d   :  { %39 = vsyncpa [#allocation16 + $0x1], 0 }
  0x1e   :  { %40 = vsyncpa [#allocation19], 0 }
  0x1f   :  { %42 = vsyncpa [#allocation19 + $0x1], 0 }
  0x20   :  { %43 = vsyncpa [#allocation22], 0 }
  0x21   :  { %45 = vsyncpa [#allocation22 + $0x1], 0 }
  0x22   :  { %46 = vsyncpa [#allocation25], 0 }
  0x23   :  { %48 = vsyncpa [#allocation25 + $0x1], 0 }
  0x24   :  { %49 = vsyncpa [#allocation28], 0 }
  0x25   :  { %51 = vsyncpa [#allocation28 + $0x1], 0 }
  0x26   :  { %52 = vsyncpa [#allocation31], 0 }
  0x27   :  { %54 = vsyncpa [#allocation31 + $0x1], 0 }
  0x28   :  { %55 = vsyncpa [#allocation34], 0 }
  0x29   :  { %57 = vsyncpa [#allocation34 + $0x1], 0 }
  0x2a   :  { %58 = vsyncpa [#allocation5], 0 }
  0x2b   :  { %60 = vsyncpa [#allocation5 + $0x1], 0  ;;  %s7038_s1 = smov 0   ;;  %s7040_s22 = smov 0  }
  0x2c   :  { %s7042_s23 = smov 0   ;;  %s7044_s24 = smov 0  }
  0x2d   :  { %s7046_s2 = smov 0   ;;  %s7048_s25 = smov 0  }
  0x2e   :  { %s7050_s3 = smov 0   ;;  %s7052_s26 = smov 0  }
  0x2f   :  { %s7054_s27 = smov 0   ;;  %s7056_s28 = smov 0  }
  0x30   :  { %s7058_s4 = smov 0  }
  0x31 LB: > { %9927 = sst [smem:[#allocation48_spill]] %s6817_s22  ;;  %s7094_s29 = sadd.s32 4294967295, %s6853_s4   ;;  %s6853_s4 = sphi %s7058_s4, %s66_s4   ;;  %s6849_s28 = sphi %s7056_s28, %s10102_s28   ;;  %s6845_s27 = sphi %s7054_s27, %s10101_s27   ;;  %s6841_s26 = sphi %s7052_s26, %s10097_s26   ;;  %s6837_s3 = sphi %s7050_s3, %s10100_s3   ;;  %s6833_s25 = sphi %s7048_s25, %s10096_s25   ;;  %s6829_s2 = sphi %s7046_s2, %s10095_s2   ;;  %s6825_s24 = sphi %s7044_s24, %s10094_s24   ;;  %s6821_s23 = sphi %s7042_s23, %s10093_s23   ;;  %s6817_s22 = sphi %s7040_s22, %s10092_s22   ;;  %s6813_s1 = sphi %s7038_s1, %s10091_s1  }
  0x32   : > { %9928 = sst [smem:[#allocation49_spill]] %s6821_s23  ;;  %s5178_s30 = sadd.s32 4294967294, %s6853_s4  }
  0x33   : > { %9929 = sst [smem:[#allocation50_spill]] %s6825_s24  ;;  %s75_s0 = sadd.s32 1, %s6845_s27 }
  0x34   : > { %9930 = sst [smem:[#allocation51_spill]] %s6829_s2  ;;  %s78_s21 = sadd.s32 1, %s6849_s28 }
  0x35   : > { %9931 = sst [smem:[#allocation52_spill]] %s6833_s25  ;;  %p76_p0 = scmp.ge.s32.totalorder %s75_s0, 2 }
  0x36   : > { %9932 = sst [smem:[#allocation53_spill]] %s6837_s3  ;;  %s85_s20 = sadd.s32 1, %s6833_s25 }
  0x37   : > { %9933 = sst [smem:[#allocation54_spill]] %s6841_s26  ;;  %p92_p1 = scmp.ne.s32.totalorder %s6833_s25, %s6829_s2 }
  0x38   : > { %9934 = sst [smem:[#allocation55_spill]] %s6849_s28  ;;  %p93_p2 = scmp.eq.s32.totalorder %s6853_s4, 0 }
  0x39   : > { %9935 = sst [smem:[#allocation56_spill]] %s6853_s4  ;;  %s10104_s0 = smov (%p76_p0, %s75_s0), 0 }
  0x3a   : > { %9936 = sst [smem:[#allocation57_spill]] %s7094_s29  ;;  %s10106_s21 = smov (!%p76_p0, %s78_s21), %s6849_s28 }
  0x3b   : > { %9937 = sst [smem:[#allocation58_spill]] %s10104_s0  ;;  %p7111_p3 = por %p93_p2, %p92_p1 }
  0x3c   : > { %p9811_p4 = scmp.ne.s32.totalorder %s6829_s2, %s6825_s24  ;;  %p80_p5 = scmp.ge.s32.totalorder %s10106_s21, 2 }
  0x3d   : > { %s9938_s26 = scalar_select %p7111_p3, 1, 0 }
  0x3e   : > { %p99_p6 = scmp.eq.s32.totalorder %s7094_s29, 0  ;;  %s212_s3 = ssub.s32 %s6845_s27, %s10104_s0 }
  0x3f   : > { %s215_s19 = sadd.s32 1, %s6821_s23  ;;  %s10108_s21 = smov (%p80_p5, %s10106_s21), 0 }
  0x40   : > { %9939 = sst [smem:[#allocation59_spill]] %s10108_s21  ;;  %p7128_p7 = por %p99_p6, %p9811_p4 }
  0x41   : > { %p213_p8 = scmp.eq.s32.totalorder %s212_s3, 0  ;;  %s82_s16 = ssub.s32 %s6849_s28, %s10108_s21 }
  0x42   : > { %s9940_s18 = scalar_select %p7128_p7, 1, 0 }
  0x43   : > { %p222_p9 = scmp.ne.s32.totalorder %s6821_s23, %s6817_s22  ;;  %p83_p10 = scmp.eq.s32.totalorder %s82_s16, 0 }
  0x44   : > { %9941 = sst [smem:[#allocation60_spill]] %s9940_s18  ;;  %p228_p11 = scmp.ne.s32.totalorder %s6817_s22, %s6813_s1 }
  0x45   : > { %s7139_s14 = scalar_select %p213_p8, %s6821_s23, %s215_s19  }
  0x46   : > { %s7142_s0 = scalar_select %p83_p10, %s6833_s25, %s85_s20  }
  0x47   : > { %9942 = sst [smem:[#allocation61_spill]] %s7139_s14  ;;  %p7146_p12 = por %p222_p9, %p93_p2 }
  0x48   : > { %9943 = sst [smem:[#allocation62_spill]] %s7142_s0  ;;  %p7152_p13 = por %p228_p11, %p99_p6 }
  0x49   : > { %p616_p0 = scmp.eq.s32.totalorder %s7094_s29, 3  ;;  %p622_p5 = scmp.eq.s32.totalorder %s5178_s30, 3 }
  0x4a   : > { %s9945_s8 = scalar_select %p7152_p13, 1, 0 }
  0x4b   : > { %p7160_p4 = por %p616_p0, %p92_p1  ;;  %p9949_p8 = scmp.ne.s32.totalorder %s6829_s2, %s6825_s24 }
  0x4c   : > { %9946 = sst [smem:[#allocation63_spill]] %s9945_s8  ;;  %p5180_p2 = scmp.ge.s32.totalorder %s6853_s4, 4 }
  0x4d   : > { %s9947_s16 = scalar_select %p7160_p4, 1, 0 }
  0x4e   : > { %p7167_p10 = por %p622_p5, %p9949_p8  ;;  %638 = sbr.rel (%p5180_p2) target bundleno = 623 (0x26f), region = 16 }
  0x4f   : > { %9948 = sst [smem:[#allocation64_spill]] %s9947_s16  ;;  %s7173_s20 = sand.u32 (!%p5180_p2), 1, %s6833_s25  }
  0x50   : > { %s9950_s19 = scalar_select %p7167_p10, 1, 0 }
  0x51   : > { %s7176_s1 = sand.u32 (!%p5180_p2), 1, %s6853_s4   ;;  %s5184_s3 = sshll.u32 (!%p5180_p2), %s7173_s20, 6 }
  0x52   : > { %9951 = sst [smem:[#allocation65_spill]] %s9950_s19  ;;  %s5292_s30 = sshll.u32 (!%p5180_p2), %s6849_s28, 10 }
  0x53   : > { %s9952_s14 = sld [smem:[#allocation90_spill]] (!%p5180_p2)  ;;  %s667_s24 = scalar_lea.vmem (!%p5180_p2), [#allocation6], %s5184_s3 }
  0x54   : > { %s674_s16 = sshll.u32 (!%p5180_p2), %s667_s24, 4  ;;  %s7188_s25 = sshll.u32 (!%p5180_p2), %s7173_s20, 4  ;;  %s7185_s16 = int_to_ptr.vmem [resolvable:$true] %s674_s16 }
  0x55   : > { %s9836_s8 = scalar_lea.sflag [#allocation7], %s7176_s1 }
  0x59   : > { %s7183_s19 = scalar_lea.hbm %s9952_s14, %s5292_s30  ;;  %s6135_s21 = scalar_lea.hbm %s9952_s14, 2048 }
  0x5a   : > { %s6131_s22 = scalar_lea.hbm %s7183_s19, 1024  ;;  %p6136_p11 = scmp.lt.u32.totalorder %s7183_s19, %s9952_s14 }
  0x5b   : > { %p6132_p1 = scmp.ne.s32.totalorder %s7183_s19, %s6131_s22  ;;  %p6137_p0 = scmp.lt.u32.totalorder %s6135_s21, %s6131_s22 }
  0x5c   : > { %p6139_p8 = scmp.lt.u32.totalorder %s6131_s22, %s7183_s19 }
  0x5d   : > { %p6133_p6 = pnand %p6132_p1, %p7111_p3  ;;  %p6138_p5 = por %p6137_p0, %p6136_p11 }
  0x5f   : > { %p6134_p9 = pneg %p6133_p6  ;;  %p6140_p2 = por %p6139_p8, %p6138_p5 }
  0x61   : > { %p6141_p10 = pnand %p6140_p2, %p6134_p9 }
  0x63   : > { %6144 = shalt.err (!%p6141_p10)
}
  0x64   : > { %s6145_s24 = scalar_lea.vmem %s7185_s16, 1024  ;;  %s6855_s29 = smov [#allocation6]  }
  0x65   : > { %p6146_p1 = scmp.ne.s32.totalorder %s7185_s16, %s6145_s24  ;;  %s6149_s3 = sshll.u32 %s6855_s29, 4  ;;  %s6150_s3 = int_to_ptr.vmem [resolvable:$false] %s6149_s3 }
  0x66   : > { %s6151_s18 = scalar_lea.vmem %s6150_s3, 2048  ;;  %p6152_p13 = scmp.lt.s32.totalorder %s7185_s16, %s6150_s3 }
  0x67   : > { %p6147_p6 = pnand %p6146_p1, %p7111_p3  ;;  %p6153_p7 = scmp.lt.s32.totalorder %s6151_s18, %s6145_s24 }
  0x69   : > { %p6148_p4 = pneg %p6147_p6  ;;  %p6154_p11 = por %p6153_p7, %p6152_p13 }
  0x6b   : > { %p6155_p0 = pnand %p6154_p11, %p6148_p4 }
  0x6d   : > { %6158 = shalt.err (!%p6155_p0)
}
  0x6e   : > { %s9832_s22 = smov 64   ;;  %s9834_s0 = smov 4  }
  0x6f   : > { %5518 = dma.hbm_to_vmem [thread:$0]  (%p7111_p3), %s7183_s19, 1024, %s7185_s16, %s9836_s8, %s9832_s22, %s9832_s22, %s9834_s0  }
  0x70   : > { %s7218_s21 = sshll.u32 %s6849_s28, 8  ;;  %s9953_s29 = sld [smem:[#allocation92_spill]] }
  0x71   : > { %s709_s18 = scalar_lea.vmem [#allocation9], %s7188_s25  ;;  %s7230_s2 = sand.u32 1, %s6821_s23  }
  0x72   : > { %s716_s14 = sshll.u32 %s709_s18, 4  ;;  %s9840_s4 = scalar_lea.sflag [#allocation10], %s7176_s1  ;;  %s7227_s14 = int_to_ptr.vmem [resolvable:$true] %s716_s14 }
  0x76   : > { %s7224_s3 = scalar_lea.hbm %s9953_s29, %s7218_s21  ;;  %s6163_s24 = scalar_lea.hbm %s9953_s29, 512 }
  0x77   : > { %s6159_s16 = scalar_lea.hbm %s7224_s3, 256  ;;  %p6164_p10 = scmp.lt.u32.totalorder %s7224_s3, %s9953_s29 }
  0x78   : > { %p6160_p4 = scmp.ne.s32.totalorder %s7224_s3, %s6159_s16  ;;  %p6165_p9 = scmp.lt.u32.totalorder %s6163_s24, %s6159_s16 }
  0x79   : > { %p6167_p8 = scmp.lt.u32.totalorder %s6159_s16, %s7224_s3 }
  0x7a   : > { %p6161_p7 = pnand %p6160_p4, %p7111_p3  ;;  %p6166_p5 = por %p6165_p9, %p6164_p10 }
  0x7c   : > { %p6162_p13 = pneg %p6161_p7  ;;  %p6168_p2 = por %p6167_p8, %p6166_p5 }
  0x7e   : > { %p6169_p1 = pnand %p6168_p2, %p6162_p13 }
  0x80   : > { %6172 = shalt.err (!%p6169_p1)
}
  0x81   : > { %s6173_s18 = scalar_lea.vmem %s7227_s14, 256  ;;  %s6858_s19 = smov [#allocation9]  }
  0x82   : > { %p6174_p6 = scmp.ne.s32.totalorder %s7227_s14, %s6173_s18  ;;  %s6177_s30 = sshll.u32 %s6858_s19, 4  ;;  %s6178_s30 = int_to_ptr.vmem [resolvable:$false] %s6177_s30 }
  0x83   : > { %s6179_s22 = scalar_lea.vmem %s6178_s30, 512  ;;  %p6180_p4 = scmp.lt.s32.totalorder %s7227_s14, %s6178_s30 }
  0x84   : > { %p6175_p11 = pnand %p6174_p6, %p7111_p3  ;;  %p6181_p7 = scmp.lt.s32.totalorder %s6179_s22, %s6173_s18 }
  0x86   : > { %p6176_p0 = pneg %p6175_p11  ;;  %p6182_p10 = por %p6181_p7, %p6180_p4 }
  0x88   : > { %p6183_p9 = pnand %p6182_p10, %p6176_p0 }
  0x8a   : > { %6186 = shalt.err (!%p6183_p9)
}
  0x8b   : > { %s9841_s0 = smov 128   ;;  %s9851_s16 = smov 8  }
  0x8c   : > { %5520 = dma.hbm_to_vmem [thread:$0]  (%p7111_p3), %s7224_s3, 256, %s7227_s14, %s9840_s4, %s9841_s0, %s9841_s0, %s9851_s16  }
  0x8d   : > { %s5447_s24 = smul.u32 48, %s7230_s2  ;;  %s9954_s5 = sld [smem:[#allocation94_spill]] }
  0x8e   : > { %s5448_s18 = smul.u32 768, %s6845_s27  ;;  %s9843_s28 = scalar_lea.sflag [#allocation13], %s7176_s1 }
  0x8f   : > { %s751_s8 = scalar_lea.vmem [#allocation12], %s5447_s24 }
  0x90   : > { %s758_s29 = sshll.u32 %s751_s8, 4  ;;  %s7266_s29 = int_to_ptr.vmem [resolvable:$true] %s758_s29 }
  0x93   : > { %s7264_s22 = scalar_lea.hbm %s9954_s5, %s5448_s18  ;;  %s6191_s19 = scalar_lea.hbm %s9954_s5, 1536 }
  0x94   : > { %s6187_s23 = scalar_lea.hbm %s7264_s22, 768  ;;  %p6192_p2 = scmp.lt.u32.totalorder %s7264_s22, %s9954_s5 }
  0x95   : > { %p6188_p13 = scmp.ne.s32.totalorder %s7264_s22, %s6187_s23  ;;  %p6193_p1 = scmp.lt.u32.totalorder %s6191_s19, %s6187_s23 }
  0x96   : > { %p6195_p11 = scmp.lt.u32.totalorder %s6187_s23, %s7264_s22 }
  0x97   : > { %p6189_p5 = pnand %p6188_p13, %p7146_p12  ;;  %p6194_p6 = por %p6193_p1, %p6192_p2 }
  0x99   : > { %p6190_p8 = pneg %p6189_p5  ;;  %p6196_p0 = por %p6195_p11, %p6194_p6 }
  0x9b   : > { %p6197_p4 = pnand %p6196_p0, %p6190_p8 }
  0x9d   : > { %6200 = shalt.err (!%p6197_p4)
}
  0x9e   : > { %s6201_s8 = scalar_lea.vmem %s7266_s29, 768  ;;  %s6861_s24 = smov [#allocation12]  }
  0x9f   : > { %p6202_p7 = scmp.ne.s32.totalorder %s7266_s29, %s6201_s8  ;;  %s6205_s14 = sshll.u32 %s6861_s24, 4  ;;  %s6206_s14 = int_to_ptr.vmem [resolvable:$false] %s6205_s14 }
  0xa0   : > { %s6207_s3 = scalar_lea.vmem %s6206_s14, 1536  ;;  %p6208_p13 = scmp.lt.s32.totalorder %s7266_s29, %s6206_s14 }
  0xa1   : > { %p6203_p10 = pnand %p6202_p7, %p7146_p12  ;;  %p6209_p5 = scmp.lt.s32.totalorder %s6207_s3, %s6201_s8 }
  0xa3   : > { %p6204_p9 = pneg %p6203_p10  ;;  %p6210_p2 = por %p6209_p5, %p6208_p13 }
  0xa5   : > { %p6211_p1 = pnand %p6210_p2, %p6204_p9 }
  0xa7   : > { %6214 = shalt.err (!%p6211_p1)
}
  0xa8   : > { %s6862_s23 = smov 192   ;;  %s6863_s19 = smov 12  }
  0xa9   : > { %5522 = dma.hbm_to_vmem [thread:$0]  (%p7146_p12), %s7264_s22, 768, %s7266_s29, %s9843_s28, %s6862_s23, %s6862_s23, %s6863_s19  }
  0xaa   : > { %s7293_s18 = sshll.u32 %s6845_s27, 4  ;;  %s789_s30 = scalar_lea.vmem [#allocation15], %s7230_s2 }
  0xab   : > { %s796_s8 = sshll.u32 %s789_s30, 4  ;;  %s9955_s7 = sld [smem:[#allocation96_spill]]  ;;  %s797_s8 = int_to_ptr.vmem [resolvable:$true] %s796_s8 }
  0xac   : > { %s9846_s4 = scalar_lea.sflag [#allocation16], %s7176_s1 }
  0xb1   : > { %s7300_s3 = scalar_lea.hbm %s9955_s7, %s7293_s18  ;;  %s6219_s23 = scalar_lea.hbm %s9955_s7, 32 }
  0xb2   : > { %s6215_s0 = scalar_lea.hbm %s7300_s3, 16  ;;  %p6220_p0 = scmp.lt.u32.totalorder %s7300_s3, %s9955_s7 }
  0xb3   : > { %p6216_p8 = scmp.ne.s32.totalorder %s7300_s3, %s6215_s0  ;;  %p6221_p4 = scmp.lt.u32.totalorder %s6219_s23, %s6215_s0 }
  0xb4   : > { %p6223_p10 = scmp.lt.u32.totalorder %s6215_s0, %s7300_s3 }
  0xb5   : > { %p6217_p6 = pnand %p6216_p8, %p7146_p12  ;;  %p6222_p7 = por %p6221_p4, %p6220_p0 }
  0xb7   : > { %p6218_p11 = pneg %p6217_p6  ;;  %p6224_p9 = por %p6223_p10, %p6222_p7 }
  0xb9   : > { %p6225_p13 = pnand %p6224_p9, %p6218_p11 }
  0xbb   : > { %6228 = shalt.err (!%p6225_p13)
}
  0xbc   : > { %s6229_s24 = scalar_lea.vmem %s797_s8, 16  ;;  %s6864_s14 = smov [#allocation15]  }
  0xbd   : > { %p6230_p5 = scmp.ne.s32.totalorder %s797_s8, %s6229_s24  ;;  %s6233_s28 = sshll.u32 %s6864_s14, 4  ;;  %s6234_s28 = int_to_ptr.vmem [resolvable:$false] %s6233_s28 }
  0xbe   : > { %s6235_s29 = scalar_lea.vmem %s6234_s28, 32  ;;  %p6236_p8 = scmp.lt.s32.totalorder %s797_s8, %s6234_s28 }
  0xbf   : > { %p6231_p2 = pnand %p6230_p5, %p7146_p12  ;;  %p6237_p6 = scmp.lt.s32.totalorder %s6235_s29, %s6229_s24 }
  0xc1   : > { %p6232_p1 = pneg %p6231_p2  ;;  %p6238_p3 = por %p6237_p6, %p6236_p8 }
  0xc3   : > { %p6239_p0 = pnand %p6238_p3, %p6232_p1 }
  0xc5   : > { %6242 = shalt.err (!%p6239_p0)
}
  0xc6   : > { %5524 = dma.hbm_to_vmem [thread:$0]  (%p7146_p12), %s7300_s3, 16, %s797_s8, %s9846_s4  }
  0xc7   : > { %s9956_s9 = sld [smem:[#allocation98_spill]]  ;;  %s827_s28 = scalar_lea.vmem [#allocation18], %s7230_s2 }
  0xc8   : > { %s834_s19 = sshll.u32 %s827_s28, 4  ;;  %s9847_s30 = scalar_lea.sflag [#allocation19], %s7176_s1  ;;  %s835_s19 = int_to_ptr.vmem [resolvable:$true] %s834_s19 }
  0xcd   : > { %s7326_s23 = scalar_lea.hbm %s9956_s9, %s7293_s18  ;;  %s6247_s3 = scalar_lea.hbm %s9956_s9, 32 }
  0xce   : > { %s6243_s24 = scalar_lea.hbm %s7326_s23, 16  ;;  %p6248_p7 = scmp.lt.u32.totalorder %s7326_s23, %s9956_s9 }
  0xcf   : > { %p6244_p3 = scmp.ne.s32.totalorder %s7326_s23, %s6243_s24  ;;  %p6249_p10 = scmp.lt.u32.totalorder %s6247_s3, %s6243_s24 }
  0xd0   : > { %p6251_p13 = scmp.lt.u32.totalorder %s6243_s24, %s7326_s23 }
  0xd1   : > { %p6245_p11 = pnand %p6244_p3, %p7146_p12  ;;  %p6250_p9 = por %p6249_p10, %p6248_p7 }
  0xd3   : > { %p6246_p4 = pneg %p6245_p11  ;;  %p6252_p5 = por %p6251_p13, %p6250_p9 }
  0xd5   : > { %p6253_p2 = pnand %p6252_p5, %p6246_p4 }
  0xd7   : > { %6256 = shalt.err (!%p6253_p2)
}
  0xd8   : > { %s6257_s22 = scalar_lea.vmem %s835_s19, 16  ;;  %s6865_s28 = smov [#allocation18]  }
  0xd9   : > { %p6258_p1 = scmp.ne.s32.totalorder %s835_s19, %s6257_s22  ;;  %s6261_s4 = sshll.u32 %s6865_s28, 4  ;;  %s6262_s4 = int_to_ptr.vmem [resolvable:$false] %s6261_s4 }
  0xda   : > { %s6263_s14 = scalar_lea.vmem %s6262_s4, 32  ;;  %p6264_p0 = scmp.lt.s32.totalorder %s835_s19, %s6262_s4 }
  0xdb   : > { %p6259_p8 = pnand %p6258_p1, %p7146_p12  ;;  %p6265_p3 = scmp.lt.s32.totalorder %s6263_s14, %s6257_s22 }
  0xdd   : > { %p6260_p6 = pneg %p6259_p8  ;;  %p6266_p11 = por %p6265_p3, %p6264_p0 }
  0xdf   : > { %p6267_p7 = pnand %p6266_p11, %p6260_p6 }
  0xe1   : > { %6270 = shalt.err (!%p6267_p7)
}
  0xe2   : > { %5526 = dma.hbm_to_vmem [thread:$0]  (%p7146_p12), %s7326_s23, 16, %s835_s19, %s9847_s30  }
  0xe3   : > { %s9957_s11 = sld [smem:[#allocation99_spill]]  ;;  %s861_s4 = scalar_lea.vmem [#allocation21], %s7230_s2 }
  0xe4   : > { %s868_s29 = sshll.u32 %s861_s4, 4  ;;  %s9848_s0 = scalar_lea.sflag [#allocation22], %s7176_s1  ;;  %s869_s29 = int_to_ptr.vmem [resolvable:$true] %s868_s29 }
  0xe9   : > { %s7353_s3 = scalar_lea.hbm %s9957_s11, %s7293_s18  ;;  %s6275_s19 = scalar_lea.hbm %s9957_s11, 32 }
  0xea   : > { %s6271_s22 = scalar_lea.hbm %s7353_s3, 16  ;;  %p6276_p13 = scmp.lt.u32.totalorder %s7353_s3, %s9957_s11 }
  0xeb   : > { %p6272_p4 = scmp.ne.s32.totalorder %s7353_s3, %s6271_s22  ;;  %p6277_p5 = scmp.lt.u32.totalorder %s6275_s19, %s6271_s22 }
  0xec   : > { %p6279_p1 = scmp.lt.u32.totalorder %s6271_s22, %s7353_s3 }
  0xed   : > { %p6273_p10 = pnand %p6272_p4, %p7146_p12  ;;  %p6278_p2 = por %p6277_p5, %p6276_p13 }
  0xef   : > { %p6274_p9 = pneg %p6273_p10  ;;  %p6280_p8 = por %p6279_p1, %p6278_p2 }
  0xf1   : > { %p6281_p6 = pnand %p6280_p8, %p6274_p9 }
  0xf3   : > { %6284 = shalt.err (!%p6281_p6)
}
  0xf4   : > { %s6285_s8 = scalar_lea.vmem %s869_s29, 16  ;;  %s6866_s4 = smov [#allocation21]  }
  0xf5   : > { %p6286_p0 = scmp.ne.s32.totalorder %s869_s29, %s6285_s8  ;;  %s6289_s30 = sshll.u32 %s6866_s4, 4  ;;  %s6290_s30 = int_to_ptr.vmem [resolvable:$false] %s6289_s30 }
  0xf6   : > { %s6291_s28 = scalar_lea.vmem %s6290_s30, 32  ;;  %p6292_p7 = scmp.lt.s32.totalorder %s869_s29, %s6290_s30 }
  0xf7   : > { %p6287_p3 = pnand %p6286_p0, %p7146_p12  ;;  %p6293_p4 = scmp.lt.s32.totalorder %s6291_s28, %s6285_s8 }
  0xf9   : > { %p6288_p11 = pneg %p6287_p3  ;;  %p6294_p10 = por %p6293_p4, %p6292_p7 }
  0xfb   : > { %p6295_p5 = pnand %p6294_p10, %p6288_p11 }
  0xfd   : > { %6298 = shalt.err (!%p6295_p5)
}
  0xfe   : > { %5528 = dma.hbm_to_vmem [thread:$0]  (%p7146_p12), %s7353_s3, 16, %s869_s29, %s9848_s0  }
  0xff   : > { %s9958_s13 = sld [smem:[#allocation101_spill]]  ;;  %s899_s30 = scalar_lea.vmem [#allocation24], %s7230_s2 }
 0x100   : > { %s906_s14 = sshll.u32 %s899_s30, 4  ;;  %s9849_s24 = scalar_lea.sflag [#allocation25], %s7176_s1  ;;  %s907_s14 = int_to_ptr.vmem [resolvable:$true] %s906_s14 }
 0x105   : > { %s7380_s19 = scalar_lea.hbm %s9958_s13, %s7293_s18  ;;  %s6303_s29 = scalar_lea.hbm %s9958_s13, 32 }
 0x106   : > { %s6299_s8 = scalar_lea.hbm %s7380_s19, 16  ;;  %p6304_p1 = scmp.lt.u32.totalorder %s7380_s19, %s9958_s13 }
 0x107   : > { %p6300_p9 = scmp.ne.s32.totalorder %s7380_s19, %s6299_s8  ;;  %p6305_p8 = scmp.lt.u32.totalorder %s6303_s29, %s6299_s8 }
 0x108   : > { %p6307_p0 = scmp.lt.u32.totalorder %s6299_s8, %s7380_s19 }
 0x109   : > { %p6301_p13 = pnand %p6300_p9, %p7146_p12  ;;  %p6306_p6 = por %p6305_p8, %p6304_p1 }
 0x10b   : > { %p6302_p2 = pneg %p6301_p13  ;;  %p6308_p3 = por %p6307_p0, %p6306_p6 }
 0x10d   : > { %p6309_p11 = pnand %p6308_p3, %p6302_p2 }
 0x10f   : > { %6312 = shalt.err (!%p6309_p11)
}
 0x110   : > { %s6313_s23 = scalar_lea.vmem %s907_s14, 16  ;;  %s6867_s30 = smov [#allocation24]  }
 0x111   : > { %p6314_p7 = scmp.ne.s32.totalorder %s907_s14, %s6313_s23  ;;  %s6317_s0 = sshll.u32 %s6867_s30, 4  ;;  %s6318_s0 = int_to_ptr.vmem [resolvable:$false] %s6317_s0 }
 0x112   : > { %s6319_s4 = scalar_lea.vmem %s6318_s0, 32  ;;  %p6320_p5 = scmp.lt.s32.totalorder %s907_s14, %s6318_s0 }
 0x113   : > { %p6315_p4 = pnand %p6314_p7, %p7146_p12  ;;  %p6321_p9 = scmp.lt.s32.totalorder %s6319_s4, %s6313_s23 }
 0x115   : > { %p6316_p10 = pneg %p6315_p4  ;;  %p6322_p13 = por %p6321_p9, %p6320_p5 }
 0x117   : > { %p6323_p1 = pnand %p6322_p13, %p6316_p10 }
 0x119   : > { %6326 = shalt.err (!%p6323_p1)
}
 0x11a   : > { %5530 = dma.hbm_to_vmem [thread:$0]  (%p7146_p12), %s7380_s19, 16, %s907_s14, %s9849_s24  }
 0x11b   : > { %s9959_s15 = sld [smem:[#allocation103_spill]]  ;;  %s937_s0 = scalar_lea.vmem [#allocation27], %s7230_s2 }
 0x11c   : > { %s944_s28 = sshll.u32 %s937_s0, 4  ;;  %s9850_s22 = scalar_lea.sflag [#allocation28], %s7176_s1  ;;  %s945_s28 = int_to_ptr.vmem [resolvable:$true] %s944_s28 }
 0x121   : > { %s7407_s29 = scalar_lea.hbm %s9959_s15, %s7293_s18  ;;  %s6331_s14 = scalar_lea.hbm %s9959_s15, 32 }
 0x122   : > { %s6327_s23 = scalar_lea.hbm %s7407_s29, 16  ;;  %p6332_p0 = scmp.lt.u32.totalorder %s7407_s29, %s9959_s15 }
 0x123   : > { %p6328_p2 = scmp.ne.s32.totalorder %s7407_s29, %s6327_s23  ;;  %p6333_p3 = scmp.lt.u32.totalorder %s6331_s14, %s6327_s23 }
 0x124   : > { %p6335_p7 = scmp.lt.u32.totalorder %s6327_s23, %s7407_s29 }
 0x125   : > { %p6329_p8 = pnand %p6328_p2, %p7146_p12  ;;  %p6334_p11 = por %p6333_p3, %p6332_p0 }
 0x127   : > { %p6330_p6 = pneg %p6329_p8  ;;  %p6336_p4 = por %p6335_p7, %p6334_p11 }
 0x129   : > { %p6337_p10 = pnand %p6336_p4, %p6330_p6 }
 0x12b   : > { %6340 = shalt.err (!%p6337_p10)
}
 0x12c   : > { %s6341_s3 = scalar_lea.vmem %s945_s28, 16  ;;  %s6868_s0 = smov [#allocation27]  }
 0x12d   : > { %p6342_p5 = scmp.ne.s32.totalorder %s945_s28, %s6341_s3  ;;  %s6345_s24 = sshll.u32 %s6868_s0, 4  ;;  %s6346_s24 = int_to_ptr.vmem [resolvable:$false] %s6345_s24 }
 0x12e   : > { %s6347_s30 = scalar_lea.vmem %s6346_s24, 32  ;;  %p6348_p1 = scmp.lt.s32.totalorder %s945_s28, %s6346_s24 }
 0x12f   : > { %p6343_p9 = pnand %p6342_p5, %p7146_p12  ;;  %p6349_p2 = scmp.lt.s32.totalorder %s6347_s30, %s6341_s3 }
 0x131   : > { %p6344_p13 = pneg %p6343_p9  ;;  %p6350_p8 = por %p6349_p2, %p6348_p1 }
 0x133   : > { %p6351_p0 = pnand %p6350_p8, %p6344_p13 }
 0x135   : > { %6354 = shalt.err (!%p6351_p0)
}
 0x136   : > { %5532 = dma.hbm_to_vmem [thread:$0]  (%p7146_p12), %s7407_s29, 16, %s945_s28, %s9850_s22  }
 0x137   : > { %s7434_s14 = scalar_lea.hbm %s9794_s17, %s7293_s18  ;;  %s975_s24 = scalar_lea.vmem [#allocation30], %s7230_s2 }
 0x138   : > { %s982_s4 = sshll.u32 %s975_s24, 4  ;;  %s9853_s8 = scalar_lea.sflag [#allocation31], %s7176_s1  ;;  %s983_s4 = int_to_ptr.vmem [resolvable:$true] %s982_s4 }
 0x139   : > { %s6355_s3 = scalar_lea.hbm %s7434_s14, 16  ;;  %s6359_s28 = scalar_lea.hbm %s9794_s17, 32 }
 0x13a   : > { %p6356_p6 = scmp.ne.s32.totalorder %s7434_s14, %s6355_s3  ;;  %p6360_p7 = scmp.lt.u32.totalorder %s7434_s14, %s9794_s17 }
 0x13b   : > { %p6361_p4 = scmp.lt.u32.totalorder %s6359_s28, %s6355_s3  ;;  %p6363_p5 = scmp.lt.u32.totalorder %s6355_s3, %s7434_s14 }
 0x13c   : > { %p6357_p3 = pnand %p6356_p6, %p7146_p12 }
 0x13d   : > { %p6362_p10 = por %p6361_p4, %p6360_p7 }
 0x13e   : > { %p6358_p11 = pneg %p6357_p3 }
 0x13f   : > { %p6364_p9 = por %p6363_p5, %p6362_p10 }
 0x141   : > { %p6365_p13 = pnand %p6364_p9, %p6358_p11 }
 0x143   : > { %6368 = shalt.err (!%p6365_p13)
}
 0x144   : > { %s6369_s19 = scalar_lea.vmem %s983_s4, 16  ;;  %s6869_s24 = smov [#allocation30]  }
 0x145   : > { %p6370_p1 = scmp.ne.s32.totalorder %s983_s4, %s6369_s19  ;;  %s6373_s22 = sshll.u32 %s6869_s24, 4  ;;  %s6374_s22 = int_to_ptr.vmem [resolvable:$false] %s6373_s22 }
 0x146   : > { %s6375_s0 = scalar_lea.vmem %s6374_s22, 32  ;;  %p6376_p0 = scmp.lt.s32.totalorder %s983_s4, %s6374_s22 }
 0x147   : > { %p6371_p2 = pnand %p6370_p1, %p7146_p12  ;;  %p6377_p6 = scmp.lt.s32.totalorder %s6375_s0, %s6369_s19 }
 0x149   : > { %p6372_p8 = pneg %p6371_p2  ;;  %p6378_p3 = por %p6377_p6, %p6376_p0 }
 0x14b   : > { %p6379_p4 = pnand %p6378_p3, %p6372_p8 }
 0x14d   : > { %6382 = shalt.err (!%p6379_p4)
}
 0x14e   : > { %5534 = dma.hbm_to_vmem [thread:$0]  (%p7146_p12), %s7434_s14, 16, %s983_s4, %s9853_s8  }
 0x14f   : > { %s9960_s28 = sld [smem:[#allocation89_spill]]  ;;  %s646_s22 = scalar_lea.vmem [#allocation3], %s7188_s25 }
 0x150   : > { %s653_s19 = sshll.u32 %s646_s22, 4  ;;  %s9962_s16 = sld [smem:[#allocation91_spill]]  ;;  %s7464_s19 = int_to_ptr.vmem [resolvable:$true] %s653_s19 }
 0x151   : > { %s643_s7 = scalar_lea.sflag [#allocation4], %s7173_s20  ;;  %p9963_p7 = scmp.ne.s32.totalorder %s9938_s26, 0 }
 0x155   : > { %s9961_s30 = smov %s9960_s28  ;;  %s7461_s23 = scalar_lea.hbm %s9960_s28, %s7218_s21 }
 0x156   : > { %s7470_s5 = scalar_lea.hbm %s9962_s16, %s7218_s21  ;;  %s6383_s14 = scalar_lea.hbm %s7461_s23, 256 }
 0x157   : > { %p6384_p11 = scmp.ne.s32.totalorder %s7461_s23, %s6383_s14  ;;  %s6387_s29 = scalar_lea.hbm %s9961_s30, 512 }
 0x158   : > { %p6388_p9 = scmp.lt.u32.totalorder %s7461_s23, %s9961_s30  ;;  %p6389_p13 = scmp.lt.u32.totalorder %s6387_s29, %s6383_s14 }
 0x159   : > { %p6385_p10 = pnand %p6384_p11, %p9963_p7  ;;  %p6391_p2 = scmp.lt.u32.totalorder %s6383_s14, %s7461_s23 }
 0x15a   : > { %p6390_p1 = por %p6389_p13, %p6388_p9 }
 0x15b   : > { %p6386_p5 = pneg %p6385_p10 }
 0x15c   : > { %p6392_p8 = por %p6391_p2, %p6390_p1 }
 0x15e   : > { %p6393_p0 = pnand %p6392_p8, %p6386_p5 }
 0x160   : > { %6396 = shalt.err (!%p6393_p0)
}
 0x161   : > { %s6397_s22 = scalar_lea.vmem %s7464_s19, 256  ;;  %s6870_s24 = smov [#allocation3]  }
 0x162   : > { %p6398_p6 = scmp.ne.s32.totalorder %s7464_s19, %s6397_s22  ;;  %s6401_s0 = sshll.u32 %s6870_s24, 4  ;;  %s6402_s0 = int_to_ptr.vmem [resolvable:$false] %s6401_s0 }
 0x163   : > { %s6403_s8 = scalar_lea.vmem %s6402_s0, 512  ;;  %p6404_p11 = scmp.lt.s32.totalorder %s7464_s19, %s6402_s0 }
 0x164   : > { %p6399_p3 = pnand %p6398_p6, %p9963_p7  ;;  %p6405_p10 = scmp.lt.s32.totalorder %s6403_s8, %s6397_s22 }
 0x166   : > { %p6400_p4 = pneg %p6399_p3  ;;  %p6406_p9 = por %p6405_p10, %p6404_p11 }
 0x168   : > { %p6407_p13 = pnand %p6406_p9, %p6400_p4 }
 0x16a   : > { %6410 = shalt.err (!%p6407_p13)
}
 0x16b   : > { %s9964_s14 = smov 8   ;;  %s9965_s4 = smov 128  }
 0x16c   : > { %5517 = dma.hbm_to_vmem [thread:$0]  (%p9963_p7), %s7461_s23, 256, %s7464_s19, %s643_s7, %s9965_s4, %s9965_s4, %s9964_s14  }
 0x16d   : > { %s688_s3 = scalar_lea.vmem [#allocation8], %s7188_s25  ;;  %s9966_s24 = sld [smem:[#allocation93_spill]] }
 0x16e   : > { %s695_s29 = sshll.u32 %s688_s3, 4  ;;  %s6411_s20 = scalar_lea.hbm %s7470_s5, 256  ;;  %s7500_s29 = int_to_ptr.vmem [resolvable:$true] %s695_s29 }
 0x16f   : > { %p6412_p5 = scmp.ne.s32.totalorder %s7470_s5, %s6411_s20  ;;  %s6415_s13 = scalar_lea.hbm %s9962_s16, 512 }
 0x170   : > { %p6416_p8 = scmp.lt.u32.totalorder %s7470_s5, %s9962_s16  ;;  %p6417_p0 = scmp.lt.u32.totalorder %s6415_s13, %s6411_s20 }
 0x171   : > { %p6413_p1 = pnand %p6412_p5, %p9963_p7  ;;  %p6419_p3 = scmp.lt.u32.totalorder %s6411_s20, %s7470_s5 }
 0x172   : > { %p6418_p6 = por %p6417_p0, %p6416_p8 }
 0x173   : > { %s9967_s0 = smov %s9966_s24  ;;  %s7506_s8 = scalar_lea.hbm %s9966_s24, %s7218_s21 }
 0x174   : > { %p6414_p2 = pneg %p6413_p1  ;;  %p6420_p4 = por %p6419_p3, %p6418_p6 }
 0x176   : > { %p6421_p11 = pnand %p6420_p4, %p6414_p2 }
 0x178   : > { %6424 = shalt.err (!%p6421_p11)
}
 0x179   : > { %s6425_s21 = scalar_lea.vmem %s7500_s29, 256  ;;  %s6871_s9 = smov [#allocation8]  }
 0x17a   : > { %p6426_p10 = scmp.ne.s32.totalorder %s7500_s29, %s6425_s21  ;;  %s6429_s11 = sshll.u32 %s6871_s9, 4  ;;  %s6430_s11 = int_to_ptr.vmem [resolvable:$false] %s6429_s11 }
 0x17b   : > { %s6431_s15 = scalar_lea.vmem %s6430_s11, 512  ;;  %p6432_p5 = scmp.lt.s32.totalorder %s7500_s29, %s6430_s11 }
 0x17c   : > { %p6427_p9 = pnand %p6426_p10, %p9963_p7  ;;  %p6433_p1 = scmp.lt.s32.totalorder %s6431_s15, %s6425_s21 }
 0x17e   : > { %p6428_p13 = pneg %p6427_p9  ;;  %p6434_p8 = por %p6433_p1, %p6432_p5 }
 0x180   : > { %p6435_p0 = pnand %p6434_p8, %p6428_p13 }
 0x182   : > { %6438 = shalt.err (!%p6435_p0)
}
 0x183   : > { %s9968_s13 = scalar_lea.sflag [#allocation7], %s7176_s1  ;;  %s730_s23 = scalar_lea.vmem [#allocation11], %s7188_s25 }
 0x184   : > { %5519 = dma.hbm_to_vmem [thread:$0]  (%p9963_p7), %s7470_s5, 256, %s7500_s29, %s9968_s13, %s9965_s4, %s9965_s4, %s9964_s14  }
 0x185   : > { %s737_s19 = sshll.u32 %s730_s23, 4  ;;  %s5197_s3 = sshll.u32 %s7230_s2, 3  ;;  %s7536_s19 = int_to_ptr.vmem [resolvable:$true] %s737_s19 }
 0x186   : > { %s6439_s28 = scalar_lea.hbm %s7506_s8, 256  ;;  %s6443_s20 = scalar_lea.hbm %s9967_s0, 512 }
 0x187   : > { %p6440_p2 = scmp.ne.s32.totalorder %s7506_s8, %s6439_s28  ;;  %p6444_p4 = scmp.lt.u32.totalorder %s7506_s8, %s9967_s0 }
 0x188   : > { %p6445_p11 = scmp.lt.u32.totalorder %s6443_s20, %s6439_s28  ;;  %p6447_p9 = scmp.lt.u32.totalorder %s6439_s28, %s7506_s8 }
 0x189   : > { %p6441_p6 = pnand %p6440_p2, %p9963_p7 }
 0x18a   : > { %p6446_p10 = por %p6445_p11, %p6444_p4 }
 0x18b   : > { %p6442_p3 = pneg %p6441_p6 }
 0x18c   : > { %p6448_p13 = por %p6447_p9, %p6446_p10 }
 0x18e   : > { %p6449_p5 = pnand %p6448_p13, %p6442_p3 }
 0x190   : > { %6452 = shalt.err (!%p6449_p5)
}
 0x191   : > { %s6453_s5 = scalar_lea.vmem %s7536_s19, 256  ;;  %s6872_s25 = smov [#allocation11]  }
 0x192   : > { %p6454_p1 = scmp.ne.s32.totalorder %s7536_s19, %s6453_s5  ;;  %s6457_s29 = sshll.u32 %s6872_s25, 4  ;;  %s6458_s29 = int_to_ptr.vmem [resolvable:$false] %s6457_s29 }
 0x193   : > { %s6459_s9 = scalar_lea.vmem %s6458_s29, 512  ;;  %p6460_p2 = scmp.lt.s32.totalorder %s7536_s19, %s6458_s29 }
 0x194   : > { %p6455_p8 = pnand %p6454_p1, %p9963_p7  ;;  %p6461_p6 = scmp.lt.s32.totalorder %s6459_s9, %s6453_s5 }
 0x196   : > { %p6456_p0 = pneg %p6455_p8  ;;  %p6462_p4 = por %p6461_p6, %p6460_p2 }
 0x198   : > { %p6463_p11 = pnand %p6462_p4, %p6456_p0 }
 0x19a   : > { %6466 = shalt.err (!%p6463_p11)
}
 0x19b   : > { %s9969_s11 = scalar_lea.sflag [#allocation10], %s7176_s1  ;;  %s5198_s15 = sshll.u32 %s6845_s27, 7 }
 0x19c   : > { %5521 = dma.hbm_to_vmem [thread:$0]  (%p9963_p7), %s7506_s8, 256, %s7536_s19, %s9969_s11, %s9965_s4, %s9965_s4, %s9964_s14  }
 0x19d   : > { %s772_s13 = scalar_lea.vmem [#allocation14], %s5197_s3  ;;  %s9970_s6 = sld [smem:[#allocation95_spill]] }
 0x19e   : > { %s779_s23 = sshll.u32 %s772_s13, 4  ;;  %s780_s23 = int_to_ptr.vmem [resolvable:$true] %s779_s23 }
 0x1a3   : > { %s777_s24 = scalar_lea.hbm %s9970_s6, %s5198_s15  ;;  %s6471_s21 = scalar_lea.hbm %s9970_s6, 256 }
 0x1a4   : > { %s6467_s26 = scalar_lea.hbm %s777_s24, 128  ;;  %p6472_p7 = scmp.lt.u32.totalorder %s777_s24, %s9970_s6 }
 0x1a5   : > { %p6468_p3 = scmp.ne.s32.totalorder %s777_s24, %s6467_s26  ;;  %p6473_p13 = scmp.lt.u32.totalorder %s6471_s21, %s6467_s26 }
 0x1a6   : > { %p6475_p1 = scmp.lt.u32.totalorder %s6467_s26, %s777_s24 }
 0x1a7   : > { %p6469_p10 = pnand %p6468_p3, %p7146_p12  ;;  %p6474_p5 = por %p6473_p13, %p6472_p7 }
 0x1a9   : > { %p6470_p9 = pneg %p6469_p10  ;;  %p6476_p8 = por %p6475_p1, %p6474_p5 }
 0x1ab   : > { %p6477_p0 = pnand %p6476_p8, %p6470_p9 }
 0x1ad   : > { %6480 = shalt.err (!%p6477_p0)
}
 0x1ae   : > { %s6481_s4 = scalar_lea.vmem %s780_s23, 128  ;;  %s6873_s8 = smov [#allocation14]  }
 0x1af   : > { %p6482_p2 = scmp.ne.s32.totalorder %s780_s23, %s6481_s4  ;;  %s6485_s19 = sshll.u32 %s6873_s8, 4  ;;  %s6486_s19 = int_to_ptr.vmem [resolvable:$false] %s6485_s19 }
 0x1b0   : > { %s6487_s3 = scalar_lea.vmem %s6486_s19, 256  ;;  %p6488_p11 = scmp.lt.s32.totalorder %s780_s23, %s6486_s19 }
 0x1b1   : > { %p6483_p6 = pnand %p6482_p2, %p7146_p12  ;;  %p6489_p3 = scmp.lt.s32.totalorder %s6487_s3, %s6481_s4 }
 0x1b3   : > { %p6484_p4 = pneg %p6483_p6  ;;  %p6490_p10 = por %p6489_p3, %p6488_p11 }
 0x1b5   : > { %p6491_p7 = pnand %p6490_p10, %p6484_p4 }
 0x1b7   : > { %6494 = shalt.err (!%p6491_p7)
}
 0x1b8   : > { %s9971_s25 = scalar_lea.sflag [#allocation13], %s7176_s1  ;;  %s5449_s29 = smul.u32 104, %s7230_s2 }
 0x1b9   : > { %5523 = dma.hbm_to_vmem [thread:$0]  (%p7146_p12), %s777_s24, 128, %s780_s23, %s9971_s25  }
 0x1ba   : > { %s5450_s9 = smul.u32 1664, %s6845_s27  ;;  %s7590_s13 = scalar_lea.hbm %s9787_s10, %s7293_s18 }
 0x1bb   : > { %s844_s28 = scalar_lea.vmem [#allocation20], %s7230_s2  ;;  %s9972_s7 = sld [smem:[#allocation97_spill]] }
 0x1bc   : > { %s851_s22 = sshll.u32 %s844_s28, 4  ;;  %s807_s5 = scalar_lea.vmem [#allocation17], %s5449_s29  ;;  %s7600_s22 = int_to_ptr.vmem [resolvable:$true] %s851_s22 }
 0x1bd   : > { %s814_s23 = sshll.u32 %s807_s5, 4  ;;  %s7598_s23 = int_to_ptr.vmem [resolvable:$true] %s814_s23 }
 0x1c1   : > { %s7596_s21 = scalar_lea.hbm %s9972_s7, %s5450_s9  ;;  %s6499_s8 = scalar_lea.hbm %s9972_s7, 3328 }
 0x1c2   : > { %s6495_s24 = scalar_lea.hbm %s7596_s21, 1664  ;;  %p6500_p1 = scmp.lt.u32.totalorder %s7596_s21, %s9972_s7 }
 0x1c3   : > { %p6496_p9 = scmp.ne.s32.totalorder %s7596_s21, %s6495_s24  ;;  %p6501_p8 = scmp.lt.u32.totalorder %s6499_s8, %s6495_s24 }
 0x1c4   : > { %p6503_p2 = scmp.lt.u32.totalorder %s6495_s24, %s7596_s21 }
 0x1c5   : > { %p6497_p13 = pnand %p6496_p9, %p7146_p12  ;;  %p6502_p0 = por %p6501_p8, %p6500_p1 }
 0x1c7   : > { %p6498_p5 = pneg %p6497_p13  ;;  %p6504_p6 = por %p6503_p2, %p6502_p0 }
 0x1c9   : > { %p6505_p4 = pnand %p6504_p6, %p6498_p5 }
 0x1cb   : > { %6508 = shalt.err (!%p6505_p4)
}
 0x1cc   : > { %s6509_s25 = scalar_lea.vmem %s7598_s23, 1664  ;;  %s6874_s29 = smov [#allocation17]  }
 0x1cd   : > { %p6510_p11 = scmp.ne.s32.totalorder %s7598_s23, %s6509_s25  ;;  %s6513_s9 = sshll.u32 %s6874_s29, 4  ;;  %s6514_s9 = int_to_ptr.vmem [resolvable:$false] %s6513_s9 }
 0x1ce   : > { %s6515_s11 = scalar_lea.vmem %s6514_s9, 3328  ;;  %p6516_p7 = scmp.lt.s32.totalorder %s7598_s23, %s6514_s9 }
 0x1cf   : > { %p6511_p3 = pnand %p6510_p11, %p7146_p12  ;;  %p6517_p9 = scmp.lt.s32.totalorder %s6515_s11, %s6509_s25 }
 0x1d1   : > { %p6512_p10 = pneg %p6511_p3  ;;  %p6518_p13 = por %p6517_p9, %p6516_p7 }
 0x1d3   : > { %p6519_p1 = pnand %p6518_p13, %p6512_p10 }
 0x1d5   : > { %6522 = shalt.err (!%p6519_p1)
}
 0x1d6   : > { %s9973_s15 = smov 4   ;;  %s9974_s28 = smov 64  }
 0x1d7   : > { %s9975_s26 = scalar_lea.sflag [#allocation16], %s7176_s1  ;;  %s6523_s20 = scalar_lea.hbm %s7590_s13, 16 }
 0x1d8   : > { %5525 = dma.hbm_to_vmem [thread:$0]  (%p7146_p12), %s7596_s21, 1664, %s7598_s23, %s9975_s26, %s9974_s28, %s9974_s28, %s9973_s15  }
 0x1d9   : > { %p6524_p5 = scmp.ne.s32.totalorder %s7590_s13, %s6523_s20  ;;  %s6527_s14 = scalar_lea.hbm %s9787_s10, 32 }
 0x1da   : > { %p6528_p2 = scmp.lt.u32.totalorder %s7590_s13, %s9787_s10  ;;  %p6529_p6 = scmp.lt.u32.totalorder %s6527_s14, %s6523_s20 }
 0x1db   : > { %p6525_p8 = pnand %p6524_p5, %p7146_p12  ;;  %p6531_p11 = scmp.lt.u32.totalorder %s6523_s20, %s7590_s13 }
 0x1dc   : > { %p6530_p4 = por %p6529_p6, %p6528_p2 }
 0x1dd   : > { %p6526_p0 = pneg %p6525_p8 }
 0x1de   : > { %p6532_p3 = por %p6531_p11, %p6530_p4 }
 0x1e0   : > { %p6533_p10 = pnand %p6532_p3, %p6526_p0 }
 0x1e2   : > { %6536 = shalt.err (!%p6533_p10)
}
 0x1e3   : > { %s6537_s21 = scalar_lea.vmem %s7600_s22, 16  ;;  %s6875_s23 = smov [#allocation20]  }
 0x1e4   : > { %p6538_p7 = scmp.ne.s32.totalorder %s7600_s22, %s6537_s21  ;;  %s6541_s19 = sshll.u32 %s6875_s23, 4  ;;  %s6542_s19 = int_to_ptr.vmem [resolvable:$false] %s6541_s19 }
 0x1e5   : > { %s6543_s3 = scalar_lea.vmem %s6542_s19, 32  ;;  %p6544_p1 = scmp.lt.s32.totalorder %s7600_s22, %s6542_s19 }
 0x1e6   : > { %p6539_p9 = pnand %p6538_p7, %p7146_p12  ;;  %p6545_p5 = scmp.lt.s32.totalorder %s6543_s3, %s6537_s21 }
 0x1e8   : > { %p6540_p13 = pneg %p6539_p9  ;;  %p6546_p8 = por %p6545_p5, %p6544_p1 }
 0x1ea   : > { %p6547_p2 = pnand %p6546_p8, %p6540_p13 }
 0x1ec   : > { %6550 = shalt.err (!%p6547_p2)
}
 0x1ed   : > { %s9976_s25 = scalar_lea.sflag [#allocation19], %s7176_s1  ;;  %s7652_s29 = sshll.u32 %s7230_s2, 4 }
 0x1ee   : > { %5527 = dma.hbm_to_vmem [thread:$0]  (%p7146_p12), %s7590_s13, 16, %s7600_s22, %s9976_s25  }
 0x1ef   : > { %s7655_s9 = sshll.u32 %s6845_s27, 8  ;;  %s9977_s20 = sld [smem:[#allocation100_spill]] }
 0x1f0   : > { %s879_s24 = scalar_lea.vmem [#allocation23], %s7652_s29  ;;  %s9978_s4 = sld [smem:[#allocation102_spill]] }
 0x1f1   : > { %s886_s14 = sshll.u32 %s879_s24, 4  ;;  %s7664_s14 = int_to_ptr.vmem [resolvable:$true] %s886_s14 }
 0x1f5   : > { %s7661_s5 = scalar_lea.hbm %s9977_s20, %s7655_s9  ;;  %s6555_s25 = scalar_lea.hbm %s9977_s20, 512 }
 0x1f6   : > { %s9979_s8 = smov %s9978_s4  ;;  %s7670_s21 = scalar_lea.hbm %s9978_s4, %s7655_s9 }
 0x1f7   : > { %s6551_s23 = scalar_lea.hbm %s7661_s5, 256  ;;  %p6556_p11 = scmp.lt.u32.totalorder %s7661_s5, %s9977_s20 }
 0x1f8   : > { %p6552_p0 = scmp.ne.s32.totalorder %s7661_s5, %s6551_s23  ;;  %p6557_p3 = scmp.lt.u32.totalorder %s6555_s25, %s6551_s23 }
 0x1f9   : > { %p6559_p7 = scmp.lt.u32.totalorder %s6551_s23, %s7661_s5 }
 0x1fa   : > { %p6553_p6 = pnand %p6552_p0, %p7146_p12  ;;  %p6558_p10 = por %p6557_p3, %p6556_p11 }
 0x1fc   : > { %p6554_p4 = pneg %p6553_p6  ;;  %p6560_p9 = por %p6559_p7, %p6558_p10 }
 0x1fe   : > { %p6561_p13 = pnand %p6560_p9, %p6554_p4 }
 0x200   : > { %6564 = shalt.err (!%p6561_p13)
}
 0x201   : > { %s6565_s24 = scalar_lea.vmem %s7664_s14, 256  ;;  %s6876_s13 = smov [#allocation23]  }
 0x202   : > { %p6566_p1 = scmp.ne.s32.totalorder %s7664_s14, %s6565_s24  ;;  %s6569_s22 = sshll.u32 %s6876_s13, 4  ;;  %s6570_s22 = int_to_ptr.vmem [resolvable:$false] %s6569_s22 }
 0x203   : > { %s6571_s4 = scalar_lea.vmem %s6570_s22, 512  ;;  %p6572_p2 = scmp.lt.s32.totalorder %s7664_s14, %s6570_s22 }
 0x204   : > { %p6567_p5 = pnand %p6566_p1, %p7146_p12  ;;  %p6573_p0 = scmp.lt.s32.totalorder %s6571_s4, %s6565_s24 }
 0x206   : > { %p6568_p8 = pneg %p6567_p5  ;;  %p6574_p6 = por %p6573_p0, %p6572_p2 }
 0x208   : > { %p6575_p11 = pnand %p6574_p6, %p6568_p8 }
 0x20a   : > { %6578 = shalt.err (!%p6575_p11)
}
 0x20b   : > { %s9980_s23 = scalar_lea.sflag [#allocation22], %s7176_s1  ;;  %s917_s19 = scalar_lea.vmem [#allocation26], %s7652_s29 }
 0x20c   : > { %5529 = dma.hbm_to_vmem [thread:$0]  (%p7146_p12), %s7661_s5, 256, %s7664_s14, %s9980_s23, %s9974_s28, %s9974_s28, %s9973_s15  }
 0x20d   : > { %s924_s3 = sshll.u32 %s917_s19, 4  ;;  %s9981_s26 = sld [smem:[#allocation104_spill]]  ;;  %s7699_s3 = int_to_ptr.vmem [resolvable:$true] %s924_s3 }
 0x20e   : > { %s6579_s22 = scalar_lea.hbm %s7670_s21, 256  ;;  %s6583_s6 = scalar_lea.hbm %s9979_s8, 512 }
 0x20f   : > { %p6580_p4 = scmp.ne.s32.totalorder %s7670_s21, %s6579_s22  ;;  %p6584_p7 = scmp.lt.u32.totalorder %s7670_s21, %s9979_s8 }
 0x210   : > { %p6585_p9 = scmp.lt.u32.totalorder %s6583_s6, %s6579_s22  ;;  %p6587_p1 = scmp.lt.u32.totalorder %s6579_s22, %s7670_s21 }
 0x211   : > { %p6581_p3 = pnand %p6580_p4, %p7146_p12 }
 0x212   : > { %p6586_p13 = por %p6585_p9, %p6584_p7 }
 0x213   : > { %s9982_s13 = smov %s9981_s26  ;;  %s7705_s24 = scalar_lea.hbm %s9981_s26, %s7655_s9 }
 0x214   : > { %p6582_p10 = pneg %p6581_p3  ;;  %p6588_p5 = por %p6587_p1, %p6586_p13 }
 0x216   : > { %p6589_p8 = pnand %p6588_p5, %p6582_p10 }
 0x218   : > { %6592 = shalt.err (!%p6589_p8)
}
 0x219   : > { %s6593_s9 = scalar_lea.vmem %s7699_s3, 256  ;;  %s6877_s0 = smov [#allocation26]  }
 0x21a   : > { %p6594_p2 = scmp.ne.s32.totalorder %s7699_s3, %s6593_s9  ;;  %s6597_s14 = sshll.u32 %s6877_s0, 4  ;;  %s6598_s14 = int_to_ptr.vmem [resolvable:$false] %s6597_s14 }
 0x21b   : > { %s6599_s7 = scalar_lea.vmem %s6598_s14, 512  ;;  %p6600_p11 = scmp.lt.s32.totalorder %s7699_s3, %s6598_s14 }
 0x21c   : > { %p6595_p0 = pnand %p6594_p2, %p7146_p12  ;;  %p6601_p4 = scmp.lt.s32.totalorder %s6599_s7, %s6593_s9 }
 0x21e   : > { %p6596_p6 = pneg %p6595_p0  ;;  %p6602_p3 = por %p6601_p4, %p6600_p11 }
 0x220   : > { %p6603_p7 = pnand %p6602_p3, %p6596_p6 }
 0x222   : > { %6606 = shalt.err (!%p6603_p7)
}
 0x223   : > { %s9983_s6 = scalar_lea.sflag [#allocation25], %s7176_s1  ;;  %s955_s23 = scalar_lea.vmem [#allocation29], %s7652_s29 }
 0x224   : > { %5531 = dma.hbm_to_vmem [thread:$0]  (%p7146_p12), %s7670_s21, 256, %s7699_s3, %s9983_s6, %s9974_s28, %s9974_s28, %s9973_s15  }
 0x225   : > { %s962_s19 = sshll.u32 %s955_s23, 4  ;;  %s9984_s26 = sld [smem:[#allocation105_spill]]  ;;  %s7734_s19 = int_to_ptr.vmem [resolvable:$true] %s962_s19 }
 0x226   : > { %s6607_s4 = scalar_lea.hbm %s7705_s24, 256  ;;  %s6611_s14 = scalar_lea.hbm %s9982_s13, 512 }
 0x227   : > { %p6608_p10 = scmp.ne.s32.totalorder %s7705_s24, %s6607_s4  ;;  %p6612_p1 = scmp.lt.u32.totalorder %s7705_s24, %s9982_s13 }
 0x228   : > { %p6613_p5 = scmp.lt.u32.totalorder %s6611_s14, %s6607_s4  ;;  %p6615_p2 = scmp.lt.u32.totalorder %s6607_s4, %s7705_s24 }
 0x229   : > { %p6609_p9 = pnand %p6608_p10, %p7146_p12 }
 0x22a   : > { %p6614_p8 = por %p6613_p5, %p6612_p1 }
 0x22b   : > { %s9985_s5 = smov %s9984_s26  ;;  %s7740_s22 = scalar_lea.hbm %s9984_s26, %s7293_s18 }
 0x22c   : > { %p6610_p13 = pneg %p6609_p9  ;;  %p6616_p0 = por %p6615_p2, %p6614_p8 }
 0x22e   : > { %p6617_p6 = pnand %p6616_p0, %p6610_p13 }
 0x230   : > { %6620 = shalt.err (!%p6617_p6)
}
 0x231   : > { %s6621_s29 = scalar_lea.vmem %s7734_s19, 256  ;;  %s6878_s3 = smov [#allocation29]  }
 0x232   : > { %p6622_p11 = scmp.ne.s32.totalorder %s7734_s19, %s6621_s29  ;;  %s6625_s6 = sshll.u32 %s6878_s3, 4  ;;  %s6626_s6 = int_to_ptr.vmem [resolvable:$false] %s6625_s6 }
 0x233   : > { %s6627_s23 = scalar_lea.vmem %s6626_s6, 512  ;;  %p6628_p7 = scmp.lt.s32.totalorder %s7734_s19, %s6626_s6 }
 0x234   : > { %p6623_p4 = pnand %p6622_p11, %p7146_p12  ;;  %p6629_p10 = scmp.lt.s32.totalorder %s6627_s23, %s6621_s29 }
 0x236   : > { %p6624_p3 = pneg %p6623_p4  ;;  %p6630_p9 = por %p6629_p10, %p6628_p7 }
 0x238   : > { %p6631_p1 = pnand %p6630_p9, %p6624_p3 }
 0x23a   : > { %6634 = shalt.err (!%p6631_p1)
}
 0x23b   : > { %s9986_s25 = scalar_lea.sflag [#allocation28], %s7176_s1  ;;  %s992_s11 = scalar_lea.vmem [#allocation32], %s7230_s2 }
 0x23c   : > { %5533 = dma.hbm_to_vmem [thread:$0]  (%p7146_p12), %s7705_s24, 256, %s7734_s19, %s9986_s25, %s9974_s28, %s9974_s28, %s9973_s15  }
 0x23d   : > { %s999_s26 = sshll.u32 %s992_s11, 4  ;;  %s6635_s4 = scalar_lea.hbm %s7740_s22, 16  ;;  %s1000_s26 = int_to_ptr.vmem [resolvable:$true] %s999_s26 }
 0x23e   : > { %p6636_p13 = scmp.ne.s32.totalorder %s7740_s22, %s6635_s4  ;;  %s6639_s14 = scalar_lea.hbm %s9985_s5, 32 }
 0x23f   : > { %p6640_p2 = scmp.lt.u32.totalorder %s7740_s22, %s9985_s5  ;;  %p6641_p0 = scmp.lt.u32.totalorder %s6639_s14, %s6635_s4 }
 0x240   : > { %p6637_p5 = pnand %p6636_p13, %p7146_p12  ;;  %p6643_p11 = scmp.lt.u32.totalorder %s6635_s4, %s7740_s22 }
 0x241   : > { %p6642_p6 = por %p6641_p0, %p6640_p2 }
 0x242   : > { %p6638_p8 = pneg %p6637_p5 }
 0x243   : > { %p6644_p4 = por %p6643_p11, %p6642_p6 }
 0x245   : > { %p6645_p3 = pnand %p6644_p4, %p6638_p8 }
 0x247   : > { %6648 = shalt.err (!%p6645_p3)
}
 0x248   : > { %s6649_s15 = scalar_lea.vmem %s1000_s26, 16  ;;  %s6879_s28 = smov [#allocation32]  }
 0x249   : > { %p6650_p7 = scmp.ne.s32.totalorder %s1000_s26, %s6649_s15  ;;  %s6653_s24 = sshll.u32 %s6879_s28, 4  ;;  %s6654_s24 = int_to_ptr.vmem [resolvable:$false] %s6653_s24 }
 0x24a   : > { %s6655_s19 = scalar_lea.vmem %s6654_s24, 32  ;;  %p6656_p1 = scmp.lt.s32.totalorder %s1000_s26, %s6654_s24 }
 0x24b   : > { %p6651_p10 = pnand %p6650_p7, %p7146_p12  ;;  %p6657_p13 = scmp.lt.s32.totalorder %s6655_s19, %s6649_s15 }
 0x24d   : > { %p6652_p9 = pneg %p6651_p10  ;;  %p6658_p5 = por %p6657_p13, %p6656_p1 }
 0x24f   : > { %p6659_p0 = pnand %p6658_p5, %p6652_p9 }
 0x251   : > { %6662 = shalt.err (!%p6659_p0)
}
 0x252   : > { %s9987_s29 = scalar_lea.sflag [#allocation31], %s7176_s1  ;;  %s9988_s23 = sld [smem:[#allocation106_spill]] }
 0x253   : > { %5535 = dma.hbm_to_vmem [thread:$0]  (%p7146_p12), %s7740_s22, 16, %s1000_s26, %s9987_s29  }
 0x254   : > { %s1009_s4 = scalar_lea.vmem [#allocation33], %s7230_s2  ;;  %s1007_s0 = scalar_lea.sflag [#allocation34], %s7230_s2 }
 0x255   : > { %s1016_s9 = sshll.u32 %s1009_s4, 4  ;;  %s1017_s9 = int_to_ptr.vmem [resolvable:$true] %s1016_s9 }
 0x258   : > { %s9989_s11 = smov %s9988_s23  ;;  %s7792_s25 = scalar_lea.hbm %s9988_s23, %s7293_s18 }
 0x259   : > { %s6663_s1 = scalar_lea.hbm %s7792_s25, 16  ;;  %s6667_s26 = scalar_lea.hbm %s9989_s11, 32 }
 0x25a   : > { %p6664_p8 = scmp.ne.s32.totalorder %s7792_s25, %s6663_s1  ;;  %p6668_p11 = scmp.lt.u32.totalorder %s7792_s25, %s9989_s11 }
 0x25b   : > { %p6669_p4 = scmp.lt.u32.totalorder %s6667_s26, %s6663_s1  ;;  %p6671_p7 = scmp.lt.u32.totalorder %s6663_s1, %s7792_s25 }
 0x25c   : > { %p6665_p2 = pnand %p6664_p8, %p7146_p12 }
 0x25d   : > { %p6670_p3 = por %p6669_p4, %p6668_p11 }
 0x25e   : > { %p6666_p6 = pneg %p6665_p2 }
 0x25f   : > { %p6672_p10 = por %p6671_p7, %p6670_p3 }
 0x261   : > { %p6673_p9 = pnand %p6672_p10, %p6666_p6 }
 0x263   : > { %6676 = shalt.err (!%p6673_p9)
}
 0x264   : > { %s6677_s2 = scalar_lea.vmem %s1017_s9, 16  ;;  %s6880_s21 = smov [#allocation33]  }
 0x265   : > { %p6678_p1 = scmp.ne.s32.totalorder %s1017_s9, %s6677_s2  ;;  %s6681_s15 = sshll.u32 %s6880_s21, 4  ;;  %s6682_s15 = int_to_ptr.vmem [resolvable:$false] %s6681_s15 }
 0x266   : > { %s6683_s28 = scalar_lea.vmem %s6682_s15, 32  ;;  %p6684_p0 = scmp.lt.s32.totalorder %s1017_s9, %s6682_s15 }
 0x267   : > { %p6679_p13 = pnand %p6678_p1, %p7146_p12  ;;  %p6685_p8 = scmp.lt.s32.totalorder %s6683_s28, %s6677_s2 }
 0x269   : > { %p6680_p5 = pneg %p6679_p13  ;;  %p6686_p2 = por %p6685_p8, %p6684_p0 }
 0x26b   : > { %p6687_p4 = pnand %p6686_p2, %p6680_p5 }
 0x26d   : > { %6690 = shalt.err (!%p6687_p4)
}
 0x26e   : > { %5536 = dma.hbm_to_vmem [thread:$0]  (%p7146_p12), %s7792_s25, 16, %s1017_s9, %s1007_s0  }
 0x26f PF: > { %s9990_s24 = sld [smem:[#allocation56_spill]] }
 0x275   : > { %p5218_p6 = scmp.ge.s32.totalorder %s9990_s24, 1  ;;  %p1021_p11 = scmp.lt.s32.totalorder %s9990_s24, 5 }
 0x277   : > { %p1022_p3 = pnand %p5218_p6, %p1021_p11 }
 0x279   : > { %1025 = sbr.rel (%p1022_p3) target bundleno = 4355 (0x1103), region = 100 }
 0x280   : > { %s9991_s19 = sld [smem:[#allocation51_spill]]  ;;  %s9992_s29 = sld [smem:[#allocation60_spill]] }
 0x286   : > { %s7816_s3 = sand.u32 1, %s9991_s19   ;;  %p9993_p7 = scmp.ne.s32.totalorder %s9992_s29, 0 }
 0x287   : > { %s7819_s6 = sshll.u32 %s7816_s3, 4  ;;  %s1028_s23 = scalar_lea.sflag [#allocation4], %s7816_s3 }
 0x288   : > { %s1031_s12 = scalar_lea.vmem [#allocation3], %s7819_s6 }
 0x289   : > { %6764 = dma.done.wait (%p9993_p7), %s1028_s23, 256  }
 0x28a   : > { %6766 = vsyncadd (%p9993_p7), %s1028_s23, 4294967040  ;;  %s9994_s25 = sld [smem:[#allocation57_spill]]  ;;  %s5220_s9 = sshll.u32 %s7816_s3, 6 }
 0x28b   : > { %s7832_s1 = scalar_lea.vmem [#allocation6], %s5220_s9 }
 0x290   : > { %s7828_s4 = sand.u32 1, %s9994_s25  }
 0x291   : > { %s1037_s0 = scalar_lea.sflag [#allocation7], %s7828_s4 }
 0x292   : > { %6768 = dma.done.wait (%p9993_p7), %s1037_s0, 1280  }
 0x293   : > { %6770 = vsyncadd (%p9993_p7), %s1037_s0, 4294966016  ;;  %s1049_s14 = scalar_lea.vmem [#allocation8], %s7819_s6  ;;  %s1055_s22 = scalar_lea.sflag [#allocation10], %s7828_s4 }
 0x294   : > { %s1058_s26 = scalar_lea.vmem [#allocation9], %s7819_s6 }
 0x295   : > { %6772 = dma.done.wait (%p9993_p7), %s1055_s22, 512  }
 0x296   : > { %6774 = vsyncadd (%p9993_p7), %s1055_s22, 4294966784  ;;  %s9995_s7 = sld [smem:[#allocation48_spill]]  ;;  %s9996_s18 = sld [smem:[#allocation63_spill]] }
 0x297   : > { %s1073_s28 = scalar_lea.sflag [#allocation13], %s7828_s4 }
 0x29c   : > { %s7846_s2 = sand.u32 1, %s9995_s7   ;;  %p9997_p12 = scmp.ne.s32.totalorder %s9996_s18, 0 }
 0x29d   : > { %s5451_s21 = smul.u32 48, %s7846_s2 }
 0x29f   : > { %s7851_s24 = scalar_lea.vmem [#allocation12], %s5451_s21 }
 0x2a0   : > { %6776 = dma.done.wait (%p9997_p12), %s1073_s28, 896  }
 0x2a1   : > { %6778 = vsyncadd (%p9997_p12), %s1073_s28, 4294966400  ;;  %s5224_s19 = sshll.u32 %s7846_s2, 3  ;;  %s1091_s23 = scalar_lea.sflag [#allocation16], %s7828_s4 }
 0x2a2   : > { %s7858_s29 = scalar_lea.vmem [#allocation14], %s5224_s19  ;;  %s1093_s25 = scalar_lea.vmem [#allocation15], %s7846_s2 }
 0x2a3   : > { %6780 = dma.done.wait (%p9997_p12), %s1091_s23, 1680  }
 0x2a4   : > { %6782 = vsyncadd (%p9997_p12), %s1091_s23, 4294965616  ;;  %s5452_s9 = smul.u32 104, %s7846_s2  ;;  %s1108_s22 = scalar_lea.sflag [#allocation19], %s7828_s4 }
 0x2a6   : > { %s7867_s0 = scalar_lea.vmem [#allocation17], %s5452_s9 }
 0x2a7   : > { %6784 = dma.done.wait (%p9997_p12), %s1108_s22, 32  }
 0x2a8   : > { %6786 = vsyncadd (%p9997_p12), %s1108_s22, 4294967264  ;;  %s1124_s28 = scalar_lea.sflag [#allocation22], %s7828_s4 }
 0x2a9   : > { %6788 = dma.done.wait (%p9997_p12), %s1124_s28, 272  }
 0x2aa   : > { %6790 = vsyncadd (%p9997_p12), %s1124_s28, 4294967024  ;;  %s7883_s23 = sshll.u32 %s7846_s2, 4  ;;  %s1141_s22 = scalar_lea.sflag [#allocation25], %s7828_s4 }
 0x2ab   : > { %6792 = dma.done.wait (%p9997_p12), %s1141_s22, 272  }
 0x2ac   : > { %6794 = vsyncadd (%p9997_p12), %s1141_s22, 4294967024  ;;  %s1158_s19 = scalar_lea.sflag [#allocation28], %s7828_s4 }
 0x2ad   : > { %6796 = dma.done.wait (%p9997_p12), %s1158_s19, 272  }
 0x2ae   : > { %6798 = vsyncadd (%p9997_p12), %s1158_s19, 4294967024  ;;  %s1175_s9 = scalar_lea.sflag [#allocation31], %s7828_s4 }
 0x2af   : > { %6800 = dma.done.wait (%p9997_p12), %s1175_s9, 32  }
 0x2b0   : > { %6802 = vsyncadd (%p9997_p12), %s1175_s9, 4294967264  ;;  %s1191_s21 = scalar_lea.sflag [#allocation34], %s7846_s2 }
 0x2b1   : > { %6804 = dma.done.wait (%p9997_p12), %s1191_s21, 16  }
 0x2b2   : > { %6806 = vsyncadd (%p9997_p12), %s1191_s21, 4294967280  ;;  %s7914_s4 = scalar_lea.vmem [#allocation35], %s7819_s6  ;;  %s9998_s19 = sld [smem:[#allocation53_spill]] }
 0x2b8   : > { %p5229_p10 = scmp.ne.s32.totalorder %s9998_s19, 0 }
 0x2b9   : > { %v1341_v0 = vld [vmem:[%s1031_s12] sm:$0xff] (!%p5229_p10)  ;;  %vm1343_vm0 = vcmask (!%p5229_p10), 261120   ;;  %v1342_v1 = vld [vmem:[%s1031_s12 + $0x8] sm:$0xff] (!%p5229_p10) }
 0x2ba   : > { %1340 = sbr.rel (%p5229_p10) target bundleno = 705 (0x2c1), region = 184  ;;  %1344 = vst.msk [vmem:[#allocation2] sm:$0xff] (!%p5229_p10), %vm1343_vm0, %v1341_v0  ;;  %1345 = vst.msk [vmem:[#allocation2 + $0x8] sm:$0xff] (!%p5229_p10), %vm1343_vm0, %v1342_v1 }
 0x2c1 PF: > { %v6054_v2 = vld [vmem:[%s7851_s24 + $0x4] ss:$12 sps:$4 sm:$0xff]   ;;  %v6056_v3 = vld [vmem:[%s7851_s24] ss:$12 sps:$4 sm:$0xff]   ;;  %v9858_v4 = vmov 0   ;;  %v9856_v8 = vmov 0.0  }
 0x2c2   : > { %1425 = vmatprep.mubr.bf16.mxu1 %v9858_v4  ;;  %1393 = vmatprep.subr.bf16.mxu1 %v6054_v2  ;;  %v6057_v5 = vld [vmem:[%s7851_s24 + $0x1c] ss:$12 sps:$4 sm:$0xff]   ;;  %v6059_v6 = vld [vmem:[%s7851_s24 + $0x18] ss:$12 sps:$4 sm:$0xff]   ;;  %v6883_v10 = vmov 4   ;;  %v6884_v11 = vmov 1  }
 0x2c3   : > { %v1346_v7 = vld [vmem:[#allocation2] sm:$0xff]  ;;  %5387 = vmatprep.subr.bf16.mxu0 %v9856_v8  ;;  %1394 = vmatpush1.bf16.msra.mxu1 %v6056_v3  ;;  %v1347_v9 = vld [vmem:[#allocation2 + $0x8] sm:$0xff]  ;;  %vm6885_vm1 = vmmov 0   ;;  %vm1389_vm2 = vcmask 261120   ;;  %v9862_v17 = vmov 2   ;;  %v6887_v18 = vmov 5  }
 0x2c4   : > { %5710 = vset.pattern.permute.xlu1 %v6883_v10  ;;  %1395 = vmatprep.subr.bf16.mxu1 %v6057_v5  ;;  %v7930_v12 = vld [vmem:[%s1049_s14] sm:$0xff]  ;;  %v1348_v13 = vpack.c.bf16 %v1347_v9, %v1346_v7  ;;  %v6060_v14 = vld [vmem:[%s7851_s24 + $0x8] ss:$12 sps:$4 sm:$0xff]   ;;  %v6888_v19 = vmov 7   ;;  %v6889_v20 = vmov 8   ;;  %v6890_v21 = vmov 6  }
 0x2c5   : > { %5709 = vset.pattern.permute.xlu0 %v6884_v11  ;;  %5389 = vmatprep.mubr.msk.bf16.mxu0 %vm6885_vm1, %v9856_v8  ;;  %v1478_v15 = vld [vmem:[%s1049_s14 + $0x8] sm:$0xff]  ;;  %v6891_v22 = vmov 9   ;;  %v6892_v23 = vmov 11   ;;  %v9860_v24 = vmov 3   ;;  %v6894_v25 = vmov 10   ;;  %s6895_s12 = smov 112  }
 0x2c6   : > { %1552 = vperm.xlu1 %5710, %v7930_v12   ;;  %1492 = vperm.xlu0 %5709, %v7930_v12   ;;  %v6061_v16 = vld [vmem:[%s7851_s24 + $0x20] ss:$12 sps:$4 sm:$0xff]   ;;  %s9903_s14 = smov 96   ;;  %v1854_v10 = vlaneseq  ;;  %s9876_s18 = smov 64   ;;  %vm1819_vm3 = vcmask 31744   ;;  %vm1908_vm4 = vcmask 130048  }
 0x2c7   : > { %1396 = vmatpush1.bf16.msra.mxu1 %v6059_v6  ;;  %s6898_s24 = smov 60   ;;  %s6900_s21 = smov 52   ;;  %vm1911_vm5 = vcmask 162816   ;;  %vm1914_vm6 = vcmask 195584   ;;  %vm1917_vm7 = vcmask 228352   ;;  %vm1920_vm8 = vcmask 236544  }
 0x2c8   : > { %5367 = vmatprep.subr.bf16.mxu1 %v9856_v8  ;;  %s9879_s9 = smov 16   ;;  %s6902_s19 = smov 12   ;;  %vm2041_vm9 = vcmask 244736   ;;  %vm3590_vm12 = vcmask 130112   ;;  %vm3655_vm13 = vcmask 1041409   ;;  %vm3657_vm14 = vcmask 1042434  }
 0x2c9   : > { %s6909_s28 = smov 36   ;;  %s6911_s22 = smov 80   ;;  %vm3659_vm15 = vcmask 1043459   ;;  %vm3661_vm0 = vcmask 1044484  }
 0x2ca   : > { %5236 = vmatmul.mubr.msk.bf16.vlgmr.msra.gmra.mrb[0].mxu1 %vm1389_vm2, %v1348_v13  ;;  %1556 = vperm.xlu1 %5710, %v1478_v15   ;;  %s6912_s15 = smov 28   ;;  %s6918_s7 = smov 72  }
 0x2cb   : > { %5368 = vmatpush3.bf16.msra.mxu1 %v6060_v14  ;;  %5371 = vmatprep.mubr.msk.bf16.mxu1 %vm6885_vm1, %v9856_v8 }
 0x2cc   : > { %5369 = vmatprep.subr.bf16.mxu1 %v9856_v8  ;;  %1496 = vperm.xlu0 %5709, %v1478_v15  }
 0x2ce   : > { %5712 = vset.pattern.permute.xlu1 %v9862_v17 }
 0x2cf   : > { %5370 = vmatpush3.bf16.msra.mxu1 %v6061_v16  ;;  %1516 = vperm.xlu1 %5712, %v1478_v15  }
 0x2d0   : > { %5711 = vset.pattern.permute.xlu0 %v9862_v17  ;;  %5375 = vmatprep.subr.bf16.mxu1 %v9856_v8 }
 0x2d1   : > { %1512 = vperm.xlu0 %5711, %v7930_v12  }
 0x2d2   : > { %5372 = vmatmul.mubr.msk.bf16.vlgmr.msra.gmra.mrb[4].mxu1 %vm1389_vm2, %v1348_v13 }
 0x2d3   : > { %5713 = vset.pattern.permute.xlu1 %v6887_v18  ;;  %5377 = vmatprep.mubr.msk.bf16.mxu1 %vm6885_vm1, %v9856_v8 }
 0x2d4   : > { %1572 = vperm.xlu1 %5713, %v7930_v12  }
 0x2d5   : > { %5714 = vset.pattern.permute.xlu0 %v6887_v18  ;;  %v8091_v18 = vld [vmem:[%s1093_s25] sm:$0x1]  ;;  %s6899_s25 = smov 56  }
 0x2d6   : > { %1576 = vperm.xlu0 %5714, %v1478_v15  }
 0x2d8   : > { %5715 = vset.pattern.permute.xlu1 %v6888_v19 }
 0x2d9   : > { %1612 = vperm.xlu1 %5715, %v7930_v12  }
 0x2da   : > { %5716 = vset.pattern.permute.xlu0 %v6889_v20 }
 0x2db   : > { %1632 = vperm.xlu0 %5716, %v7930_v12  }
 0x2dd   : > { %1616 = vperm.xlu1 %5715, %v1478_v15  }
 0x2df   : > { %5720 = vset.pattern.permute.xlu0 %v6890_v21 }
 0x2e0   : > { %1602 = vperm.xlu0 %5720, %v7930_v12  }
 0x2e1   : > { %5717 = vset.pattern.permute.xlu1 %v6889_v20 }
 0x2e2   : > { %1636 = vperm.xlu1 %5717, %v1478_v15  }
 0x2e4   : > { %5723 = vset.pattern.permute.xlu0 %v6891_v22 }
 0x2e5   : > { %1536 = vperm.xlu0 %5723, %v1478_v15  }
 0x2e6   : > { %5718 = vset.pattern.permute.xlu1 %v9858_v4 }
 0x2e7   : > { %1481 = vperm.xlu1 %5718, %v7930_v12  }
 0x2e9   : > { %5725 = vset.pattern.permute.xlu0 %v6892_v23 }
 0x2ea   : > { %1652 = vperm.xlu0 %5725, %v7930_v12  }
 0x2eb   : > { %5719 = vset.pattern.permute.xlu1 %v9860_v24 }
 0x2ec   : > { %1542 = vperm.xlu1 %5719, %v7930_v12  }
 0x2ee   : > { %5726 = vset.pattern.permute.xlu0 %v9858_v4 }
 0x2ef   : > { %1486 = vperm.xlu0 %5726, %v1478_v15  }
 0x2f0   : > { %1546 = vperm.xlu1 %5719, %v1478_v15  }
 0x2f4   : > { %5721 = vset.pattern.permute.xlu1 %v6890_v21 }
 0x2f5   : > { %1606 = vperm.xlu1 %5721, %v1478_v15  }
 0x2f9   : > { %5722 = vset.pattern.permute.xlu1 %v6891_v22 }
 0x2fa   : > { %1532 = vperm.xlu1 %5722, %v7930_v12  }
 0x2fe   : > { %5724 = vset.pattern.permute.xlu1 %v6894_v25 }
 0x2ff   : > { %1592 = vperm.xlu1 %5724, %v7930_v12   ;;  %v3580_v12 = vand.u32 127, %v1854_v10 }
 0x303   : > { %1596 = vperm.xlu1 %5724, %v1478_v15  }
 0x307   : > { %5727 = vset.pattern.permute.xlu1 %v6892_v23 }
 0x308   : > { %1656 = vperm.xlu1 %5727, %v1478_v15   ;;  %v3585_v15 = vadd.s32 4294967288, %v3580_v12 }
 0x30c   : > { %5728 = vset.pattern.permute.xlu1 %v6884_v11  ;;  %v8081_v11 = vshrl.u32 %v1854_v10, 7 }
 0x30e   : > { %v9863_v13 = vsub.s32 0, %v8081_v11  ;;  %v8085_v14 = vsub.s32 %v3580_v12, %v8081_v11  ;;  %v8099_v20 = vsub.s32 %v3585_v15, %v8081_v11 }
 0x310   : > { %v8096_v19 = vrot.slane %v8091_v18, %v9863_v13 }
 0x345   : > { %v7965_v26 = vpop.permute.xlu1 %1552  ;;  %v7967_v27 = vpop.permute.xlu0 %1492 }
 0x346   : > { %9999 = vst [vmem:[#allocation66_spill] sm:$0xff] %v7965_v26  ;;  %10000 = vst [vmem:[#allocation67_spill] sm:$0xff] %v7967_v27 }
 0x349   : > { %v7969_v28 = vpop.permute.xlu1 %1556 }
 0x34a   : > { %10001 = vst [vmem:[#allocation68_spill] sm:$0xff] %v7969_v28 }
 0x34b   : > { %v7979_v33 = vpop.permute.xlu0 %1496 }
 0x34c   : > { %10002 = vst [vmem:[#allocation69_spill] sm:$0xff] %v7979_v33 }
 0x34e   : > { %v7986_v36 = vpop.permute.xlu1 %1516 }
 0x34f   : > { %10003 = vst [vmem:[#allocation70_spill] sm:$0xff] %v7986_v36 }
 0x350   : > { %v8004_v42 = vpop.permute.xlu0 %1512 }
 0x351   : > { %10004 = vst [vmem:[#allocation71_spill] sm:$0xff] %v8004_v42 }
 0x353   : > { %v8011_v46 = vpop.permute.xlu1 %1572 }
 0x354   : > { %10005 = vst [vmem:[#allocation72_spill] sm:$0xff] %v8011_v46 }
 0x355   : > { %v8019_v50 = vpop.permute.xlu0 %1576 }
 0x356   : > { %10006 = vst [vmem:[#allocation73_spill] sm:$0xff] %v8019_v50 }
 0x358   : > { %v8024_v52 = vpop.permute.xlu1 %1612 }
 0x359   : > { %10007 = vst [vmem:[#allocation74_spill] sm:$0xff] %v8024_v52 }
 0x35a   : > { %v8066_v3 = vpop.permute.xlu0 %1632 }
 0x35b   : > { %10010 = vst [vmem:[#allocation77_spill] sm:$0xff] %v8066_v3 }
 0x35c   : > { %v8050_v61 = vpop.permute.xlu1 %1616 }
 0x35d   : > { %10008 = vst [vmem:[#allocation75_spill] sm:$0xff] %v8050_v61 }
 0x361   : > { %v8061_v1 = vpop.permute.xlu1 %1636 }
 0x362   : > { %10009 = vst [vmem:[#allocation76_spill] sm:$0xff] %v8061_v1 }
 0x366   : > { %v8087_v16 = vpop.permute.xlu1 %1481 }
 0x367   : > { %10011 = vst [vmem:[#allocation78_spill] sm:$0xff] %v8087_v16 }
 0x36b   : > { %v8101_v21 = vpop.permute.xlu1 %1542 }
 0x36c   : > { %10012 = vst [vmem:[#allocation79_spill] sm:$0xff] %v8101_v21 }
 0x36f   : > { %v8103_v22 = vpop.permute.xlu1 %1546 }
 0x370   : > { %10013 = vst [vmem:[#allocation80_spill] sm:$0xff] %v8103_v22 }
 0x374   : > { %v8105_v23 = vpop.permute.xlu1 %1606 }
 0x375   : > { %10014 = vst [vmem:[#allocation81_spill] sm:$0xff] %v8105_v23 }
 0x379   : > { %v8107_v25 = vpop.permute.xlu1 %1532 }
 0x39d   : > { %v7971_v29 = vpop.f32.mrb[0].mxu1 }
 0x39e   : > { %v7973_v30 = vpop.f32.mrb[1].mxu1 }
 0x39f   : > { %v7975_v31 = vpop.f32.mrb[2].mxu1  ;;  %v1499_v32 = vmul.f32 %v7967_v27, %v7973_v30  ;;  %v1559_v37 = vmul.f32 %v7965_v26, %v7973_v30  ;;  %v1519_v45 = vmul.f32 %v8004_v42, %v7973_v30  ;;  %v1579_v49 = vmul.f32 %v8011_v46, %v7973_v30 }
 0x3a0   : > { %v7981_v34 = vpop.f32.mrb[3].mxu1  ;;  %v7993_v38 = vpack.i.bf16 %v7975_v31, %v7971_v29  ;;  %v1619_v53 = vmul.f32 %v8024_v52, %v7973_v30  ;;  %v1639_v7 = vmul.f32 %v8066_v3, %v7973_v30 }
 0x3a1   : > { %1503 = vrot.lane.b32.xlu1 %v1499_v32, %s6895_s12  ;;  %v1500_v35 = vmul.f32 %v7979_v33, %v7981_v34  ;;  %v1560_v40 = vmul.f32 %v7969_v28, %v7981_v34  ;;  %v8002_v41 = vpack.i.bf16 %v7981_v34, %v7973_v30  ;;  %v1520_v48 = vmul.f32 %v7986_v36, %v7981_v34  ;;  %v8109_v32 = vpop.permute.xlu0 %1602 }
 0x3a2   : > { %v1580_v51 = vmul.f32 %v8019_v50, %v7981_v34  ;;  %v1620_v6 = vmul.f32 %v8050_v61, %v7981_v34  ;;  %v1640_v9 = vmul.f32 %v8061_v1, %v7981_v34  ;;  %10015 = vst [vmem:[#allocation82_spill] sm:$0xff] %v8109_v32  ;;  %v1550_v10 = vmul.f32 %v8103_v22, %v7981_v34 }
 0x3a3   : > { %1505 = vrot.lane.b32.xlu0 %v1500_v35, %s6895_s12  ;;  %v8111_v35 = vpop.permute.xlu1 %1592  ;;  %v1609_v12 = vmul.f32 %v8109_v32, %v7973_v30  ;;  %v8141_v13 = vmul.f32 %v8105_v23, %v7981_v34 }
 0x3a4   : > { %10016 = vst [vmem:[#allocation83_spill] sm:$0xff] %v8111_v35 }
 0x3a5   : > { %1563 = vrot.lane.b32.xlu1 %v1559_v37, %s6895_s12  ;;  %v7996_v39 = vpop.f32.mrb[4].mxu1  ;;  %v8113_v37 = vpop.permute.xlu0 %1536 }
 0x3a6   : > { %v5373_v43 = vpop.f32.mrb[5].mxu1  ;;  %v1661_v55 = vmul.f32 %v7967_v27, %v7996_v39  ;;  %v1687_v57 = vmul.f32 %v7965_v26, %v7996_v39  ;;  %v1673_v59 = vmul.f32 %v8004_v42, %v7996_v39  ;;  %v1699_v62 = vmul.f32 %v8011_v46, %v7996_v39  ;;  %10017 = vst [vmem:[#allocation84_spill] sm:$0xff] %v8113_v37 }
 0x3a7   : > { %1565 = vrot.lane.b32.xlu0 %v1560_v40, %s6895_s12  ;;  %v8007_v44 = vpop.f32.mrb[6].mxu1  ;;  %v1713_v0 = vmul.f32 %v8024_v52, %v7996_v39  ;;  %v1725_v5 = vmul.f32 %v8066_v3, %v7996_v39  ;;  %v8115_v40 = vpop.permute.xlu1 %1596 }
 0x3a8   : > { %v5374_v47 = vpop.f32.mrb[7].mxu1  ;;  %v1662_v54 = vmul.f32 %v7979_v33, %v8007_v44  ;;  %v1688_v56 = vmul.f32 %v7969_v28, %v8007_v44  ;;  %v1674_v58 = vmul.f32 %v7986_v36, %v8007_v44  ;;  %v1700_v60 = vmul.f32 %v8019_v50, %v8007_v44  ;;  %10018 = vst [vmem:[#allocation85_spill] sm:$0xff] %v8115_v40 }
 0x3a9   : > { %1523 = vrot.lane.b32.xlu1 %v1519_v45, %s9903_s14  ;;  %v1714_v63 = vmul.f32 %v8050_v61, %v8007_v44  ;;  %v1726_v2 = vmul.f32 %v8061_v1, %v8007_v44  ;;  %v8117_v43 = vpop.permute.xlu0 %1652  ;;  %v1748_v61 = vmul.f32 %v8103_v22, %v8007_v44 }
 0x3aa   : > { %10019 = vst [vmem:[#allocation86_spill] sm:$0xff] %v8117_v43 }
 0x3ab   : > { %1525 = vrot.lane.b32.xlu0 %v1520_v48, %s9903_s14  ;;  %v8119_v45 = vpop.permute.xlu1 %1656 }
 0x3ac   : > { %10020 = vst [vmem:[#allocation87_spill] sm:$0xff] %v8119_v45 }
 0x3ad   : > { %1583 = vrot.lane.b32.xlu1 %v1579_v49, %s9903_s14  ;;  %v8121_v47 = vpop.permute.xlu0 %1486 }
 0x3ae   : > { %10021 = vst [vmem:[#allocation88_spill] sm:$0xff] %v8121_v47 }
 0x3af   : > { %1585 = vrot.lane.b32.xlu0 %v1580_v51, %s9903_s14 }
 0x3b1   : > { %1623 = vrot.lane.b32.xlu1 %v1619_v53, %s6895_s12 }
 0x3b3   : > { %1667 = vrot.lane.b32.xlu0 %v1662_v54, %s6895_s12 }
 0x3b5   : > { %1665 = vrot.lane.b32.xlu1 %v1661_v55, %s6895_s12 }
 0x3b7   : > { %1693 = vrot.lane.b32.xlu0 %v1688_v56, %s6895_s12 }
 0x3b9   : > { %1691 = vrot.lane.b32.xlu1 %v1687_v57, %s6895_s12 }
 0x3bb   : > { %1679 = vrot.lane.b32.xlu0 %v1674_v58, %s9903_s14 }
 0x3bd   : > { %1677 = vrot.lane.b32.xlu1 %v1673_v59, %s9903_s14 }
 0x3bf   : > { %1705 = vrot.lane.b32.xlu0 %v1700_v60, %s9903_s14 }
 0x3c1   : > { %1703 = vrot.lane.b32.xlu1 %v1699_v62, %s9903_s14 }
 0x3c3   : > { %1719 = vrot.lane.b32.xlu0 %v1714_v63, %s6895_s12  ;;  %v1489_v63 = vmul.f32 %v8087_v16, %v7973_v30 }
 0x3c5   : > { %1717 = vrot.lane.b32.xlu1 %v1713_v0, %s6895_s12  ;;  %v1490_v0 = vmul.f32 %v8121_v47, %v7981_v34 }
 0x3c7   : > { %1731 = vrot.lane.b32.xlu0 %v1726_v2, %s9903_s14 }
 0x3c9   : > { %1729 = vrot.lane.b32.xlu1 %v1725_v5, %s9903_s14  ;;  %v1549_v5 = vmul.f32 %v8101_v21, %v7973_v30 }
 0x3cb   : > { %1625 = vrot.lane.b32.xlu0 %v1620_v6, %s6895_s12  ;;  %v1740_v6 = vmul.f32 %v8121_v47, %v8007_v44 }
 0x3cd   : > { %1643 = vrot.lane.b32.xlu1 %v1639_v7, %s9903_s14  ;;  %v1739_v7 = vmul.f32 %v8087_v16, %v7996_v39 }
 0x3cf   : > { %1645 = vrot.lane.b32.xlu0 %v1640_v9, %s9903_s14 }
 0x413   : > { %v1504_v48 = vpop.permute.xlu1 %1503 }
 0x414   : > { %v1509_v9 = vadd.f32 %v1504_v48, %v1489_v63  ;;  %v1747_v48 = vmul.f32 %v8101_v21, %v7996_v39 }
 0x415   : > { %v1506_v49 = vpop.permute.xlu0 %1505 }
 0x417   : > { %v1564_v51 = vpop.permute.xlu1 %1563 }
 0x419   : > { %v1566_v53 = vpop.permute.xlu0 %1565 }
 0x41a   : > { %v1570_v47 = vadd.f32 %v1566_v53, %v1550_v10 }
 0x41b   : > { %v1524_v54 = vpop.permute.xlu1 %1523 }
 0x41c   : > { %v1529_v1 = vadd.f32 %v1524_v54, %v1509_v9  ;;  %v1755_v54 = vmul.f32 %v8109_v32, %v7996_v39 }
 0x41d   : > { %v1526_v55 = vpop.permute.xlu0 %1525 }
 0x41f   : > { %v1584_v56 = vpop.permute.xlu1 %1583 }
 0x421   : > { %v1586_v57 = vpop.permute.xlu0 %1585 }
 0x423   : > { %v8123_v58 = vpop.permute.xlu1 %1623 }
 0x425   : > { %v1668_v59 = vpop.permute.xlu0 %1667 }
 0x426   : > { %v1672_v15 = vadd.f32 %v1668_v59, %v1490_v0  ;;  %v1742_v4 = vadd.f32 %v1740_v6, %v1668_v59  ;;  %v1510_v59 = vadd.f32 %v1506_v49, %v1490_v0  ;;  %v1756_v6 = vmul.f32 %v8105_v23, %v8007_v44 }
 0x427   : > { %v1666_v60 = vpop.permute.xlu1 %1665 }
 0x428   : > { %v1671_v24 = vadd.f32 %v1666_v60, %v1489_v63  ;;  %v1741_v17 = vadd.f32 %v1739_v7, %v1666_v60  ;;  %v1569_v63 = vadd.f32 %v1564_v51, %v1549_v5 }
 0x429   : > { %v1694_v62 = vpop.permute.xlu0 %1693 }
 0x42a   : > { %v1698_v50 = vadd.f32 %v1694_v62, %v1550_v10  ;;  %v1750_v42 = vadd.f32 %v1748_v61, %v1694_v62  ;;  %v1589_v61 = vadd.f32 %v1584_v56, %v1569_v63 }
 0x42b   : > { %v1692_v2 = vpop.permute.xlu1 %1691 }
 0x42c   : > { %v1697_v7 = vadd.f32 %v1692_v2, %v1549_v5  ;;  %v1749_v9 = vadd.f32 %v1747_v48, %v1692_v2 }
 0x42d   : > { %v1680_v8 = vpop.permute.xlu0 %1679 }
 0x42e   : > { %v1684_v3 = vadd.f32 %v1680_v8, %v1672_v15  ;;  %v1744_v28 = vadd.f32 %v1742_v4, %v1680_v8 }
 0x42f   : > { %v1678_v52 = vpop.permute.xlu1 %1677 }
 0x430   : > { %v1683_v36 = vadd.f32 %v1678_v52, %v1671_v24  ;;  %v1743_v33 = vadd.f32 %v1741_v17, %v1678_v52  ;;  %v8155_v4 = vadd.f32 %v1684_v3, %v8113_v37  ;;  %v8159_v24 = vadd.f32 %v8107_v25, %v1529_v1 }
 0x431   : > { %v1706_v60 = vpop.permute.xlu0 %1705  ;;  %v1746_v44 = vadd.f32 %v1744_v28, %v8113_v37  ;;  %v1590_v28 = vadd.f32 %v1586_v57, %v1570_v47 }
 0x432   : > { %v8152_v22 = vadd.f32 %v1683_v36, %v8107_v25  ;;  %v1710_v15 = vadd.f32 %v1706_v60, %v1698_v50  ;;  %v1745_v8 = vadd.f32 %v1743_v33, %v8107_v25  ;;  %v1752_v49 = vadd.f32 %v1750_v42, %v1706_v60 }
 0x433   : > { %v1704_v17 = vpop.permute.xlu1 %1703  ;;  %v1530_v50 = vadd.f32 %v1526_v55, %v1510_v59  ;;  %v8181_v57 = vadd.f32 %v8115_v40, %v1590_v28 }
 0x434   : > { %v1709_v39 = vadd.f32 %v1704_v17, %v1697_v7  ;;  %v1751_v52 = vadd.f32 %v1749_v9, %v1704_v17  ;;  %v8164_v36 = vpack.i.bf16 %v8155_v4, %v8152_v22  ;;  %v1712_v3 = vadd.f32 %v1710_v15, %v8115_v40 }
 0x435   : > { %v1720_v51 = vpop.permute.xlu0 %1719  ;;  %v8169_v62 = vpack.i.bf16 %v1746_v44, %v1745_v8  ;;  %v1754_v5 = vadd.f32 %v1752_v49, %v8115_v40  ;;  %v8178_v7 = vadd.f32 %v8111_v35, %v1589_v61  ;;  %v1629_v15 = vadd.f32 %v8123_v58, %v1609_v12 }
 0x436   : > { %v1711_v33 = vadd.f32 %v1709_v39, %v8111_v35  ;;  %v1753_v53 = vadd.f32 %v1751_v52, %v8111_v35  ;;  %v1724_v0 = vadd.f32 %v1720_v51, %v8141_v13  ;;  %v1758_v42 = vadd.f32 %v1756_v6, %v1720_v51 }
 0x437   : > { %v1718_v1 = vpop.permute.xlu1 %1717  ;;  %v8188_v44 = vadd.f32 %v8113_v37, %v1530_v50  ;;  %v1801_v49 = vmul.f32 %v8159_v24, %v8159_v24  ;;  %v1803_v58 = vmul.f32 %v8178_v7, %v8178_v7 }
 0x438   : > { %v8172_v2 = vpack.i.bf16 %v1712_v3, %v1711_v33  ;;  %v1723_v55 = vadd.f32 %v1718_v1, %v1609_v12  ;;  %v1757_v56 = vadd.f32 %v1755_v54, %v1718_v1  ;;  %v8175_v60 = vpack.i.bf16 %v1754_v5, %v1753_v53 }
 0x439   : > { %v1732_v10 = vpop.permute.xlu0 %1731 }
 0x43a   : > { %v1736_v48 = vadd.f32 %v1732_v10, %v1724_v0  ;;  %v1760_v59 = vadd.f32 %v1758_v42, %v1732_v10  ;;  %v1804_v0 = vmul.f32 %v8181_v57, %v8181_v57  ;;  %v1802_v10 = vmul.f32 %v8188_v44, %v8188_v44 }
 0x43b   : > { %v1730_v63 = vpop.permute.xlu1 %1729 }
 0x43c   : > { %v1735_v9 = vadd.f32 %v1730_v63, %v1723_v55  ;;  %v1759_v47 = vadd.f32 %v1757_v56, %v1730_v63  ;;  %v1738_v8 = vadd.f32 %v1736_v48, %v8119_v45  ;;  %v1762_v39 = vadd.f32 %v1760_v59, %v8119_v45 }
 0x43d   : > { %v1626_v6 = vpop.permute.xlu0 %1625  ;;  %v1806_v56 = vadd.f32 %v1804_v0, %v1802_v10  ;;  %v1829_v63 = vmul.f32 %v1712_v3, %v1712_v3 }
 0x43e   : > { %v1737_v54 = vadd.f32 %v1735_v9, %v8117_v43  ;;  %v1761_v17 = vadd.f32 %v1759_v47, %v8117_v43  ;;  %v1630_v51 = vadd.f32 %v1626_v6, %v8141_v13  ;;  %v1805_v13 = vadd.f32 %v1803_v58, %v1801_v49 }
 0x43f   : > { %v1644_v52 = vpop.permute.xlu1 %1643  ;;  %v1827_v9 = vmul.f32 %v8155_v4, %v8155_v4  ;;  %v1833_v47 = vmul.f32 %v1738_v8, %v1738_v8  ;;  %v1828_v6 = vmul.f32 %v1711_v33, %v1711_v33  ;;  %v1852_v4 = vmul.f32 -2.0, %v8091_v18 }
 0x440   : > { %v1649_v61 = vadd.f32 %v1644_v52, %v1629_v15  ;;  %v8196_v12 = vpack.i.bf16 %v1738_v8, %v1737_v54  ;;  %v8198_v1 = vpack.i.bf16 %v1762_v39, %v1761_v17  ;;  %v1826_v17 = vmul.f32 %v8152_v22, %v8152_v22 }
 0x441   : > { %v1646_v53 = vpop.permute.xlu0 %1645  ;;  %v1831_v15 = vadd.f32 %v1829_v63, %v1827_v9  ;;  %v1832_v39 = vmul.f32 %v1737_v54, %v1737_v54  ;;  %v10022_v22 = vsub.s32 0, %v8081_v11  ;;  %v10023_v8 = vmov 2  }
 0x442   : > { %v8201_v50 = vadd.f32 %v8117_v43, %v1649_v61  ;;  %v1650_v28 = vadd.f32 %v1646_v53, %v1630_v51  ;;  %v1830_v49 = vadd.f32 %v1828_v6, %v1826_v17  ;;  %v10024_v54 = vmov 3  }
 0x443   : > { %v1835_v52 = vadd.f32 %v1833_v47, %v1831_v15  ;;  %v1857_v33 = vrot.slane %v1852_v4, %v10022_v22 }
 0x444   : > { %v8206_v42 = vadd.f32 %v8119_v45, %v1650_v28  ;;  %v1807_v5 = vmul.f32 %v8201_v50, %v8201_v50  ;;  %v1834_v3 = vadd.f32 %v1832_v39, %v1830_v49 }
 0x446   : > { %v1809_v55 = vadd.f32 %v1807_v5, %v1805_v13  ;;  %v1808_v48 = vmul.f32 %v8206_v42, %v8206_v42 }
 0x448   : > { %1813 = vrot.lane.b32.xlu1 %v1809_v55, %s9876_s18  ;;  %v1810_v59 = vadd.f32 %v1808_v48, %v1806_v56 }
 0x44a   : > { %1815 = vrot.lane.b32.xlu0 %v1810_v59, %s9876_s18 }
 0x44c   : > { %2271 = vrot.lane.b32.xlu1 %v1809_v55, %s6898_s24 }
 0x44e   : > { %2273 = vrot.lane.b32.xlu0 %v1810_v59, %s6898_s24  ;;  %s9875_s24 = smov 8  }
 0x450   : > { %2694 = vrot.lane.b32.xlu1 %v1809_v55, %s6899_s25 }
 0x452   : > { %2696 = vrot.lane.b32.xlu0 %v1810_v59, %s6899_s25  ;;  %s6904_s25 = smov 4  }
 0x454   : > { %3113 = vrot.lane.b32.xlu1 %v1809_v55, %s6900_s21 }
 0x456   : > { %1840 = vrot.lane.b32.xlu0 %v1835_v52, %s9879_s9 }
 0x458   : > { %1838 = vrot.lane.b32.xlu1 %v1834_v3, %s9879_s9 }
 0x45a   : > { %3115 = vrot.lane.b32.xlu0 %v1810_v59, %s6900_s21  ;;  %s9877_s21 = smov 48  }
 0x45c   : > { %2283 = vrot.lane.b32.xlu1 %v1834_v3, %s6902_s19 }
 0x45e   : > { %2285 = vrot.lane.b32.xlu0 %v1835_v52, %s6902_s19  ;;  %s6906_s19 = smov 84  }
 0x460   : > { %2706 = vrot.lane.b32.xlu1 %v1834_v3, %s9875_s24 }
 0x462   : > { %2708 = vrot.lane.b32.xlu0 %v1835_v52, %s9875_s24  ;;  %s9901_s24 = smov 32  }
 0x464   : > { %3125 = vrot.lane.b32.xlu1 %v1834_v3, %s6904_s25 }
 0x466   : > { %1859 = vperm.xlu0 %5726, %v1857_v33  }
 0x468   : > { %2296 = vperm.xlu1 %5728, %v1857_v33  }
 0x46a   : > { %3127 = vrot.lane.b32.xlu0 %v1835_v52, %s6904_s25  ;;  %s6907_s25 = smov 88  }
 0x46b   : > { %5729 = vset.pattern.permute.xlu0 %v10023_v8 }
 0x46c   : > { %5730 = vset.pattern.permute.xlu1 %v10024_v54 }
 0x4ba   : > { %v1814_v51 = vpop.permute.xlu1 %1813 }
 0x4bb   : > { %v1820_v18 = vsel %vm1819_vm3, %v1814_v51, 0.0 }
 0x4bc   : > { %1821 = vadd.xlane.f32.xlu0 %v1820_v18  ;;  %v1816_v61 = vpop.permute.xlu0 %1815 }
 0x4bd   : > { %v1823_v55 = vsel %vm1819_vm3, %v1816_v61, 0.0 }
 0x4be   : > { %v2272_v58 = vpop.permute.xlu1 %2271 }
 0x4bf   : > { %v2277_v53 = vsel %vm1819_vm3, %v2272_v58, 0.0  ;;  %v10025_v58 = vmov 0  }
 0x4c0   : > { %2278 = vadd.xlane.f32.xlu1 %v2277_v53  ;;  %v2274_v11 = vpop.permute.xlu0 %2273 }
 0x4c1   : > { %v2280_v48 = vsel %vm1819_vm3, %v2274_v11, 0.0 }
 0x4c2   : > { %v2695_v28 = vpop.permute.xlu1 %2694 }
 0x4c3   : > { %v2700_v0 = vsel %vm1819_vm3, %v2695_v28, 0.0 }
 0x4c4   : > { %2701 = vadd.xlane.f32.xlu1 %v2700_v0  ;;  %v2697_v13 = vpop.permute.xlu0 %2696  ;;  %v8251_v0 = vmul.f32 0.25, %v7975_v31 }
 0x4c5   : > { %v2703_v5 = vsel %vm1819_vm3, %v2697_v13, 0.0 }
 0x4c6   : > { %v3114_v10 = vpop.permute.xlu1 %3113  ;;  %2704 = vadd.xlane.f32.xlu0 %v2703_v5  ;;  %v8256_v5 = vmul.f32 0.25, %v7971_v29 }
 0x4c7   : > { %v3119_v3 = vsel %vm1819_vm3, %v3114_v10, 0.0 }
 0x4c8   : > { %1824 = vadd.xlane.f32.xlu1 %v1823_v55  ;;  %v1841_v47 = vpop.permute.xlu0 %1840 }
 0x4c9   : > { %v1847_v17 = vsel %vm1819_vm3, %v1841_v47, 0.0 }
 0x4ca   : > { %v1839_v56 = vpop.permute.xlu1 %1838 }
 0x4cb   : > { %v1844_v63 = vsel %vm1819_vm3, %v1839_v56, 0.0 }
 0x4cc   : > { %2281 = vadd.xlane.f32.xlu1 %v2280_v48  ;;  %v3116_v49 = vpop.permute.xlu0 %3115 }
 0x4cd   : > { %v3122_v22 = vsel %vm1819_vm3, %v3116_v49, 0.0 }
 0x4ce   : > { %v2284_v59 = vpop.permute.xlu1 %2283 }
 0x4cf   : > { %v2289_v9 = vsel %vm1819_vm3, %v2284_v59, 0.0 }
 0x4d0   : > { %1845 = vadd.xlane.f32.xlu1 %v1844_v63  ;;  %2290 = vadd.xlane.f32.xlu0 %v2289_v9  ;;  %v2286_v4 = vpop.permute.xlu0 %2285 }
 0x4d2   : > { %v2707_v6 = vpop.permute.xlu1 %2706 }
 0x4d3   : > { %v2712_v15 = vsel %vm1819_vm3, %v2707_v6, 0.0  ;;  %v8283_v6 = vld [vmem:[%s7858_s29] sm:$0xff]  ;;  %s6913_s29 = smov 76  }
 0x4d4   : > { %2713 = vadd.xlane.f32.xlu1 %v2712_v15  ;;  %1848 = vadd.xlane.f32.xlu0 %v1847_v17  ;;  %v2709_v8 = vpop.permute.xlu0 %2708  ;;  %v8288_v15 = vrot.slane %v8283_v6, 1  ;;  %5453 = vpush %v8283_v6  ;;  %v2292_v17 = vsel %vm1819_vm3, %v2286_v4, 0.0 }
 0x4d6   : > { %v3126_v39 = vpop.permute.xlu1 %3125  ;;  %5455 = vpush %v8288_v15 }
 0x4d7   : > { %v3131_v52 = vsel %vm1819_vm3, %v3126_v39, 0.0  ;;  %v2715_v39 = vsel %vm1819_vm3, %v2709_v8, 0.0 }
 0x4d8   : > { %3132 = vadd.xlane.f32.xlu1 %v3131_v52 }
 0x4dc   : > { %3120 = vadd.xlane.f32.xlu1 %v3119_v3 }
 0x4e0   : > { %3123 = vadd.xlane.f32.xlu1 %v3122_v22 }
 0x4e5   : > { %v1860_v51 = vpop.permute.xlu0 %1859 }
 0x4e6   : > { %v1864_v18 = vmul.f32 %v1860_v51, %v8178_v7  ;;  %v1865_v61 = vmul.f32 %v1860_v51, %v8181_v57  ;;  %v1866_v11 = vmul.f32 %v1860_v51, %v8201_v50  ;;  %v1867_v28 = vmul.f32 %v1860_v51, %v8206_v42 }
 0x4e7   : > { %v2297_v10 = vpop.permute.xlu1 %2296  ;;  %v1862_v55 = vmul.f32 %v1860_v51, %v8159_v24  ;;  %v1863_v56 = vmul.f32 %v1860_v51, %v8188_v44 }
 0x4e8   : > { %v5766_v53 = vpack.i.bf16 %v1865_v61, %v1864_v18  ;;  %v5776_v13 = vpack.i.bf16 %v1867_v28, %v1866_v11  ;;  %v2301_v31 = vmul.f32 %v2297_v10, %v8178_v7  ;;  %v2302_v29 = vmul.f32 %v2297_v10, %v8181_v57 }
 0x4e9   : > { %v2303_v59 = vmul.f32 %v2297_v10, %v8201_v50  ;;  %v2304_v63 = vmul.f32 %v2297_v10, %v8206_v42  ;;  %v5751_v9 = vpack.i.bf16 %v1863_v56, %v1862_v55  ;;  %v2299_v52 = vmul.f32 %v2297_v10, %v8159_v24  ;;  %v3128_v51 = vpop.permute.xlu0 %3127 }
 0x4ea   : > { %2719 = vperm.xlu0 %5729, %v1857_v33   ;;  %v5806_v48 = vpack.i.bf16 %v2302_v29, %v2301_v31  ;;  %v2300_v49 = vmul.f32 %v2297_v10, %v8188_v44 }
 0x4eb   : > { %v5816_v47 = vpack.i.bf16 %v2304_v63, %v2303_v59 }
 0x4ec   : > { %v5791_v3 = vpack.i.bf16 %v2300_v49, %v2299_v52 }
 0x4ee   : > { %5757 = vrot.lane.b32.xlu0 %v7993_v38, %s9877_s21  ;;  %s6920_s21 = smov 127  }
 0x4ef   : > { %5926 = vset.pattern.permute.xlu0 %v10025_v58 }
 0x4f1   : > { %3138 = vperm.xlu1 %5730, %v1857_v33   ;;  %v8261_v33 = vpack.i.bf16 %v8251_v0, %v8256_v5 }
 0x4f2   : > { %5767 = vrot.lane.b32.xlu0 %v5766_v53, %s6906_s19 }
 0x4f5   : > { %5732 = vrot.lane.b32.xlu1 %v7993_v38, %s9876_s18  ;;  %s6919_s18 = smov 25  }
 0x4f6   : > { %5777 = vrot.lane.b32.xlu0 %v5776_v13, %s6907_s25  ;;  %5927 = vset.pattern.permute.xlu1 %v10025_v58  ;;  %s6910_s25 = smov 40  }
 0x4f9   : > { %5737 = vrot.lane.b32.xlu1 %v8164_v36, %s9901_s24 }
 0x4fa   : > { %5787 = vrot.lane.b32.xlu0 %v8261_v33, %s6895_s12 }
 0x4fd   : > { %5742 = vrot.lane.b32.xlu1 %v8172_v2, %s6909_s28 }
 0x4fe   : > { %5797 = vrot.lane.b32.xlu0 %v7993_v38, %s9901_s24 }
 0x501   : > { %5747 = vrot.lane.b32.xlu1 %v8196_v12, %s6910_s25  ;;  %s6916_s25 = smov 26  }
 0x502   : > { %5807 = vrot.lane.b32.xlu0 %v5806_v48, %s6911_s22 }
 0x505   : > { %5752 = vrot.lane.b32.xlu1 %v5751_v9, %s6911_s22 }
 0x506   : > { %5817 = vrot.lane.b32.xlu0 %v5816_v47, %s6906_s19  ;;  %s6915_s19 = smov 29  }
 0x509   : > { %5762 = vrot.lane.b32.xlu1 %v8164_v36, %s6912_s15 }
 0x50d   : > { %5772 = vrot.lane.b32.xlu1 %v8172_v2, %s9901_s24 }
 0x511   : > { %5782 = vrot.lane.b32.xlu1 %v8196_v12, %s6909_s28  ;;  %s6914_s28 = smov 27  }
 0x535   : > { %2293 = vadd.xlane.f32.xlu1 %v2292_v17 }
 0x539   : > { %2716 = vadd.xlane.f32.xlu1 %v2715_v39 }
 0x549   : > { %v1822_v61 = vpop.xlane.xlu0 %1821 }
 0x54a   : > { %5792 = vrot.lane.b32.xlu1 %v5791_v3, %s6913_s29  ;;  %v1874_v11 = vmul.f32 %v8096_v19, %v1822_v61 }
 0x54d   : > { %v2279_v22 = vpop.xlane.xlu1 %2278 }
 0x54e   : > { %v2305_v31 = vmul.f32 %v2279_v22, %v8096_v19  ;;  %v3134_v22 = vsel %vm1819_vm3, %v3128_v51, 0.0 }
 0x551   : > { %v2702_v18 = vpop.xlane.xlu1 %2701 }
 0x553   : > { %v2705_v8 = vpop.xlane.xlu0 %2704 }
 0x555   : > { %v1825_v53 = vpop.xlane.xlu1 %1824 }
 0x556   : > { %v1875_v4 = vmul.f32 %v8096_v19, %v1825_v53 }
 0x558   : > { %v5826_v28 = vpack.i.bf16 %v1875_v4, %v1874_v11 }
 0x559   : > { %v2282_v13 = vpop.xlane.xlu1 %2281 }
 0x55a   : > { %v2306_v10 = vmul.f32 %v2282_v13, %v8096_v19  ;;  %5827 = vrot.lane.b32.xlu0 %v5826_v28, %s6912_s15  ;;  %v2729_v28 = vmul.f32 %v2705_v8, %v8096_v19 }
 0x55c   : > { %v5831_v29 = vpack.i.bf16 %v2306_v10, %v2305_v31  ;;  %v2728_v31 = vmul.f32 %v2702_v18, %v8096_v19 }
 0x55d   : > { %v1846_v55 = vpop.xlane.xlu1 %1845  ;;  %v8303_v56 = vpop.xlane.xlu0 %2290 }
 0x55e   : > { %5832 = vrot.lane.b32.xlu0 %v5831_v29, %s6914_s28  ;;  %v1924_v63 = vmul.f32 %v8096_v19, %v1846_v55  ;;  %v5891_v51 = vpack.i.bf16 %v2729_v28, %v2728_v31  ;;  %v1763_v31 = vld [vmem:[%s1058_s26] sm:$0xff] }
 0x561   : > { %v8306_v48 = vpop.xlane.xlu1 %2713  ;;  %v1849_v59 = vpop.xlane.xlu0 %1848 }
 0x562   : > { %v1925_v9 = vmul.f32 %v8096_v19, %v1849_v59 }
 0x564   : > { %v5836_v47 = vpack.i.bf16 %v1925_v9, %v1924_v63  ;;  %v2001_v63 = vrot.slane %v8283_v6, 3  ;;  %v2017_v9 = vrot.slane %v8283_v6, 5 }
 0x565   : > { %v8310_v17 = vpop.xlane.xlu1 %3132 }
 0x566   : > { %5837 = vrot.lane.b32.xlu0 %v5836_v47, %s6915_s19  ;;  %s6917_s19 = smov 24   ;;  %v2033_v47 = vrot.slane %v8283_v6, 7 }
 0x569   : > { %v2720_v39 = vpop.permute.xlu0 %2719  ;;  %v3121_v3 = vpop.xlane.xlu1 %3120 }
 0x56a   : > { %5842 = vrot.lane.b32.xlu0 %v8261_v33, %s9903_s14  ;;  %v2724_v52 = vmul.f32 %v2720_v39, %v8178_v7  ;;  %v2725_v49 = vmul.f32 %v2720_v39, %v8181_v57  ;;  %v2726_v53 = vmul.f32 %v2720_v39, %v8201_v50  ;;  %v2727_v11 = vmul.f32 %v2720_v39, %v8206_v42 }
 0x56b   : > { %v3147_v55 = vmul.f32 %v3121_v3, %v8096_v19  ;;  %v2723_v59 = vmul.f32 %v2720_v39, %v8188_v44  ;;  %v8363_v3 = vrot.slane %v8283_v6, 6 }
 0x56c   : > { %v5861_v61 = vpack.i.bf16 %v2725_v49, %v2724_v52  ;;  %v5876_v13 = vpack.i.bf16 %v2727_v11, %v2726_v53  ;;  %v8358_v49 = vrot.slane %v8283_v6, 4 }
 0x56d   : > { %v3124_v4 = vpop.xlane.xlu1 %3123 }
 0x56e   : > { %3135 = vadd.xlane.f32.xlu1 %v3134_v22  ;;  %5852 = vrot.lane.b32.xlu0 %v7993_v38, %s9879_s9  ;;  %v3148_v18 = vmul.f32 %v3124_v4, %v8096_v19  ;;  %s6921_s9 = smov 20  }
 0x571   : > { %v8325_v10 = vpop.permute.xlu1 %3138 }
 0x572   : > { %5862 = vrot.lane.b32.xlu0 %v5861_v61, %s6913_s29  ;;  %v3143_v38 = vmul.f32 %v8325_v10, %v8178_v7  ;;  %v3144_v29 = vmul.f32 %v8325_v10, %v8181_v57  ;;  %v5921_v7 = vpack.i.bf16 %v3148_v18, %v3147_v55  ;;  %v2722_v57 = vmul.f32 %v2720_v39, %v8159_v24  ;;  %v8371_v61 = vpop.permute.xlu0 %5757 }
 0x573   : > { %v8353_v39 = vrot.slane %v8283_v6, 2 }
 0x574   : > { %v5911_v8 = vpack.i.bf16 %v3144_v29, %v3143_v38 }
 0x575   : > { %v8355_v52 = vpop.permute.xlu1 %5732  ;;  %5457 = vpush %v8353_v39 }
 0x576   : > { %5877 = vrot.lane.b32.xlu0 %v5876_v13, %s6911_s22  ;;  %5459 = vpush %v2001_v63  ;;  %v8376_v11 = vpop.permute.xlu0 %5767 }
 0x577   : > { %5461 = vpush %v8358_v49 }
 0x578   : > { %5463 = vpush %v2017_v9 }
 0x579   : > { %5465 = vpush %v8363_v3 }
 0x57a   : > { %5892 = vrot.lane.b32.xlu0 %v5891_v51, %s6916_s25  ;;  %5467 = vpush %v2033_v47  ;;  %v8379_v28 = vpop.permute.xlu0 %5777 }
 0x57e   : > { %5897 = vrot.lane.b32.xlu0 %v8261_v33, %s6911_s22  ;;  %v5846_v33 = vpack.i.bf16 %v2723_v59, %v2722_v57  ;;  %v8387_v51 = vpop.permute.xlu0 %5787 }
 0x57f   : > { %5802 = vrot.lane.b32.xlu1 %v8164_v36, %s6917_s19 }
 0x582   : > { %5912 = vrot.lane.b32.xlu0 %v5911_v8, %s6918_s7  ;;  %v2358_v8 = vmul.f32 %v8303_v56, %v8096_v19 }
 0x583   : > { %5812 = vrot.lane.b32.xlu1 %v8172_v2, %s6912_s15 }
 0x586   : > { %5922 = vrot.lane.b32.xlu0 %v5921_v7, %s6919_s18  ;;  %s6923_s18 = smov 125  }
 0x587   : > { %5822 = vrot.lane.b32.xlu1 %v8196_v12, %s9901_s24  ;;  %s6928_s24 = smov 104  }
 0x58a   : > { %2412 = vrot.lane.b32.xlu0 %v8288_v15, %s6920_s21 }
 0x58b   : > { %5847 = vrot.lane.b32.xlu1 %v5846_v33, %s6918_s7  ;;  %s6922_s7 = smov 126  }
 0x58e   : > { %2430 = vrot.lane.b32.xlu0 %v2001_v63, %s6920_s21 }
 0x58f   : > { %5857 = vrot.lane.b32.xlu1 %v8164_v36, %s6921_s9  ;;  %v5738_v36 = vpop.permute.xlu1 %5737  ;;  %s8475_s9 = spop %5453 }
 0x592   : > { %2448 = vrot.lane.b32.xlu0 %v2017_v9, %s6920_s21 }
 0x593   : > { %v5743_v22 = vpop.permute.xlu1 %5742 }
 0x596   : > { %2466 = vrot.lane.b32.xlu0 %v2033_v47, %s6920_s21 }
 0x597   : > { %v5748_v53 = vpop.permute.xlu1 %5747 }
 0x598   : > { %v5749_v23 = vunpack.i.l.bf16 %v5748_v53 }
 0x59a   : > { %2833 = vrot.lane.b32.xlu0 %v8288_v15, %s6922_s7 }
 0x59b   : > { %v5753_v4 = vpop.permute.xlu1 %5752 }
 0x59c   : > { %v5754_v32 = vunpack.i.l.bf16 %v5753_v4 }
 0x59e   : > { %2851 = vrot.lane.b32.xlu0 %v2001_v63, %s6922_s7 }
 0x59f   : > { %v8381_v13 = vpop.permute.xlu1 %5762 }
 0x5a2   : > { %2869 = vrot.lane.b32.xlu0 %v2017_v9, %s6922_s7 }
 0x5a3   : > { %v8389_v38 = vpop.permute.xlu1 %5772 }
 0x5a6   : > { %2887 = vrot.lane.b32.xlu0 %v2033_v47, %s6922_s7 }
 0x5a7   : > { %v8393_v29 = vpop.permute.xlu1 %5782 }
 0x5aa   : > { %3252 = vrot.lane.b32.xlu0 %v8288_v15, %s6923_s18  ;;  %v8391_v15 = vpop.permute.xlu0 %5797 }
 0x5ae   : > { %3270 = vrot.lane.b32.xlu0 %v2001_v63, %s6923_s18  ;;  %v8401_v7 = vpop.permute.xlu0 %5807 }
 0x5af   : > { %v5809_v27 = vunpack.i.l.bf16 %v8401_v7 }
 0x5b2   : > { %3288 = vrot.lane.b32.xlu0 %v2017_v9, %s6923_s18  ;;  %v8405_v63 = vpop.permute.xlu0 %5817  ;;  %v2779_v9 = vmul.f32 %v8306_v48, %v8096_v19  ;;  %v5755_v48 = vunpack.i.h.bf16 %v5753_v4 }
 0x5b4   : > { %v1910_v4 = vsel %vm1908_vm4, %v8251_v0, %v5755_v48 }
 0x5b6   : > { %3306 = vrot.lane.b32.xlu0 %v2033_v47, %s6923_s18  ;;  %v5740_v47 = vunpack.i.h.bf16 %v5738_v36 }
 0x5ba   : > { %2121 = vperm.xlu0 %5926, %v1763_v31   ;;  %v5739_v31 = vunpack.i.l.bf16 %v5738_v36 }
 0x5be   : > { %5944 = vrot.lane.b32.xlu0 %v8002_v41, %s6895_s12 }
 0x5bf   : > { %6053 = vset.pattern.permute.xlu0 %v10024_v54 }
 0x5c2   : > { %v2294_v18 = vpop.xlane.xlu1 %2293 }
 0x5c3   : > { %v2359_v55 = vmul.f32 %v2294_v18, %v8096_v19  ;;  %v5745_v18 = vunpack.i.h.bf16 %v5743_v22 }
 0x5c5   : > { %v5866_v57 = vpack.i.bf16 %v2359_v55, %v2358_v8  ;;  %v5744_v8 = vunpack.i.l.bf16 %v5743_v22  ;;  %v5735_v55 = vunpack.i.h.bf16 %v8355_v52 }
 0x5c6   : > { %v2717_v59 = vpop.xlane.xlu1 %2716 }
 0x5c7   : > { %5867 = vrot.lane.b32.xlu1 %v5866_v57, %s6912_s15  ;;  %v2780_v33 = vmul.f32 %v2717_v59, %v8096_v19  ;;  %v5734_v57 = vunpack.i.l.bf16 %v8355_v52  ;;  %v5750_v59 = vunpack.i.h.bf16 %v5748_v53  ;;  %v1967_v36 = vsel %vm1908_vm4, %v5735_v55, %v5740_v47 }
 0x5c8   : > { %v5769_v47 = vunpack.i.l.bf16 %v8376_v11 }
 0x5c9   : > { %v5881_v54 = vpack.i.bf16 %v2780_v33, %v2779_v9  ;;  %v1969_v9 = vsel %vm1911_vm5, %v1967_v36, %v5745_v18 }
 0x5ca   : > { %v1971_v53 = vsel %vm1914_vm6, %v1969_v9, %v5750_v59 }
 0x5cb   : > { %5872 = vrot.lane.b32.xlu1 %v8172_v2, %s6917_s19  ;;  %v1966_v2 = vsel %vm1908_vm4, %v5734_v57, %v5739_v31  ;;  %v1973_v55 = vsel %vm1917_vm7, %v1971_v53, 1.0 }
 0x5cc   : > { %v5828_v56 = vpop.permute.xlu0 %5827  ;;  %v1968_v22 = vsel %vm1911_vm5, %v1966_v2, %v5744_v8 }
 0x5cd   : > { %v1970_v52 = vsel %vm1914_vm6, %v1968_v22, %v5749_v23  ;;  %v5830_v59 = vunpack.i.h.bf16 %v5828_v56  ;;  %v5829_v48 = vunpack.i.l.bf16 %v5828_v56  ;;  %v10026_v56 = vmov 0.0  }
 0x5ce   : > { %v1972_v23 = vsel %vm1917_vm7, %v1970_v52, 1.0 }
 0x5cf   : > { %5882 = vrot.lane.b32.xlu1 %v5881_v54, %s6914_s28  ;;  %v5770_v54 = vunpack.i.h.bf16 %v8376_v11 }
 0x5d0   : > { %v8418_v33 = vpop.permute.xlu0 %5832 }
 0x5d1   : > { %v1913_v0 = vsel %vm1911_vm5, %v1910_v4, %v5770_v54 }
 0x5d3   : > { %5887 = vrot.lane.b32.xlu1 %v8196_v12, %s6912_s15  ;;  %v1909_v12 = vsel %vm1908_vm4, %v8256_v5, %v5754_v32  ;;  %v5780_v32 = vunpack.i.h.bf16 %v8379_v28  ;;  %v5779_v5 = vunpack.i.l.bf16 %v8379_v28  ;;  %s6924_s15 = smov 68  }
 0x5d4   : > { %v1912_v57 = vsel %vm1911_vm5, %v1909_v12, %v5769_v47  ;;  %v8449_v47 = vpop.permute.xlu1 %5792 }
 0x5d5   : > { %v1915_v22 = vsel %vm1914_vm6, %v1912_v57, %v5779_v5  ;;  %v1916_v9 = vsel %vm1914_vm6, %v1913_v0, %v5780_v32  ;;  %v3142_v57 = vmul.f32 %v8325_v10, %v8188_v44 }
 0x5d6   : > { %v1918_v52 = vsel %vm1917_vm7, %v1915_v22, %v5829_v48  ;;  %v1919_v53 = vsel %vm1917_vm7, %v1916_v9, %v5830_v59  ;;  %v3145_v59 = vmul.f32 %v8325_v10, %v8201_v50  ;;  %v8481_v50 = vld [vmem:[%s7832_s1 + $0x8] sm:$0xff]  }
 0x5d7   : > { %v1921_v28 = vsel %vm1920_vm8, %v1918_v52, 1.0  ;;  %v1922_v12 = vsel %vm1920_vm8, %v1919_v53, 1.0  ;;  %v8492_v48 = vunpack.c.h.bf16 %v8481_v50  ;;  %v8513_v52 = vld [vmem:[%s7832_s1 + $0x18] sm:$0xff]  }
 0x5d8   : > { %v5838_v31 = vpop.permute.xlu0 %5837  ;;  %v1923_v54 = vpack.c.bf16 %v1922_v12, %v1921_v28  ;;  %v8518_v53 = vunpack.c.h.bf16 %v8513_v52 }
 0x5d9   : > { %v5840_v8 = vunpack.i.h.bf16 %v5838_v31  ;;  %v5839_v18 = vunpack.i.l.bf16 %v5838_v31 }
 0x5db   : > { %v1974_v11 = vsel %vm1920_vm8, %v1972_v23, %v5839_v18  ;;  %v1975_v2 = vsel %vm1920_vm8, %v1973_v55, %v5840_v8  ;;  %v3198_v8 = vmul.f32 %v8310_v17, %v8096_v19  ;;  %v3141_v55 = vmul.f32 %v8325_v10, %v8159_v24  ;;  %v8473_v24 = vld [vmem:[%s7832_s1] sm:$0xff]  }
 0x5dc   : > { %v1976_v36 = vpack.c.bf16 %v1975_v2, %v1974_v11  ;;  %v3146_v17 = vmul.f32 %v8325_v10, %v8206_v42  ;;  %v8478_v44 = vunpack.c.h.bf16 %v8473_v24  ;;  %v8486_v42 = vld [vmem:[%s7832_s1 + $0x10] sm:$0xff]   ;;  %v9889_v10 = vstv %s8475_s9 }
 0x5dd   : > { %v5906_v0 = vpack.i.bf16 %v3142_v57, %v3141_v55  ;;  %v8495_v32 = vunpack.c.h.bf16 %v8486_v42  ;;  %v8539_v55 = vld [vmem:[%s7832_s1 + $0x28] sm:$0xff]  }
 0x5de   : > { %v2046_v4 = vsel %vm2041_vm9, %v1976_v36, 0  ;;  %v1982_v11 = vmul.f32 %v8478_v44, %v9889_v10  ;;  %v5784_v10 = vunpack.i.l.bf16 %v8393_v29 }
 0x5df   : > { %5376 = vmatpush3.bf16.xpose.msra.mxu1 %v2046_v4  ;;  %v8521_v4 = vld [vmem:[%s7832_s1 + $0x20] sm:$0xff]  }
 0x5e0   : > { %5381 = vmatprep.subr.bf16.mxu1 %v10026_v56 }
 0x5e6   : > { %5378 = vmatmul.mubr.msk.bf16.vlgmr.msra.gmra.mrb[8].mxu1 %vm2041_vm9, %v1923_v54  ;;  %v8529_v54 = vunpack.c.h.bf16 %v8521_v4 }
 0x5e7   : > { %5383 = vmatprep.mubr.msk.bf16.mxu1 %vm6885_vm1, %v10026_v56 }
 0x5fb   : > { %v3136_v31 = vpop.xlane.xlu1 %3135 }
 0x5fc   : > { %v3199_v18 = vmul.f32 %v3136_v31, %v8096_v19  ;;  %v5916_v19 = vpack.i.bf16 %v3146_v17, %v3145_v59  ;;  %v8549_v59 = vld [vmem:[%s7832_s1 + $0x30] sm:$0xff]  }
 0x5fe   : > { %v5901_v23 = vpack.i.bf16 %v3199_v18, %v3198_v8 }
 0x5ff   : > { %v8499_v5 = vpop.permute.xlu1 %5802 }
 0x600   : > { %5902 = vrot.lane.b32.xlu1 %v5901_v23, %s6916_s25 }
 0x603   : > { %v8543_v57 = vpop.permute.xlu1 %5812 }
 0x604   : > { %5907 = vrot.lane.b32.xlu1 %v5906_v0, %s6924_s15  ;;  %v8546_v0 = vunpack.c.h.bf16 %v8539_v55 }
 0x608   : > { %5917 = vrot.lane.b32.xlu1 %v5916_v19, %s6913_s29  ;;  %s8483_s29 = spop %5455 }
 0x609   : > { %v9886_v2 = vstv %s8483_s29 }
 0x60a   : > { %v1990_v22 = vmul.f32 %v8492_v48, %v9886_v2  ;;  %v8570_v2 = vpop.permute.xlu0 %5842 }
 0x60c   : > { %2403 = vrot.lane.b32.xlu1 %v8283_v6, %s6920_s21  ;;  %v1992_v28 = vadd.f32 %v1990_v22, %v1982_v11  ;;  %v8557_v11 = vunpack.c.h.bf16 %v8549_v59 }
 0x60e   : > { %v8588_v45 = vpop.permute.xlu0 %5852 }
 0x610   : > { %2421 = vrot.lane.b32.xlu1 %v8353_v39, %s6920_s21 }
 0x614   : > { %2439 = vrot.lane.b32.xlu1 %v8358_v49, %s6920_s21 }
 0x618   : > { %2457 = vrot.lane.b32.xlu1 %v8363_v3, %s6920_s21  ;;  %s8497_s21 = spop %5457 }
 0x619   : > { %v9885_v36 = vstv %s8497_s21  ;;  %s8515_s28 = spop %5459 }
 0x61a   : > { %v1998_v9 = vmul.f32 %v8495_v32, %v9885_v36  ;;  %s8523_s25 = spop %5461  ;;  %v9884_v12 = vstv %s8515_s28  ;;  %v8568_v36 = vpop.permute.xlu1 %5822 }
 0x61b   : > { %v2006_v31 = vmul.f32 %v8518_v53, %v9884_v12  ;;  %v9883_v8 = vstv %s8523_s25  ;;  %s8541_s19 = spop %5463 }
 0x61c   : > { %2824 = vrot.lane.b32.xlu1 %v8283_v6, %s6922_s7  ;;  %v2000_v18 = vadd.f32 %v1998_v9, %v1992_v28  ;;  %v2014_v23 = vmul.f32 %v8529_v54, %v9883_v8  ;;  %s8551_s15 = spop %5465  ;;  %v9888_v19 = vstv %s8541_s19 }
 0x61d   : > { %v2022_v22 = vmul.f32 %v8546_v0, %v9888_v19  ;;  %v9887_v9 = vstv %s8551_s15  ;;  %v5765_v19 = vunpack.i.h.bf16 %v8381_v13 }
 0x61e   : > { %v2008_v17 = vadd.f32 %v2006_v31, %v2000_v18  ;;  %v2030_v8 = vmul.f32 %v8557_v11, %v9887_v9  ;;  %v5794_v18 = vunpack.i.l.bf16 %v8449_v47  ;;  %v5789_v9 = vunpack.i.l.bf16 %v8387_v51 }
 0x620   : > { %2842 = vrot.lane.b32.xlu1 %v8353_v39, %s6922_s7  ;;  %v2016_v28 = vadd.f32 %v2014_v23, %v2008_v17  ;;  %v5764_v23 = vunpack.i.l.bf16 %v8381_v13  ;;  %v5795_v17 = vunpack.i.h.bf16 %v8449_v47  ;;  %v5760_v47 = vunpack.i.h.bf16 %v8371_v61 }
 0x621   : > { %v5785_v13 = vunpack.i.h.bf16 %v8393_v29  ;;  %v2347_v43 = vsel %vm1908_vm4, %v5789_v9, %v5794_v18  ;;  %v5834_v29 = vunpack.i.l.bf16 %v8418_v33  ;;  %v5819_v18 = vunpack.i.l.bf16 %v8405_v63 }
 0x622   : > { %v2024_v12 = vadd.f32 %v2022_v22, %v2016_v28  ;;  %v5774_v22 = vunpack.i.l.bf16 %v8389_v38  ;;  %v8582_v28 = vpop.permute.xlu1 %5847  ;;  %v2393_v46 = vsel %vm1908_vm4, %v5760_v47, %v5765_v19  ;;  %v5804_v47 = vunpack.i.l.bf16 %v8499_v5 }
 0x624   : > { %2860 = vrot.lane.b32.xlu1 %v8358_v49, %s6922_s7  ;;  %v8572_v31 = vadd.f32 %v2030_v8, %v2024_v12  ;;  %v5759_v12 = vunpack.i.l.bf16 %v8371_v61  ;;  %v5790_v8 = vunpack.i.h.bf16 %v8387_v51  ;;  %v2349_v61 = vsel %vm1911_vm5, %v2347_v43, %v5809_v27  ;;  %v5863_v27 = vpop.permute.xlu0 %5862  ;;  %v8615_v43 = vld [vmem:[%s7832_s1 + $0x38] sm:$0xff]   ;;  %s9906_s1 = smov 116  }
 0x625   : > { %v5864_v21 = vunpack.i.l.bf16 %v5863_v27 }
 0x626   : > { %v2392_v40 = vsel %vm1908_vm4, %v5759_v12, %v5764_v23  ;;  %v2348_v51 = vsel %vm1908_vm4, %v5790_v8, %v5795_v17  ;;  %v8621_v17 = vunpack.c.h.bf16 %v8615_v43  ;;  %v5845_v8 = vunpack.i.h.bf16 %v8570_v2 }
 0x627   : > { %v2394_v26 = vsel %vm1911_vm5, %v2392_v40, %v5774_v22  ;;  %v5800_v40 = vunpack.i.h.bf16 %v8391_v15  ;;  %v5835_v22 = vunpack.i.h.bf16 %v8418_v33  ;;  %v1764_v33 = vld [vmem:[%s1058_s26 + $0x8] sm:$0xff]  ;;  %s9904_s26 = smov 120  }
 0x628   : > { %2878 = vrot.lane.b32.xlu1 %v8363_v3, %s6922_s7  ;;  %v2396_v9 = vsel %vm1914_vm6, %v2394_v26, %v5784_v10  ;;  %v2351_v26 = vsel %vm1914_vm6, %v2349_v61, %v5819_v18  ;;  %s8623_s7 = spop %5467  ;;  %v5814_v18 = vunpack.i.l.bf16 %v8543_v57 }
 0x629   : > { %v2398_v10 = vsel %vm1917_vm7, %v2396_v9, 1.0  ;;  %v2353_v12 = vsel %vm1917_vm7, %v2351_v26, %v5834_v29  ;;  %v9899_v29 = vstv %s8623_s7  ;;  %v5815_v9 = vunpack.i.h.bf16 %v8543_v57 }
 0x62c   : > { %3243 = vrot.lane.b32.xlu1 %v8283_v6, %s6923_s18  ;;  %v5775_v6 = vunpack.i.h.bf16 %v8389_v38  ;;  %v5810_v38 = vunpack.i.h.bf16 %v8401_v7  ;;  %v8609_v7 = vpop.permute.xlu1 %5857 }
 0x62e   : > { %v2350_v23 = vsel %vm1911_vm5, %v2348_v51, %v5810_v38  ;;  %v5849_v38 = vunpack.i.l.bf16 %v8582_v28 }
 0x630   : > { %3261 = vrot.lane.b32.xlu1 %v8353_v39, %s6923_s18  ;;  %v2395_v39 = vsel %vm1911_vm5, %v2393_v46, %v5775_v6  ;;  %v5820_v46 = vunpack.i.h.bf16 %v8405_v63  ;;  %v5805_v6 = vunpack.i.h.bf16 %v8499_v5  ;;  %v5878_v5 = vpop.permute.xlu0 %5877 }
 0x631   : > { %v2397_v19 = vsel %vm1914_vm6, %v2395_v39, %v5785_v13  ;;  %v5850_v13 = vunpack.i.h.bf16 %v8582_v28 }
 0x632   : > { %v2352_v63 = vsel %vm1914_vm6, %v2350_v23, %v5820_v46  ;;  %v2038_v23 = vmul.f32 %v8621_v17, %v9899_v29  ;;  %v5824_v46 = vunpack.i.l.bf16 %v8568_v36  ;;  %v2814_v29 = vsel %vm1908_vm4, %v5800_v40, %v5805_v6 }
 0x634   : > { %3279 = vrot.lane.b32.xlu1 %v8358_v49, %s6923_s18  ;;  %v5799_v49 = vunpack.i.l.bf16 %v8391_v15  ;;  %v2399_v15 = vsel %vm1917_vm7, %v2397_v19, 1.0  ;;  %v5825_v19 = vunpack.i.h.bf16 %v8568_v36  ;;  %v2769_v36 = vsel %vm1908_vm4, %v5845_v8, %v5850_v13  ;;  %v5893_v13 = vpop.permute.xlu0 %5892 }
 0x635   : > { %v2355_v8 = vsel %vm1920_vm8, %v2353_v12, 1.0 }
 0x636   : > { %v2813_v35 = vsel %vm1908_vm4, %v5799_v49, %v5804_v47  ;;  %v5879_v47 = vunpack.i.l.bf16 %v5878_v5 }
 0x638   : > { %3297 = vrot.lane.b32.xlu1 %v8363_v3, %s6923_s18  ;;  %v5844_v3 = vunpack.i.l.bf16 %v8570_v2  ;;  %v5865_v2 = vunpack.i.h.bf16 %v5863_v27  ;;  %s6927_s18 = smov 108  }
 0x639   : > { %v5868_v51 = vpop.permute.xlu1 %5867 }
 0x63a   : > { %v5870_v39 = vunpack.i.h.bf16 %v5868_v51  ;;  %v5869_v61 = vunpack.i.l.bf16 %v5868_v51  ;;  %v2354_v51 = vsel %vm1917_vm7, %v2352_v63, %v5835_v22  ;;  %v2768_v37 = vsel %vm1908_vm4, %v5844_v3, %v5849_v38 }
 0x63b   : > { %v8660_v22 = vadd.f32 %v2038_v23, %v8572_v31  ;;  %v2770_v40 = vsel %vm1911_vm5, %v2768_v37, %v5864_v21  ;;  %v2771_v49 = vsel %vm1911_vm5, %v2769_v36, %v5865_v2  ;;  %v2356_v6 = vsel %vm1920_vm8, %v2354_v51, 1.0 }
 0x63c   : > { %2126 = vperm.xlu1 %5927, %v1764_v33   ;;  %v2400_v28 = vsel %vm1920_vm8, %v2398_v10, %v5869_v61  ;;  %v2401_v26 = vsel %vm1920_vm8, %v2399_v15, %v5870_v39  ;;  %v2815_v33 = vsel %vm1911_vm5, %v2813_v35, %v5814_v18  ;;  %v2816_v10 = vsel %vm1911_vm5, %v2814_v29, %v5815_v9 }
 0x63d   : > { %v8650_v16 = vpop.permute.xlu1 %5872  ;;  %v2402_v57 = vpack.c.bf16 %v2401_v26, %v2400_v28  ;;  %v2817_v27 = vsel %vm1914_vm6, %v2815_v33, %v5824_v46  ;;  %v2818_v63 = vsel %vm1914_vm6, %v2816_v10, %v5825_v19  ;;  %v5880_v31 = vunpack.i.h.bf16 %v5878_v5 }
 0x63e   : > { %v2819_v61 = vsel %vm1917_vm7, %v2817_v27, 1.0  ;;  %v2820_v29 = vsel %vm1917_vm7, %v2818_v63, 1.0  ;;  %v2772_v21 = vsel %vm1914_vm6, %v2770_v40, %v5879_v47  ;;  %v5895_v9 = vunpack.i.h.bf16 %v5893_v13 }
 0x63f   : > { %v2479_v15 = vsel %vm2041_vm9, %v2402_v57, 0  ;;  %v2773_v37 = vsel %vm1914_vm6, %v2771_v49, %v5880_v31  ;;  %v5894_v18 = vunpack.i.l.bf16 %v5893_v13  ;;  %v2357_v23 = vpack.c.bf16 %v2356_v6, %v2355_v8  ;;  %v5898_v57 = vpop.permute.xlu0 %5897 }
 0x640   : > { %5929 = vrot.lane.b32.xlu1 %v8169_v62, %s6895_s12  ;;  %5388 = vmatpush3.bf16.xpose.msra.mxu0 %v2479_v15  ;;  %v2775_v28 = vsel %vm1917_vm7, %v2773_v37, %v5895_v9  ;;  %v5860_v27 = vunpack.i.h.bf16 %v8609_v7  ;;  %v5859_v63 = vunpack.i.l.bf16 %v8609_v7  ;;  %v5875_v40 = vunpack.i.h.bf16 %v8650_v16 }
 0x641   : > { %v5883_v35 = vpop.permute.xlu1 %5882  ;;  %5399 = vmatprep.subr.bf16.mxu0 %v10026_v56  ;;  %v2774_v46 = vsel %vm1917_vm7, %v2772_v21, %v5894_v18  ;;  %v2777_v51 = vsel %vm1920_vm8, %v2775_v28, 1.0  ;;  %v5874_v49 = vunpack.i.l.bf16 %v8650_v16  ;;  %v5854_v8 = vunpack.i.l.bf16 %v8588_v45 }
 0x642   : > { %v5885_v38 = vunpack.i.h.bf16 %v5883_v35  ;;  %v5884_v39 = vunpack.i.l.bf16 %v5883_v35  ;;  %v2776_v26 = vsel %vm1920_vm8, %v2774_v46, 1.0  ;;  %v5855_v35 = vunpack.i.h.bf16 %v8588_v45 }
 0x643   : > { %v2778_v2 = vpack.c.bf16 %v2777_v51, %v2776_v26  ;;  %v5913_v36 = vpop.permute.xlu0 %5912  ;;  %v3232_v13 = vsel %vm1908_vm4, %v5854_v8, %v5859_v63  ;;  %v5899_v46 = vunpack.i.l.bf16 %v5898_v57 }
 0x644   : > { %5934 = vrot.lane.b32.xlu1 %v8175_v60, %s9906_s1  ;;  %v2821_v12 = vsel %vm1920_vm8, %v2819_v61, %v5884_v39  ;;  %v2822_v3 = vsel %vm1920_vm8, %v2820_v29, %v5885_v38  ;;  %v3233_v38 = vsel %vm1908_vm4, %v5855_v35, %v5860_v27  ;;  %v3234_v39 = vsel %vm1911_vm5, %v3232_v13, %v5874_v49 }
 0x645   : > { %v2823_v5 = vpack.c.bf16 %v2822_v3, %v2821_v12  ;;  %v5888_v15 = vpop.permute.xlu1 %5887  ;;  %v3235_v61 = vsel %vm1911_vm5, %v3233_v38, %v5875_v40  ;;  %v5915_v27 = vunpack.i.h.bf16 %v5913_v36  ;;  %v5914_v63 = vunpack.i.l.bf16 %v5913_v36 }
 0x646   : > { %v5890_v6 = vunpack.i.h.bf16 %v5888_v15  ;;  %v5889_v31 = vunpack.i.l.bf16 %v5888_v15 }
 0x647   : > { %5390 = vmatmul.mubr.msk.bf16.vlgmr.msra.gmra.mrb[0].mxu0 %vm2041_vm9, %v2357_v23  ;;  %v2900_v19 = vsel %vm2041_vm9, %v2823_v5, 0  ;;  %v5923_v33 = vpop.permute.xlu0 %5922 }
 0x648   : > { %5939 = vrot.lane.b32.xlu1 %v8198_v1, %s9904_s26  ;;  %5400 = vmatpush3.bf16.xpose.msra.mxu0 %v2900_v19  ;;  %v3236_v7 = vsel %vm1914_vm6, %v3234_v39, %v5889_v31  ;;  %v3237_v29 = vsel %vm1914_vm6, %v3235_v61, %v5890_v6  ;;  %v5900_v19 = vunpack.i.h.bf16 %v5898_v57  ;;  %v5925_v6 = vunpack.i.h.bf16 %v5923_v33 }
 0x649   : > { %5401 = vmatprep.mubr.msk.bf16.mxu0 %vm6885_vm1, %v10026_v56  ;;  %5411 = vmatprep.subr.bf16.mxu0 %v10026_v56  ;;  %v3238_v45 = vsel %vm1917_vm7, %v3236_v7, 1.0  ;;  %v3239_v12 = vsel %vm1917_vm7, %v3237_v29, 1.0  ;;  %v5924_v31 = vunpack.i.l.bf16 %v5923_v33 }
 0x64b   : > { %v2413_v10 = vpop.permute.xlu0 %2412 }
 0x64c   : > { %5949 = vrot.lane.b32.xlu1 %v8169_v62, %s6927_s18 }
 0x64f   : > { %5402 = vmatmul.mubr.msk.bf16.vlgmr.msra.gmra.mrb[4].mxu0 %vm2041_vm9, %v2778_v2  ;;  %v2431_v47 = vpop.permute.xlu0 %2430 }
 0x650   : > { %5954 = vrot.lane.b32.xlu1 %v8175_v60, %s6895_s12  ;;  %5413 = vmatprep.mubr.msk.bf16.mxu0 %vm6885_vm1, %v10026_v56 }
 0x653   : > { %v2449_v3 = vpop.permute.xlu0 %2448 }
 0x654   : > { %5959 = vrot.lane.b32.xlu1 %v8198_v1, %s9906_s1 }
 0x657   : > { %v2467_v49 = vpop.permute.xlu0 %2466 }
 0x658   : > { %5964 = vrot.lane.b32.xlu1 %v8002_v41, %s9903_s14 }
 0x65b   : > { %v2834_v33 = vpop.permute.xlu0 %2833 }
 0x65c   : > { %5969 = vrot.lane.b32.xlu1 %v8169_v62, %s6928_s24 }
 0x672   : > { %v5903_v16 = vpop.permute.xlu1 %5902 }
 0x673   : > { %v5905_v21 = vunpack.i.h.bf16 %v5903_v16  ;;  %v5904_v37 = vunpack.i.l.bf16 %v5903_v16 }
 0x675   : > { %v3240_v9 = vsel %vm1920_vm8, %v3238_v45, %v5904_v37  ;;  %v3241_v18 = vsel %vm1920_vm8, %v3239_v12, %v5905_v21  ;;  %v2852_v12 = vpop.permute.xlu0 %2851 }
 0x676   : > { %v5908_v23 = vpop.permute.xlu1 %5907  ;;  %v3242_v5 = vpack.c.bf16 %v3241_v18, %v3240_v9 }
 0x677   : > { %v5910_v28 = vunpack.i.h.bf16 %v5908_v23  ;;  %v5909_v26 = vunpack.i.l.bf16 %v5908_v23 }
 0x678   : > { %v3319_v51 = vsel %vm2041_vm9, %v3242_v5, 0 }
 0x679   : > { %v3187_v2 = vsel %vm1908_vm4, %v5899_v46, %v5909_v26  ;;  %v3188_v15 = vsel %vm1908_vm4, %v5900_v19, %v5910_v28  ;;  %5412 = vmatpush3.bf16.xpose.msra.mxu0 %v3319_v51  ;;  %v2870_v18 = vpop.permute.xlu0 %2869  ;;  %v10027_v26 = vstv %s8475_s9  ;;  %s10035_s9 = scalar_lea.vmem [#allocation11], %s7819_s6 }
 0x67a   : > { %v5918_v40 = vpop.permute.xlu1 %5917  ;;  %4344 = vmatprep.subr.bf16.mxu0 %v10025_v58  ;;  %v3189_v57 = vsel %vm1911_vm5, %v3187_v2, %v5914_v63  ;;  %v3190_v13 = vsel %vm1911_vm5, %v3188_v15, %v5915_v27  ;;  %v10028_v2 = vstv %s8483_s29  ;;  %v8745_v27 = vunpack.c.l.bf16 %v8486_v42 }
 0x67b   : > { %v5920_v35 = vunpack.i.h.bf16 %v5918_v40  ;;  %v5919_v8 = vunpack.i.l.bf16 %v5918_v40 }
 0x67d   : > { %v3191_v38 = vsel %vm1914_vm6, %v3189_v57, %v5919_v8  ;;  %v3192_v39 = vsel %vm1914_vm6, %v3190_v13, %v5920_v35  ;;  %v2888_v5 = vpop.permute.xlu0 %2887 }
 0x67e   : > { %v3193_v61 = vsel %vm1917_vm7, %v3191_v38, %v5924_v31  ;;  %v3194_v36 = vsel %vm1917_vm7, %v3192_v39, %v5925_v6  ;;  %v2404_v7 = vpop.permute.xlu1 %2403  ;;  %v10030_v6 = vstv %s8515_s28  ;;  %v8757_v31 = vunpack.c.l.bf16 %v8521_v4 }
 0x67f   : > { %v3195_v29 = vsel %vm1920_vm8, %v3193_v61, 1.0  ;;  %v3196_v16 = vsel %vm1920_vm8, %v3194_v36, 1.0  ;;  %5469 = vpush %v2404_v7  ;;  %v10031_v39 = vstv %s8523_s25  ;;  %v8763_v61 = vunpack.c.l.bf16 %v8539_v55 }
 0x680   : > { %v3197_v21 = vpack.c.bf16 %v3196_v16, %v3195_v29  ;;  %5471 = vpush %v2413_v10  ;;  %v10032_v29 = vstv %s8541_s19  ;;  %v8769_v16 = vunpack.c.l.bf16 %v8549_v59  ;;  %vm3667_vm7 = vcmask 1047559  }
 0x681   : > { %v3253_v46 = vpop.permute.xlu0 %3252  ;;  %v2021_v4 = vmul.f32 %v8763_v61, %v10032_v29  ;;  %vm4018_vm8 = vcmask 64512  }
 0x682   : > { %5414 = vmatmul.mubr.msk.bf16.vlgmr.msra.gmra.mrb[8].mxu0 %vm2041_vm9, %v3197_v21  ;;  %v2422_v37 = vpop.permute.xlu1 %2421  ;;  %vm4021_vm9 = vcmask 97280  }
 0x683   : > { %5473 = vpush %v2422_v37 }
 0x684   : > { %5475 = vpush %v2431_v47  ;;  %v8733_v47 = vunpack.c.l.bf16 %v8473_v24 }
 0x685   : > { %v3271_v35 = vpop.permute.xlu0 %3270 }
 0x686   : > { %v2440_v45 = vpop.permute.xlu1 %2439  ;;  %v1981_v51 = vmul.f32 %v8733_v47, %v10027_v26 }
 0x687   : > { %5477 = vpush %v2440_v45  ;;  %v10033_v45 = vstv %s8551_s15 }
 0x688   : > { %5479 = vpush %v2449_v3  ;;  %v8736_v3 = vunpack.c.l.bf16 %v8481_v50  ;;  %v10029_v50 = vstv %s8497_s21  ;;  %v2029_v55 = vmul.f32 %v8769_v16, %v10033_v45 }
 0x689   : > { %v1997_v63 = vmul.f32 %v8745_v27, %v10029_v50  ;;  %v3289_v13 = vpop.permute.xlu0 %3288 }
 0x68a   : > { %v2458_v9 = vpop.permute.xlu1 %2457  ;;  %v1989_v15 = vmul.f32 %v8736_v3, %v10028_v2 }
 0x68b   : > { %5481 = vpush %v2458_v9 }
 0x68c   : > { %5483 = vpush %v2467_v49  ;;  %v1991_v24 = vadd.f32 %v1989_v15, %v1981_v51  ;;  %v8751_v49 = vunpack.c.l.bf16 %v8513_v52  ;;  %v2013_v52 = vmul.f32 %v8757_v31, %v10031_v39 }
 0x68e   : > { %v2825_v23 = vpop.permute.xlu1 %2824  ;;  %v1999_v8 = vadd.f32 %v1997_v63, %v1991_v24  ;;  %v2005_v42 = vmul.f32 %v8751_v49, %v10030_v6 }
 0x68f   : > { %5485 = vpush %v2825_v23 }
 0x690   : > { %5487 = vpush %v2834_v33  ;;  %v2007_v38 = vadd.f32 %v2005_v42, %v1999_v8  ;;  %v3307_v33 = vpop.permute.xlu0 %3306 }
 0x692   : > { %v2843_v10 = vpop.permute.xlu1 %2842  ;;  %v2015_v7 = vadd.f32 %v2013_v52, %v2007_v38 }
 0x693   : > { %5489 = vpush %v2843_v10 }
 0x694   : > { %5491 = vpush %v2852_v12  ;;  %v2023_v37 = vadd.f32 %v2021_v4, %v2015_v7  ;;  %v8775_v12 = vunpack.c.l.bf16 %v8615_v43 }
 0x696   : > { %v2861_v19 = vpop.permute.xlu1 %2860  ;;  %v2031_v9 = vadd.f32 %v2029_v55, %v2023_v37 }
 0x697   : > { %5493 = vpush %v2861_v19 }
 0x698   : > { %5495 = vpush %v2870_v18  ;;  %v10034_v18 = vstv %s8623_s7 }
 0x699   : > { %v2037_v23 = vmul.f32 %v8775_v12, %v10034_v18 }
 0x69a   : > { %v2879_v28 = vpop.permute.xlu1 %2878 }
 0x69b   : > { %5497 = vpush %v2879_v28  ;;  %v2039_v10 = vadd.f32 %v2037_v23, %v2031_v9 }
 0x69c   : > { %5499 = vpush %v2888_v5 }
 0x69e   : > { %v3244_v40 = vpop.permute.xlu1 %3243 }
 0x69f   : > { %5501 = vpush %v3244_v40 }
 0x6a0   : > { %5503 = vpush %v3253_v46  ;;  %v8782_v46 = vld [vmem:[%s10035_s9] sm:$0xff] }
 0x6a1   : > { %vm2091_vm10 = vcmp.gt.f32.partialorder %v8782_v46, 0.5 }
 0x6a2   : > { %v3262_v57 = vpop.permute.xlu1 %3261 }
 0x6a3   : > { %5505 = vpush %v3262_v57 }
 0x6a4   : > { %5507 = vpush %v3271_v35 }
 0x6a6   : > { %v3280_v36 = vpop.permute.xlu1 %3279 }
 0x6a7   : > { %5509 = vpush %v3280_v36 }
 0x6a8   : > { %5511 = vpush %v3289_v13 }
 0x6aa   : > { %v3298_v21 = vpop.permute.xlu1 %3297 }
 0x6ab   : > { %5513 = vpush %v3298_v21 }
 0x6ac   : > { %5515 = vpush %v3307_v33 }
 0x6b0   : > { %s5470_s29 = spop %5469 }
 0x6b1   : > { %s5472_s21 = spop %5471 }
 0x6b4   : > { %s5474_s28 = spop %5473 }
 0x6b5   : > { %s8805_s25 = spop %5475  ;;  %v2424_v37 = vstv %s5474_s28  ;;  %s10036_s28 = scalar_lea.vmem [#allocation11], %s7819_s6 }
 0x6b8   : > { %s8807_s19 = spop %5477 }
 0x6b9   : > { %v2082_v5 = vpop.f32.mrb[8].mxu1  ;;  %s8809_s15 = spop %5479 }
 0x6ba   : > { %v2083_v19 = vadd.f32 %v2082_v5, %v2039_v10  ;;  %v5379_v59 = vpop.f32.mrb[9].mxu1  ;;  %v2426_v10 = vmul.f32 %v8745_v27, %v2424_v37  ;;  %v2433_v5 = vstv %s8805_s25 }
 0x6bb   : > { %v8784_v28 = vpop.permute.xlu1 %2126  ;;  %v2085_v26 = vpop.f32.mrb[10].mxu1  ;;  %v2427_v59 = vmul.f32 %v8495_v32, %v2424_v37 }
 0x6bc   : > { %v2089_v51 = vmul.f32 0.57735026, %v2083_v19  ;;  %v8787_v2 = vadd.f32 %v2085_v26, %v8660_v22  ;;  %v5380_v43 = vpop.f32.mrb[11].mxu1  ;;  %s8811_s7 = spop %5481 }
 0x6bd   : > { %s8813_s9 = spop %5483 }
 0x6be   : > { %v5239_v15 = vadd.f32 -100000.0, %v2089_v51 }
 0x6bf   : > { %v5930_v24 = vpop.permute.xlu1 %5929 }
 0x6c0   : > { %v8792_v50 = vsel %vm2091_vm10, %v2089_v51, %v5239_v15  ;;  %v5932_v35 = vunpack.i.h.bf16 %v5930_v24  ;;  %v5931_v8 = vunpack.i.l.bf16 %v5930_v24  ;;  %s5486_s14 = spop %5485  ;;  %v2435_v24 = vmul.f32 %v8751_v49, %v2433_v5 }
 0x6c1   : > { %v2097_v63 = vsel %vm1908_vm4, %v8792_v50, -inf  ;;  %s5488_s26 = spop %5487  ;;  %v2827_v9 = vstv %s5486_s14 }
 0x6c2   : > { %2098 = vmax.xlane.f32.xlu1 %v2097_v63  ;;  %v2156_v57 = vsel %vm1908_vm4, %v7981_v34, %v5932_v35  ;;  %v2155_v13 = vsel %vm1908_vm4, %v7973_v30, %v5931_v8  ;;  %v2406_v30 = vstv %s5470_s29  ;;  %v2415_v34 = vstv %s5472_s21 }
 0x6c3   : > { %v5935_v40 = vpop.permute.xlu1 %5934  ;;  %v2408_v21 = vmul.f32 %v8733_v47, %v2406_v30  ;;  %v2417_v33 = vmul.f32 %v8736_v3, %v2415_v34  ;;  %v2409_v45 = vmul.f32 %v8478_v44, %v2406_v30  ;;  %v2418_v55 = vmul.f32 %v8492_v48, %v2415_v34 }
 0x6c4   : > { %v5937_v6 = vunpack.i.h.bf16 %v5935_v40  ;;  %v5936_v42 = vunpack.i.l.bf16 %v5935_v40  ;;  %v2836_v18 = vstv %s5488_s26  ;;  %s5490_s1 = spop %5489  ;;  %v2829_v26 = vmul.f32 %v8733_v47, %v2827_v9 }
 0x6c5   : > { %v2419_v23 = vadd.f32 %v2417_v33, %v2408_v21  ;;  %v2420_v19 = vadd.f32 %v2418_v55, %v2409_v45  ;;  %v2838_v51 = vmul.f32 %v8736_v3, %v2836_v18  ;;  %v2845_v43 = vstv %s5490_s1  ;;  %s5492_s14 = spop %5491 }
 0x6c6   : > { %v2157_v52 = vsel %vm1911_vm5, %v2155_v13, %v5936_v42  ;;  %v2158_v36 = vsel %vm1911_vm5, %v2156_v57, %v5937_v6  ;;  %v2830_v63 = vmul.f32 %v8478_v44, %v2827_v9  ;;  %v2839_v40 = vmul.f32 %v8492_v48, %v2836_v18 }
 0x6c7   : > { %v5940_v22 = vpop.permute.xlu1 %5939  ;;  %v2428_v15 = vadd.f32 %v2426_v10, %v2419_v23  ;;  %v2442_v35 = vstv %s8807_s19  ;;  %v2429_v8 = vadd.f32 %v2427_v59, %v2420_v19  ;;  %v2436_v6 = vmul.f32 %v8518_v53, %v2433_v5 }
 0x6c8   : > { %v5942_v38 = vunpack.i.h.bf16 %v5940_v22  ;;  %v5941_v39 = vunpack.i.l.bf16 %v5940_v22  ;;  %v2840_v42 = vadd.f32 %v2838_v51, %v2829_v26  ;;  %v2847_v22 = vmul.f32 %v8745_v27, %v2845_v43  ;;  %s5494_s1 = spop %5493 }
 0x6c9   : > { %v2854_v57 = vstv %s5492_s14  ;;  %v2437_v13 = vadd.f32 %v2435_v24, %v2428_v15  ;;  %v2863_v34 = vstv %s5494_s1  ;;  %s5496_s26 = spop %5495  ;;  %v2460_v55 = vstv %s8811_s7 }
 0x6ca   : > { %v2159_v7 = vsel %vm1914_vm6, %v2157_v52, %v5941_v39  ;;  %v2160_v29 = vsel %vm1914_vm6, %v2158_v36, %v5942_v38  ;;  %v2444_v38 = vmul.f32 %v8757_v31, %v2442_v35  ;;  %v2841_v39 = vadd.f32 %v2839_v40, %v2830_v63 }
 0x6cb   : > { %v2161_v4 = vpack.c.bf16 %v2160_v29, %v2159_v7  ;;  %v2848_v52 = vmul.f32 %v8495_v32, %v2845_v43  ;;  %v2451_v36 = vstv %s8809_s15  ;;  %v2438_v7 = vadd.f32 %v2436_v6, %v2429_v8 }
 0x6cc   : > { %v2445_v29 = vmul.f32 %v8529_v54, %v2442_v35  ;;  %v2856_v30 = vmul.f32 %v8751_v49, %v2854_v57  ;;  %v2446_v21 = vadd.f32 %v2444_v38, %v2437_v13  ;;  %v2453_v33 = vmul.f32 %v8763_v61, %v2451_v36  ;;  %s5498_s29 = spop %5497 }
 0x6cd   : > { %5382 = vmatpush3.bf16.msra.mxu1 %v2161_v4  ;;  %v2849_v4 = vadd.f32 %v2847_v22, %v2840_v42  ;;  %v2850_v37 = vadd.f32 %v2848_v52, %v2841_v39  ;;  %v2857_v45 = vmul.f32 %v8518_v53, %v2854_v57  ;;  %v2454_v18 = vmul.f32 %v8546_v0, %v2451_v36  ;;  %s5500_s21 = spop %5499 }
 0x6ce   : > { %5393 = vmatprep.subr.bf16.mxu1 %v10026_v56  ;;  %v2447_v9 = vadd.f32 %v2445_v29, %v2438_v7  ;;  %v2865_v10 = vmul.f32 %v8757_v31, %v2863_v34  ;;  %v2872_v5 = vstv %s5496_s26  ;;  %v2455_v19 = vadd.f32 %v2453_v33, %v2446_v21  ;;  %s6929_s26 = smov 100  }
 0x6cf   : > { %v2858_v23 = vadd.f32 %v2856_v30, %v2849_v4  ;;  %v2462_v59 = vmul.f32 %v8769_v16, %v2460_v55  ;;  %v2859_v26 = vadd.f32 %v2857_v45, %v2850_v37  ;;  %v2866_v51 = vmul.f32 %v8529_v54, %v2863_v34 }
 0x6d0   : > { %v2469_v43 = vstv %s8813_s9  ;;  %v2456_v15 = vadd.f32 %v2454_v18, %v2447_v9  ;;  %v2463_v24 = vmul.f32 %v8557_v11, %v2460_v55  ;;  %v2874_v40 = vmul.f32 %v8763_v61, %v2872_v5  ;;  %s5502_s6 = spop %5501 }
 0x6d1   : > { %v2867_v63 = vadd.f32 %v2865_v10, %v2858_v23  ;;  %v2881_v35 = vstv %s5498_s29  ;;  %v2464_v8 = vadd.f32 %v2462_v59, %v2455_v19  ;;  %v2471_v6 = vmul.f32 %v8775_v12, %v2469_v43  ;;  %v8855_v19 = vld [vmem:[%s10036_s28 + $0x8] sm:$0xff]  ;;  %s5504_s25 = spop %5503  ;;  %s10039_s29 = smov 16  }
 0x6d2   : > { %v2868_v42 = vadd.f32 %v2866_v51, %v2859_v26  ;;  %v2875_v22 = vmul.f32 %v8546_v0, %v2872_v5  ;;  %v2465_v57 = vadd.f32 %v2463_v24, %v2456_v15  ;;  %v2472_v13 = vmul.f32 %v8621_v17, %v2469_v43  ;;  %s10041_s28 = smov 48  }
 0x6d3   : > { %v2876_v38 = vadd.f32 %v2874_v40, %v2867_v63  ;;  %v2883_v39 = vmul.f32 %v8769_v16, %v2881_v35  ;;  %v2890_v52 = vstv %s5500_s21  ;;  %v2473_v7 = vadd.f32 %v2471_v6, %v2464_v8  ;;  %s6930_s21 = smov 124  }
 0x6d4   : > { %v2877_v36 = vadd.f32 %v2875_v22, %v2868_v42  ;;  %v2884_v29 = vmul.f32 %v8557_v11, %v2881_v35  ;;  %v2090_v4 = vmul.f32 0.57735026, %v8787_v2  ;;  %v2474_v37 = vadd.f32 %v2472_v13, %v2465_v57  ;;  %s5506_s19 = spop %5505 }
 0x6d5   : > { %v2885_v33 = vadd.f32 %v2883_v39, %v2876_v38  ;;  %v2892_v45 = vmul.f32 %v8775_v12, %v2890_v52  ;;  %v2893_v5 = vmul.f32 %v8621_v17, %v2890_v52  ;;  %vm2092_vm11 = vcmp.gt.f32.partialorder %v8855_v19, 0.5  ;;  %s5508_s15 = spop %5507 }
 0x6d6   : > { %v2886_v18 = vadd.f32 %v2884_v29, %v2877_v36  ;;  %v5240_v59 = vadd.f32 -100000.0, %v2090_v4 }
 0x6d7   : > { %v2894_v51 = vadd.f32 %v2892_v45, %v2885_v33  ;;  %v3246_v33 = vstv %s5502_s6  ;;  %s10065_s6 = smov 64  }
 0x6d8   : > { %v2895_v24 = vadd.f32 %v2893_v5, %v2886_v18  ;;  %v8870_v42 = vsel %vm2092_vm11, %v2090_v4, %v5240_v59  ;;  %v3248_v45 = vmul.f32 %v8733_v47, %v3246_v33  ;;  %v3249_v18 = vmul.f32 %v8478_v44, %v3246_v33  ;;  %s5510_s7 = spop %5509 }
 0x6d9   : > { %v2100_v52 = vsel %vm1908_vm4, %v8870_v42, -inf  ;;  %v3273_v59 = vstv %s5508_s15  ;;  %s5512_s9 = spop %5511  ;;  %s10070_s15 = scalar_lea.vmem [#allocation20], %s7846_s2 }
 0x6dc   : > { %s5514_s14 = spop %5513 }
 0x6dd   : > { %s5516_s1 = spop %5515 }
 0x71a   : > { %v2515_v30 = vpop.f32.mrb[0].mxu0 }
 0x71b   : > { %v2516_v34 = vadd.f32 %v2515_v30, %v2473_v7  ;;  %v5391_v21 = vpop.f32.mrb[1].mxu0 }
 0x71c   : > { %v2518_v55 = vpop.f32.mrb[2].mxu0 }
 0x71d   : > { %v2522_v9 = vmul.f32 0.57735026, %v2516_v34  ;;  %v2519_v23 = vadd.f32 %v2518_v55, %v2474_v37  ;;  %v5392_v10 = vpop.f32.mrb[3].mxu0  ;;  %v3255_v37 = vstv %s5504_s25  ;;  %s10066_s25 = smov 96  }
 0x71e   : > { %v3257_v55 = vmul.f32 %v8736_v3, %v3255_v37 }
 0x71f   : > { %v5243_v26 = vadd.f32 -100000.0, %v2522_v9  ;;  %v2523_v2 = vmul.f32 0.57735026, %v2519_v23  ;;  %v3258_v23 = vmul.f32 %v8492_v48, %v3255_v37 }
 0x720   : > { %v3259_v10 = vadd.f32 %v3257_v55, %v3248_v45 }
 0x721   : > { %v5244_v43 = vadd.f32 -100000.0, %v2523_v2  ;;  %v8860_v15 = vsel %vm2091_vm10, %v2522_v9, %v5243_v26  ;;  %v3264_v9 = vstv %s5506_s19  ;;  %v3260_v26 = vadd.f32 %v3258_v23, %v3249_v18 }
 0x722   : > { %v2936_v63 = vpop.f32.mrb[4].mxu0  ;;  %v2528_v40 = vsel %vm1908_vm4, %v8860_v15, -inf  ;;  %v3266_v5 = vmul.f32 %v8745_v27, %v3264_v9 }
 0x723   : > { %v2937_v35 = vadd.f32 %v2936_v63, %v2894_v51  ;;  %2529 = vmax.xlane.f32.xlu0 %v2528_v40  ;;  %v5403_v8 = vpop.f32.mrb[5].mxu0  ;;  %v8866_v6 = vsel %vm2092_vm11, %v2523_v2, %v5244_v43  ;;  %v3267_v2 = vmul.f32 %v8495_v32, %v3264_v9  ;;  %v3275_v43 = vmul.f32 %v8751_v49, %v3273_v59 }
 0x724   : > { %v2939_v22 = vpop.f32.mrb[6].mxu0  ;;  %v2531_v57 = vsel %vm1908_vm4, %v8866_v6, -inf  ;;  %v3268_v51 = vadd.f32 %v3266_v5, %v3259_v10  ;;  %v3276_v40 = vmul.f32 %v8518_v53, %v3273_v59 }
 0x725   : > { %v2943_v13 = vmul.f32 0.57735026, %v2937_v35  ;;  %v2940_v38 = vadd.f32 %v2939_v22, %v2895_v24  ;;  %v5404_v39 = vpop.f32.mrb[7].mxu0  ;;  %2532 = vmax.xlane.f32.xlu1 %v2531_v57  ;;  %v3282_v24 = vstv %s5510_s7  ;;  %v3269_v63 = vadd.f32 %v3267_v2, %v3260_v26  ;;  %s10071_s7 = scalar_lea.vmem [#allocation21], %s7846_s2 }
 0x726   : > { %v3277_v35 = vadd.f32 %v3275_v43, %v3268_v51  ;;  %v3284_v8 = vmul.f32 %v8757_v31, %v3282_v24  ;;  %v3291_v22 = vstv %s5512_s9  ;;  %s10072_s9 = scalar_lea.vmem [#allocation26], %s7883_s23 }
 0x727   : > { %v5247_v36 = vadd.f32 -100000.0, %v2943_v13  ;;  %v2944_v7 = vmul.f32 0.57735026, %v2940_v38  ;;  %2101 = vmax.xlane.f32.xlu0 %v2100_v52  ;;  %v3278_v57 = vadd.f32 %v3276_v40, %v3269_v63  ;;  %v3293_v39 = vmul.f32 %v8763_v61, %v3291_v22 }
 0x728   : > { %v3286_v38 = vadd.f32 %v3284_v8, %v3277_v35  ;;  %v3300_v52 = vstv %s5514_s14  ;;  %s10073_s14 = smov %s10072_s9 }
 0x729   : > { %v5248_v29 = vadd.f32 -100000.0, %v2944_v7  ;;  %v8878_v30 = vsel %vm2091_vm10, %v2943_v13, %v5247_v36  ;;  %v3285_v13 = vmul.f32 %v8529_v54, %v3282_v24  ;;  %v3303_v37 = vmul.f32 %v8557_v11, %v3300_v52 }
 0x72a   : > { %v2949_v4 = vsel %vm1908_vm4, %v8878_v30, -inf }
 0x72b   : > { %2950 = vmax.xlane.f32.xlu0 %v2949_v4  ;;  %v8884_v34 = vsel %vm2092_vm11, %v2944_v7, %v5248_v29  ;;  %v3287_v36 = vadd.f32 %v3285_v13, %v3278_v57  ;;  %v3294_v7 = vmul.f32 %v8546_v0, %v3291_v22  ;;  %v3295_v29 = vadd.f32 %v3293_v39, %v3286_v38  ;;  %v8907_v57 = vpop.permute.xlu1 %5949 }
 0x72c   : > { %v2952_v21 = vsel %vm1908_vm4, %v8884_v34, -inf  ;;  %v3302_v4 = vmul.f32 %v8769_v16, %v3300_v52 }
 0x72d   : > { %2953 = vmax.xlane.f32.xlu1 %v2952_v21  ;;  %v3309_v21 = vstv %s5516_s1  ;;  %v3296_v33 = vadd.f32 %v3294_v7, %v3287_v36  ;;  %s10074_s1 = scalar_lea.vmem [#allocation24], %s7846_s2 }
 0x72e   : > { %v3304_v45 = vadd.f32 %v3302_v4, %v3295_v29  ;;  %v3311_v55 = vmul.f32 %v8775_v12, %v3309_v21  ;;  %v3312_v18 = vmul.f32 %v8621_v17, %v3309_v21 }
 0x72f   : > { %v3305_v9 = vadd.f32 %v3303_v37, %v3296_v33  ;;  %v8912_v39 = vpop.permute.xlu1 %5954  ;;  %v8929_v33 = vpop.permute.xlu0 %2121 }
 0x730   : > { %v3313_v23 = vadd.f32 %v3311_v55, %v3304_v45 }
 0x731   : > { %v3314_v10 = vadd.f32 %v3312_v18, %v3305_v9 }
 0x733   : > { %v8914_v52 = vpop.permute.xlu1 %5959  ;;  %v8931_v37 = vpop.permute.xlu0 %5944 }
 0x737   : > { %v8916_v36 = vpop.permute.xlu1 %5964 }
 0x73b   : > { %v8922_v46 = vpop.permute.xlu1 %5969 }
 0x74f   : > { %v2099_v7 = vpop.xlane.xlu1 %2098 }
 0x750   : > { %v2103_v19 = vsub.f32 %v8792_v50, %v2099_v7 }
 0x752   : > { %v2105_v29 = vmul.f32 1.442695, %v2103_v19 }
 0x754   : > { %6081 = vpow2.f32 %v2105_v29 }
 0x755   : > { %v3355_v5 = vpop.f32.mrb[8].mxu0 }
 0x756   : > { %v3356_v59 = vadd.f32 %v3355_v5, %v3313_v23  ;;  %v5415_v26 = vpop.f32.mrb[9].mxu0 }
 0x757   : > { %v3358_v2 = vpop.f32.mrb[10].mxu0 }
 0x758   : > { %v3362_v51 = vmul.f32 0.57735026, %v3356_v59  ;;  %v3359_v43 = vadd.f32 %v3358_v2, %v3314_v10  ;;  %v5416_v24 = vpop.f32.mrb[11].mxu0 }
 0x75a   : > { %v5251_v63 = vadd.f32 -100000.0, %v3362_v51  ;;  %v3363_v40 = vmul.f32 0.57735026, %v3359_v43 }
 0x75c   : > { %v5252_v35 = vadd.f32 -100000.0, %v3363_v40  ;;  %v3366_v8 = vsel %vm2091_vm10, %v3362_v51, %v5251_v63 }
 0x75d   : > { %v3368_v22 = vsel %vm1908_vm4, %v3366_v8, -inf }
 0x75e   : > { %3369 = vmax.xlane.f32.xlu0 %v3368_v22  ;;  %v3367_v13 = vsel %vm2092_vm11, %v3363_v40, %v5252_v35  ;;  %v8925_v4 = vpop.eup %6081 }
 0x75f   : > { %v3371_v38 = vsel %vm1908_vm4, %v3367_v13, -inf  ;;  %v2109_v21 = vsel %vm1908_vm4, %v8925_v4, 0.0 }
 0x760   : > { %3372 = vmax.xlane.f32.xlu1 %v3371_v38 }
 0x771   : > { %5979 = vrot.lane.b32.xlu1 %v8198_v1, %s6895_s12 }
 0x774   : > { %5974 = vrot.lane.b32.xlu0 %v8175_v60, %s6927_s18 }
 0x793   : > { %2110 = vadd.xlane.f32.xlu0 %v2109_v21 }
 0x7b0   : > { %v2530_v45 = vpop.xlane.xlu0 %2529 }
 0x7b1   : > { %v2534_v55 = vsub.f32 %v8860_v15, %v2530_v45 }
 0x7b2   : > { %v2533_v2 = vpop.xlane.xlu1 %2532 }
 0x7b3   : > { %v2536_v9 = vmul.f32 1.442695, %v2534_v55  ;;  %v2535_v51 = vsub.f32 %v8866_v6, %v2533_v2 }
 0x7b4   : > { %v2102_v18 = vpop.xlane.xlu0 %2101 }
 0x7b5   : > { %6083 = vpow2.f32 %v2536_v9  ;;  %v2104_v50 = vsub.f32 %v8870_v42, %v2102_v18  ;;  %v2538_v63 = vmul.f32 1.442695, %v2535_v51 }
 0x7b7   : > { %v2107_v23 = vmul.f32 1.442695, %v2104_v50 }
 0x7b8   : > { %v2951_v15 = vpop.xlane.xlu0 %2950 }
 0x7b9   : > { %6085 = vpow2.f32 %v2107_v23  ;;  %v2955_v42 = vsub.f32 %v8878_v30, %v2951_v15 }
 0x7ba   : > { %v2954_v24 = vpop.xlane.xlu1 %2953 }
 0x7bb   : > { %v2957_v43 = vmul.f32 1.442695, %v2955_v42  ;;  %v2956_v40 = vsub.f32 %v8884_v34, %v2954_v24 }
 0x7bd   : > { %6087 = vpow2.f32 %v2957_v43  ;;  %v2959_v22 = vmul.f32 1.442695, %v2956_v40 }
 0x7be   : > { %6089 = vpow2.f32 %v2538_v63 }
 0x7bf   : > { %v8935_v10 = vpop.eup %6083  ;;  %6091 = vpow2.f32 %v2959_v22 }
 0x7c0   : > { %v2540_v5 = vsel %vm1908_vm4, %v8935_v10, 0.0 }
 0x7c1   : > { %2541 = vadd.xlane.f32.xlu0 %v2540_v5 }
 0x7c3   : > { %v8939_v59 = vpop.eup %6085 }
 0x7c4   : > { %v2112_v26 = vsel %vm1908_vm4, %v8939_v59, 0.0 }
 0x7c5   : > { %2113 = vadd.xlane.f32.xlu1 %v2112_v26 }
 0x7c7   : > { %v8949_v29 = vpop.eup %6087 }
 0x7c8   : > { %v2961_v6 = vsel %vm1908_vm4, %v8949_v29, 0.0  ;;  %v8953_v30 = vpop.eup %6089 }
 0x7c9   : > { %v2543_v34 = vsel %vm1908_vm4, %v8953_v30, 0.0  ;;  %v8957_v21 = vpop.eup %6091 }
 0x7d6   : > { %5989 = vrot.lane.b32.xlu1 %v8169_v62, %s6929_s26  ;;  %s10075_s26 = scalar_lea.vmem [#allocation29], %s7883_s23 }
 0x7d7   : > { %5984 = vrot.lane.b32.xlu0 %v8002_v41, %s6911_s22  ;;  %s10037_s22 = smov 116  }
 0x7eb   : > { %v3370_v35 = vpop.xlane.xlu0 %3369 }
 0x7ec   : > { %v3374_v38 = vsub.f32 %v3366_v8, %v3370_v35  ;;  %v5951_v35 = vunpack.i.l.bf16 %v8907_v57 }
 0x7ed   : > { %v3373_v62 = vpop.xlane.xlu1 %3372 }
 0x7ee   : > { %v3375_v7 = vsub.f32 %v3367_v13, %v3373_v62  ;;  %v3376_v41 = vmul.f32 1.442695, %v3374_v38  ;;  %v2964_v13 = vsel %vm1908_vm4, %v8957_v21, 0.0  ;;  %v5952_v38 = vunpack.i.h.bf16 %v8907_v57 }
 0x7ef   : > { %v8973_v18 = vpop.permute.xlu0 %5974  ;;  %v5956_v62 = vunpack.i.l.bf16 %v8912_v39 }
 0x7f0   : > { %v3378_v19 = vmul.f32 1.442695, %v3375_v7  ;;  %v5946_v7 = vunpack.i.l.bf16 %v8931_v37 }
 0x7f1   : > { %v8991_v24 = vpop.permute.xlu1 %5979 }
 0x7f2   : > { %6093 = vpow2.f32 %v3378_v19 }
 0x7f3   : > { %6095 = vpow2.f32 %v3376_v41  ;;  %v5957_v41 = vunpack.i.h.bf16 %v8912_v39 }
 0x7f6   : > { %2962 = vadd.xlane.f32.xlu0 %v2961_v6  ;;  %v5947_v6 = vunpack.i.h.bf16 %v8931_v37 }
 0x7fa   : > { %2544 = vadd.xlane.f32.xlu1 %v2543_v34  ;;  %v5962_v34 = vunpack.i.h.bf16 %v8914_v52 }
 0x7fc   : > { %v8959_v8 = vpop.eup %6093 }
 0x7fd   : > { %v3383_v45 = vsel %vm1908_vm4, %v8959_v8, 0.0  ;;  %v8965_v55 = vpop.eup %6095 }
 0x7fe   : > { %2965 = vadd.xlane.f32.xlu1 %v2964_v13  ;;  %3384 = vadd.xlane.f32.xlu0 %v3383_v45  ;;  %v3380_v9 = vsel %vm1908_vm4, %v8965_v55, 0.0  ;;  %v5961_v13 = vunpack.i.l.bf16 %v8914_v52  ;;  %v2578_v45 = vsel %vm1908_vm4, %v5946_v7, %v5951_v35 }
 0x802   : > { %3381 = vadd.xlane.f32.xlu1 %v3380_v9 }
 0x813   : > { %5999 = vrot.lane.b32.xlu1 %v8198_v1, %s6927_s18 }
 0x814   : > { %5994 = vrot.lane.b32.xlu0 %v8175_v60, %s6928_s24 }
 0x820   : > { %v2111_v50 = vpop.xlane.xlu0 %2110 }
 0x821   : > { %6097 = vrcp.f32 %v2111_v50  ;;  %v2579_v50 = vsel %vm1908_vm4, %v5947_v6, %v5952_v38 }
 0x822   : > { %v2581_v39 = vsel %vm1911_vm5, %v2579_v50, %v5957_v41 }
 0x82b   : > { %v6098_v23 = vpop.eup %6097 }
 0x82c   : > { %v2117_v5 = vmul.f32 %v6098_v23, %v8925_v4  ;;  %v2580_v23 = vsel %vm1911_vm5, %v2578_v45, %v5956_v62 }
 0x82e   : > { %v8977_v26 = vmul.f32 %v8929_v33, %v2117_v5  ;;  %v2582_v5 = vsel %vm1914_vm6, %v2580_v23, %v5961_v13 }
 0x830   : > { %v2207_v15 = vmul.f32 %v8733_v47, %v8977_v26  ;;  %v2211_v1 = vmul.f32 %v8745_v27, %v8977_v26  ;;  %v2209_v60 = vmul.f32 %v8736_v3, %v8977_v26  ;;  %v2213_v4 = vmul.f32 %v8751_v49, %v8977_v26 }
 0x831   : > { %v2215_v35 = vmul.f32 %v8757_v31, %v8977_v26  ;;  %v2219_v23 = vmul.f32 %v8769_v16, %v8977_v26 }
 0x832   : > { %v2223_v42 = vsel %vm1908_vm4, %v2207_v15, 0.0  ;;  %v2235_v2 = vsel %vm1908_vm4, %v2211_v1, 0.0  ;;  %v2229_v51 = vsel %vm1908_vm4, %v2209_v60, 0.0  ;;  %v2241_v43 = vsel %vm1908_vm4, %v2213_v4, 0.0 }
 0x833   : > { %2224 = vadd.xlane.f32.xlu0 %v2223_v42  ;;  %v2583_v15 = vsel %vm1914_vm6, %v2581_v39, %v5962_v34  ;;  %v2247_v62 = vsel %vm1908_vm4, %v2215_v35, 0.0  ;;  %v2217_v34 = vmul.f32 %v8763_v61, %v8977_v26  ;;  %v2259_v39 = vsel %vm1908_vm4, %v2219_v23, 0.0 }
 0x834   : > { %v2584_v4 = vpack.c.bf16 %v2583_v15, %v2582_v5  ;;  %v5977_v35 = vunpack.i.h.bf16 %v8973_v18 }
 0x835   : > { %v2253_v45 = vsel %vm1908_vm4, %v2217_v34, 0.0  ;;  %v5981_v34 = vunpack.i.l.bf16 %v8991_v24 }
 0x837   : > { %2236 = vadd.xlane.f32.xlu1 %v2235_v2  ;;  %2230 = vadd.xlane.f32.xlu0 %v2229_v51 }
 0x83b   : > { %2242 = vadd.xlane.f32.xlu1 %v2241_v43 }
 0x84e   : > { %v2542_v63 = vpop.xlane.xlu0 %2541 }
 0x84f   : > { %6099 = vrcp.f32 %v2542_v63 }
 0x852   : > { %v2114_v40 = vpop.xlane.xlu1 %2113  ;;  %v9062_v5 = vpop.permute.xlu0 %5984 }
 0x853   : > { %6101 = vrcp.f32 %v2114_v40 }
 0x859   : > { %v6100_v22 = vpop.eup %6099 }
 0x85a   : > { %v2548_v19 = vmul.f32 %v6100_v22, %v8935_v10 }
 0x85c   : > { %v9004_v9 = vmul.f32 %v2548_v19, %v8929_v33 }
 0x85d   : > { %v6102_v57 = vpop.eup %6101 }
 0x85e   : > { %v2118_v10 = vmul.f32 %v6102_v57, %v8939_v59  ;;  %v2642_v37 = vmul.f32 %v8769_v16, %v9004_v9  ;;  %v2630_v52 = vmul.f32 %v8733_v47, %v9004_v9  ;;  %v2644_v59 = vmul.f32 %v8775_v12, %v9004_v9 }
 0x85f   : > { %v2632_v2 = vmul.f32 %v8736_v3, %v9004_v9  ;;  %v2634_v7 = vmul.f32 %v8745_v27, %v9004_v9  ;;  %v2636_v57 = vmul.f32 %v8751_v49, %v9004_v9 }
 0x860   : > { %v9017_v42 = vmul.f32 %v8784_v28, %v2118_v10  ;;  %v2682_v1 = vsel %vm1908_vm4, %v2642_v37, 0.0  ;;  %v2646_v60 = vsel %vm1908_vm4, %v2630_v52, 0.0  ;;  %v2688_v43 = vsel %vm1908_vm4, %v2644_v59, 0.0 }
 0x861   : > { %2683 = vadd.xlane.f32.xlu0 %v2682_v1  ;;  %2647 = vadd.xlane.f32.xlu1 %v2646_v60  ;;  %v2652_v40 = vsel %vm1908_vm4, %v2632_v2, 0.0  ;;  %v2658_v6 = vsel %vm1908_vm4, %v2634_v7, 0.0  ;;  %v2664_v50 = vsel %vm1908_vm4, %v2636_v57, 0.0  ;;  %v2638_v10 = vmul.f32 %v8757_v31, %v9004_v9  ;;  %v5990_v60 = vpop.permute.xlu1 %5989 }
 0x862   : > { %v2162_v51 = vpack.c.bf16 %v9017_v42, %v8977_v26  ;;  %v2210_v63 = vmul.f32 %v8492_v48, %v9017_v42  ;;  %v2212_v38 = vmul.f32 %v8495_v32, %v9017_v42  ;;  %v2214_v19 = vmul.f32 %v8518_v53, %v9017_v42 }
 0x863   : > { %v2670_v37 = vsel %vm1908_vm4, %v2638_v10, 0.0  ;;  %v2221_v52 = vmul.f32 %v8775_v12, %v8977_v26  ;;  %v2640_v1 = vmul.f32 %v8763_v61, %v9004_v9 }
 0x864   : > { %5384 = vmatmul.mubr.msk.bf16.vlgmr.msra.gmra.mrb[12].mxu1 %vm1908_vm4, %v2162_v51  ;;  %v2232_v22 = vsel %vm1908_vm4, %v2210_v63, 0.0  ;;  %v2238_v41 = vsel %vm1908_vm4, %v2212_v38, 0.0  ;;  %v2244_v13 = vsel %vm1908_vm4, %v2214_v19, 0.0  ;;  %v2208_v51 = vmul.f32 %v8478_v44, %v9017_v42 }
 0x865   : > { %5394 = vmatpush3.bf16.msra.mxu1 %v2584_v4  ;;  %2689 = vadd.xlane.f32.xlu0 %v2688_v43  ;;  %v2265_v15 = vsel %vm1908_vm4, %v2221_v52, 0.0  ;;  %v2676_v2 = vsel %vm1908_vm4, %v2640_v1, 0.0  ;;  %v5972_v43 = vunpack.i.h.bf16 %v8922_v46  ;;  %v5971_v63 = vunpack.i.l.bf16 %v8922_v46 }
 0x866   : > { %2653 = vadd.xlane.f32.xlu1 %v2652_v40  ;;  %5395 = vmatprep.mubr.msk.bf16.mxu1 %vm6885_vm1, %v10026_v56  ;;  %v2226_v26 = vsel %vm1908_vm4, %v2208_v51, 0.0  ;;  %v5967_v38 = vunpack.i.h.bf16 %v8916_v36  ;;  %v5987_v52 = vunpack.i.h.bf16 %v9062_v5 }
 0x867   : > { %5405 = vmatprep.subr.bf16.mxu1 %v10026_v56 }
 0x868   : > { %v2998_v19 = vsel %vm1908_vm4, %v5967_v38, %v5972_v43 }
 0x869   : > { %2233 = vadd.xlane.f32.xlu0 %v2232_v22  ;;  %v5976_v22 = vunpack.i.l.bf16 %v8973_v18 }
 0x86a   : > { %2248 = vadd.xlane.f32.xlu1 %v2247_v62  ;;  %v5966_v62 = vunpack.i.l.bf16 %v8916_v36 }
 0x86d   : > { %2239 = vadd.xlane.f32.xlu0 %v2238_v41  ;;  %v2997_v41 = vsel %vm1908_vm4, %v5966_v62, %v5971_v63 }
 0x86e   : > { %2659 = vadd.xlane.f32.xlu1 %v2658_v6  ;;  %v5982_v6 = vunpack.i.h.bf16 %v8991_v24  ;;  %v2999_v18 = vsel %vm1911_vm5, %v2997_v41, %v5976_v22 }
 0x86f   : > { %v3001_v36 = vsel %vm1914_vm6, %v2999_v18, %v5981_v34 }
 0x871   : > { %2245 = vadd.xlane.f32.xlu0 %v2244_v13 }
 0x872   : > { %2254 = vadd.xlane.f32.xlu1 %v2253_v45  ;;  %v3000_v45 = vsel %vm1911_vm5, %v2998_v19, %v5977_v35 }
 0x873   : > { %v3002_v23 = vsel %vm1914_vm6, %v3000_v45, %v5982_v6  ;;  %v2216_v45 = vmul.f32 %v8529_v54, %v9017_v42 }
 0x876   : > { %2665 = vadd.xlane.f32.xlu1 %v2664_v50 }
 0x87a   : > { %2260 = vadd.xlane.f32.xlu1 %v2259_v39 }
 0x87e   : > { %2671 = vadd.xlane.f32.xlu1 %v2670_v37 }
 0x882   : > { %2266 = vadd.xlane.f32.xlu1 %v2265_v15  ;;  %v5992_v15 = vunpack.i.h.bf16 %v5990_v60 }
 0x883   : > { %v2963_v59 = vpop.xlane.xlu0 %2962 }
 0x884   : > { %6103 = vrcp.f32 %v2963_v59  ;;  %v3003_v59 = vpack.c.bf16 %v3002_v23, %v3001_v36  ;;  %v3417_v62 = vsel %vm1908_vm4, %v5987_v52, %v5992_v15 }
 0x886   : > { %2677 = vadd.xlane.f32.xlu1 %v2676_v2  ;;  %v5991_v2 = vunpack.i.l.bf16 %v5990_v60 }
 0x887   : > { %v2545_v4 = vpop.xlane.xlu1 %2544 }
 0x888   : > { %6105 = vrcp.f32 %v2545_v4 }
 0x88a   : > { %2227 = vadd.xlane.f32.xlu1 %v2226_v26  ;;  %v5986_v26 = vunpack.i.l.bf16 %v9062_v5 }
 0x88b   : > { %v2966_v40 = vpop.xlane.xlu1 %2965  ;;  %v3385_v46 = vpop.xlane.xlu0 %3384 }
 0x88c   : > { %6107 = vrcp.f32 %v2966_v40  ;;  %v3416_v38 = vsel %vm1908_vm4, %v5986_v26, %v5991_v2  ;;  %v2218_v2 = vmul.f32 %v8546_v0, %v9017_v42 }
 0x88e   : > { %v6104_v7 = vpop.eup %6103  ;;  %v2256_v26 = vsel %vm1908_vm4, %v2218_v2, 0.0 }
 0x88f   : > { %v3382_v13 = vpop.xlane.xlu1 %3381  ;;  %v2969_v50 = vmul.f32 %v6104_v7, %v8949_v29  ;;  %v5995_v24 = vpop.permute.xlu0 %5994 }
 0x890   : > { %6109 = vrcp.f32 %v3382_v13  ;;  %v5997_v43 = vunpack.i.h.bf16 %v5995_v24  ;;  %v5996_v63 = vunpack.i.l.bf16 %v5995_v24 }
 0x891   : > { %6111 = vrcp.f32 %v3385_v46  ;;  %v9092_v1 = vmul.f32 %v2969_v50, %v8929_v33 }
 0x892   : > { %v6106_v57 = vpop.eup %6105  ;;  %v3418_v19 = vsel %vm1911_vm5, %v3416_v38, %v5996_v63  ;;  %v3419_v6 = vsel %vm1911_vm5, %v3417_v62, %v5997_v43  ;;  %vm3663_vm5 = vcmask 1045509  }
 0x893   : > { %v2549_v39 = vmul.f32 %v6106_v57, %v8953_v30  ;;  %v6000_v29 = vpop.permute.xlu1 %5999  ;;  %v3049_v5 = vmul.f32 %v8733_v47, %v9092_v1  ;;  %v3051_v50 = vmul.f32 %v8736_v3, %v9092_v1 }
 0x894   : > { %v6002_v35 = vunpack.i.h.bf16 %v6000_v29  ;;  %v6001_v22 = vunpack.i.l.bf16 %v6000_v29 }
 0x895   : > { %v9088_v10 = vmul.f32 %v2549_v39, %v8784_v28  ;;  %v3065_v57 = vsel %vm1908_vm4, %v3049_v5, 0.0  ;;  %v3071_v15 = vsel %vm1908_vm4, %v3051_v50, 0.0 }
 0x896   : > { %v6108_v37 = vpop.eup %6107  ;;  %v3420_v34 = vsel %vm1914_vm6, %v3418_v19, %v6001_v22  ;;  %v3421_v46 = vsel %vm1914_vm6, %v3419_v6, %v6002_v35  ;;  %v2220_v22 = vmul.f32 %v8557_v11, %v9017_v42  ;;  %v2222_v19 = vmul.f32 %v8621_v17, %v9017_v42 }
 0x897   : > { %v2970_v51 = vmul.f32 %v6108_v37, %v8957_v21  ;;  %v2585_v30 = vpack.c.bf16 %v9088_v10, %v9004_v9  ;;  %v2631_v4 = vmul.f32 %v8478_v44, %v9088_v10  ;;  %v2645_v40 = vmul.f32 %v8621_v17, %v9088_v10 }
 0x898   : > { %v2633_v21 = vmul.f32 %v8492_v48, %v9088_v10  ;;  %v3422_v39 = vpack.c.bf16 %v3421_v46, %v3420_v34  ;;  %v2250_v37 = vsel %vm1908_vm4, %v2216_v45, 0.0  ;;  %v2635_v52 = vmul.f32 %v8495_v32, %v9088_v10 }
 0x899   : > { %5396 = vmatmul.mubr.msk.bf16.vlgmr.msra.gmra.mrb[16].mxu1 %vm1908_vm4, %v2585_v30  ;;  %v2649_v60 = vsel %vm1908_vm4, %v2631_v4, 0.0  ;;  %v2691_v9 = vsel %vm1908_vm4, %v2645_v40, 0.0  ;;  %v9112_v7 = vmul.f32 %v2970_v51, %v8784_v28  ;;  %v3055_v30 = vmul.f32 %v8751_v49, %v9092_v1 }
 0x89a   : > { %5406 = vmatpush3.bf16.msra.mxu1 %v3003_v59  ;;  %2650 = vadd.xlane.f32.xlu0 %v2649_v60  ;;  %v6110_v41 = vpop.eup %6109  ;;  %v2655_v13 = vsel %vm1908_vm4, %v2633_v21, 0.0  ;;  %v2661_v59 = vsel %vm1908_vm4, %v2635_v52, 0.0  ;;  %v2637_v43 = vmul.f32 %v8518_v53, %v9088_v10  ;;  %v3059_v40 = vmul.f32 %v8763_v61, %v9092_v1 }
 0x89b   : > { %2692 = vadd.xlane.f32.xlu1 %v2691_v9  ;;  %5407 = vmatprep.mubr.msk.bf16.mxu1 %vm6885_vm1, %v10026_v56  ;;  %v6112_v18 = vpop.eup %6111  ;;  %v3388_v36 = vmul.f32 %v6110_v41, %v8965_v55  ;;  %v3004_v23 = vpack.c.bf16 %v9112_v7, %v9092_v1  ;;  %v3053_v55 = vmul.f32 %v8745_v27, %v9092_v1  ;;  %v3083_v63 = vsel %vm1908_vm4, %v3055_v30, 0.0 }
 0x89c   : > { %5417 = vmatprep.subr.bf16.mxu1 %v10026_v56  ;;  %v3389_v24 = vmul.f32 %v6112_v18, %v8959_v8  ;;  %v2667_v35 = vsel %vm1908_vm4, %v2637_v43, 0.0  ;;  %v3095_v60 = vsel %vm1908_vm4, %v3059_v40, 0.0  ;;  %v3060_v21 = vmul.f32 %v8546_v0, %v9112_v7 }
 0x89d   : > { %v9139_v29 = vmul.f32 %v3388_v36, %v8929_v33  ;;  %v3077_v51 = vsel %vm1908_vm4, %v3053_v55, 0.0  ;;  %v2262_v9 = vsel %vm1908_vm4, %v2220_v22, 0.0  ;;  %v2639_v5 = vmul.f32 %v8529_v54, %v9088_v10 }
 0x89e   : > { %2656 = vadd.xlane.f32.xlu0 %v2655_v13  ;;  %v9145_v8 = vmul.f32 %v3389_v24, %v8784_v28  ;;  %v3098_v38 = vsel %vm1908_vm4, %v3060_v21, 0.0  ;;  %v2268_v46 = vsel %vm1908_vm4, %v2222_v19, 0.0  ;;  %v2641_v13 = vmul.f32 %v8546_v0, %v9088_v10 }
 0x89f   : > { %3066 = vadd.xlane.f32.xlu1 %v3065_v57  ;;  %v3468_v62 = vmul.f32 %v8733_v47, %v9139_v29  ;;  %v2673_v41 = vsel %vm1908_vm4, %v2639_v5, 0.0  ;;  %v3470_v34 = vmul.f32 %v8736_v3, %v9139_v29  ;;  %v3474_v45 = vmul.f32 %v8751_v49, %v9139_v29 }
 0x8a0   : > { %v3423_v4 = vpack.c.bf16 %v9145_v8, %v9139_v29  ;;  %v2679_v42 = vsel %vm1908_vm4, %v2641_v13, 0.0  ;;  %v2643_v18 = vmul.f32 %v8557_v11, %v9088_v10  ;;  %v3473_v57 = vmul.f32 %v8495_v32, %v9145_v8 }
 0x8a1   : > { %5408 = vmatmul.mubr.msk.bf16.vlgmr.msra.gmra.mrb[20].mxu1 %vm1908_vm4, %v3004_v23  ;;  %v3484_v6 = vsel %vm1908_vm4, %v3468_v62, 0.0  ;;  %v3490_v47 = vsel %vm1908_vm4, %v3470_v34, 0.0  ;;  %v3502_v3 = vsel %vm1908_vm4, %v3474_v45, 0.0  ;;  %v3057_v36 = vmul.f32 %v8757_v31, %v9092_v1 }
 0x8a2   : > { %5418 = vmatpush3.bf16.msra.mxu1 %v3422_v39  ;;  %2251 = vadd.xlane.f32.xlu0 %v2250_v37  ;;  %v2685_v50 = vsel %vm1908_vm4, %v2643_v18, 0.0  ;;  %v3499_v49 = vsel %vm1908_vm4, %v3473_v57, 0.0  ;;  %v3050_v24 = vmul.f32 %v8478_v44, %v9112_v7  ;;  %v3052_v55 = vmul.f32 %v8492_v48, %v9112_v7 }
 0x8a3   : > { %3072 = vadd.xlane.f32.xlu1 %v3071_v15  ;;  %5419 = vmatprep.mubr.msk.bf16.mxu1 %vm6885_vm1, %v10026_v56  ;;  %v3089_v10 = vsel %vm1908_vm4, %v3057_v36, 0.0  ;;  %v3054_v2 = vmul.f32 %v8495_v32, %v9112_v7  ;;  %v3056_v30 = vmul.f32 %v8518_v53, %v9112_v7  ;;  %v3469_v40 = vmul.f32 %v8478_v44, %v9145_v8 }
 0x8a4   : > { %5423 = vmatprep.subr.bf16.mxu1 %v10026_v56  ;;  %v3068_v15 = vsel %vm1908_vm4, %v3050_v24, 0.0  ;;  %v3471_v22 = vmul.f32 %v8492_v48, %v9145_v8  ;;  %vm3665_vm6 = vcmask 1046534  }
 0x8a6   : > { %2662 = vadd.xlane.f32.xlu0 %v2661_v59  ;;  %v3074_v59 = vsel %vm1908_vm4, %v3052_v55, 0.0  ;;  %v3493_v21 = vsel %vm1908_vm4, %v3471_v22, 0.0 }
 0x8a7   : > { %3078 = vadd.xlane.f32.xlu1 %v3077_v51  ;;  %v3080_v51 = vsel %vm1908_vm4, %v3054_v2, 0.0 }
 0x8a9   : > { %5420 = vmatmul.mubr.msk.bf16.vlgmr.msra.gmra.mrb[24].mxu1 %vm1908_vm4, %v3423_v4  ;;  %v3086_v4 = vsel %vm1908_vm4, %v3056_v30, 0.0 }
 0x8aa   : > { %2257 = vadd.xlane.f32.xlu0 %v2256_v26  ;;  %5427 = vmatprep.mubr.msk.bf16.mxu1 %vm6885_vm1, %v10026_v56  ;;  %v3058_v26 = vmul.f32 %v8529_v54, %v9112_v7 }
 0x8ab   : > { %3084 = vadd.xlane.f32.xlu1 %v3083_v63  ;;  %v3472_v63 = vmul.f32 %v8745_v27, %v9139_v29 }
 0x8ac   : > { %v3092_v43 = vsel %vm1908_vm4, %v3058_v26, 0.0 }
 0x8ad   : > { %v3496_v32 = vsel %vm1908_vm4, %v3472_v63, 0.0 }
 0x8ae   : > { %2668 = vadd.xlane.f32.xlu0 %v2667_v35  ;;  %v3487_v35 = vsel %vm1908_vm4, %v3469_v40, 0.0 }
 0x8af   : > { %3096 = vadd.xlane.f32.xlu1 %v3095_v60 }
 0x8b2   : > { %2263 = vadd.xlane.f32.xlu0 %v2262_v9 }
 0x8b3   : > { %3099 = vadd.xlane.f32.xlu1 %v3098_v38 }
 0x8b6   : > { %2674 = vadd.xlane.f32.xlu0 %v2673_v41 }
 0x8b7   : > { %3485 = vadd.xlane.f32.xlu1 %v3484_v6 }
 0x8ba   : > { %2269 = vadd.xlane.f32.xlu0 %v2268_v46 }
 0x8bb   : > { %3491 = vadd.xlane.f32.xlu1 %v3490_v47 }
 0x8be   : > { %2680 = vadd.xlane.f32.xlu0 %v2679_v42 }
 0x8bf   : > { %3503 = vadd.xlane.f32.xlu1 %v3502_v3 }
 0x8c0   : > { %v2225_v60 = vpop.xlane.xlu0 %2224 }
 0x8c2   : > { %2686 = vadd.xlane.f32.xlu0 %v2685_v50 }
 0x8c3   : > { %3500 = vadd.xlane.f32.xlu1 %v3499_v49 }
 0x8c4   : > { %v2237_v23 = vpop.xlane.xlu1 %2236  ;;  %v2231_v9 = vpop.xlane.xlu0 %2230 }
 0x8c5   : > { %v3604_v39 = vrot.slane %v2237_v23, %v8085_v14  ;;  %v3595_v6 = vrot.slane %v2231_v9, %v8085_v14 }
 0x8c6   : > { %3090 = vadd.xlane.f32.xlu0 %v3089_v10 }
 0x8c8   : > { %v2243_v37 = vpop.xlane.xlu1 %2242 }
 0x8c9   : > { %v3613_v52 = vrot.slane %v2243_v37, %v8085_v14 }
 0x8ca   : > { %3069 = vadd.xlane.f32.xlu0 %v3068_v15 }
 0x8ce   : > { %3075 = vadd.xlane.f32.xlu0 %v3074_v59 }
 0x8d2   : > { %3081 = vadd.xlane.f32.xlu0 %v3080_v51 }
 0x8d6   : > { %3087 = vadd.xlane.f32.xlu0 %v3086_v4  ;;  %v3584_v4 = vrot.slane %v2225_v60, %v8085_v14 }
 0x8da   : > { %3093 = vadd.xlane.f32.xlu0 %v3092_v43 }
 0x8de   : > { %3497 = vadd.xlane.f32.xlu0 %v3496_v32 }
 0x8e2   : > { %3488 = vadd.xlane.f32.xlu0 %v3487_v35 }
 0x8e6   : > { %3494 = vadd.xlane.f32.xlu0 %v3493_v21 }
 0x8ee   : > { %v2648_v5 = vpop.xlane.xlu1 %2647  ;;  %v9225_v27 = vpop.xlane.xlu0 %2683 }
 0x8ef   : > { %v3689_v38 = vrot.slane %v2648_v5, %v8085_v14 }
 0x8f2   : > { %v2690_v62 = vpop.xlane.xlu0 %2689 }
 0x8f3   : > { %v2654_v41 = vpop.xlane.xlu1 %2653  ;;  %v3752_v9 = vrot.slane %v2690_v62, %v8085_v14 }
 0x8f4   : > { %v3698_v44 = vrot.slane %v2654_v41, %v8085_v14 }
 0x8f6   : > { %v2234_v19 = vpop.xlane.xlu0 %2233 }
 0x8f7   : > { %v2249_v48 = vpop.xlane.xlu1 %2248  ;;  %v3599_v34 = vrot.slane %v2234_v19, %v8099_v20 }
 0x8f8   : > { %v3622_v46 = vrot.slane %v2249_v48, %v8085_v14 }
 0x8f9   : > { %v3600_v13 = vsel %vm3590_vm12, %v3599_v34, %v3595_v6 }
 0x8fa   : > { %v2240_v47 = vpop.xlane.xlu0 %2239 }
 0x8fb   : > { %v2660_v45 = vpop.xlane.xlu1 %2659  ;;  %v3608_v42 = vrot.slane %v2240_v47, %v8099_v20 }
 0x8fc   : > { %v3707_v18 = vrot.slane %v2660_v45, %v8085_v14 }
 0x8fd   : > { %v3609_v3 = vsel %vm3590_vm12, %v3608_v42, %v3604_v39 }
 0x8fe   : > { %v2246_v57 = vpop.xlane.xlu0 %2245 }
 0x8ff   : > { %v2255_v50 = vpop.xlane.xlu1 %2254  ;;  %v3617_v36 = vrot.slane %v2246_v57, %v8099_v20 }
 0x900   : > { %v3631_v49 = vrot.slane %v2255_v50, %v8085_v14 }
 0x901   : > { %v3618_v23 = vsel %vm3590_vm12, %v3617_v36, %v3613_v52 }
 0x903   : > { %v9239_v10 = vpop.xlane.xlu1 %2665 }
 0x904   : > { %v3716_v24 = vrot.slane %v9239_v10, %v8085_v14 }
 0x907   : > { %v9243_v37 = vpop.xlane.xlu1 %2260 }
 0x908   : > { %v3640_v15 = vrot.slane %v9243_v37, %v8085_v14 }
 0x90b   : > { %v9247_v55 = vpop.xlane.xlu1 %2671 }
 0x90c   : > { %v3725_v39 = vrot.slane %v9247_v55, %v8085_v14 }
 0x90f   : > { %v9251_v59 = vpop.xlane.xlu1 %2266 }
 0x910   : > { %v3649_v52 = vrot.slane %v9251_v59, %v8085_v14 }
 0x913   : > { %v9255_v2 = vpop.xlane.xlu1 %2677 }
 0x914   : > { %v3734_v51 = vrot.slane %v9255_v2, %v8085_v14 }
 0x917   : > { %v2228_v30 = vpop.xlane.xlu1 %2227 }
 0x918   : > { %v3589_v26 = vrot.slane %v2228_v30, %v8099_v20 }
 0x91a   : > { %v3591_v43 = vsel %vm3590_vm12, %v3589_v26, %v3584_v4 }
 0x91b   : > { %v3656_v63 = vsel %vm3655_vm13, %v3600_v13, %v3591_v43 }
 0x91c   : > { %v3658_v32 = vsel %vm3657_vm14, %v3609_v3, %v3656_v63 }
 0x91d   : > { %v3660_v40 = vsel %vm3659_vm15, %v3618_v23, %v3658_v32 }
 0x927   : > { %v2651_v35 = vpop.xlane.xlu0 %2650 }
 0x928   : > { %v2693_v22 = vpop.xlane.xlu1 %2692  ;;  %v3693_v21 = vrot.slane %v2651_v35, %v8099_v20 }
 0x929   : > { %v3756_v60 = vrot.slane %v2693_v22, %v8099_v20 }
 0x92a   : > { %v3694_v5 = vsel %vm3590_vm12, %v3693_v21, %v3689_v38 }
 0x92b   : > { %v9270_v41 = vsel %vm3590_vm12, %v3756_v60, %v3752_v9  ;;  %v2657_v19 = vpop.xlane.xlu0 %2656 }
 0x92c   : > { %v9272_v6 = vpop.xlane.xlu1 %3066  ;;  %v3702_v48 = vrot.slane %v2657_v19, %v8099_v20 }
 0x92d   : > { %v3785_v34 = vrot.slane %v9272_v6, %v8085_v14 }
 0x92e   : > { %v3703_v13 = vsel %vm3590_vm12, %v3702_v48, %v3698_v44 }
 0x92f   : > { %v3758_v47 = vsel %vm3655_vm13, %v3703_v13, %v3694_v5  ;;  %v2252_v62 = vpop.xlane.xlu0 %2251 }
 0x930   : > { %v9279_v45 = vpop.xlane.xlu1 %3072  ;;  %v3626_v38 = vrot.slane %v2252_v62, %v8099_v20 }
 0x931   : > { %v3794_v42 = vrot.slane %v9279_v45, %v8085_v14 }
 0x932   : > { %v3627_v3 = vsel %vm3590_vm12, %v3626_v38, %v3622_v46 }
 0x933   : > { %v3662_v57 = vsel %vm3661_vm0, %v3627_v3, %v3660_v40  ;;  %v2663_v50 = vpop.xlane.xlu0 %2662 }
 0x934   : > { %v9286_v36 = vpop.xlane.xlu1 %3078  ;;  %v3711_v44 = vrot.slane %v2663_v50, %v8099_v20 }
 0x935   : > { %v3803_v23 = vrot.slane %v9286_v36, %v8085_v14 }
 0x936   : > { %v3712_v30 = vsel %vm3590_vm12, %v3711_v44, %v3707_v18 }
 0x937   : > { %v3759_v4 = vsel %vm3657_vm14, %v3712_v30, %v3758_v47  ;;  %v2258_v26 = vpop.xlane.xlu0 %2257  ;;  %v9293_v43 = vpop.f32.mrb[12].mxu1 }
 0x938   : > { %v9295_v63 = vpop.xlane.xlu1 %3084  ;;  %v3635_v46 = vrot.slane %v2258_v26, %v8099_v20  ;;  %3992 = vrot.lane.b32.xlu0 %v9293_v43, %s6895_s12  ;;  %v5385_v32 = vpop.f32.mrb[13].mxu1 }
 0x939   : > { %v3812_v40 = vrot.slane %v9295_v63, %v8085_v14  ;;  %v9302_v35 = vpop.f32.mrb[14].mxu1 }
 0x93a   : > { %v3636_v18 = vsel %vm3590_vm12, %v3635_v46, %v3631_v49  ;;  %3994 = vrot.lane.b32.xlu1 %v9302_v35, %s6895_s12  ;;  %v5386_v22 = vpop.f32.mrb[15].mxu1 }
 0x93b   : > { %v2669_v21 = vpop.xlane.xlu0 %2668  ;;  %v3664_v9 = vsel %vm3663_vm5, %v3636_v18, %v3662_v57 }
 0x93c   : > { %v3097_v60 = vpop.xlane.xlu1 %3096  ;;  %v3720_v5 = vrot.slane %v2669_v21, %v8099_v20  ;;  %4024 = vrot.lane.b32.xlu0 %v9293_v43, %s6927_s18 }
 0x93d   : > { %v3830_v19 = vrot.slane %v3097_v60, %v8085_v14 }
 0x93e   : > { %v3721_v49 = vsel %vm3590_vm12, %v3720_v5, %v3716_v24  ;;  %4026 = vrot.lane.b32.xlu1 %v9302_v35, %s6927_s18 }
 0x93f   : > { %v3760_v48 = vsel %vm3659_vm15, %v3721_v49, %v3759_v4  ;;  %v2264_v13 = vpop.xlane.xlu0 %2263 }
 0x940   : > { %v3100_v47 = vpop.xlane.xlu1 %3099  ;;  %v3644_v62 = vrot.slane %v2264_v13, %v8099_v20  ;;  %4054 = vrot.lane.b32.xlu0 %v9293_v43, %s6928_s24 }
 0x941   : > { %v3834_v38 = vrot.slane %v3100_v47, %v8099_v20 }
 0x942   : > { %v3645_v10 = vsel %vm3590_vm12, %v3644_v62, %v3640_v15  ;;  %4056 = vrot.lane.b32.xlu1 %v9302_v35, %s6928_s24  ;;  %s10038_s24 = smov 120  }
 0x943   : > { %v3835_v24 = vsel %vm3590_vm12, %v3834_v38, %v3830_v19  ;;  %v2675_v3 = vpop.xlane.xlu0 %2674  ;;  %v3666_v57 = vsel %vm3665_vm6, %v3645_v10, %v3664_v9 }
 0x944   : > { %v9331_v50 = vpop.xlane.xlu1 %3485  ;;  %v3729_v44 = vrot.slane %v2675_v3, %v8099_v20 }
 0x945   : > { %v3881_v30 = vrot.slane %v9331_v50, %v8085_v14 }
 0x946   : > { %v3730_v37 = vsel %vm3590_vm12, %v3729_v44, %v3725_v39 }
 0x947   : > { %v3761_v15 = vsel %vm3661_vm0, %v3730_v37, %v3760_v48  ;;  %v2270_v4 = vpop.xlane.xlu0 %2269 }
 0x948   : > { %v9341_v26 = vpop.xlane.xlu1 %3491  ;;  %v3653_v46 = vrot.slane %v2270_v4, %v8099_v20 }
 0x949   : > { %v3890_v32 = vrot.slane %v9341_v26, %v8085_v14 }
 0x94a   : > { %v3654_v18 = vsel %vm3590_vm12, %v3653_v46, %v3649_v52  ;;  %v3743_v52 = vrot.slane %v9225_v27, %v8085_v14 }
 0x94b   : > { %v2681_v22 = vpop.xlane.xlu0 %2680  ;;  %v9351_v55 = vsel %vm3667_vm7, %v3654_v18, %v3666_v57 }
 0x94c   : > { %v9353_v39 = vpop.xlane.xlu1 %3503  ;;  %v3738_v21 = vrot.slane %v2681_v22, %v8099_v20 }
 0x94d   : > { %v3908_v9 = vrot.slane %v9353_v39, %v8085_v14 }
 0x94e   : > { %v3739_v60 = vsel %vm3590_vm12, %v3738_v21, %v3734_v51 }
 0x94f   : > { %v3762_v59 = vsel %vm3663_vm5, %v3739_v60, %v3761_v15  ;;  %v2687_v5 = vpop.xlane.xlu0 %2686 }
 0x950   : > { %v3747_v19 = vrot.slane %v2687_v5, %v8099_v20  ;;  %v3501_v26 = vpop.xlane.xlu1 %3500 }
 0x951   : > { %v3903_v18 = vrot.slane %v3501_v26, %v8099_v20 }
 0x952   : > { %v3748_v49 = vsel %vm3590_vm12, %v3747_v19, %v3743_v52 }
 0x953   : > { %v3091_v48 = vpop.xlane.xlu0 %3090  ;;  %v3763_v13 = vsel %vm3665_vm6, %v3748_v49, %v3762_v59 }
 0x954   : > { %v3821_v47 = vrot.slane %v3091_v48, %v8085_v14  ;;  %v9371_v2 = vsel %vm3667_vm7, %v9270_v41, %v3763_v13 }
 0x957   : > { %v3070_v51 = vpop.xlane.xlu0 %3069 }
 0x958   : > { %v3789_v62 = vrot.slane %v3070_v51, %v8099_v20 }
 0x95a   : > { %v3790_v27 = vsel %vm3590_vm12, %v3789_v62, %v3785_v34 }
 0x95b   : > { %v3076_v38 = vpop.xlane.xlu0 %3075 }
 0x95c   : > { %v3798_v10 = vrot.slane %v3076_v38, %v8099_v20 }
 0x95e   : > { %v3799_v3 = vsel %vm3590_vm12, %v3798_v10, %v3794_v42 }
 0x95f   : > { %v3854_v57 = vsel %vm3655_vm13, %v3799_v3, %v3790_v27  ;;  %v3082_v41 = vpop.xlane.xlu0 %3081 }
 0x960   : > { %v3807_v50 = vrot.slane %v3082_v41, %v8099_v20 }
 0x962   : > { %v3808_v6 = vsel %vm3590_vm12, %v3807_v50, %v3803_v23 }
 0x963   : > { %v3855_v34 = vsel %vm3657_vm14, %v3808_v6, %v3854_v57  ;;  %v3088_v44 = vpop.xlane.xlu0 %3087 }
 0x964   : > { %v3816_v37 = vrot.slane %v3088_v44, %v8099_v20 }
 0x966   : > { %v3817_v45 = vsel %vm3590_vm12, %v3816_v37, %v3812_v40  ;;  %v3062_v37 = vmul.f32 %v8557_v11, %v9112_v7 }
 0x967   : > { %v3856_v42 = vsel %vm3659_vm15, %v3817_v45, %v3855_v34  ;;  %v3094_v15 = vpop.xlane.xlu0 %3093  ;;  %v3061_v34 = vmul.f32 %v8769_v16, %v9092_v1  ;;  %v3475_v45 = vmul.f32 %v8518_v53, %v9145_v8  ;;  %v3063_v53 = vmul.f32 %v8775_v12, %v9092_v1 }
 0x968   : > { %v3825_v4 = vrot.slane %v3094_v15, %v8099_v20  ;;  %v3476_v15 = vmul.f32 %v8757_v31, %v9139_v29  ;;  %v3478_v31 = vmul.f32 %v8763_v61, %v9139_v29  ;;  %v3481_v61 = vmul.f32 %v8557_v11, %v9145_v8 }
 0x969   : > { %v3101_v44 = vsel %vm1908_vm4, %v3061_v34, 0.0 }
 0x96a   : > { %v3826_v36 = vsel %vm3590_vm12, %v3825_v4, %v3821_v47  ;;  %v3505_v4 = vsel %vm1908_vm4, %v3475_v45, 0.0  ;;  %v3508_v26 = vsel %vm1908_vm4, %v3476_v15, 0.0 }
 0x96b   : > { %v3857_v23 = vsel %vm3661_vm0, %v3826_v36, %v3856_v42  ;;  %v3498_v46 = vpop.xlane.xlu0 %3497  ;;  %v3104_v42 = vsel %vm1908_vm4, %v3062_v37, 0.0  ;;  %v3477_v36 = vmul.f32 %v8529_v54, %v9145_v8 }
 0x96c   : > { %v3899_v22 = vrot.slane %v3498_v46, %v8085_v14  ;;  %v2623_v21 = vpop.f32.mrb[16].mxu1  ;;  %v9402_v63 = vsel %vm3663_vm5, %v3835_v24, %v3857_v23  ;;  %v3107_v46 = vsel %vm1908_vm4, %v3063_v53, 0.0 }
 0x96d   : > { %3998 = vrot.lane.b32.xlu0 %v2623_v21, %s10037_s22  ;;  %v5397_v40 = vpop.f32.mrb[17].mxu1  ;;  %v3511_v23 = vsel %vm1908_vm4, %v3477_v36, 0.0 }
 0x96e   : > { %v3904_v60 = vsel %vm3590_vm12, %v3903_v18, %v3899_v22  ;;  %v2626_v59 = vpop.f32.mrb[18].mxu1  ;;  %v3514_v18 = vsel %vm1908_vm4, %v3478_v31, 0.0  ;;  %v3479_v22 = vmul.f32 %v8546_v0, %v9145_v8  ;;  %v3482_v0 = vmul.f32 %v8775_v12, %v9139_v29 }
 0x96f   : > { %v6003_v5 = vpack.i.bf16 %v2626_v59, %v2623_v21  ;;  %v3489_v52 = vpop.xlane.xlu0 %3488  ;;  %4000 = vrot.lane.b32.xlu1 %v2626_v59, %s10037_s22  ;;  %v5398_v19 = vpop.f32.mrb[19].mxu1 }
 0x970   : > { %v3885_v49 = vrot.slane %v3489_v52, %v8099_v20  ;;  %v3517_v54 = vsel %vm1908_vm4, %v3479_v22, 0.0 }
 0x971   : > { %4030 = vrot.lane.b32.xlu0 %v2623_v21, %s6895_s12 }
 0x972   : > { %v3886_v48 = vsel %vm3590_vm12, %v3885_v49, %v3881_v30 }
 0x973   : > { %v3495_v13 = vpop.xlane.xlu0 %3494  ;;  %4032 = vrot.lane.b32.xlu1 %v2626_v59, %s6895_s12 }
 0x974   : > { %v3894_v24 = vrot.slane %v3495_v13, %v8099_v20  ;;  %v3042_v47 = vpop.f32.mrb[20].mxu1 }
 0x975   : > { %4060 = vrot.lane.b32.xlu0 %v2623_v21, %s6927_s18  ;;  %v5409_v51 = vpop.f32.mrb[21].mxu1  ;;  %v3480_v21 = vmul.f32 %v8769_v16, %v9139_v29  ;;  %v3483_v16 = vmul.f32 %v8621_v17, %v9145_v8  ;;  %v3064_v29 = vmul.f32 %v8621_v17, %v9112_v7 }
 0x976   : > { %v3895_v62 = vsel %vm3590_vm12, %v3894_v24, %v3890_v32  ;;  %v3045_v27 = vpop.f32.mrb[22].mxu1 }
 0x977   : > { %v3950_v38 = vsel %vm3655_vm13, %v3895_v62, %v3886_v48  ;;  %v6008_v10 = vpack.i.bf16 %v3045_v27, %v3042_v47  ;;  %4062 = vrot.lane.b32.xlu1 %v2626_v59, %s6927_s18  ;;  %v5410_v3 = vpop.f32.mrb[23].mxu1  ;;  %s10040_s18 = smov 32   ;;  %v3520_v1 = vsel %vm1908_vm4, %v3480_v21, 0.0  ;;  %v3529_v49 = vsel %vm1908_vm4, %v3483_v16, 0.0  ;;  %v10042_v21 = vld [vmem:[#allocation84_spill] sm:$0xff] }
 0x978   : > { %v9417_v30 = vsel %vm3657_vm14, %v3904_v60, %v3950_v38  ;;  %v3523_v60 = vsel %vm1908_vm4, %v3481_v61, 0.0  ;;  %v3110_v8 = vsel %vm1908_vm4, %v3064_v29, 0.0  ;;  %vm3560_vm14 = vcmask 392192  }
 0x979   : > { %4004 = vrot.lane.b32.xlu0 %v3042_v47, %s10038_s24 }
 0x97b   : > { %6004 = vrot.lane.b32.xlu1 %v6003_v5, %s10039_s29  ;;  %v3526_v5 = vsel %vm1908_vm4, %v3482_v0, 0.0 }
 0x97c   : > { %v3461_v57 = vpop.f32.mrb[24].mxu1 }
 0x97d   : > { %4036 = vrot.lane.b32.xlu0 %v3042_v47, %s10037_s22  ;;  %v5421_v41 = vpop.f32.mrb[25].mxu1 }
 0x97e   : > { %v3464_v50 = vpop.f32.mrb[26].mxu1 }
 0x97f   : > { %v6013_v32 = vpack.i.bf16 %v3464_v50, %v3461_v57  ;;  %4006 = vrot.lane.b32.xlu1 %v3045_v27, %s10038_s24  ;;  %v5422_v6 = vpop.f32.mrb[27].mxu1 }
 0x981   : > { %4066 = vrot.lane.b32.xlu0 %v3042_v47, %s6895_s12 }
 0x983   : > { %4038 = vrot.lane.b32.xlu1 %v3045_v27, %s10037_s22 }
 0x985   : > { %6009 = vrot.lane.b32.xlu0 %v6008_v10, %s10040_s18 }
 0x987   : > { %4068 = vrot.lane.b32.xlu1 %v3045_v27, %s6895_s12 }
 0x989   : > { %4010 = vrot.lane.b32.xlu0 %v3461_v57, %s6930_s21 }
 0x98b   : > { %4012 = vrot.lane.b32.xlu1 %v3464_v50, %s6930_s21  ;;  %s10081_s21 = sld [smem:[#allocation53_spill]] }
 0x98d   : > { %4042 = vrot.lane.b32.xlu0 %v3461_v57, %s10038_s24 }
 0x98f   : > { %4044 = vrot.lane.b32.xlu1 %v3464_v50, %s10038_s24  ;;  %s10077_s24 = scalar_lea.vmem [#allocation27], %s7846_s2 }
 0x991   : > { %4072 = vrot.lane.b32.xlu0 %v3461_v57, %s10037_s22  ;;  %p5285_p9 = scmp.ne.s32.totalorder %s10081_s21, 1 }
 0x993   : > { %4074 = vrot.lane.b32.xlu1 %v3464_v50, %s10037_s22  ;;  %s10076_s22 = smov %s10075_s26 }
 0x9aa   : > { %v3993_v40 = vpop.permute.xlu0 %3992 }
 0x9ac   : > { %v3995_v59 = vpop.permute.xlu1 %3994 }
 0x9ae   : > { %v4025_v52 = vpop.permute.xlu0 %4024 }
 0x9b0   : > { %3102 = vadd.xlane.f32.xlu0 %v3101_v44  ;;  %v4027_v19 = vpop.permute.xlu1 %4026 }
 0x9b2   : > { %v4055_v11 = vpop.permute.xlu0 %4054 }
 0x9b4   : > { %3105 = vadd.xlane.f32.xlu0 %v3104_v42  ;;  %v4057_v48 = vpop.permute.xlu1 %4056 }
 0x9b7   : > { %3506 = vadd.xlane.f32.xlu1 %v3505_v4 }
 0x9b8   : > { %3509 = vadd.xlane.f32.xlu0 %v3508_v26 }
 0x9bc   : > { %3512 = vadd.xlane.f32.xlu0 %v3511_v23 }
 0x9c0   : > { %3108 = vadd.xlane.f32.xlu0 %v3107_v46 }
 0x9c4   : > { %3515 = vadd.xlane.f32.xlu0 %v3514_v18 }
 0x9c8   : > { %3518 = vadd.xlane.f32.xlu0 %v3517_v54  ;;  %6014 = vrot.lane.b32.xlu1 %v6013_v32, %s10041_s28 }
 0x9cc   : > { %3521 = vadd.xlane.f32.xlu0 %v3520_v1 }
 0x9d0   : > { %3524 = vadd.xlane.f32.xlu0 %v3523_v60 }
 0x9d4   : > { %3527 = vadd.xlane.f32.xlu0 %v3526_v5 }
 0x9d8   : > { %3530 = vadd.xlane.f32.xlu0 %v3529_v49  ;;  %v10044_v49 = vld [vmem:[#allocation78_spill] sm:$0xff] }
 0x9df   : > { %v3999_v13 = vpop.permute.xlu0 %3998 }
 0x9e0   : > { %v4016_v45 = vsel %vm1819_vm3, %v3993_v40, %v3999_v13 }
 0x9e1   : > { %v4001_v24 = vpop.permute.xlu1 %4000 }
 0x9e2   : > { %v4017_v4 = vsel %vm1819_vm3, %v3995_v59, %v4001_v24  ;;  %v10043_v59 = vld [vmem:[#allocation83_spill] sm:$0xff] }
 0x9e3   : > { %v4031_v47 = vpop.permute.xlu0 %4030  ;;  %v10045_v24 = vld [vmem:[#allocation79_spill] sm:$0xff] }
 0x9e4   : > { %v4048_v53 = vsel %vm1819_vm3, %v4025_v52, %v4031_v47 }
 0x9e5   : > { %v4033_v51 = vpop.permute.xlu1 %4032 }
 0x9e6   : > { %v4049_v54 = vsel %vm1819_vm3, %v4027_v19, %v4033_v51  ;;  %v10046_v51 = vld [vmem:[#allocation66_spill] sm:$0xff] }
 0x9e7   : > { %v4061_v12 = vpop.permute.xlu0 %4060 }
 0x9e8   : > { %v4078_v40 = vsel %vm1819_vm3, %v4055_v11, %v4061_v12  ;;  %v10047_v11 = vld [vmem:[#allocation72_spill] sm:$0xff] }
 0x9e9   : > { %v4063_v62 = vpop.permute.xlu1 %4062 }
 0x9ea   : > { %v4079_v60 = vsel %vm1819_vm3, %v4057_v48, %v4063_v62  ;;  %v10048_v48 = vld [vmem:[#allocation85_spill] sm:$0xff] }
 0x9eb   : > { %v4005_v27 = vpop.permute.xlu0 %4004 }
 0x9ec   : > { %3111 = vadd.xlane.f32.xlu1 %v3110_v8  ;;  %v10049_v8 = vld [vmem:[#allocation67_spill] sm:$0xff] }
 0x9ed   : > { %v6005_v38 = vpop.permute.xlu1 %6004 }
 0x9ee   : > { %v6007_v10 = vunpack.i.h.bf16 %v6005_v38  ;;  %v6006_v3 = vunpack.i.l.bf16 %v6005_v38 }
 0x9ef   : > { %v4037_v57 = vpop.permute.xlu0 %4036 }
 0x9f0   : > { %v3557_v41 = vsel %vm1908_vm4, %v9302_v35, %v6007_v10  ;;  %v3556_v50 = vsel %vm1908_vm4, %v9293_v43, %v6006_v3  ;;  %v4019_v35 = vsel %vm4018_vm8, %v4016_v45, %v4005_v27  ;;  %v4050_v18 = vsel %vm4018_vm8, %v4048_v53, %v4037_v57  ;;  %v10050_v10 = vld [vmem:[#allocation71_spill] sm:$0xff]  ;;  %v10051_v57 = vld [vmem:[#allocation88_spill] sm:$0xff] }
 0x9f1   : > { %v4007_v32 = vpop.permute.xlu1 %4006 }
 0x9f2   : > { %v4020_v36 = vsel %vm4018_vm8, %v4017_v4, %v4007_v32  ;;  %v10052_v32 = vld [vmem:[#allocation69_spill] sm:$0xff] }
 0x9f3   : > { %v4067_v6 = vpop.permute.xlu0 %4066  ;;  %v10056_v4 = vld [vmem:[#allocation73_spill] sm:$0xff] }
 0x9f4   : > { %v4080_v16 = vsel %vm4018_vm8, %v4078_v40, %v4067_v6 }
 0x9f5   : > { %v4039_v34 = vpop.permute.xlu1 %4038 }
 0x9f6   : > { %v4051_v0 = vsel %vm4018_vm8, %v4049_v54, %v4039_v34  ;;  %v10053_v34 = vld [vmem:[#allocation70_spill] sm:$0xff] }
 0x9f7   : > { %v6010_v44 = vpop.permute.xlu0 %6009 }
 0x9f8   : > { %v6012_v17 = vunpack.i.h.bf16 %v6010_v44  ;;  %v6011_v7 = vunpack.i.l.bf16 %v6010_v44 }
 0x9f9   : > { %v4069_v37 = vpop.permute.xlu1 %4068 }
 0x9fa   : > { %v9477_v42 = vsel %vm1389_vm2, %v3557_v41, %v6012_v17  ;;  %v9480_v15 = vsel %vm1389_vm2, %v3556_v50, %v6011_v7  ;;  %v4081_v52 = vsel %vm4018_vm8, %v4079_v60, %v4069_v37  ;;  %v10054_v7 = vld [vmem:[#allocation80_spill] sm:$0xff]  ;;  %v10060_v60 = vld [vmem:[#allocation74_spill] sm:$0xff] }
 0x9fb   : > { %v4011_v43 = vpop.permute.xlu0 %4010 }
 0x9fc   : > { %v4022_v26 = vsel %vm4021_vm9, %v4019_v35, %v4011_v43  ;;  %v10055_v35 = vld [vmem:[#allocation68_spill] sm:$0xff] }
 0x9fd   : > { %v4013_v23 = vpop.permute.xlu1 %4012  ;;  %v4084_v46 = vsub.f32 %v4022_v26, %v8107_v25 }
 0x9fe   : > { %v4023_v31 = vsel %vm4021_vm9, %v4020_v36, %v4013_v23  ;;  %v10057_v36 = vld [vmem:[#allocation86_spill] sm:$0xff] }
 0x9ff   : > { %v4043_v22 = vpop.permute.xlu0 %4042  ;;  %v4085_v1 = vsub.f32 %v4023_v31, %v10042_v21  ;;  %v4090_v13 = vmul.f32 %v4084_v46, %v10044_v49  ;;  %v4100_v38 = vmul.f32 %v4084_v46, %v10049_v8  ;;  %v4110_v3 = vmul.f32 %v4084_v46, %v10050_v10  ;;  %v10063_v49 = vld [vmem:[#allocation75_spill] sm:$0xff] }
 0xa00   : > { %v4052_v61 = vsel %vm4021_vm9, %v4050_v18, %v4043_v22  ;;  %v10058_v22 = vld [vmem:[#allocation87_spill] sm:$0xff] }
 0xa01   : > { %v4086_v5 = vsub.f32 %v4052_v61, %v10043_v59  ;;  %v4045_v25 = vpop.permute.xlu1 %4044  ;;  %v4091_v41 = vmul.f32 %v4085_v1, %v10051_v57  ;;  %v4101_v6 = vmul.f32 %v4085_v1, %v10052_v32  ;;  %v4111_v44 = vmul.f32 %v4085_v1, %v10053_v34  ;;  %v10059_v1 = vld [vmem:[#allocation82_spill] sm:$0xff]  ;;  %v10061_v59 = vld [vmem:[#allocation77_spill] sm:$0xff] }
 0xa02   : > { %v4053_v19 = vsel %vm4021_vm9, %v4051_v0, %v4045_v25  ;;  %v10062_v25 = vld [vmem:[#allocation81_spill] sm:$0xff] }
 0xa03   : > { %v4092_v47 = vmul.f32 %v4086_v5, %v10045_v24  ;;  %v4102_v29 = vmul.f32 %v4086_v5, %v10046_v51  ;;  %v4112_v12 = vmul.f32 %v4086_v5, %v10047_v11  ;;  %v4087_v62 = vsub.f32 %v4053_v19, %v10048_v48  ;;  %v4073_v27 = vpop.permute.xlu0 %4072  ;;  %v10064_v19 = vld [vmem:[#allocation76_spill] sm:$0xff] }
 0xa04   : > { %v4082_v50 = vsel %vm4021_vm9, %v4080_v16, %v4073_v27 }
 0xa05   : > { %v4094_v17 = vadd.f32 %v4092_v47, %v4090_v13  ;;  %v4093_v37 = vmul.f32 %v4087_v62, %v10054_v7  ;;  %v4075_v45 = vpop.permute.xlu1 %4074  ;;  %v4103_v43 = vmul.f32 %v4087_v62, %v10055_v35  ;;  %v4113_v26 = vmul.f32 %v4087_v62, %v10056_v4 }
 0xa06   : > { %v4088_v23 = vsub.f32 %v4082_v50, %v10057_v36  ;;  %v4083_v53 = vsel %vm4021_vm9, %v4081_v52, %v4075_v45  ;;  %v4104_v46 = vadd.f32 %v4102_v29, %v4100_v38  ;;  %v4114_v31 = vadd.f32 %v4112_v12, %v4110_v3 }
 0xa07   : > { %v4095_v18 = vadd.f32 %v4093_v37, %v4091_v41  ;;  %v4089_v54 = vsub.f32 %v4083_v53, %v10058_v22  ;;  %v4105_v21 = vadd.f32 %v4103_v43, %v4101_v6  ;;  %v4115_v61 = vadd.f32 %v4113_v26, %v4111_v44 }
 0xa08   : > { %v4096_v40 = vmul.f32 %v4088_v23, %v10059_v1  ;;  %v4106_v0 = vmul.f32 %v4088_v23, %v10060_v60  ;;  %v4116_v5 = vmul.f32 %v4088_v23, %v10061_v59 }
 0xa09   : > { %v4097_v16 = vmul.f32 %v4089_v54, %v10062_v25  ;;  %v4107_v13 = vmul.f32 %v4089_v54, %v10063_v49  ;;  %v4117_v24 = vmul.f32 %v4089_v54, %v10064_v19 }
 0xa0a   : > { %v9523_v52 = vadd.f32 %v4096_v40, %v4094_v17  ;;  %v9525_v47 = vadd.f32 %v4106_v0, %v4104_v46  ;;  %v9527_v51 = vadd.f32 %v4116_v5, %v4114_v31 }
 0xa0b   : > { %v9529_v29 = vadd.f32 %v4097_v16, %v4095_v18  ;;  %v9531_v11 = vadd.f32 %v4107_v13, %v4105_v21  ;;  %v9533_v12 = vadd.f32 %v4117_v24, %v4115_v61 }
 0xa0c   : > { %v4120_v48 = vmul.f32 %v9523_v52, %v9523_v52  ;;  %v4122_v62 = vmul.f32 %v9525_v47, %v9525_v47  ;;  %v4126_v10 = vmul.f32 %v9527_v51, %v9527_v51 }
 0xa0d   : > { %v4121_v27 = vmul.f32 %v9529_v29, %v9529_v29  ;;  %v4123_v8 = vmul.f32 %v9531_v11, %v9531_v11  ;;  %v6023_v3 = vpack.i.bf16 %v9529_v29, %v9523_v52  ;;  %v6033_v57 = vpack.i.bf16 %v9531_v11, %v9525_v47 }
 0xa0e   : > { %v4124_v38 = vadd.f32 %v4122_v62, %v4120_v48  ;;  %v4127_v50 = vmul.f32 %v9533_v12, %v9533_v12 }
 0xa0f   : > { %v4125_v41 = vadd.f32 %v4123_v8, %v4121_v27 }
 0xa10   : > { %v4128_v32 = vadd.f32 %v4126_v10, %v4124_v38 }
 0xa11   : > { %v4129_v6 = vadd.f32 %v4127_v50, %v4125_v41 }
 0xa12   : > { %6113 = vrsqrt.f32 %v4128_v32  ;;  %vm4132_vm3 = vcmp.eq.f32.partialorder %v4128_v32, inf  ;;  %v4135_v7 = vand.u32 2147483648, %v4128_v32  ;;  %vm4134_vm10 = vcmp.eq.f32.partialorder %v4128_v32, 0.0 }
 0xa13   : > { %6115 = vrsqrt.f32 %v4129_v6  ;;  %vm4139_vm11 = vcmp.eq.f32.partialorder %v4129_v6, inf  ;;  %v4142_v35 = vand.u32 2147483648, %v4129_v6  ;;  %vm4141_vm13 = vcmp.eq.f32.partialorder %v4129_v6, 0.0 }
 0xa1c   : > { %v6114_v34 = vpop.eup %6113 }
 0xa1d   : > { %v6116_v44 = vpop.eup %6115  ;;  %v4131_v17 = vmul.f32 %v6114_v34, %v4128_v32  ;;  %v6062_v34 = vld [vmem:[%s7867_s0] sm:$0xff]  }
 0xa1e   : > { %v4138_v37 = vmul.f32 %v6116_v44, %v4129_v6  ;;  %4345 = vmatpush1.bf16.msra.mxu0 %v6062_v34  ;;  %v6063_v44 = vld [vmem:[%s7867_s0 + $0x8] sm:$0xff]  }
 0xa1f   : > { %v4133_v45 = vsel %vm4132_vm3, %v4128_v32, %v4131_v17  ;;  %4346 = vmatprep.subr.bf16.mxu0 %v10025_v58 }
 0xa20   : > { %v4140_v43 = vsel %vm4139_vm11, %v4129_v6, %v4138_v37  ;;  %v4136_v4 = vsel %vm4134_vm10, %v4135_v7, %v4133_v45 }
 0xa21   : > { %v4143_v26 = vsel %vm4141_vm13, %v4142_v35, %v4140_v43  ;;  %v4144_v36 = vadd.f32 0.0001, %v4136_v4  ;;  %v6065_v35 = vld [vmem:[%s7867_s0 + $0x18] sm:$0xff]  }
 0xa22   : > { %v4145_v23 = vadd.f32 0.0001, %v4143_v26  ;;  %4347 = vmatpush1.bf16.msra.mxu0 %v6063_v44 }
 0xa23   : > { %6117 = vrcp.f32 %v4144_v36  ;;  %4348 = vmatprep.subr.bf16.mxu0 %v10025_v58 }
 0xa24   : > { %6119 = vrcp.f32 %v4145_v23  ;;  %v6067_v23 = vld [vmem:[%s7867_s0 + $0x28] sm:$0xff]  }
 0xa2d   : > { %v6118_v53 = vpop.eup %6117 }
 0xa2e   : > { %v6120_v46 = vpop.eup %6119  ;;  %v4148_v31 = vmul.f32 %v6118_v53, %v9523_v52  ;;  %v4150_v21 = vmul.f32 %v6118_v53, %v9525_v47  ;;  %v4152_v40 = vmul.f32 %v6118_v53, %v9527_v51 }
 0xa2f   : > { %v4149_v18 = vmul.f32 %v6120_v46, %v9529_v29  ;;  %v4151_v54 = vmul.f32 %v6120_v46, %v9531_v11  ;;  %v4153_v1 = vmul.f32 %v6120_v46, %v9533_v12  ;;  %v6068_v11 = vld [vmem:[%s7867_s0 + $0x30] sm:$0xff]  }
 0xa31   : > { %v6038_v22 = vpack.i.bf16 %v4149_v18, %v4148_v31  ;;  %v6043_v61 = vpack.i.bf16 %v4151_v54, %v4150_v21  ;;  %v6048_v60 = vpack.i.bf16 %v4153_v1, %v4152_v40  ;;  %v6072_v1 = vld [vmem:[%s7867_s0 + $0x50] sm:$0xff]   ;;  %v6073_v40 = vld [vmem:[%s7867_s0 + $0x58] sm:$0xff]  }
 0xa33   : > { %6039 = vrot.lane.b32.xlu1 %v6038_v22, %s10040_s18  ;;  %v6069_v22 = vld [vmem:[%s7867_s0 + $0x38] sm:$0xff]  }
 0xa37   : > { %6044 = vrot.lane.b32.xlu1 %v6043_v61, %s10041_s28  ;;  %v6071_v61 = vld [vmem:[%s7867_s0 + $0x48] sm:$0xff]  }
 0xa3b   : > { %6049 = vrot.lane.b32.xlu1 %v6048_v60, %s10065_s6 }
 0xa3d   : > { %v3103_v0 = vpop.xlane.xlu0 %3102 }
 0xa3e   : > { %v3839_v5 = vrot.slane %v3103_v0, %v8085_v14 }
 0xa41   : > { %v3106_v59 = vpop.xlane.xlu0 %3105 }
 0xa42   : > { %v3843_v25 = vrot.slane %v3106_v59, %v8099_v20 }
 0xa44   : > { %v3844_v16 = vsel %vm3590_vm12, %v3843_v25, %v3839_v5  ;;  %v3507_v49 = vpop.xlane.xlu1 %3506  ;;  %v6074_v25 = vld [vmem:[%s7867_s0 + $0x60] sm:$0xff]  }
 0xa45   : > { %v3912_v13 = vrot.slane %v3507_v49, %v8099_v20  ;;  %v3510_v19 = vpop.xlane.xlu0 %3509  ;;  %v9566_v24 = vsel %vm3665_vm6, %v3844_v16, %v9402_v63 }
 0xa46   : > { %v3917_v41 = vrot.slane %v3510_v19, %v8085_v14 }
 0xa47   : > { %v3913_v48 = vsel %vm3590_vm12, %v3912_v13, %v3908_v9 }
 0xa48   : > { %v3952_v62 = vsel %vm3659_vm15, %v3913_v48, %v9417_v30  ;;  %v6015_v27 = vpop.permute.xlu1 %6014  ;;  %vm4340_vm15 = vcmask 654336  }
 0xa49   : > { %v6017_v8 = vunpack.i.h.bf16 %v6015_v27  ;;  %v6016_v38 = vunpack.i.l.bf16 %v6015_v27  ;;  %v3513_v10 = vpop.xlane.xlu0 %3512 }
 0xa4a   : > { %v3921_v63 = vrot.slane %v3513_v10, %v8099_v20 }
 0xa4b   : > { %v3562_v39 = vsel %vm3560_vm14, %v9477_v42, %v6017_v8  ;;  %v3561_v9 = vsel %vm3560_vm14, %v9480_v15, %v6016_v38  ;;  %v6064_v42 = vld [vmem:[%s7867_s0 + $0x10] sm:$0xff]   ;;  %v6028_v15 = vpack.i.bf16 %v4143_v26, %v4136_v4 }
 0xa4c   : > { %v6018_v50 = vpack.i.bf16 %v3562_v39, %v3561_v9  ;;  %v3922_v30 = vsel %vm3590_vm12, %v3921_v63, %v3917_v41  ;;  %4349 = vmatpush1.bf16.msra.mxu0 %v6064_v42 }
 0xa4d   : > { %v3953_v32 = vsel %vm3661_vm0, %v3922_v30, %v3952_v62  ;;  %v9582_v6 = vpop.xlane.xlu0 %3108  ;;  %4350 = vmatprep.subr.bf16.mxu0 %v10025_v58  ;;  %vm4212_vm0 = vcmask 785408  }
 0xa4e   : > { %6019 = vrot.lane.b32.xlu0 %v6018_v50, %s10040_s18  ;;  %v3848_v60 = vrot.slane %v9582_v6, %v8085_v14  ;;  %s10080_s18 = scalar_lea.vmem [#allocation33], %s7846_s2 }
 0xa50   : > { %4351 = vmatpush1.bf16.msra.mxu0 %v6065_v35 }
 0xa51   : > { %v3516_v17 = vpop.xlane.xlu0 %3515  ;;  %4352 = vmatprep.subr.bf16.mxu0 %v10025_v58 }
 0xa52   : > { %6024 = vrot.lane.b32.xlu0 %v6023_v3, %s10066_s25  ;;  %v3926_v37 = vrot.slane %v3516_v17, %v8085_v14  ;;  %v6066_v3 = vld [vmem:[%s7867_s0 + $0x20] sm:$0xff]  }
 0xa54   : > { %4353 = vmatpush1.bf16.msra.mxu0 %v6066_v3 }
 0xa55   : > { %v3519_v7 = vpop.xlane.xlu0 %3518  ;;  %4354 = vmatprep.subr.bf16.mxu0 %v10025_v58 }
 0xa56   : > { %v3930_v45 = vrot.slane %v3519_v7, %v8099_v20  ;;  %6029 = vrot.lane.b32.xlu0 %v6028_v15, %s10039_s29  ;;  %s10078_s29 = scalar_lea.vmem [#allocation30], %s7846_s2 }
 0xa58   : > { %v3931_v43 = vsel %vm3590_vm12, %v3930_v45, %v3926_v37  ;;  %4355 = vmatpush1.bf16.msra.mxu0 %v6067_v23 }
 0xa59   : > { %v3954_v52 = vsel %vm3663_vm5, %v3931_v43, %v3953_v32  ;;  %v3522_v29 = vpop.xlane.xlu0 %3521  ;;  %4356 = vmatprep.subr.bf16.mxu0 %v10025_v58 }
 0xa5a   : > { %6034 = vrot.lane.b32.xlu0 %v6033_v57, %s6895_s12  ;;  %v3935_v26 = vrot.slane %v3522_v29, %v8085_v14  ;;  %s10068_s12 = scalar_lea.vmem [#allocation23], %s7883_s23  ;;  %s10079_s23 = scalar_lea.vmem [#allocation32], %s7846_s2 }
 0xa5b   : > { %s10069_s19 = smov %s10068_s12 }
 0xa5c   : > { %4357 = vmatpush1.bf16.msra.mxu0 %v6068_v11 }
 0xa5d   : > { %v3525_v4 = vpop.xlane.xlu0 %3524  ;;  %4358 = vmatprep.subr.bf16.mxu0 %v10025_v58 }
 0xa5e   : > { %v3939_v36 = vrot.slane %v3525_v4, %v8099_v20 }
 0xa60   : > { %v3940_v53 = vsel %vm3590_vm12, %v3939_v36, %v3935_v26  ;;  %4359 = vmatpush1.bf16.msra.mxu0 %v6069_v22  ;;  %v6129_v22 = vld [vmem:[#allocation2] sm:$0xff] }
 0xa61   : > { %v3528_v46 = vpop.xlane.xlu0 %3527  ;;  %v3955_v47 = vsel %vm3665_vm6, %v3940_v53, %v3954_v52  ;;  %4360 = vmatprep.subr.bf16.mxu0 %v10025_v58 }
 0xa62   : > { %v3944_v31 = vrot.slane %v3528_v46, %v8085_v14 }
 0xa64   : > { %3958 = vxpose.xlu1.b32.start [1/4] (short) (narrow) %v9351_v55, 16  ;;  %v6070_v55 = vld [vmem:[%s7867_s0 + $0x40] sm:$0xff]   ;;  %s10067_s0 = scalar_lea.vmem [#allocation18], %s7846_s2 }
 0xa65   : > { %v3531_v57 = vpop.xlane.xlu0 %3530  ;;  %4361 = vmatpush1.bf16.msra.mxu0 %v6070_v55  ;;  %v5254_v36 = vld [vmem:[%s10067_s0] ss:$0 sm:$0xff]  ;;  %v6130_v55 = vld [vmem:[#allocation2 + $0x8] sm:$0xff] }
 0xa66   : > { %v3948_v18 = vrot.slane %v3531_v57, %v8099_v20  ;;  %4362 = vmatprep.subr.bf16.mxu0 %v10025_v58 }
 0xa68   : > { %v3949_v54 = vsel %vm3590_vm12, %v3948_v18, %v3944_v31  ;;  %3959 = vxpose.xlu1.b32.cont [2/4] (short) (narrow) %v9371_v2, 16 }
 0xa69   : > { %v3956_v21 = vsel %vm3667_vm7, %v3949_v54, %v3955_v47  ;;  %4363 = vmatpush1.bf16.msra.mxu0 %v6071_v61 }
 0xa6a   : > { %4364 = vmatprep.subr.bf16.mxu0 %v10025_v58 }
 0xa6d   : > { %4365 = vmatpush1.bf16.msra.mxu0 %v6072_v1 }
 0xa6e   : > { %4366 = vmatprep.subr.bf16.mxu0 %v10025_v58 }
 0xa71   : > { %4367 = vmatpush1.bf16.msra.mxu0 %v6073_v40 }
 0xa72   : > { %4368 = vmatprep.subr.bf16.mxu0 %v10025_v58 }
 0xa75   : > { %4369 = vmatpush1.bf16.msra.mxu0 %v6074_v25 }
 0xa79   : > { %v3112_v2 = vpop.xlane.xlu1 %3111 }
 0xa7a   : > { %v3852_v0 = vrot.slane %v3112_v2, %v8099_v20 }
 0xa7c   : > { %v3853_v59 = vsel %vm3590_vm12, %v3852_v0, %v3848_v60  ;;  %vm4224_vm12 = vcmask 523264  }
 0xa7d   : > { %v3860_v5 = vsel %vm3667_vm7, %v3853_v59, %v9566_v24 }
 0xa7e   : > { %3960 = vxpose.xlu1.b32.cont [3/4] (short) (narrow) %v3860_v5, 16 }
 0xa82   : > { %3961 = vxpose.xlu1.b32.end [4/4] (short) (narrow) %v3956_v21, 16 }
 0xaa5   : > { %v6040_v16 = vpop.permute.xlu1 %6039 }
 0xaa6   : > { %v6042_v27 = vunpack.i.h.bf16 %v6040_v16  ;;  %v6041_v8 = vunpack.i.l.bf16 %v6040_v16 }
 0xaa9   : > { %v6045_v13 = vpop.permute.xlu1 %6044 }
 0xaaa   : > { %v6047_v38 = vunpack.i.h.bf16 %v6045_v13  ;;  %v6046_v58 = vunpack.i.l.bf16 %v6045_v13  ;;  %v6076_v13 = vld [vmem:[%s10069_s19 + $0x8] sm:$0xff]  }
 0xaad   : > { %v6050_v14 = vpop.permute.xlu1 %6049 }
 0xaae   : > { %v6052_v41 = vunpack.i.h.bf16 %v6050_v14  ;;  %v6051_v63 = vunpack.i.l.bf16 %v6050_v14 }
 0xac0   : > { %v6020_v49 = vpop.permute.xlu0 %6019 }
 0xac1   : > { %v6021_v44 = vunpack.i.l.bf16 %v6020_v49  ;;  %v6022_v15 = vunpack.i.h.bf16 %v6020_v49  ;;  %v6075_v49 = vld [vmem:[%s10068_s12] sm:$0xff]  }
 0xac2   : > { %5424 = vmatpush3.bf16.msra.mxu1 %v6075_v49 }
 0xac3   : > { %5425 = vmatprep.subr.bf16.mxu1 %v10026_v56 }
 0xac4   : > { %v6025_v19 = vpop.permute.xlu0 %6024 }
 0xac5   : > { %v6026_v17 = vunpack.i.l.bf16 %v6025_v19  ;;  %v6027_v7 = vunpack.i.h.bf16 %v6025_v19 }
 0xac6   : > { %5426 = vmatpush3.bf16.msra.mxu1 %v6076_v13 }
 0xac7   : > { %5431 = vmatprep.subr.bf16.mxu1 %v10026_v56 }
 0xac8   : > { %v6030_v48 = vpop.permute.xlu0 %6029 }
 0xac9   : > { %v6032_v62 = vunpack.i.h.bf16 %v6030_v48  ;;  %v6031_v20 = vunpack.i.l.bf16 %v6030_v48 }
 0xacb   : > { %v4219_v24 = vsel %vm1908_vm4, %v9533_v12, %v6032_v62  ;;  %v4218_v10 = vsel %vm1908_vm4, %v9527_v51, %v6031_v20  ;;  %vm4215_vm4 = vcmask 916480  }
 0xacc   : > { %v4221_v39 = vsel %vm1389_vm2, %v4219_v24, %v6042_v27  ;;  %v4220_v9 = vsel %vm1389_vm2, %v4218_v10, %v6041_v8  ;;  %v6035_v42 = vpop.permute.xlu0 %6034 }
 0xacd   : > { %v4222_v50 = vsel %vm3560_vm14, %v4220_v9, %v6046_v58  ;;  %v4223_v30 = vsel %vm3560_vm14, %v4221_v39, %v6047_v38  ;;  %v6037_v35 = vunpack.i.h.bf16 %v6035_v42  ;;  %v6036_v43 = vunpack.i.l.bf16 %v6035_v42  ;;  %v5269_v58 = vld [vmem:[%s10070_s15] ss:$0 sm:$0xff] }
 0xace   : > { %v4225_v32 = vsel %vm4224_vm12, %v4222_v50, %v6051_v63  ;;  %v4226_v6 = vsel %vm4224_vm12, %v4223_v30, %v6052_v41  ;;  %v5270_v63 = vld [vmem:[%s10071_s7] ss:$0 sm:$0xff] }
 0xacf   : > { %v4228_v34 = vpack.c.bf16 %v4226_v6, %v4225_v32  ;;  %v6077_v32 = vld [vmem:[%s10072_s9] sm:$0xff]  }
 0xad0   : > { %v6078_v6 = vld [vmem:[%s10073_s14 + $0x8] sm:$0xff]  }
 0xad1   : > { %5268 = vmatprep.mubr.msk.bf16.mxu0 %vm4340_vm15, %v4228_v34  ;;  %v5271_v34 = vld [vmem:[%s10074_s1] ss:$0 sm:$0xff] }
 0xaf6   : > { %v3974_v12 = vpop.trf.xlu1 }
 0xaf7   : > { %v4210_v51 = vsel %vm1389_vm2, %v3974_v12, %v6021_v44 }
 0xaf8   : > { %v4213_v37 = vsel %vm4212_vm0, %v4210_v51, %v6026_v17 }
 0xaf9   : > { %v4216_v3 = vsel %vm4215_vm4, %v4213_v37, %v6036_v43  ;;  %v6080_v43 = vld [vmem:[%s10076_s22 + $0x8] sm:$0xff]  }
 0xafa   : > { %v3975_v45 = vpop.trf.xlu1 }
 0xafb   : > { %v4211_v52 = vsel %vm1389_vm2, %v3975_v45, %v6022_v15 }
 0xafc   : > { %v4214_v29 = vsel %vm4212_vm0, %v4211_v52, %v6027_v7  ;;  %v5275_v52 = vld [vmem:[%s10077_s24] ss:$0 sm:$0xff] }
 0xafd   : > { %v4217_v4 = vsel %vm4215_vm4, %v4214_v29, %v6037_v35  ;;  %v6079_v35 = vld [vmem:[%s10075_s26] sm:$0xff]  }
 0xafe   : > { %v4227_v26 = vpack.c.bf16 %v4217_v4, %v4216_v3 }
 0xb00   : > { %4377 = vmatmul.mubr.bf16.vlgmr.msra.gmra.mrb[12].mxu0 %v4227_v26 }
 0xbd3   : > { %v4378_v23 = vpop.f32.mrb[12].mxu0 }
 0xbd4   : > { %v4379_v53 = vadd.f32 %v5254_v36, %v4378_v23  ;;  %v4380_v46 = vpop.f32.mrb[13].mxu0 }
 0xbd5   : > { %v4381_v47 = vpop.f32.mrb[14].mxu0 }
 0xbd6   : > { %v4385_v11 = vmul.f32 %v4379_v53, %v8929_v33  ;;  %v4382_v57 = vadd.f32 %v5254_v36, %v4381_v47  ;;  %v4383_v31 = vpop.f32.mrb[15].mxu0 }
 0xbd8   : > { %v4386_v18 = vmul.f32 %v4382_v57, %v8784_v28  ;;  %v4387_v54 = vadd.f32 %v6129_v22, %v4385_v11  ;;  %v5279_v11 = vld [vmem:[%s10078_s29] ss:$0 sm:$0xff] }
 0xbda   : > { %v4389_v21 = vsel %vm1389_vm2, %v4387_v54, 0.0  ;;  %v4388_v61 = vadd.f32 %v6130_v55, %v4386_v18 }
 0xbdb   : > { %4390 = vadd.xlane.f32.xlu0 %v4389_v21 }
 0xbdc   : > { %v4392_v1 = vsel %vm1389_vm2, %v4388_v61, 0.0 }
 0xbdf   : > { %4393 = vadd.xlane.f32.xlu0 %v4392_v1 }
 0xc68   : > { %v4391_v2 = vpop.xlane.xlu0 %4390 }
 0xc69   : > { %v4396_v40 = vmul.f32 0.03125, %v4391_v2 }
 0xc6b   : > { %v4398_v60 = vsub.f32 %v4387_v54, %v4396_v40 }
 0xc6c   : > { %v4394_v33 = vpop.xlane.xlu0 %4393 }
 0xc6d   : > { %v4397_v0 = vmul.f32 0.03125, %v4394_v33  ;;  %v4400_v59 = vmul.f32 %v4398_v60, %v4398_v60 }
 0xc6f   : > { %v4399_v5 = vsub.f32 %v4388_v61, %v4397_v0  ;;  %v4402_v28 = vsel %vm1389_vm2, %v4400_v59, 0.0 }
 0xc70   : > { %4403 = vadd.xlane.f32.xlu0 %v4402_v28 }
 0xc71   : > { %v4401_v25 = vmul.f32 %v4399_v5, %v4399_v5 }
 0xc73   : > { %v4405_v16 = vsel %vm1389_vm2, %v4401_v25, 0.0 }
 0xc74   : > { %4406 = vadd.xlane.f32.xlu0 %v4405_v16 }
 0xcfd   : > { %v4404_v19 = vpop.xlane.xlu0 %4403 }
 0xcfe   : > { %v4408_v48 = vmul.f32 0.03125, %v4404_v19 }
 0xd00   : > { %v4410_v14 = vadd.f32 1e-05, %v4408_v48 }
 0xd01   : > { %v4407_v62 = vpop.xlane.xlu0 %4406 }
 0xd02   : > { %6121 = vrsqrt.f32 %v4410_v14  ;;  %v4409_v20 = vmul.f32 0.03125, %v4407_v62 }
 0xd04   : > { %v4411_v27 = vadd.f32 1e-05, %v4409_v20 }
 0xd06   : > { %6123 = vrsqrt.f32 %v4411_v27  ;;  %v5283_v27 = vld [vmem:[%s10079_s23] ss:$0 sm:$0xff] }
 0xd0c   : > { %v6122_v8 = vpop.eup %6121 }
 0xd0d   : > { %v4414_v38 = vmul.f32 %v6122_v8, %v4398_v60 }
 0xd0f   : > { %v4423_v10 = vmul.f32 %v5269_v58, %v4414_v38  ;;  %v5284_v38 = vld [vmem:[%s10080_s18] ss:$0 sm:$0xff] }
 0xd10   : > { %v6124_v24 = vpop.eup %6123 }
 0xd11   : > { %v4415_v41 = vmul.f32 %v6124_v24, %v4399_v5  ;;  %v4432_v9 = vadd.f32 %v5270_v63, %v4423_v10 }
 0xd13   : > { %v4424_v39 = vmul.f32 %v5269_v58, %v4415_v41 }
 0xd15   : > { %v4433_v50 = vadd.f32 %v5270_v63, %v4424_v39 }
 0xd17   : > { %v4434_v30 = vpack.c.bf16 %v4433_v50, %v4432_v9 }
 0xd19   : > { %5428 = vmatmul.mubr.msk.bf16.vlgmr.msra.gmra.mrb[28].mxu1 %vm1389_vm2, %v4434_v30 }
 0xd1a   : > { %5435 = vmatprep.mubr.msk.bf16.mxu1 %vm6885_vm1, %v10026_v56  ;;  %5432 = vmatpush3.bf16.msra.mxu1 %v6077_v32 }
 0xd1b   : > { %5433 = vmatprep.subr.bf16.mxu1 %v10026_v56 }
 0xd1e   : > { %5434 = vmatpush3.bf16.msra.mxu1 %v6078_v6 }
 0xd1f   : > { %5439 = vmatprep.subr.bf16.mxu1 %v10026_v56 }
 0xdec   : > { %v4495_v44 = vpop.f32.mrb[28].mxu1 }
 0xded   : > { %v4496_v12 = vadd.f32 %v5271_v34, %v4495_v44  ;;  %v5429_v51 = vpop.f32.mrb[29].mxu1 }
 0xdee   : > { %v4498_v17 = vpop.f32.mrb[30].mxu1 }
 0xdef   : > { %v4499_v42 = vadd.f32 %v5271_v34, %v4498_v17  ;;  %v5430_v15 = vpop.f32.mrb[31].mxu1  ;;  %v4502_v7 = vmax.f32 %v4496_v12, 0.0 }
 0xdf1   : > { %v4503_v37 = vmax.f32 %v4499_v42, 0.0 }
 0xdf3   : > { %v4504_v45 = vpack.c.bf16 %v4503_v37, %v4502_v7 }
 0xdf5   : > { %5436 = vmatmul.mubr.msk.bf16.vlgmr.msra.gmra.mrb[32].mxu1 %vm1389_vm2, %v4504_v45 }
 0xdf6   : > { %5443 = vmatprep.mubr.msk.bf16.mxu1 %vm6885_vm1, %v10026_v56  ;;  %5440 = vmatpush3.bf16.msra.mxu1 %v6079_v35 }
 0xdf7   : > { %5441 = vmatprep.subr.bf16.mxu1 %v10026_v56 }
 0xdfa   : > { %5442 = vmatpush3.bf16.msra.mxu1 %v6080_v43 }
 0xec8   : > { %v4565_v29 = vpop.f32.mrb[32].mxu1 }
 0xec9   : > { %v4566_v3 = vadd.f32 %v5275_v52, %v4565_v29  ;;  %v5437_v4 = vpop.f32.mrb[33].mxu1 }
 0xeca   : > { %v4568_v26 = vpop.f32.mrb[34].mxu1 }
 0xecb   : > { %v4569_v36 = vadd.f32 %v5275_v52, %v4568_v26  ;;  %v5438_v23 = vpop.f32.mrb[35].mxu1  ;;  %v4572_v53 = vmax.f32 %v4566_v3, 0.0 }
 0xecd   : > { %v4573_v46 = vmax.f32 %v4569_v36, 0.0 }
 0xecf   : > { %v4574_v47 = vpack.c.bf16 %v4573_v46, %v4572_v53 }
 0xed1   : > { %5444 = vmatmul.mubr.msk.bf16.vlgmr.msra.gmra.mrb[36].mxu1 %vm1389_vm2, %v4574_v47 }
 0xfa4   : > { %v4635_v57 = vpop.f32.mrb[36].mxu1 }
 0xfa5   : > { %v4636_v56 = vadd.f32 %v5279_v11, %v4635_v57  ;;  %v5445_v31 = vpop.f32.mrb[37].mxu1 }
 0xfa6   : > { %v4638_v18 = vpop.f32.mrb[38].mxu1 }
 0xfa7   : > { %v4642_v22 = vadd.f32 %v4636_v56, %v4432_v9  ;;  %v4639_v54 = vadd.f32 %v5279_v11, %v4638_v18  ;;  %v5446_v21 = vpop.f32.mrb[39].mxu1 }
 0xfa9   : > { %v4643_v55 = vadd.f32 %v4639_v54, %v4433_v50  ;;  %v4644_v61 = vsel %vm1389_vm2, %v4642_v22, 0.0 }
 0xfaa   : > { %4645 = vadd.xlane.f32.xlu0 %v4644_v61 }
 0xfab   : > { %v4647_v1 = vsel %vm1389_vm2, %v4643_v55, 0.0 }
 0xfae   : > { %4648 = vadd.xlane.f32.xlu0 %v4647_v1 }
0x1037   : > { %v4646_v2 = vpop.xlane.xlu0 %4645 }
0x1038   : > { %v4650_v40 = vmul.f32 0.03125, %v4646_v2 }
0x103a   : > { %v4652_v60 = vsub.f32 %v4642_v22, %v4650_v40 }
0x103b   : > { %v4649_v33 = vpop.xlane.xlu0 %4648 }
0x103c   : > { %v4651_v0 = vmul.f32 0.03125, %v4649_v33  ;;  %v4654_v59 = vmul.f32 %v4652_v60, %v4652_v60 }
0x103e   : > { %v4653_v5 = vsub.f32 %v4643_v55, %v4651_v0  ;;  %v4656_v28 = vsel %vm1389_vm2, %v4654_v59, 0.0 }
0x103f   : > { %4657 = vadd.xlane.f32.xlu0 %v4656_v28 }
0x1040   : > { %v4655_v25 = vmul.f32 %v4653_v5, %v4653_v5 }
0x1042   : > { %v4659_v16 = vsel %vm1389_vm2, %v4655_v25, 0.0 }
0x1043   : > { %4660 = vadd.xlane.f32.xlu1 %v4659_v16 }
0x10cc   : > { %v4658_v49 = vpop.xlane.xlu0 %4657 }
0x10cd   : > { %v4662_v13 = vmul.f32 0.03125, %v4658_v49 }
0x10cf   : > { %v4664_v19 = vadd.f32 1e-05, %v4662_v13 }
0x10d0   : > { %v4661_v48 = vpop.xlane.xlu1 %4660 }
0x10d1   : > { %6125 = vrsqrt.f32 %v4664_v19  ;;  %v4663_v14 = vmul.f32 0.03125, %v4661_v48 }
0x10d3   : > { %v4665_v62 = vadd.f32 1e-05, %v4663_v14 }
0x10d5   : > { %6127 = vrsqrt.f32 %v4665_v62 }
0x10db   : > { %v6126_v20 = vpop.eup %6125 }
0x10dc   : > { %v4668_v8 = vmul.f32 %v6126_v20, %v4652_v60 }
0x10de   : > { %v4677_v58 = vmul.f32 %v5283_v27, %v4668_v8 }
0x10df   : > { %v6128_v24 = vpop.eup %6127 }
0x10e0   : > { %v4686_v10 = vadd.f32 %v5284_v38, %v4677_v58  ;;  %v4669_v41 = vmul.f32 %v6128_v24, %v4653_v5  ;;  %4693 = sbr.rel (%p5285_p9) target bundleno = 4327 (0x10e7), region = 188 }
0x10e2   : > { %4688 = vst.msk [vmem:[#allocation2] sm:$0xff] %vm1389_vm2, %v4686_v10  ;;  %v4678_v63 = vmul.f32 %v5283_v27, %v4669_v41  ;;  %4694 = vst.msk [vmem:[%s7914_s4] sm:$0xff] (!%p5285_p9), %vm1389_vm2, %v4686_v10 }
0x10e4   : > { %v4687_v39 = vadd.f32 %v5284_v38, %v4678_v63 }
0x10e6   : > { %4689 = vst.msk [vmem:[#allocation2 + $0x8] sm:$0xff] %vm1389_vm2, %v4687_v39  ;;  %4695 = vst.msk [vmem:[%s7914_s4 + $0x8] sm:$0xff] (!%p5285_p9), %vm1389_vm2, %v4687_v39 }
0x10e7 PF: > { %s10082_s2 = sld [smem:[#allocation54_spill]]  ;;  %s10083_s28 = sld [smem:[#allocation64_spill]] }
0x10e8   : > { %s10084_s12 = sld [smem:[#allocation107_spill]]  ;;  %s4710_s15 = sshll.u32 %s7914_s4, 4  ;;  %s9713_s15 = int_to_ptr.vmem [resolvable:$true] %s4710_s15 }
0x10e9   : > { %s4697_s7 = scalar_lea.sflag [#allocation5], %s7816_s3  ;;  %s6691_s9 = scalar_lea.vmem %s9713_s15, 256 }
0x10ea   : > { %p6692_p1 = scmp.ne.s32.totalorder %s9713_s15, %s6691_s9  ;;  %s6931_s14 = smov [#allocation35]  }
0x10eb   : > { %s6695_s1 = sshll.u32 %s6931_s14, 4  ;;  %s6696_s1 = int_to_ptr.vmem [resolvable:$false] %s6695_s1 }
0x10ec   : > { %s6697_s26 = scalar_lea.vmem %s6696_s1, 512  ;;  %p6698_p8 = scmp.lt.s32.totalorder %s9713_s15, %s6696_s1 }
0x10ed   : > { %s5299_s6 = sshll.u32 %s10082_s2, 8  ;;  %p10085_p13 = scmp.ne.s32.totalorder %s10083_s28, 0 }
0x10ee   : > { %s9710_s19 = scalar_lea.hbm %s10084_s12, %s5299_s6  ;;  %p6699_p2 = scmp.lt.s32.totalorder %s6697_s26, %s6691_s9 }
0x10ef   : > { %p6693_p5 = pnand %p6692_p1, %p10085_p13 }
0x10f0   : > { %p6700_p4 = por %p6699_p2, %p6698_p8 }
0x10f1   : > { %p6694_p0 = pneg %p6693_p5 }
0x10f3   : > { %p6701_p6 = pnand %p6700_p4, %p6694_p0 }
0x10f5   : > { %6704 = shalt.err (!%p6701_p6)
}
0x10f6   : > { %s6705_s4 = scalar_lea.hbm %s9710_s19, 256  ;;  %s6709_s29 = scalar_lea.hbm %s10084_s12, 512 }
0x10f7   : > { %p6706_p11 = scmp.ne.s32.totalorder %s9710_s19, %s6705_s4  ;;  %p6710_p12 = scmp.lt.u32.totalorder %s9710_s19, %s10084_s12 }
0x10f8   : > { %p6711_p10 = scmp.lt.u32.totalorder %s6709_s29, %s6705_s4  ;;  %p6713_p1 = scmp.lt.u32.totalorder %s6705_s4, %s9710_s19 }
0x10f9   : > { %p6707_p3 = pnand %p6706_p11, %p10085_p13 }
0x10fa   : > { %p6712_p9 = por %p6711_p10, %p6710_p12 }
0x10fb   : > { %p6708_p7 = pneg %p6707_p3 }
0x10fc   : > { %p6714_p5 = por %p6713_p1, %p6712_p9 }
0x10fe   : > { %p6715_p0 = pnand %p6714_p5, %p6708_p7 }
0x1100   : > { %6718 = shalt.err (!%p6715_p0)
}
0x1101   : > { %s6932_s21 = smov 128   ;;  %s10086_s2 = smov 8  }
0x1102   : > { %5557 = dma.vmem_to_hbm [thread:$0]  (%p10085_p13), %s9713_s15, 256, %s9710_s19, %s4697_s7, %s6932_s21, %s6932_s21, %s10086_s2  }
0x1103 PF: > { %s10087_s6 = sld [smem:[#allocation56_spill]]  ;;  %s10088_s25 = sld [smem:[#allocation50_spill]] }
0x1104   : > { %s10089_s0 = sld [smem:[#allocation65_spill]] }
0x1109   : > { %p5563_p8 = scmp.ge.s32.totalorder %s10087_s6, 2  ;;  %s4725_s9 = sand.u32 1, %s10088_s25  }
0x110a   : > { %p10090_p2 = scmp.ne.s32.totalorder %s10089_s0, 0  ;;  %s4726_s14 = scalar_lea.sflag [#allocation5], %s4725_s9 }
0x110c   : > { %p5560_p4 = pnand %p5563_p8, %p10090_p2 }
0x110e   : > { %6808 = dma.done.wait (!%p5560_p4), %s4726_s14, 256  }
0x110f   : > { %6810 = vsyncadd (!%p5560_p4), %s4726_s14, 4294967040  ;;  %s66_s4 = sadd.s32 1, %s10087_s6   ;;  %s10091_s1 = sld [smem:[#allocation48_spill]] }
0x1110   : > { %p63_p6 = scmp.ge.s32.totalorder %s66_s4, 6   ;;  %s10092_s22 = sld [smem:[#allocation49_spill]] }
0x1111   : > { %s10093_s23 = sld [smem:[#allocation61_spill]]  ;;  %s10094_s24 = sld [smem:[#allocation51_spill]] }
0x1112   : > { %s10095_s2 = sld [smem:[#allocation52_spill]]  ;;  %s10096_s25 = sld [smem:[#allocation62_spill]] }
0x1113   : > { %s10097_s26 = sld [smem:[#allocation55_spill]]  ;;  %s10098_s28 = sld [smem:[#allocation58_spill]] }
0x1114   : > { %s10099_s19 = sld [smem:[#allocation59_spill]]  ;;  %s10100_s3 = smov %s6845_s27 }
0x1115   :  { %65 = sbr.rel (!%p63_p6) target bundleno = 49 (0x31), region = 382 }
0x1119   : > { %s10101_s27 = smov %s10098_s28 }
0x111a   : > { %s10102_s28 = smov %s10099_s19 }
0x111c   :  { %4731 = vsyncpa [#allocation4], 1 }
0x111d   :  { %4733 = vsyncpa [#allocation4 + $0x1], 1 }
0x111e   :  { %4734 = vsyncpa [#allocation7], 1 }
0x111f   :  { %4736 = vsyncpa [#allocation7 + $0x1], 1 }
0x1120   :  { %4737 = vsyncpa [#allocation10], 1 }
0x1121   :  { %4739 = vsyncpa [#allocation10 + $0x1], 1 }
0x1122   :  { %4740 = vsyncpa [#allocation13], 1 }
0x1123   :  { %4742 = vsyncpa [#allocation13 + $0x1], 1 }
0x1124   :  { %4743 = vsyncpa [#allocation16], 1 }
0x1125   :  { %4745 = vsyncpa [#allocation16 + $0x1], 1 }
0x1126   :  { %4746 = vsyncpa [#allocation19], 1 }
0x1127   :  { %4748 = vsyncpa [#allocation19 + $0x1], 1 }
0x1128   :  { %4749 = vsyncpa [#allocation22], 1 }
0x1129   :  { %4751 = vsyncpa [#allocation22 + $0x1], 1 }
0x112a   :  { %4752 = vsyncpa [#allocation25], 1 }
0x112b   :  { %4754 = vsyncpa [#allocation25 + $0x1], 1 }
0x112c   :  { %4755 = vsyncpa [#allocation28], 1 }
0x112d   :  { %4757 = vsyncpa [#allocation28 + $0x1], 1 }
0x112e   :  { %4758 = vsyncpa [#allocation31], 1 }
0x112f   :  { %4760 = vsyncpa [#allocation31 + $0x1], 1 }
0x1130   :  { %4761 = vsyncpa [#allocation34], 1 }
0x1131   :  { %4763 = vsyncpa [#allocation34 + $0x1], 1 }
0x1132   :  { %4764 = vsyncpa [#allocation5], 1 }
0x1133   :  { %4766 = vsyncpa [#allocation5 + $0x1], 1 }

</bundles_post_ra>
